<compile_context>
chip_gen: v5e
topology: v5e:2x2
jax: 0.10.0
libtpu: 0.0.40
codegen_flags: <defaults>
</compile_context>

<pallas_src>
import jax
import jax.numpy as jnp
from jax.experimental import pallas as pl
from jax.experimental.pallas import tpu as pltpu

BOARD = 8
MOVE_PLANES = 35
HISTORICAL_BOARD_PLANES = 12
RESIDUAL_BLOCKS = 6
CHANNELS = 64

_PADH = BOARD + 2          # staging rows: one zero halo row above and below


# ------------------------------ Pallas kernels ------------------------------

def _stage(dst_ref, v, c):
    """Write the 3 dx-shifted copies of v (nb, 8, 8, c), channel-concatenated,
    into dst rows 1..8.  The row halo (rows 0, 9) and the two column halo
    cells are pre-zeroed once per program and never touched here, so they stay
    zero for every conv in the program."""
    v = v.astype(dst_ref.dtype)
    # dx = 1 (center tap): full-width aligned store.
    dst_ref[:, 1:1 + BOARD, :, c:2 * c] = v
    # dx = 0 (left tap): output column x reads input column x-1.
    dst_ref[:, 1:1 + BOARD, 1:BOARD, 0:c] = v[:, :, 0:BOARD - 1, :]
    # dx = 2 (right tap): output column x reads input column x+1.
    dst_ref[:, 1:1 + BOARD, 0:BOARD - 1, 2 * c:3 * c] = v[:, :, 1:BOARD, :]


def _conv3x3(stg_ref, get_w, m):
    """3x3 'same' conv from a staged (nb, 10, 8, 3*cin) buffer as 3 MXU
    matmuls (one per dy) with K = 3*cin, bf16 operands, f32 accumulation."""
    k3 = stg_ref.shape[-1]
    acc = None
    for dy in range(3):
        lhs = stg_ref[:, dy:dy + BOARD, :, :].reshape(m, k3)
        p = jnp.dot(lhs, get_w(dy), preferred_element_type=jnp.float32)
        acc = p if acc is None else acc + p
    return acc


def _trunk_kernel(x_ref,
                  wc_ref, cs_ref, cb_ref,          # ConvolutionalBlock
                  wr_ref, rs_ref, rb_ref,          # stacked ResidualBlocks
                  wo_ref, os_ref, ob_ref,          # OutputBlock 1x1 conv + BN
                  head_ref,
                  stg1_ref, stg_ref, a_ref):
    nb = x_ref.shape[0]
    cin = x_ref.shape[3]
    ch = wc_ref.shape[2]
    n_blk = wr_ref.shape[0]
    m = nb * BOARD * BOARD

    # Zero the (small) staging buffers once per program; only their halo cells
    # rely on it, interiors are fully rewritten by every _stage call.
    stg1_ref[...] = jnp.zeros(stg1_ref.shape, stg1_ref.dtype)
    stg_ref[...] = jnp.zeros(stg_ref.shape, stg_ref.dtype)

    # ---- ConvolutionalBlock: conv3x3 (+bias) + folded BN + ReLU ----
    _stage(stg1_ref, x_ref[...], cin)
    y = _conv3x3(stg1_ref, lambda dy: wc_ref[dy], m)
    y = jnp.maximum(y * cs_ref[...] + cb_ref[...], 0.0)
    a_ref[...] = y.reshape(nb, BOARD, BOARD, ch)

    # ---- ResidualBlocks (statically unrolled; activations stay in VMEM) ----
    for blk in range(n_blk):
        _stage(stg_ref, a_ref[...], ch)
        t = _conv3x3(stg_ref, lambda dy, b=blk: wr_ref[b, 0, dy], m)
        t = jnp.maximum(t * rs_ref[blk, 0] + rb_ref[blk, 0], 0.0)

        _stage(stg_ref, t.reshape(nb, BOARD, BOARD, ch), ch)
        z = _conv3x3(stg_ref, lambda dy, b=blk: wr_ref[b, 1, dy], m)
        z = z * rs_ref[blk, 1] + rb_ref[blk, 1]
        # f32 skip connection read straight from the interior-only scratch.
        z = z + a_ref[...].reshape(m, ch)
        a_ref[...] = jnp.maximum(z, 0.0).reshape(nb, BOARD, BOARD, ch)

    # ---- OutputBlock front: 1x1 conv + folded BN + ReLU ----
    h = jnp.dot(a_ref[...].reshape(m, ch).astype(jnp.bfloat16), wo_ref[...],
                preferred_element_type=jnp.float32)
    head_ref[...] = jnp.maximum(h * os_ref[...] + ob_ref[...], 0.0)


def _mlp_head_kernel(x_ref, w1_ref, b1_ref, w2_ref, b2_ref, o_ref):
    """OutputBlock tail: fc1 + ReLU + fc2 + sigmoid (single VMEM block)."""
    h = jnp.dot(x_ref[...].astype(jnp.bfloat16), w1_ref[...],
                preferred_element_type=jnp.float32) + b1_ref[...]
    h = jnp.maximum(h, 0.0)
    z = jnp.dot(h.astype(jnp.bfloat16), w2_ref[...],
                preferred_element_type=jnp.float32) + b2_ref[...]
    # Numerically stable sigmoid via tanh (EUP path, no exp overflow).
    o_ref[...] = 0.5 * (jnp.tanh(0.5 * z) + 1.0)


# --------------------------- parameters (synthetic) ---------------------------

def _round_up(x, m):
    return ((x + m - 1) // m) * m


def _fold_bn(gamma, beta, mean, var, conv_bias=None, eps=1e-5):
    # Inference-mode BatchNorm folded into per-channel scale/bias.
    # TODO(synk): training-mode BatchNorm (batch statistics) is not reproduced.
    scale = gamma / jnp.sqrt(var + eps)
    bias = beta - mean * scale
    if conv_bias is not None:
        bias = bias + scale * conv_bias
    return (scale.reshape(1, -1).astype(jnp.float32),
            bias.reshape(1, -1).astype(jnp.float32))


def _bn_raw(key, c):
    k1, k2, k3, k4 = jax.random.split(key, 4)
    gamma = 1.0 + 0.1 * jax.random.normal(k1, (c,), jnp.float32)
    beta = 0.1 * jax.random.normal(k2, (c,), jnp.float32)
    mean = 0.1 * jax.random.normal(k3, (c,), jnp.float32)
    var = 1.0 + 0.5 * jax.random.uniform(k4, (c,), jnp.float32)
    return gamma, beta, mean, var


def _conv_w_stack(w_oihw, cin_pad=None):
    """torch OIHW (Cout, Cin, 3, 3) -> (3, 3*Cin', Cout) bf16 with K ordered
    (dx, cin) to match the channel-concatenated staging buffer; optionally
    zero-pads Cin up to cin_pad (the padded input channels are zero)."""
    cin = w_oihw.shape[1]
    w = jnp.transpose(w_oihw, (2, 3, 1, 0))          # (ky, kx, cin, cout)
    if cin_pad is not None and cin_pad > cin:
        w = jnp.pad(w, ((0, 0), (0, 0), (0, cin_pad - cin), (0, 0)))
        cin = cin_pad
    return w.reshape(3, 3 * cin, w.shape[-1]).astype(jnp.bfloat16)


def init_params(key, input_planes, residual_blocks, channels):
    keys = iter(jax.random.split(key, 4 * residual_blocks + 16))
    nxt = lambda: next(keys)
    cin_pad = _round_up(input_planes, 32)   # lane-friendly staging offsets
    params = {}

    # ConvolutionalBlock: conv3x3 (with bias) + BN + ReLU
    w = 0.1 * jax.random.normal(nxt(), (channels, input_planes, 3, 3), jnp.float32)
    b = 0.1 * jax.random.normal(nxt(), (channels,), jnp.float32)
    scale, bias = _fold_bn(*_bn_raw(nxt(), channels), conv_bias=b)
    params["conv"] = {"w": _conv_w_stack(w, cin_pad), "scale": scale, "bias": bias}

    # ResidualBlocks: two bias-free conv3x3 + BN each, stacked into single arrays.
    ws, ss, bs = [], [], []
    for _ in range(residual_blocks):
        w1 = 0.1 * jax.random.normal(nxt(), (channels, channels, 3, 3), jnp.float32)
        s1, b1 = _fold_bn(*_bn_raw(nxt(), channels))
        w2 = 0.1 * jax.random.normal(nxt(), (channels, channels, 3, 3), jnp.float32)
        s2, b2 = _fold_bn(*_bn_raw(nxt(), channels))
        ws.append(jnp.stack([_conv_w_stack(w1), _conv_w_stack(w2)]))
        ss.append(jnp.stack([s1, s2]))
        bs.append(jnp.stack([b1, b2]))
    params["res"] = {"w": jnp.stack(ws),        # (n_blk, 2, 3, 3*C, C)  bf16
                     "scale": jnp.stack(ss),    # (n_blk, 2, 1, C)       f32
                     "bias": jnp.stack(bs)}     # (n_blk, 2, 1, C)       f32

    # OutputBlock: conv1x1 + BN + ReLU, fc1 + ReLU, fc2 + sigmoid
    c_half = channels // 2
    hidden = c_half * 4
    wc1 = 0.1 * jax.random.normal(nxt(), (c_half, channels, 1, 1), jnp.float32)
    bc1 = 0.1 * jax.random.normal(nxt(), (c_half,), jnp.float32)
    os_, ob_ = _fold_bn(*_bn_raw(nxt(), c_half), conv_bias=bc1)
    fc1_w = 0.05 * jax.random.normal(nxt(), (hidden, c_half * BOARD * BOARD), jnp.float32)
    fc1_b = 0.05 * jax.random.normal(nxt(), (hidden,), jnp.float32)
    fc2_w = 0.05 * jax.random.normal(nxt(), (1, hidden), jnp.float32)
    fc2_b = 0.05 * jax.random.normal(nxt(), (1,), jnp.float32)

    # Permute fc1 input columns from torch's CHW flatten to the kernel's NHWC
    # flatten so no transpose is needed at runtime (one-time init cost).
    idx = jnp.arange(c_half * BOARD * BOARD)
    hw = idx // c_half
    c = idx % c_half
    fc1_w_hwc = fc1_w[:, c * (BOARD * BOARD) + hw]

    params["out"] = {
        "w_conv": jnp.transpose(wc1[:, :, 0, 0], (1, 0)).astype(jnp.bfloat16),  # (C, C/2)
        "scale": os_, "bias": ob_,
        "fc1_w": fc1_w_hwc.T.astype(jnp.bfloat16),            # (C/2*64, hidden)
        "fc1_b": fc1_b.reshape(1, -1).astype(jnp.float32),
        "fc2_w": fc2_w.T.astype(jnp.bfloat16),                # (hidden, 1)
        "fc2_b": fc2_b.reshape(1, -1).astype(jnp.float32),
    }
    return params


# ------------------------------- forward pass -------------------------------

def _broadcast_spec(arr):
    ndim = arr.ndim

    def index_map(b):
        return (0,) * ndim

    return pl.BlockSpec(arr.shape, index_map)


def _tc_per_chip():
    """TensorCores per chip (megacore parts get 2, inference parts get 1)."""
    try:
        kind = jax.devices()[0].device_kind.lower()
    except Exception:
        return 1
    if "lite" in kind or "v5e" in kind or "v6e" in kind:
        return 1
    if "v7" in kind or "v4" in kind or "v5p" in kind:
        return 2
    return 1


def _batch_tile(n, n_cores):
    # Fill MXU rows (nb*64, up to 256) on single-core chips, but keep at least
    # `n_cores` grid programs so megacore parts use both TensorCores.
    for nb in (4, 2, 1):
        if n % nb == 0 and (n // nb) >= n_cores:
            return nb
    for nb in (4, 2, 1):
        if n % nb == 0:
            return nb
    return 1


@jax.jit
def resnet_forward(x_nchw, params):
    wc = params["conv"]["w"]                       # (3, 3*cin_pad, ch)
    cin_pad, ch = wc.shape[1] // 3, wc.shape[2]
    c_half = params["out"]["w_conv"].shape[1]

    # torch: x.view(-1, input_channels, 8, 8); NCHW -> NHWC once at the
    # boundary, cast to bf16 (MXU operand dtype), zero-pad channels to the
    # lane-friendly width used by the stacked weights.
    x = x_nchw.reshape(-1, x_nchw.shape[1], BOARD, BOARD)
    n = x.shape[0]
    x = jnp.transpose(x, (0, 2, 3, 1)).astype(jnp.bfloat16)
    if cin_pad > x.shape[-1]:
        x = jnp.pad(x, ((0, 0), (0, 0), (0, 0), (0, cin_pad - x.shape[-1])))

    nb = _batch_tile(n, _tc_per_chip())
    grid = (n // nb,)

    trunk_in = [x,
                wc, params["conv"]["scale"], params["conv"]["bias"],
                params["res"]["w"], params["res"]["scale"], params["res"]["bias"],
                params["out"]["w_conv"], params["out"]["scale"], params["out"]["bias"]]
    in_specs = [pl.BlockSpec((nb, BOARD, BOARD, cin_pad), lambda b: (b, 0, 0, 0))]
    in_specs += [_broadcast_spec(a) for a in trunk_in[1:]]

    # VMEM residency (staging + activation scratch + stacked weights) is well
    # under 1 MiB on every generation -- no vmem_limit tuning needed.
    head = pl.pallas_call(
        _trunk_kernel,
        out_shape=jax.ShapeDtypeStruct((n * BOARD * BOARD, c_half), jnp.float32),
        grid_spec=pltpu.PrefetchScalarGridSpec(
            num_scalar_prefetch=0,
            grid=grid,
            in_specs=in_specs,
            out_specs=pl.BlockSpec((nb * BOARD * BOARD, c_half),
                                   lambda b: (b, 0)),
            scratch_shapes=[
                pltpu.VMEM((nb, _PADH, BOARD, 3 * cin_pad), jnp.bfloat16),
                pltpu.VMEM((nb, _PADH, BOARD, 3 * ch), jnp.bfloat16),
                pltpu.VMEM((nb, BOARD, BOARD, ch), jnp.float32),
            ]),
        compiler_params=pltpu.CompilerParams(
            dimension_semantics=("parallel",)),
    )(*trunk_in)

    # Rows of `head` are ordered (batch, y, x), so this row-major reshape is
    # exactly the NHWC flatten that the HWC-permuted fc1 weights expect.
    head_flat = head.reshape(n, BOARD * BOARD * c_half)

    out = pl.pallas_call(
        _mlp_head_kernel,
        out_shape=jax.ShapeDtypeStruct((n, 1), jnp.float32),
        in_specs=[pl.BlockSpec(memory_space=pltpu.MemorySpace.VMEM)] * 5,
        out_specs=pl.BlockSpec(memory_space=pltpu.MemorySpace.VMEM),
    )(head_flat, params["out"]["fc1_w"], params["out"]["fc1_b"],
      params["out"]["fc2_w"], params["out"]["fc2_b"])
    return out


if __name__ == "__main__":
    key = jax.random.PRNGKey(0)
    k_param, k_x = jax.random.split(key)

    # "init_mini" configuration (history_size=0): 35 input planes, 3 residual
    # blocks, 32 channels; board fixed at 8x8, batch = 2.
    input_planes = MOVE_PLANES
    n_res = RESIDUAL_BLOCKS // 2
    channels = CHANNELS // 2

    params = init_params(k_param, input_planes, n_res, channels)
    x = jax.random.normal(k_x, (2, input_planes, BOARD, BOARD), jnp.float32)

    out = resnet_forward(x, params)
    out = jax.block_until_ready(out)
    assert out.shape == (2, 1), out.shape
    assert bool(jnp.all(jnp.isfinite(out)))
    assert bool(jnp.all((out > 0.0) & (out < 1.0)))  # sigmoid range
    print("KERNEL_OK")
</pallas_src>

<mosaic_0001>
module attributes {stable_mosaic.version = 11 : i64} {
  func.func @_trunk_kernel(%arg0: i32, %arg1: memref<2x8x8x64xbf16, #tpu.memory_space<vmem>>, %arg2: memref<3x192x32xbf16, #tpu.memory_space<vmem>>, %arg3: memref<1x32xf32, #tpu.memory_space<vmem>>, %arg4: memref<1x32xf32, #tpu.memory_space<vmem>>, %arg5: memref<3x2x3x96x32xbf16, #tpu.memory_space<vmem>>, %arg6: memref<3x2x1x32xf32, #tpu.memory_space<vmem>>, %arg7: memref<3x2x1x32xf32, #tpu.memory_space<vmem>>, %arg8: memref<32x16xbf16, #tpu.memory_space<vmem>>, %arg9: memref<1x16xf32, #tpu.memory_space<vmem>>, %arg10: memref<1x16xf32, #tpu.memory_space<vmem>>, %arg11: memref<128x16xf32, #tpu.memory_space<vmem>>, %arg12: memref<2x10x8x192xbf16, #tpu.memory_space<vmem>>, %arg13: memref<2x10x8x96xbf16, #tpu.memory_space<vmem>>, %arg14: memref<2x8x8x32xf32, #tpu.memory_space<vmem>>) attributes {dimension_semantics = [#tpu.dimension_semantics<parallel>], iteration_bounds = array<i64: 1>, scalar_prefetch = 0 : i64, scratch_operands = 3 : i64, tpu.core_type = #tpu.core_type<tc>, window_params = [{transform_indices = @transform_0, window_bounds = array<i64: 2, 8, 8, 64>}, {pipeline_mode = #tpu.pipeline_mode<synchronous>, transform_indices = @transform_1, window_bounds = array<i64: 3, 192, 32>}, {pipeline_mode = #tpu.pipeline_mode<synchronous>, transform_indices = @transform_2, window_bounds = array<i64: 1, 32>}, {pipeline_mode = #tpu.pipeline_mode<synchronous>, transform_indices = @transform_3, window_bounds = array<i64: 1, 32>}, {pipeline_mode = #tpu.pipeline_mode<synchronous>, transform_indices = @transform_4, window_bounds = array<i64: 3, 2, 3, 96, 32>}, {pipeline_mode = #tpu.pipeline_mode<synchronous>, transform_indices = @transform_5, window_bounds = array<i64: 3, 2, 1, 32>}, {pipeline_mode = #tpu.pipeline_mode<synchronous>, transform_indices = @transform_6, window_bounds = array<i64: 3, 2, 1, 32>}, {pipeline_mode = #tpu.pipeline_mode<synchronous>, transform_indices = @transform_7, window_bounds = array<i64: 32, 16>}, {pipeline_mode = #tpu.pipeline_mode<synchronous>, transform_indices = @transform_8, window_bounds = array<i64: 1, 16>}, {pipeline_mode = #tpu.pipeline_mode<synchronous>, transform_indices = @transform_9, window_bounds = array<i64: 1, 16>}, {transform_indices = @transform_10, window_bounds = array<i64: 128, 16>}]} {
    %cst = arith.constant 0.000000e+00 : bf16
    %0 = vector.broadcast %cst : bf16 to vector<2x10x8x192xbf16>
    %c0 = arith.constant 0 : index
    %c0_0 = arith.constant 0 : index
    %c0_1 = arith.constant 0 : index
    %c0_2 = arith.constant 0 : index
    %1 = vector.load %arg12[%c0, %c0_0, %c0_1, %c0_2] : memref<2x10x8x192xbf16, #tpu.memory_space<vmem>>, vector<2x10x8x192xbf16>
    tpu.vector_store %arg12[%c0, %c0_0, %c0_1, %c0_2], %0 {strides = array<i32>} : memref<2x10x8x192xbf16, #tpu.memory_space<vmem>>, vector<2x10x8x192xbf16>,
    %cst_3 = arith.constant 0.000000e+00 : bf16
    %2 = vector.broadcast %cst_3 : bf16 to vector<2x10x8x96xbf16>
    %c0_4 = arith.constant 0 : index
    %c0_5 = arith.constant 0 : index
    %c0_6 = arith.constant 0 : index
    %c0_7 = arith.constant 0 : index
    %3 = vector.load %arg13[%c0_4, %c0_5, %c0_6, %c0_7] : memref<2x10x8x96xbf16, #tpu.memory_space<vmem>>, vector<2x10x8x96xbf16>
    tpu.vector_store %arg13[%c0_4, %c0_5, %c0_6, %c0_7], %2 {strides = array<i32>} : memref<2x10x8x96xbf16, #tpu.memory_space<vmem>>, vector<2x10x8x96xbf16>,
    %c0_8 = arith.constant 0 : index
    %c0_9 = arith.constant 0 : index
    %c0_10 = arith.constant 0 : index
    %c0_11 = arith.constant 0 : index
    %4 = vector.load %arg1[%c0_8, %c0_9, %c0_10, %c0_11] : memref<2x8x8x64xbf16, #tpu.memory_space<vmem>>, vector<2x8x8x64xbf16>
    %c0_12 = arith.constant 0 : index
    %c1 = arith.constant 1 : index
    %c0_13 = arith.constant 0 : index
    %c64 = arith.constant 64 : index
    %5 = vector.load %arg12[%c0_12, %c1, %c0_13, %c64] : memref<2x10x8x192xbf16, #tpu.memory_space<vmem>>, vector<2x8x8x64xbf16>
    tpu.vector_store %arg12[%c0_12, %c1, %c0_13, %c64], %4 {strides = array<i32>} : memref<2x10x8x192xbf16, #tpu.memory_space<vmem>>, vector<2x8x8x64xbf16>,
    %6 = vector.extract_strided_slice %4 {offsets = [0, 0, 0, 0], sizes = [2, 8, 7, 64], strides = [1, 1, 1, 1]} : vector<2x8x8x64xbf16> to vector<2x8x7x64xbf16>
    %c0_14 = arith.constant 0 : index
    %c1_15 = arith.constant 1 : index
    %c1_16 = arith.constant 1 : index
    %c0_17 = arith.constant 0 : index
    %7 = vector.load %arg12[%c0_14, %c1_15, %c1_16, %c0_17] : memref<2x10x8x192xbf16, #tpu.memory_space<vmem>>, vector<2x8x7x64xbf16>
    tpu.vector_store %arg12[%c0_14, %c1_15, %c1_16, %c0_17], %6 {strides = array<i32>} : memref<2x10x8x192xbf16, #tpu.memory_space<vmem>>, vector<2x8x7x64xbf16>,
    %8 = vector.extract_strided_slice %4 {offsets = [0, 0, 1, 0], sizes = [2, 8, 7, 64], strides = [1, 1, 1, 1]} : vector<2x8x8x64xbf16> to vector<2x8x7x64xbf16>
    %c0_18 = arith.constant 0 : index
    %c1_19 = arith.constant 1 : index
    %c0_20 = arith.constant 0 : index
    %c128 = arith.constant 128 : index
    %9 = vector.load %arg12[%c0_18, %c1_19, %c0_20, %c128] : memref<2x10x8x192xbf16, #tpu.memory_space<vmem>>, vector<2x8x7x64xbf16>
    tpu.vector_store %arg12[%c0_18, %c1_19, %c0_20, %c128], %8 {strides = array<i32>} : memref<2x10x8x192xbf16, #tpu.memory_space<vmem>>, vector<2x8x7x64xbf16>,
    %c0_21 = arith.constant 0 : index
    %c0_22 = arith.constant 0 : index
    %c0_23 = arith.constant 0 : index
    %c0_24 = arith.constant 0 : index
    %10 = vector.load %arg12[%c0_21, %c0_22, %c0_23, %c0_24] : memref<2x10x8x192xbf16, #tpu.memory_space<vmem>>, vector<2x8x8x192xbf16>
    %11 = vector.shape_cast %10 : vector<2x8x8x192xbf16> to vector<128x192xbf16>
    %c0_25 = arith.constant 0 : index
    %c0_26 = arith.constant 0 : index
    %c0_27 = arith.constant 0 : index
    %12 = vector.load %arg2[%c0_25, %c0_26, %c0_27] : memref<3x192x32xbf16, #tpu.memory_space<vmem>>, vector<1x192x32xbf16>
    %13 = vector.shape_cast %12 : vector<1x192x32xbf16> to vector<192x32xbf16>
    %cst_28 = arith.constant dense<0.000000e+00> : vector<128x32xf32>
    %14 = tpu.matmul %11, %13, %cst_28 {dimension_numbers = #tpu.dot_dimension_numbers<[1], [0], [0], [1], [0, 0, 1, 1], [], []>} : vector<128x192xbf16>, vector<192x32xbf16>, vector<128x32xf32> -> vector<128x32xf32>
    %c0_29 = arith.constant 0 : index
    %c1_30 = arith.constant 1 : index
    %c0_31 = arith.constant 0 : index
    %c0_32 = arith.constant 0 : index
    %15 = vector.load %arg12[%c0_29, %c1_30, %c0_31, %c0_32] : memref<2x10x8x192xbf16, #tpu.memory_space<vmem>>, vector<2x8x8x192xbf16>
    %16 = vector.shape_cast %15 : vector<2x8x8x192xbf16> to vector<128x192xbf16>
    %c1_33 = arith.constant 1 : index
    %c0_34 = arith.constant 0 : index
    %c0_35 = arith.constant 0 : index
    %17 = vector.load %arg2[%c1_33, %c0_34, %c0_35] : memref<3x192x32xbf16, #tpu.memory_space<vmem>>, vector<1x192x32xbf16>
    %18 = vector.shape_cast %17 : vector<1x192x32xbf16> to vector<192x32xbf16>
    %cst_36 = arith.constant dense<0.000000e+00> : vector<128x32xf32>
    %19 = tpu.matmul %16, %18, %cst_36 {dimension_numbers = #tpu.dot_dimension_numbers<[1], [0], [0], [1], [0, 0, 1, 1], [], []>} : vector<128x192xbf16>, vector<192x32xbf16>, vector<128x32xf32> -> vector<128x32xf32>
    %20 = arith.addf %14, %19 : vector<128x32xf32>
    %c0_37 = arith.constant 0 : index
    %c2 = arith.constant 2 : index
    %c0_38 = arith.constant 0 : index
    %c0_39 = arith.constant 0 : index
    %21 = vector.load %arg12[%c0_37, %c2, %c0_38, %c0_39] : memref<2x10x8x192xbf16, #tpu.memory_space<vmem>>, vector<2x8x8x192xbf16>
    %22 = vector.shape_cast %21 : vector<2x8x8x192xbf16> to vector<128x192xbf16>
    %c2_40 = arith.constant 2 : index
    %c0_41 = arith.constant 0 : index
    %c0_42 = arith.constant 0 : index
    %23 = vector.load %arg2[%c2_40, %c0_41, %c0_42] : memref<3x192x32xbf16, #tpu.memory_space<vmem>>, vector<1x192x32xbf16>
    %24 = vector.shape_cast %23 : vector<1x192x32xbf16> to vector<192x32xbf16>
    %cst_43 = arith.constant dense<0.000000e+00> : vector<128x32xf32>
    %25 = tpu.matmul %22, %24, %cst_43 {dimension_numbers = #tpu.dot_dimension_numbers<[1], [0], [0], [1], [0, 0, 1, 1], [], []>} : vector<128x192xbf16>, vector<192x32xbf16>, vector<128x32xf32> -> vector<128x32xf32>
    %26 = arith.addf %20, %25 : vector<128x32xf32>
    %c0_44 = arith.constant 0 : index
    %c0_45 = arith.constant 0 : index
    %27 = vector.load %arg3[%c0_44, %c0_45] : memref<1x32xf32, #tpu.memory_space<vmem>>, vector<1x32xf32>
    %28 = vector.broadcast %27 : vector<1x32xf32> to vector<128x32xf32>
    %29 = arith.mulf %26, %28 : vector<128x32xf32>
    %c0_46 = arith.constant 0 : index
    %c0_47 = arith.constant 0 : index
    %30 = vector.load %arg4[%c0_46, %c0_47] : memref<1x32xf32, #tpu.memory_space<vmem>>, vector<1x32xf32>
    %31 = vector.broadcast %30 : vector<1x32xf32> to vector<128x32xf32>
    %32 = arith.addf %29, %31 : vector<128x32xf32>
    %cst_48 = arith.constant 0.000000e+00 : f32
    %33 = vector.broadcast %cst_48 : f32 to vector<128x32xf32>
    %34 = arith.maximumf %32, %33 : vector<128x32xf32>
    %35 = vector.shape_cast %34 : vector<128x32xf32> to vector<2x8x8x32xf32>
    %c0_49 = arith.constant 0 : index
    %c0_50 = arith.constant 0 : index
    %c0_51 = arith.constant 0 : index
    %c0_52 = arith.constant 0 : index
    %36 = vector.load %arg14[%c0_49, %c0_50, %c0_51, %c0_52] : memref<2x8x8x32xf32, #tpu.memory_space<vmem>>, vector<2x8x8x32xf32>
    tpu.vector_store %arg14[%c0_49, %c0_50, %c0_51, %c0_52], %35 {strides = array<i32>} : memref<2x8x8x32xf32, #tpu.memory_space<vmem>>, vector<2x8x8x32xf32>,
    %c0_53 = arith.constant 0 : index
    %c0_54 = arith.constant 0 : index
    %c0_55 = arith.constant 0 : index
    %c0_56 = arith.constant 0 : index
    %37 = vector.load %arg14[%c0_53, %c0_54, %c0_55, %c0_56] : memref<2x8x8x32xf32, #tpu.memory_space<vmem>>, vector<2x8x8x32xf32>
    %38 = arith.truncf %37 : vector<2x8x8x32xf32> to vector<2x8x8x32xbf16>
    %c0_57 = arith.constant 0 : index
    %c1_58 = arith.constant 1 : index
    %c0_59 = arith.constant 0 : index
    %c32 = arith.constant 32 : index
    %39 = vector.load %arg13[%c0_57, %c1_58, %c0_59, %c32] : memref<2x10x8x96xbf16, #tpu.memory_space<vmem>>, vector<2x8x8x32xbf16>
    tpu.vector_store %arg13[%c0_57, %c1_58, %c0_59, %c32], %38 {strides = array<i32>} : memref<2x10x8x96xbf16, #tpu.memory_space<vmem>>, vector<2x8x8x32xbf16>,
    %40 = vector.extract_strided_slice %38 {offsets = [0, 0, 0, 0], sizes = [2, 8, 7, 32], strides = [1, 1, 1, 1]} : vector<2x8x8x32xbf16> to vector<2x8x7x32xbf16>
    %c0_60 = arith.constant 0 : index
    %c1_61 = arith.constant 1 : index
    %c1_62 = arith.constant 1 : index
    %c0_63 = arith.constant 0 : index
    %41 = vector.load %arg13[%c0_60, %c1_61, %c1_62, %c0_63] : memref<2x10x8x96xbf16, #tpu.memory_space<vmem>>, vector<2x8x7x32xbf16>
    tpu.vector_store %arg13[%c0_60, %c1_61, %c1_62, %c0_63], %40 {strides = array<i32>} : memref<2x10x8x96xbf16, #tpu.memory_space<vmem>>, vector<2x8x7x32xbf16>,
    %42 = vector.extract_strided_slice %38 {offsets = [0, 0, 1, 0], sizes = [2, 8, 7, 32], strides = [1, 1, 1, 1]} : vector<2x8x8x32xbf16> to vector<2x8x7x32xbf16>
    %c0_64 = arith.constant 0 : index
    %c1_65 = arith.constant 1 : index
    %c0_66 = arith.constant 0 : index
    %c64_67 = arith.constant 64 : index
    %43 = vector.load %arg13[%c0_64, %c1_65, %c0_66, %c64_67] : memref<2x10x8x96xbf16, #tpu.memory_space<vmem>>, vector<2x8x7x32xbf16>
    tpu.vector_store %arg13[%c0_64, %c1_65, %c0_66, %c64_67], %42 {strides = array<i32>} : memref<2x10x8x96xbf16, #tpu.memory_space<vmem>>, vector<2x8x7x32xbf16>,
    %c0_68 = arith.constant 0 : index
    %c0_69 = arith.constant 0 : index
    %c0_70 = arith.constant 0 : index
    %c0_71 = arith.constant 0 : index
    %44 = vector.load %arg13[%c0_68, %c0_69, %c0_70, %c0_71] : memref<2x10x8x96xbf16, #tpu.memory_space<vmem>>, vector<2x8x8x96xbf16>
    %45 = vector.shape_cast %44 : vector<2x8x8x96xbf16> to vector<128x96xbf16>
    %c0_72 = arith.constant 0 : index
    %c0_73 = arith.constant 0 : index
    %c0_74 = arith.constant 0 : index
    %c0_75 = arith.constant 0 : index
    %c0_76 = arith.constant 0 : index
    %46 = vector.load %arg5[%c0_72, %c0_73, %c0_74, %c0_75, %c0_76] : memref<3x2x3x96x32xbf16, #tpu.memory_space<vmem>>, vector<1x1x1x96x32xbf16>
    %47 = vector.shape_cast %46 : vector<1x1x1x96x32xbf16> to vector<96x32xbf16>
    %cst_77 = arith.constant dense<0.000000e+00> : vector<128x32xf32>
    %48 = tpu.matmul %45, %47, %cst_77 {dimension_numbers = #tpu.dot_dimension_numbers<[1], [0], [0], [1], [0, 0, 1, 1], [], []>} : vector<128x96xbf16>, vector<96x32xbf16>, vector<128x32xf32> -> vector<128x32xf32>
    %c0_78 = arith.constant 0 : index
    %c1_79 = arith.constant 1 : index
    %c0_80 = arith.constant 0 : index
    %c0_81 = arith.constant 0 : index
    %49 = vector.load %arg13[%c0_78, %c1_79, %c0_80, %c0_81] : memref<2x10x8x96xbf16, #tpu.memory_space<vmem>>, vector<2x8x8x96xbf16>
    %50 = vector.shape_cast %49 : vector<2x8x8x96xbf16> to vector<128x96xbf16>
    %c0_82 = arith.constant 0 : index
    %c0_83 = arith.constant 0 : index
    %c1_84 = arith.constant 1 : index
    %c0_85 = arith.constant 0 : index
    %c0_86 = arith.constant 0 : index
    %51 = vector.load %arg5[%c0_82, %c0_83, %c1_84, %c0_85, %c0_86] : memref<3x2x3x96x32xbf16, #tpu.memory_space<vmem>>, vector<1x1x1x96x32xbf16>
    %52 = vector.shape_cast %51 : vector<1x1x1x96x32xbf16> to vector<96x32xbf16>
    %cst_87 = arith.constant dense<0.000000e+00> : vector<128x32xf32>
    %53 = tpu.matmul %50, %52, %cst_87 {dimension_numbers = #tpu.dot_dimension_numbers<[1], [0], [0], [1], [0, 0, 1, 1], [], []>} : vector<128x96xbf16>, vector<96x32xbf16>, vector<128x32xf32> -> vector<128x32xf32>
    %54 = arith.addf %48, %53 : vector<128x32xf32>
    %c0_88 = arith.constant 0 : index
    %c2_89 = arith.constant 2 : index
    %c0_90 = arith.constant 0 : index
    %c0_91 = arith.constant 0 : index
    %55 = vector.load %arg13[%c0_88, %c2_89, %c0_90, %c0_91] : memref<2x10x8x96xbf16, #tpu.memory_space<vmem>>, vector<2x8x8x96xbf16>
    %56 = vector.shape_cast %55 : vector<2x8x8x96xbf16> to vector<128x96xbf16>
    %c0_92 = arith.constant 0 : index
    %c0_93 = arith.constant 0 : index
    %c2_94 = arith.constant 2 : index
    %c0_95 = arith.constant 0 : index
    %c0_96 = arith.constant 0 : index
    %57 = vector.load %arg5[%c0_92, %c0_93, %c2_94, %c0_95, %c0_96] : memref<3x2x3x96x32xbf16, #tpu.memory_space<vmem>>, vector<1x1x1x96x32xbf16>
    %58 = vector.shape_cast %57 : vector<1x1x1x96x32xbf16> to vector<96x32xbf16>
    %cst_97 = arith.constant dense<0.000000e+00> : vector<128x32xf32>
    %59 = tpu.matmul %56, %58, %cst_97 {dimension_numbers = #tpu.dot_dimension_numbers<[1], [0], [0], [1], [0, 0, 1, 1], [], []>} : vector<128x96xbf16>, vector<96x32xbf16>, vector<128x32xf32> -> vector<128x32xf32>
    %60 = arith.addf %54, %59 : vector<128x32xf32>
    %c0_98 = arith.constant 0 : index
    %c0_99 = arith.constant 0 : index
    %c0_100 = arith.constant 0 : index
    %c0_101 = arith.constant 0 : index
    %61 = vector.load %arg6[%c0_98, %c0_99, %c0_100, %c0_101] : memref<3x2x1x32xf32, #tpu.memory_space<vmem>>, vector<1x1x1x32xf32>
    %62 = vector.shape_cast %61 : vector<1x1x1x32xf32> to vector<1x32xf32>
    %63 = vector.broadcast %62 : vector<1x32xf32> to vector<128x32xf32>
    %64 = arith.mulf %60, %63 : vector<128x32xf32>
    %c0_102 = arith.constant 0 : index
    %c0_103 = arith.constant 0 : index
    %c0_104 = arith.constant 0 : index
    %c0_105 = arith.constant 0 : index
    %65 = vector.load %arg7[%c0_102, %c0_103, %c0_104, %c0_105] : memref<3x2x1x32xf32, #tpu.memory_space<vmem>>, vector<1x1x1x32xf32>
    %66 = vector.shape_cast %65 : vector<1x1x1x32xf32> to vector<1x32xf32>
    %67 = vector.broadcast %66 : vector<1x32xf32> to vector<128x32xf32>
    %68 = arith.addf %64, %67 : vector<128x32xf32>
    %cst_106 = arith.constant 0.000000e+00 : f32
    %69 = vector.broadcast %cst_106 : f32 to vector<128x32xf32>
    %70 = arith.maximumf %68, %69 : vector<128x32xf32>
    %71 = vector.shape_cast %70 : vector<128x32xf32> to vector<2x8x8x32xf32>
    %72 = arith.truncf %71 : vector<2x8x8x32xf32> to vector<2x8x8x32xbf16>
    %c0_107 = arith.constant 0 : index
    %c1_108 = arith.constant 1 : index
    %c0_109 = arith.constant 0 : index
    %c32_110 = arith.constant 32 : index
    %73 = vector.load %arg13[%c0_107, %c1_108, %c0_109, %c32_110] : memref<2x10x8x96xbf16, #tpu.memory_space<vmem>>, vector<2x8x8x32xbf16>
    tpu.vector_store %arg13[%c0_107, %c1_108, %c0_109, %c32_110], %72 {strides = array<i32>} : memref<2x10x8x96xbf16, #tpu.memory_space<vmem>>, vector<2x8x8x32xbf16>,
    %74 = vector.extract_strided_slice %72 {offsets = [0, 0, 0, 0], sizes = [2, 8, 7, 32], strides = [1, 1, 1, 1]} : vector<2x8x8x32xbf16> to vector<2x8x7x32xbf16>
    %c0_111 = arith.constant 0 : index
    %c1_112 = arith.constant 1 : index
    %c1_113 = arith.constant 1 : index
    %c0_114 = arith.constant 0 : index
    %75 = vector.load %arg13[%c0_111, %c1_112, %c1_113, %c0_114] : memref<2x10x8x96xbf16, #tpu.memory_space<vmem>>, vector<2x8x7x32xbf16>
    tpu.vector_store %arg13[%c0_111, %c1_112, %c1_113, %c0_114], %74 {strides = array<i32>} : memref<2x10x8x96xbf16, #tpu.memory_space<vmem>>, vector<2x8x7x32xbf16>,
    %76 = vector.extract_strided_slice %72 {offsets = [0, 0, 1, 0], sizes = [2, 8, 7, 32], strides = [1, 1, 1, 1]} : vector<2x8x8x32xbf16> to vector<2x8x7x32xbf16>
    %c0_115 = arith.constant 0 : index
    %c1_116 = arith.constant 1 : index
    %c0_117 = arith.constant 0 : index
    %c64_118 = arith.constant 64 : index
    %77 = vector.load %arg13[%c0_115, %c1_116, %c0_117, %c64_118] : memref<2x10x8x96xbf16, #tpu.memory_space<vmem>>, vector<2x8x7x32xbf16>
    tpu.vector_store %arg13[%c0_115, %c1_116, %c0_117, %c64_118], %76 {strides = array<i32>} : memref<2x10x8x96xbf16, #tpu.memory_space<vmem>>, vector<2x8x7x32xbf16>,
    %c0_119 = arith.constant 0 : index
    %c0_120 = arith.constant 0 : index
    %c0_121 = arith.constant 0 : index
    %c0_122 = arith.constant 0 : index
    %78 = vector.load %arg13[%c0_119, %c0_120, %c0_121, %c0_122] : memref<2x10x8x96xbf16, #tpu.memory_space<vmem>>, vector<2x8x8x96xbf16>
    %79 = vector.shape_cast %78 : vector<2x8x8x96xbf16> to vector<128x96xbf16>
    %c0_123 = arith.constant 0 : index
    %c1_124 = arith.constant 1 : index
    %c0_125 = arith.constant 0 : index
    %c0_126 = arith.constant 0 : index
    %c0_127 = arith.constant 0 : index
    %80 = vector.load %arg5[%c0_123, %c1_124, %c0_125, %c0_126, %c0_127] : memref<3x2x3x96x32xbf16, #tpu.memory_space<vmem>>, vector<1x1x1x96x32xbf16>
    %81 = vector.shape_cast %80 : vector<1x1x1x96x32xbf16> to vector<96x32xbf16>
    %cst_128 = arith.constant dense<0.000000e+00> : vector<128x32xf32>
    %82 = tpu.matmul %79, %81, %cst_128 {dimension_numbers = #tpu.dot_dimension_numbers<[1], [0], [0], [1], [0, 0, 1, 1], [], []>} : vector<128x96xbf16>, vector<96x32xbf16>, vector<128x32xf32> -> vector<128x32xf32>
    %c0_129 = arith.constant 0 : index
    %c1_130 = arith.constant 1 : index
    %c0_131 = arith.constant 0 : index
    %c0_132 = arith.constant 0 : index
    %83 = vector.load %arg13[%c0_129, %c1_130, %c0_131, %c0_132] : memref<2x10x8x96xbf16, #tpu.memory_space<vmem>>, vector<2x8x8x96xbf16>
    %84 = vector.shape_cast %83 : vector<2x8x8x96xbf16> to vector<128x96xbf16>
    %c0_133 = arith.constant 0 : index
    %c1_134 = arith.constant 1 : index
    %c1_135 = arith.constant 1 : index
    %c0_136 = arith.constant 0 : index
    %c0_137 = arith.constant 0 : index
    %85 = vector.load %arg5[%c0_133, %c1_134, %c1_135, %c0_136, %c0_137] : memref<3x2x3x96x32xbf16, #tpu.memory_space<vmem>>, vector<1x1x1x96x32xbf16>
    %86 = vector.shape_cast %85 : vector<1x1x1x96x32xbf16> to vector<96x32xbf16>
    %cst_138 = arith.constant dense<0.000000e+00> : vector<128x32xf32>
    %87 = tpu.matmul %84, %86, %cst_138 {dimension_numbers = #tpu.dot_dimension_numbers<[1], [0], [0], [1], [0, 0, 1, 1], [], []>} : vector<128x96xbf16>, vector<96x32xbf16>, vector<128x32xf32> -> vector<128x32xf32>
    %88 = arith.addf %82, %87 : vector<128x32xf32>
    %c0_139 = arith.constant 0 : index
    %c2_140 = arith.constant 2 : index
    %c0_141 = arith.constant 0 : index
    %c0_142 = arith.constant 0 : index
    %89 = vector.load %arg13[%c0_139, %c2_140, %c0_141, %c0_142] : memref<2x10x8x96xbf16, #tpu.memory_space<vmem>>, vector<2x8x8x96xbf16>
    %90 = vector.shape_cast %89 : vector<2x8x8x96xbf16> to vector<128x96xbf16>
    %c0_143 = arith.constant 0 : index
    %c1_144 = arith.constant 1 : index
    %c2_145 = arith.constant 2 : index
    %c0_146 = arith.constant 0 : index
    %c0_147 = arith.constant 0 : index
    %91 = vector.load %arg5[%c0_143, %c1_144, %c2_145, %c0_146, %c0_147] : memref<3x2x3x96x32xbf16, #tpu.memory_space<vmem>>, vector<1x1x1x96x32xbf16>
    %92 = vector.shape_cast %91 : vector<1x1x1x96x32xbf16> to vector<96x32xbf16>
    %cst_148 = arith.constant dense<0.000000e+00> : vector<128x32xf32>
    %93 = tpu.matmul %90, %92, %cst_148 {dimension_numbers = #tpu.dot_dimension_numbers<[1], [0], [0], [1], [0, 0, 1, 1], [], []>} : vector<128x96xbf16>, vector<96x32xbf16>, vector<128x32xf32> -> vector<128x32xf32>
    %94 = arith.addf %88, %93 : vector<128x32xf32>
    %c0_149 = arith.constant 0 : index
    %c1_150 = arith.constant 1 : index
    %c0_151 = arith.constant 0 : index
    %c0_152 = arith.constant 0 : index
    %95 = vector.load %arg6[%c0_149, %c1_150, %c0_151, %c0_152] : memref<3x2x1x32xf32, #tpu.memory_space<vmem>>, vector<1x1x1x32xf32>
    %96 = vector.shape_cast %95 : vector<1x1x1x32xf32> to vector<1x32xf32>
    %97 = vector.broadcast %96 : vector<1x32xf32> to vector<128x32xf32>
    %98 = arith.mulf %94, %97 : vector<128x32xf32>
    %c0_153 = arith.constant 0 : index
    %c1_154 = arith.constant 1 : index
    %c0_155 = arith.constant 0 : index
    %c0_156 = arith.constant 0 : index
    %99 = vector.load %arg7[%c0_153, %c1_154, %c0_155, %c0_156] : memref<3x2x1x32xf32, #tpu.memory_space<vmem>>, vector<1x1x1x32xf32>
    %100 = vector.shape_cast %99 : vector<1x1x1x32xf32> to vector<1x32xf32>
    %101 = vector.broadcast %100 : vector<1x32xf32> to vector<128x32xf32>
    %102 = arith.addf %98, %101 : vector<128x32xf32>
    %c0_157 = arith.constant 0 : index
    %c0_158 = arith.constant 0 : index
    %c0_159 = arith.constant 0 : index
    %c0_160 = arith.constant 0 : index
    %103 = vector.load %arg14[%c0_157, %c0_158, %c0_159, %c0_160] : memref<2x8x8x32xf32, #tpu.memory_space<vmem>>, vector<2x8x8x32xf32>
    %104 = vector.shape_cast %103 : vector<2x8x8x32xf32> to vector<128x32xf32>
    %105 = arith.addf %102, %104 : vector<128x32xf32>
    %cst_161 = arith.constant 0.000000e+00 : f32
    %106 = vector.broadcast %cst_161 : f32 to vector<128x32xf32>
    %107 = arith.maximumf %105, %106 : vector<128x32xf32>
    %108 = vector.shape_cast %107 : vector<128x32xf32> to vector<2x8x8x32xf32>
    %c0_162 = arith.constant 0 : index
    %c0_163 = arith.constant 0 : index
    %c0_164 = arith.constant 0 : index
    %c0_165 = arith.constant 0 : index
    %109 = vector.load %arg14[%c0_162, %c0_163, %c0_164, %c0_165] : memref<2x8x8x32xf32, #tpu.memory_space<vmem>>, vector<2x8x8x32xf32>
    tpu.vector_store %arg14[%c0_162, %c0_163, %c0_164, %c0_165], %108 {strides = array<i32>} : memref<2x8x8x32xf32, #tpu.memory_space<vmem>>, vector<2x8x8x32xf32>,
    %c0_166 = arith.constant 0 : index
    %c0_167 = arith.constant 0 : index
    %c0_168 = arith.constant 0 : index
    %c0_169 = arith.constant 0 : index
    %110 = vector.load %arg14[%c0_166, %c0_167, %c0_168, %c0_169] : memref<2x8x8x32xf32, #tpu.memory_space<vmem>>, vector<2x8x8x32xf32>
    %111 = arith.truncf %110 : vector<2x8x8x32xf32> to vector<2x8x8x32xbf16>
    %c0_170 = arith.constant 0 : index
    %c1_171 = arith.constant 1 : index
    %c0_172 = arith.constant 0 : index
    %c32_173 = arith.constant 32 : index
    %112 = vector.load %arg13[%c0_170, %c1_171, %c0_172, %c32_173] : memref<2x10x8x96xbf16, #tpu.memory_space<vmem>>, vector<2x8x8x32xbf16>
    tpu.vector_store %arg13[%c0_170, %c1_171, %c0_172, %c32_173], %111 {strides = array<i32>} : memref<2x10x8x96xbf16, #tpu.memory_space<vmem>>, vector<2x8x8x32xbf16>,
    %113 = vector.extract_strided_slice %111 {offsets = [0, 0, 0, 0], sizes = [2, 8, 7, 32], strides = [1, 1, 1, 1]} : vector<2x8x8x32xbf16> to vector<2x8x7x32xbf16>
    %c0_174 = arith.constant 0 : index
    %c1_175 = arith.constant 1 : index
    %c1_176 = arith.constant 1 : index
    %c0_177 = arith.constant 0 : index
    %114 = vector.load %arg13[%c0_174, %c1_175, %c1_176, %c0_177] : memref<2x10x8x96xbf16, #tpu.memory_space<vmem>>, vector<2x8x7x32xbf16>
    tpu.vector_store %arg13[%c0_174, %c1_175, %c1_176, %c0_177], %113 {strides = array<i32>} : memref<2x10x8x96xbf16, #tpu.memory_space<vmem>>, vector<2x8x7x32xbf16>,
    %115 = vector.extract_strided_slice %111 {offsets = [0, 0, 1, 0], sizes = [2, 8, 7, 32], strides = [1, 1, 1, 1]} : vector<2x8x8x32xbf16> to vector<2x8x7x32xbf16>
    %c0_178 = arith.constant 0 : index
    %c1_179 = arith.constant 1 : index
    %c0_180 = arith.constant 0 : index
    %c64_181 = arith.constant 64 : index
    %116 = vector.load %arg13[%c0_178, %c1_179, %c0_180, %c64_181] : memref<2x10x8x96xbf16, #tpu.memory_space<vmem>>, vector<2x8x7x32xbf16>
    tpu.vector_store %arg13[%c0_178, %c1_179, %c0_180, %c64_181], %115 {strides = array<i32>} : memref<2x10x8x96xbf16, #tpu.memory_space<vmem>>, vector<2x8x7x32xbf16>,
    %c0_182 = arith.constant 0 : index
    %c0_183 = arith.constant 0 : index
    %c0_184 = arith.constant 0 : index
    %c0_185 = arith.constant 0 : index
    %117 = vector.load %arg13[%c0_182, %c0_183, %c0_184, %c0_185] : memref<2x10x8x96xbf16, #tpu.memory_space<vmem>>, vector<2x8x8x96xbf16>
    %118 = vector.shape_cast %117 : vector<2x8x8x96xbf16> to vector<128x96xbf16>
    %c1_186 = arith.constant 1 : index
    %c0_187 = arith.constant 0 : index
    %c0_188 = arith.constant 0 : index
    %c0_189 = arith.constant 0 : index
    %c0_190 = arith.constant 0 : index
    %119 = vector.load %arg5[%c1_186, %c0_187, %c0_188, %c0_189, %c0_190] : memref<3x2x3x96x32xbf16, #tpu.memory_space<vmem>>, vector<1x1x1x96x32xbf16>
    %120 = vector.shape_cast %119 : vector<1x1x1x96x32xbf16> to vector<96x32xbf16>
    %cst_191 = arith.constant dense<0.000000e+00> : vector<128x32xf32>
    %121 = tpu.matmul %118, %120, %cst_191 {dimension_numbers = #tpu.dot_dimension_numbers<[1], [0], [0], [1], [0, 0, 1, 1], [], []>} : vector<128x96xbf16>, vector<96x32xbf16>, vector<128x32xf32> -> vector<128x32xf32>
    %c0_192 = arith.constant 0 : index
    %c1_193 = arith.constant 1 : index
    %c0_194 = arith.constant 0 : index
    %c0_195 = arith.constant 0 : index
    %122 = vector.load %arg13[%c0_192, %c1_193, %c0_194, %c0_195] : memref<2x10x8x96xbf16, #tpu.memory_space<vmem>>, vector<2x8x8x96xbf16>
    %123 = vector.shape_cast %122 : vector<2x8x8x96xbf16> to vector<128x96xbf16>
    %c1_196 = arith.constant 1 : index
    %c0_197 = arith.constant 0 : index
    %c1_198 = arith.constant 1 : index
    %c0_199 = arith.constant 0 : index
    %c0_200 = arith.constant 0 : index
    %124 = vector.load %arg5[%c1_196, %c0_197, %c1_198, %c0_199, %c0_200] : memref<3x2x3x96x32xbf16, #tpu.memory_space<vmem>>, vector<1x1x1x96x32xbf16>
    %125 = vector.shape_cast %124 : vector<1x1x1x96x32xbf16> to vector<96x32xbf16>
    %cst_201 = arith.constant dense<0.000000e+00> : vector<128x32xf32>
    %126 = tpu.matmul %123, %125, %cst_201 {dimension_numbers = #tpu.dot_dimension_numbers<[1], [0], [0], [1], [0, 0, 1, 1], [], []>} : vector<128x96xbf16>, vector<96x32xbf16>, vector<128x32xf32> -> vector<128x32xf32>
    %127 = arith.addf %121, %126 : vector<128x32xf32>
    %c0_202 = arith.constant 0 : index
    %c2_203 = arith.constant 2 : index
    %c0_204 = arith.constant 0 : index
    %c0_205 = arith.constant 0 : index
    %128 = vector.load %arg13[%c0_202, %c2_203, %c0_204, %c0_205] : memref<2x10x8x96xbf16, #tpu.memory_space<vmem>>, vector<2x8x8x96xbf16>
    %129 = vector.shape_cast %128 : vector<2x8x8x96xbf16> to vector<128x96xbf16>
    %c1_206 = arith.constant 1 : index
    %c0_207 = arith.constant 0 : index
    %c2_208 = arith.constant 2 : index
    %c0_209 = arith.constant 0 : index
    %c0_210 = arith.constant 0 : index
    %130 = vector.load %arg5[%c1_206, %c0_207, %c2_208, %c0_209, %c0_210] : memref<3x2x3x96x32xbf16, #tpu.memory_space<vmem>>, vector<1x1x1x96x32xbf16>
    %131 = vector.shape_cast %130 : vector<1x1x1x96x32xbf16> to vector<96x32xbf16>
    %cst_211 = arith.constant dense<0.000000e+00> : vector<128x32xf32>
    %132 = tpu.matmul %129, %131, %cst_211 {dimension_numbers = #tpu.dot_dimension_numbers<[1], [0], [0], [1], [0, 0, 1, 1], [], []>} : vector<128x96xbf16>, vector<96x32xbf16>, vector<128x32xf32> -> vector<128x32xf32>
    %133 = arith.addf %127, %132 : vector<128x32xf32>
    %c1_212 = arith.constant 1 : index
    %c0_213 = arith.constant 0 : index
    %c0_214 = arith.constant 0 : index
    %c0_215 = arith.constant 0 : index
    %134 = vector.load %arg6[%c1_212, %c0_213, %c0_214, %c0_215] : memref<3x2x1x32xf32, #tpu.memory_space<vmem>>, vector<1x1x1x32xf32>
    %135 = vector.shape_cast %134 : vector<1x1x1x32xf32> to vector<1x32xf32>
    %136 = vector.broadcast %135 : vector<1x32xf32> to vector<128x32xf32>
    %137 = arith.mulf %133, %136 : vector<128x32xf32>
    %c1_216 = arith.constant 1 : index
    %c0_217 = arith.constant 0 : index
    %c0_218 = arith.constant 0 : index
    %c0_219 = arith.constant 0 : index
    %138 = vector.load %arg7[%c1_216, %c0_217, %c0_218, %c0_219] : memref<3x2x1x32xf32, #tpu.memory_space<vmem>>, vector<1x1x1x32xf32>
    %139 = vector.shape_cast %138 : vector<1x1x1x32xf32> to vector<1x32xf32>
    %140 = vector.broadcast %139 : vector<1x32xf32> to vector<128x32xf32>
    %141 = arith.addf %137, %140 : vector<128x32xf32>
    %cst_220 = arith.constant 0.000000e+00 : f32
    %142 = vector.broadcast %cst_220 : f32 to vector<128x32xf32>
    %143 = arith.maximumf %141, %142 : vector<128x32xf32>
    %144 = vector.shape_cast %143 : vector<128x32xf32> to vector<2x8x8x32xf32>
    %145 = arith.truncf %144 : vector<2x8x8x32xf32> to vector<2x8x8x32xbf16>
    %c0_221 = arith.constant 0 : index
    %c1_222 = arith.constant 1 : index
    %c0_223 = arith.constant 0 : index
    %c32_224 = arith.constant 32 : index
    %146 = vector.load %arg13[%c0_221, %c1_222, %c0_223, %c32_224] : memref<2x10x8x96xbf16, #tpu.memory_space<vmem>>, vector<2x8x8x32xbf16>
    tpu.vector_store %arg13[%c0_221, %c1_222, %c0_223, %c32_224], %145 {strides = array<i32>} : memref<2x10x8x96xbf16, #tpu.memory_space<vmem>>, vector<2x8x8x32xbf16>,
    %147 = vector.extract_strided_slice %145 {offsets = [0, 0, 0, 0], sizes = [2, 8, 7, 32], strides = [1, 1, 1, 1]} : vector<2x8x8x32xbf16> to vector<2x8x7x32xbf16>
    %c0_225 = arith.constant 0 : index
    %c1_226 = arith.constant 1 : index
    %c1_227 = arith.constant 1 : index
    %c0_228 = arith.constant 0 : index
    %148 = vector.load %arg13[%c0_225, %c1_226, %c1_227, %c0_228] : memref<2x10x8x96xbf16, #tpu.memory_space<vmem>>, vector<2x8x7x32xbf16>
    tpu.vector_store %arg13[%c0_225, %c1_226, %c1_227, %c0_228], %147 {strides = array<i32>} : memref<2x10x8x96xbf16, #tpu.memory_space<vmem>>, vector<2x8x7x32xbf16>,
    %149 = vector.extract_strided_slice %145 {offsets = [0, 0, 1, 0], sizes = [2, 8, 7, 32], strides = [1, 1, 1, 1]} : vector<2x8x8x32xbf16> to vector<2x8x7x32xbf16>
    %c0_229 = arith.constant 0 : index
    %c1_230 = arith.constant 1 : index
    %c0_231 = arith.constant 0 : index
    %c64_232 = arith.constant 64 : index
    %150 = vector.load %arg13[%c0_229, %c1_230, %c0_231, %c64_232] : memref<2x10x8x96xbf16, #tpu.memory_space<vmem>>, vector<2x8x7x32xbf16>
    tpu.vector_store %arg13[%c0_229, %c1_230, %c0_231, %c64_232], %149 {strides = array<i32>} : memref<2x10x8x96xbf16, #tpu.memory_space<vmem>>, vector<2x8x7x32xbf16>,
    %c0_233 = arith.constant 0 : index
    %c0_234 = arith.constant 0 : index
    %c0_235 = arith.constant 0 : index
    %c0_236 = arith.constant 0 : index
    %151 = vector.load %arg13[%c0_233, %c0_234, %c0_235, %c0_236] : memref<2x10x8x96xbf16, #tpu.memory_space<vmem>>, vector<2x8x8x96xbf16>
    %152 = vector.shape_cast %151 : vector<2x8x8x96xbf16> to vector<128x96xbf16>
    %c1_237 = arith.constant 1 : index
    %c1_238 = arith.constant 1 : index
    %c0_239 = arith.constant 0 : index
    %c0_240 = arith.constant 0 : index
    %c0_241 = arith.constant 0 : index
    %153 = vector.load %arg5[%c1_237, %c1_238, %c0_239, %c0_240, %c0_241] : memref<3x2x3x96x32xbf16, #tpu.memory_space<vmem>>, vector<1x1x1x96x32xbf16>
    %154 = vector.shape_cast %153 : vector<1x1x1x96x32xbf16> to vector<96x32xbf16>
    %cst_242 = arith.constant dense<0.000000e+00> : vector<128x32xf32>
    %155 = tpu.matmul %152, %154, %cst_242 {dimension_numbers = #tpu.dot_dimension_numbers<[1], [0], [0], [1], [0, 0, 1, 1], [], []>} : vector<128x96xbf16>, vector<96x32xbf16>, vector<128x32xf32> -> vector<128x32xf32>
    %c0_243 = arith.constant 0 : index
    %c1_244 = arith.constant 1 : index
    %c0_245 = arith.constant 0 : index
    %c0_246 = arith.constant 0 : index
    %156 = vector.load %arg13[%c0_243, %c1_244, %c0_245, %c0_246] : memref<2x10x8x96xbf16, #tpu.memory_space<vmem>>, vector<2x8x8x96xbf16>
    %157 = vector.shape_cast %156 : vector<2x8x8x96xbf16> to vector<128x96xbf16>
    %c1_247 = arith.constant 1 : index
    %c1_248 = arith.constant 1 : index
    %c1_249 = arith.constant 1 : index
    %c0_250 = arith.constant 0 : index
    %c0_251 = arith.constant 0 : index
    %158 = vector.load %arg5[%c1_247, %c1_248, %c1_249, %c0_250, %c0_251] : memref<3x2x3x96x32xbf16, #tpu.memory_space<vmem>>, vector<1x1x1x96x32xbf16>
    %159 = vector.shape_cast %158 : vector<1x1x1x96x32xbf16> to vector<96x32xbf16>
    %cst_252 = arith.constant dense<0.000000e+00> : vector<128x32xf32>
    %160 = tpu.matmul %157, %159, %cst_252 {dimension_numbers = #tpu.dot_dimension_numbers<[1], [0], [0], [1], [0, 0, 1, 1], [], []>} : vector<128x96xbf16>, vector<96x32xbf16>, vector<128x32xf32> -> vector<128x32xf32>
    %161 = arith.addf %155, %160 : vector<128x32xf32>
    %c0_253 = arith.constant 0 : index
    %c2_254 = arith.constant 2 : index
    %c0_255 = arith.constant 0 : index
    %c0_256 = arith.constant 0 : index
    %162 = vector.load %arg13[%c0_253, %c2_254, %c0_255, %c0_256] : memref<2x10x8x96xbf16, #tpu.memory_space<vmem>>, vector<2x8x8x96xbf16>
    %163 = vector.shape_cast %162 : vector<2x8x8x96xbf16> to vector<128x96xbf16>
    %c1_257 = arith.constant 1 : index
    %c1_258 = arith.constant 1 : index
    %c2_259 = arith.constant 2 : index
    %c0_260 = arith.constant 0 : index
    %c0_261 = arith.constant 0 : index
    %164 = vector.load %arg5[%c1_257, %c1_258, %c2_259, %c0_260, %c0_261] : memref<3x2x3x96x32xbf16, #tpu.memory_space<vmem>>, vector<1x1x1x96x32xbf16>
    %165 = vector.shape_cast %164 : vector<1x1x1x96x32xbf16> to vector<96x32xbf16>
    %cst_262 = arith.constant dense<0.000000e+00> : vector<128x32xf32>
    %166 = tpu.matmul %163, %165, %cst_262 {dimension_numbers = #tpu.dot_dimension_numbers<[1], [0], [0], [1], [0, 0, 1, 1], [], []>} : vector<128x96xbf16>, vector<96x32xbf16>, vector<128x32xf32> -> vector<128x32xf32>
    %167 = arith.addf %161, %166 : vector<128x32xf32>
    %c1_263 = arith.constant 1 : index
    %c1_264 = arith.constant 1 : index
    %c0_265 = arith.constant 0 : index
    %c0_266 = arith.constant 0 : index
    %168 = vector.load %arg6[%c1_263, %c1_264, %c0_265, %c0_266] : memref<3x2x1x32xf32, #tpu.memory_space<vmem>>, vector<1x1x1x32xf32>
    %169 = vector.shape_cast %168 : vector<1x1x1x32xf32> to vector<1x32xf32>
    %170 = vector.broadcast %169 : vector<1x32xf32> to vector<128x32xf32>
    %171 = arith.mulf %167, %170 : vector<128x32xf32>
    %c1_267 = arith.constant 1 : index
    %c1_268 = arith.constant 1 : index
    %c0_269 = arith.constant 0 : index
    %c0_270 = arith.constant 0 : index
    %172 = vector.load %arg7[%c1_267, %c1_268, %c0_269, %c0_270] : memref<3x2x1x32xf32, #tpu.memory_space<vmem>>, vector<1x1x1x32xf32>
    %173 = vector.shape_cast %172 : vector<1x1x1x32xf32> to vector<1x32xf32>
    %174 = vector.broadcast %173 : vector<1x32xf32> to vector<128x32xf32>
    %175 = arith.addf %171, %174 : vector<128x32xf32>
    %c0_271 = arith.constant 0 : index
    %c0_272 = arith.constant 0 : index
    %c0_273 = arith.constant 0 : index
    %c0_274 = arith.constant 0 : index
    %176 = vector.load %arg14[%c0_271, %c0_272, %c0_273, %c0_274] : memref<2x8x8x32xf32, #tpu.memory_space<vmem>>, vector<2x8x8x32xf32>
    %177 = vector.shape_cast %176 : vector<2x8x8x32xf32> to vector<128x32xf32>
    %178 = arith.addf %175, %177 : vector<128x32xf32>
    %cst_275 = arith.constant 0.000000e+00 : f32
    %179 = vector.broadcast %cst_275 : f32 to vector<128x32xf32>
    %180 = arith.maximumf %178, %179 : vector<128x32xf32>
    %181 = vector.shape_cast %180 : vector<128x32xf32> to vector<2x8x8x32xf32>
    %c0_276 = arith.constant 0 : index
    %c0_277 = arith.constant 0 : index
    %c0_278 = arith.constant 0 : index
    %c0_279 = arith.constant 0 : index
    %182 = vector.load %arg14[%c0_276, %c0_277, %c0_278, %c0_279] : memref<2x8x8x32xf32, #tpu.memory_space<vmem>>, vector<2x8x8x32xf32>
    tpu.vector_store %arg14[%c0_276, %c0_277, %c0_278, %c0_279], %181 {strides = array<i32>} : memref<2x8x8x32xf32, #tpu.memory_space<vmem>>, vector<2x8x8x32xf32>,
    %c0_280 = arith.constant 0 : index
    %c0_281 = arith.constant 0 : index
    %c0_282 = arith.constant 0 : index
    %c0_283 = arith.constant 0 : index
    %183 = vector.load %arg14[%c0_280, %c0_281, %c0_282, %c0_283] : memref<2x8x8x32xf32, #tpu.memory_space<vmem>>, vector<2x8x8x32xf32>
    %184 = arith.truncf %183 : vector<2x8x8x32xf32> to vector<2x8x8x32xbf16>
    %c0_284 = arith.constant 0 : index
    %c1_285 = arith.constant 1 : index
    %c0_286 = arith.constant 0 : index
    %c32_287 = arith.constant 32 : index
    %185 = vector.load %arg13[%c0_284, %c1_285, %c0_286, %c32_287] : memref<2x10x8x96xbf16, #tpu.memory_space<vmem>>, vector<2x8x8x32xbf16>
    tpu.vector_store %arg13[%c0_284, %c1_285, %c0_286, %c32_287], %184 {strides = array<i32>} : memref<2x10x8x96xbf16, #tpu.memory_space<vmem>>, vector<2x8x8x32xbf16>,
    %186 = vector.extract_strided_slice %184 {offsets = [0, 0, 0, 0], sizes = [2, 8, 7, 32], strides = [1, 1, 1, 1]} : vector<2x8x8x32xbf16> to vector<2x8x7x32xbf16>
    %c0_288 = arith.constant 0 : index
    %c1_289 = arith.constant 1 : index
    %c1_290 = arith.constant 1 : index
    %c0_291 = arith.constant 0 : index
    %187 = vector.load %arg13[%c0_288, %c1_289, %c1_290, %c0_291] : memref<2x10x8x96xbf16, #tpu.memory_space<vmem>>, vector<2x8x7x32xbf16>
    tpu.vector_store %arg13[%c0_288, %c1_289, %c1_290, %c0_291], %186 {strides = array<i32>} : memref<2x10x8x96xbf16, #tpu.memory_space<vmem>>, vector<2x8x7x32xbf16>,
    %188 = vector.extract_strided_slice %184 {offsets = [0, 0, 1, 0], sizes = [2, 8, 7, 32], strides = [1, 1, 1, 1]} : vector<2x8x8x32xbf16> to vector<2x8x7x32xbf16>
    %c0_292 = arith.constant 0 : index
    %c1_293 = arith.constant 1 : index
    %c0_294 = arith.constant 0 : index
    %c64_295 = arith.constant 64 : index
    %189 = vector.load %arg13[%c0_292, %c1_293, %c0_294, %c64_295] : memref<2x10x8x96xbf16, #tpu.memory_space<vmem>>, vector<2x8x7x32xbf16>
    tpu.vector_store %arg13[%c0_292, %c1_293, %c0_294, %c64_295], %188 {strides = array<i32>} : memref<2x10x8x96xbf16, #tpu.memory_space<vmem>>, vector<2x8x7x32xbf16>,
    %c0_296 = arith.constant 0 : index
    %c0_297 = arith.constant 0 : index
    %c0_298 = arith.constant 0 : index
    %c0_299 = arith.constant 0 : index
    %190 = vector.load %arg13[%c0_296, %c0_297, %c0_298, %c0_299] : memref<2x10x8x96xbf16, #tpu.memory_space<vmem>>, vector<2x8x8x96xbf16>
    %191 = vector.shape_cast %190 : vector<2x8x8x96xbf16> to vector<128x96xbf16>
    %c2_300 = arith.constant 2 : index
    %c0_301 = arith.constant 0 : index
    %c0_302 = arith.constant 0 : index
    %c0_303 = arith.constant 0 : index
    %c0_304 = arith.constant 0 : index
    %192 = vector.load %arg5[%c2_300, %c0_301, %c0_302, %c0_303, %c0_304] : memref<3x2x3x96x32xbf16, #tpu.memory_space<vmem>>, vector<1x1x1x96x32xbf16>
    %193 = vector.shape_cast %192 : vector<1x1x1x96x32xbf16> to vector<96x32xbf16>
    %cst_305 = arith.constant dense<0.000000e+00> : vector<128x32xf32>
    %194 = tpu.matmul %191, %193, %cst_305 {dimension_numbers = #tpu.dot_dimension_numbers<[1], [0], [0], [1], [0, 0, 1, 1], [], []>} : vector<128x96xbf16>, vector<96x32xbf16>, vector<128x32xf32> -> vector<128x32xf32>
    %c0_306 = arith.constant 0 : index
    %c1_307 = arith.constant 1 : index
    %c0_308 = arith.constant 0 : index
    %c0_309 = arith.constant 0 : index
    %195 = vector.load %arg13[%c0_306, %c1_307, %c0_308, %c0_309] : memref<2x10x8x96xbf16, #tpu.memory_space<vmem>>, vector<2x8x8x96xbf16>
    %196 = vector.shape_cast %195 : vector<2x8x8x96xbf16> to vector<128x96xbf16>
    %c2_310 = arith.constant 2 : index
    %c0_311 = arith.constant 0 : index
    %c1_312 = arith.constant 1 : index
    %c0_313 = arith.constant 0 : index
    %c0_314 = arith.constant 0 : index
    %197 = vector.load %arg5[%c2_310, %c0_311, %c1_312, %c0_313, %c0_314] : memref<3x2x3x96x32xbf16, #tpu.memory_space<vmem>>, vector<1x1x1x96x32xbf16>
    %198 = vector.shape_cast %197 : vector<1x1x1x96x32xbf16> to vector<96x32xbf16>
    %cst_315 = arith.constant dense<0.000000e+00> : vector<128x32xf32>
    %199 = tpu.matmul %196, %198, %cst_315 {dimension_numbers = #tpu.dot_dimension_numbers<[1], [0], [0], [1], [0, 0, 1, 1], [], []>} : vector<128x96xbf16>, vector<96x32xbf16>, vector<128x32xf32> -> vector<128x32xf32>
    %200 = arith.addf %194, %199 : vector<128x32xf32>
    %c0_316 = arith.constant 0 : index
    %c2_317 = arith.constant 2 : index
    %c0_318 = arith.constant 0 : index
    %c0_319 = arith.constant 0 : index
    %201 = vector.load %arg13[%c0_316, %c2_317, %c0_318, %c0_319] : memref<2x10x8x96xbf16, #tpu.memory_space<vmem>>, vector<2x8x8x96xbf16>
    %202 = vector.shape_cast %201 : vector<2x8x8x96xbf16> to vector<128x96xbf16>
    %c2_320 = arith.constant 2 : index
    %c0_321 = arith.constant 0 : index
    %c2_322 = arith.constant 2 : index
    %c0_323 = arith.constant 0 : index
    %c0_324 = arith.constant 0 : index
    %203 = vector.load %arg5[%c2_320, %c0_321, %c2_322, %c0_323, %c0_324] : memref<3x2x3x96x32xbf16, #tpu.memory_space<vmem>>, vector<1x1x1x96x32xbf16>
    %204 = vector.shape_cast %203 : vector<1x1x1x96x32xbf16> to vector<96x32xbf16>
    %cst_325 = arith.constant dense<0.000000e+00> : vector<128x32xf32>
    %205 = tpu.matmul %202, %204, %cst_325 {dimension_numbers = #tpu.dot_dimension_numbers<[1], [0], [0], [1], [0, 0, 1, 1], [], []>} : vector<128x96xbf16>, vector<96x32xbf16>, vector<128x32xf32> -> vector<128x32xf32>
    %206 = arith.addf %200, %205 : vector<128x32xf32>
    %c2_326 = arith.constant 2 : index
    %c0_327 = arith.constant 0 : index
    %c0_328 = arith.constant 0 : index
    %c0_329 = arith.constant 0 : index
    %207 = vector.load %arg6[%c2_326, %c0_327, %c0_328, %c0_329] : memref<3x2x1x32xf32, #tpu.memory_space<vmem>>, vector<1x1x1x32xf32>
    %208 = vector.shape_cast %207 : vector<1x1x1x32xf32> to vector<1x32xf32>
    %209 = vector.broadcast %208 : vector<1x32xf32> to vector<128x32xf32>
    %210 = arith.mulf %206, %209 : vector<128x32xf32>
    %c2_330 = arith.constant 2 : index
    %c0_331 = arith.constant 0 : index
    %c0_332 = arith.constant 0 : index
    %c0_333 = arith.constant 0 : index
    %211 = vector.load %arg7[%c2_330, %c0_331, %c0_332, %c0_333] : memref<3x2x1x32xf32, #tpu.memory_space<vmem>>, vector<1x1x1x32xf32>
    %212 = vector.shape_cast %211 : vector<1x1x1x32xf32> to vector<1x32xf32>
    %213 = vector.broadcast %212 : vector<1x32xf32> to vector<128x32xf32>
    %214 = arith.addf %210, %213 : vector<128x32xf32>
    %cst_334 = arith.constant 0.000000e+00 : f32
    %215 = vector.broadcast %cst_334 : f32 to vector<128x32xf32>
    %216 = arith.maximumf %214, %215 : vector<128x32xf32>
    %217 = vector.shape_cast %216 : vector<128x32xf32> to vector<2x8x8x32xf32>
    %218 = arith.truncf %217 : vector<2x8x8x32xf32> to vector<2x8x8x32xbf16>
    %c0_335 = arith.constant 0 : index
    %c1_336 = arith.constant 1 : index
    %c0_337 = arith.constant 0 : index
    %c32_338 = arith.constant 32 : index
    %219 = vector.load %arg13[%c0_335, %c1_336, %c0_337, %c32_338] : memref<2x10x8x96xbf16, #tpu.memory_space<vmem>>, vector<2x8x8x32xbf16>
    tpu.vector_store %arg13[%c0_335, %c1_336, %c0_337, %c32_338], %218 {strides = array<i32>} : memref<2x10x8x96xbf16, #tpu.memory_space<vmem>>, vector<2x8x8x32xbf16>,
    %220 = vector.extract_strided_slice %218 {offsets = [0, 0, 0, 0], sizes = [2, 8, 7, 32], strides = [1, 1, 1, 1]} : vector<2x8x8x32xbf16> to vector<2x8x7x32xbf16>
    %c0_339 = arith.constant 0 : index
    %c1_340 = arith.constant 1 : index
    %c1_341 = arith.constant 1 : index
    %c0_342 = arith.constant 0 : index
    %221 = vector.load %arg13[%c0_339, %c1_340, %c1_341, %c0_342] : memref<2x10x8x96xbf16, #tpu.memory_space<vmem>>, vector<2x8x7x32xbf16>
    tpu.vector_store %arg13[%c0_339, %c1_340, %c1_341, %c0_342], %220 {strides = array<i32>} : memref<2x10x8x96xbf16, #tpu.memory_space<vmem>>, vector<2x8x7x32xbf16>,
    %222 = vector.extract_strided_slice %218 {offsets = [0, 0, 1, 0], sizes = [2, 8, 7, 32], strides = [1, 1, 1, 1]} : vector<2x8x8x32xbf16> to vector<2x8x7x32xbf16>
    %c0_343 = arith.constant 0 : index
    %c1_344 = arith.constant 1 : index
    %c0_345 = arith.constant 0 : index
    %c64_346 = arith.constant 64 : index
    %223 = vector.load %arg13[%c0_343, %c1_344, %c0_345, %c64_346] : memref<2x10x8x96xbf16, #tpu.memory_space<vmem>>, vector<2x8x7x32xbf16>
    tpu.vector_store %arg13[%c0_343, %c1_344, %c0_345, %c64_346], %222 {strides = array<i32>} : memref<2x10x8x96xbf16, #tpu.memory_space<vmem>>, vector<2x8x7x32xbf16>,
    %c0_347 = arith.constant 0 : index
    %c0_348 = arith.constant 0 : index
    %c0_349 = arith.constant 0 : index
    %c0_350 = arith.constant 0 : index
    %224 = vector.load %arg13[%c0_347, %c0_348, %c0_349, %c0_350] : memref<2x10x8x96xbf16, #tpu.memory_space<vmem>>, vector<2x8x8x96xbf16>
    %225 = vector.shape_cast %224 : vector<2x8x8x96xbf16> to vector<128x96xbf16>
    %c2_351 = arith.constant 2 : index
    %c1_352 = arith.constant 1 : index
    %c0_353 = arith.constant 0 : index
    %c0_354 = arith.constant 0 : index
    %c0_355 = arith.constant 0 : index
    %226 = vector.load %arg5[%c2_351, %c1_352, %c0_353, %c0_354, %c0_355] : memref<3x2x3x96x32xbf16, #tpu.memory_space<vmem>>, vector<1x1x1x96x32xbf16>
    %227 = vector.shape_cast %226 : vector<1x1x1x96x32xbf16> to vector<96x32xbf16>
    %cst_356 = arith.constant dense<0.000000e+00> : vector<128x32xf32>
    %228 = tpu.matmul %225, %227, %cst_356 {dimension_numbers = #tpu.dot_dimension_numbers<[1], [0], [0], [1], [0, 0, 1, 1], [], []>} : vector<128x96xbf16>, vector<96x32xbf16>, vector<128x32xf32> -> vector<128x32xf32>
    %c0_357 = arith.constant 0 : index
    %c1_358 = arith.constant 1 : index
    %c0_359 = arith.constant 0 : index
    %c0_360 = arith.constant 0 : index
    %229 = vector.load %arg13[%c0_357, %c1_358, %c0_359, %c0_360] : memref<2x10x8x96xbf16, #tpu.memory_space<vmem>>, vector<2x8x8x96xbf16>
    %230 = vector.shape_cast %229 : vector<2x8x8x96xbf16> to vector<128x96xbf16>
    %c2_361 = arith.constant 2 : index
    %c1_362 = arith.constant 1 : index
    %c1_363 = arith.constant 1 : index
    %c0_364 = arith.constant 0 : index
    %c0_365 = arith.constant 0 : index
    %231 = vector.load %arg5[%c2_361, %c1_362, %c1_363, %c0_364, %c0_365] : memref<3x2x3x96x32xbf16, #tpu.memory_space<vmem>>, vector<1x1x1x96x32xbf16>
    %232 = vector.shape_cast %231 : vector<1x1x1x96x32xbf16> to vector<96x32xbf16>
    %cst_366 = arith.constant dense<0.000000e+00> : vector<128x32xf32>
    %233 = tpu.matmul %230, %232, %cst_366 {dimension_numbers = #tpu.dot_dimension_numbers<[1], [0], [0], [1], [0, 0, 1, 1], [], []>} : vector<128x96xbf16>, vector<96x32xbf16>, vector<128x32xf32> -> vector<128x32xf32>
    %234 = arith.addf %228, %233 : vector<128x32xf32>
    %c0_367 = arith.constant 0 : index
    %c2_368 = arith.constant 2 : index
    %c0_369 = arith.constant 0 : index
    %c0_370 = arith.constant 0 : index
    %235 = vector.load %arg13[%c0_367, %c2_368, %c0_369, %c0_370] : memref<2x10x8x96xbf16, #tpu.memory_space<vmem>>, vector<2x8x8x96xbf16>
    %236 = vector.shape_cast %235 : vector<2x8x8x96xbf16> to vector<128x96xbf16>
    %c2_371 = arith.constant 2 : index
    %c1_372 = arith.constant 1 : index
    %c2_373 = arith.constant 2 : index
    %c0_374 = arith.constant 0 : index
    %c0_375 = arith.constant 0 : index
    %237 = vector.load %arg5[%c2_371, %c1_372, %c2_373, %c0_374, %c0_375] : memref<3x2x3x96x32xbf16, #tpu.memory_space<vmem>>, vector<1x1x1x96x32xbf16>
    %238 = vector.shape_cast %237 : vector<1x1x1x96x32xbf16> to vector<96x32xbf16>
    %cst_376 = arith.constant dense<0.000000e+00> : vector<128x32xf32>
    %239 = tpu.matmul %236, %238, %cst_376 {dimension_numbers = #tpu.dot_dimension_numbers<[1], [0], [0], [1], [0, 0, 1, 1], [], []>} : vector<128x96xbf16>, vector<96x32xbf16>, vector<128x32xf32> -> vector<128x32xf32>
    %240 = arith.addf %234, %239 : vector<128x32xf32>
    %c2_377 = arith.constant 2 : index
    %c1_378 = arith.constant 1 : index
    %c0_379 = arith.constant 0 : index
    %c0_380 = arith.constant 0 : index
    %241 = vector.load %arg6[%c2_377, %c1_378, %c0_379, %c0_380] : memref<3x2x1x32xf32, #tpu.memory_space<vmem>>, vector<1x1x1x32xf32>
    %242 = vector.shape_cast %241 : vector<1x1x1x32xf32> to vector<1x32xf32>
    %243 = vector.broadcast %242 : vector<1x32xf32> to vector<128x32xf32>
    %244 = arith.mulf %240, %243 : vector<128x32xf32>
    %c2_381 = arith.constant 2 : index
    %c1_382 = arith.constant 1 : index
    %c0_383 = arith.constant 0 : index
    %c0_384 = arith.constant 0 : index
    %245 = vector.load %arg7[%c2_381, %c1_382, %c0_383, %c0_384] : memref<3x2x1x32xf32, #tpu.memory_space<vmem>>, vector<1x1x1x32xf32>
    %246 = vector.shape_cast %245 : vector<1x1x1x32xf32> to vector<1x32xf32>
    %247 = vector.broadcast %246 : vector<1x32xf32> to vector<128x32xf32>
    %248 = arith.addf %244, %247 : vector<128x32xf32>
    %c0_385 = arith.constant 0 : index
    %c0_386 = arith.constant 0 : index
    %c0_387 = arith.constant 0 : index
    %c0_388 = arith.constant 0 : index
    %249 = vector.load %arg14[%c0_385, %c0_386, %c0_387, %c0_388] : memref<2x8x8x32xf32, #tpu.memory_space<vmem>>, vector<2x8x8x32xf32>
    %250 = vector.shape_cast %249 : vector<2x8x8x32xf32> to vector<128x32xf32>
    %251 = arith.addf %248, %250 : vector<128x32xf32>
    %cst_389 = arith.constant 0.000000e+00 : f32
    %252 = vector.broadcast %cst_389 : f32 to vector<128x32xf32>
    %253 = arith.maximumf %251, %252 : vector<128x32xf32>
    %254 = vector.shape_cast %253 : vector<128x32xf32> to vector<2x8x8x32xf32>
    %c0_390 = arith.constant 0 : index
    %c0_391 = arith.constant 0 : index
    %c0_392 = arith.constant 0 : index
    %c0_393 = arith.constant 0 : index
    %255 = vector.load %arg14[%c0_390, %c0_391, %c0_392, %c0_393] : memref<2x8x8x32xf32, #tpu.memory_space<vmem>>, vector<2x8x8x32xf32>
    tpu.vector_store %arg14[%c0_390, %c0_391, %c0_392, %c0_393], %254 {strides = array<i32>} : memref<2x8x8x32xf32, #tpu.memory_space<vmem>>, vector<2x8x8x32xf32>,
    %c0_394 = arith.constant 0 : index
    %c0_395 = arith.constant 0 : index
    %c0_396 = arith.constant 0 : index
    %c0_397 = arith.constant 0 : index
    %256 = vector.load %arg14[%c0_394, %c0_395, %c0_396, %c0_397] : memref<2x8x8x32xf32, #tpu.memory_space<vmem>>, vector<2x8x8x32xf32>
    %257 = vector.shape_cast %256 : vector<2x8x8x32xf32> to vector<128x32xf32>
    %258 = arith.truncf %257 : vector<128x32xf32> to vector<128x32xbf16>
    %c0_398 = arith.constant 0 : index
    %c0_399 = arith.constant 0 : index
    %259 = vector.load %arg8[%c0_398, %c0_399] : memref<32x16xbf16, #tpu.memory_space<vmem>>, vector<32x16xbf16>
    %cst_400 = arith.constant dense<0.000000e+00> : vector<128x16xf32>
    %260 = tpu.matmul %258, %259, %cst_400 {dimension_numbers = #tpu.dot_dimension_numbers<[1], [0], [0], [1], [0, 0, 1, 1], [], []>} : vector<128x32xbf16>, vector<32x16xbf16>, vector<128x16xf32> -> vector<128x16xf32>
    %c0_401 = arith.constant 0 : index
    %c0_402 = arith.constant 0 : index
    %261 = vector.load %arg9[%c0_401, %c0_402] : memref<1x16xf32, #tpu.memory_space<vmem>>, vector<1x16xf32>
    %262 = vector.broadcast %261 : vector<1x16xf32> to vector<128x16xf32>
    %263 = arith.mulf %260, %262 : vector<128x16xf32>
    %c0_403 = arith.constant 0 : index
    %c0_404 = arith.constant 0 : index
    %264 = vector.load %arg10[%c0_403, %c0_404] : memref<1x16xf32, #tpu.memory_space<vmem>>, vector<1x16xf32>
    %265 = vector.broadcast %264 : vector<1x16xf32> to vector<128x16xf32>
    %266 = arith.addf %263, %265 : vector<128x16xf32>
    %cst_405 = arith.constant 0.000000e+00 : f32
    %267 = vector.broadcast %cst_405 : f32 to vector<128x16xf32>
    %268 = arith.maximumf %266, %267 : vector<128x16xf32>
    %c0_406 = arith.constant 0 : index
    %c0_407 = arith.constant 0 : index
    %269 = vector.load %arg11[%c0_406, %c0_407] : memref<128x16xf32, #tpu.memory_space<vmem>>, vector<128x16xf32>
    tpu.vector_store %arg11[%c0_406, %c0_407], %268 {strides = array<i32>} : memref<128x16xf32, #tpu.memory_space<vmem>>, vector<128x16xf32>,
    return
  }
  func.func @transform_0(%arg0: i32) -> (i32, i32, i32, i32) {
    %c0_i32 = arith.constant 0 : i32
    %c0_i32_0 = arith.constant 0 : i32
    %c0_i32_1 = arith.constant 0 : i32
    %c0_i32_2 = arith.constant 0 : i32
    return %arg0, %c0_i32, %c0_i32_0, %c0_i32_1 : i32, i32, i32, i32
  }
  func.func @transform_1(%arg0: i32) -> (i32, i32, i32) {
    %c0_i32 = arith.constant 0 : i32
    %c0_i32_0 = arith.constant 0 : i32
    %c0_i32_1 = arith.constant 0 : i32
    %c0_i32_2 = arith.constant 0 : i32
    return %c0_i32, %c0_i32_0, %c0_i32_1 : i32, i32, i32
  }
  func.func @transform_2(%arg0: i32) -> (i32, i32) {
    %c0_i32 = arith.constant 0 : i32
    %c0_i32_0 = arith.constant 0 : i32
    %c0_i32_1 = arith.constant 0 : i32
    return %c0_i32, %c0_i32_0 : i32, i32
  }
  func.func @transform_3(%arg0: i32) -> (i32, i32) {
    %c0_i32 = arith.constant 0 : i32
    %c0_i32_0 = arith.constant 0 : i32
    %c0_i32_1 = arith.constant 0 : i32
    return %c0_i32, %c0_i32_0 : i32, i32
  }
  func.func @transform_4(%arg0: i32) -> (i32, i32, i32, i32, i32) {
    %c0_i32 = arith.constant 0 : i32
    %c0_i32_0 = arith.constant 0 : i32
    %c0_i32_1 = arith.constant 0 : i32
    %c0_i32_2 = arith.constant 0 : i32
    %c0_i32_3 = arith.constant 0 : i32
    %c0_i32_4 = arith.constant 0 : i32
    return %c0_i32, %c0_i32_0, %c0_i32_1, %c0_i32_2, %c0_i32_3 : i32, i32, i32, i32, i32
  }
  func.func @transform_5(%arg0: i32) -> (i32, i32, i32, i32) {
    %c0_i32 = arith.constant 0 : i32
    %c0_i32_0 = arith.constant 0 : i32
    %c0_i32_1 = arith.constant 0 : i32
    %c0_i32_2 = arith.constant 0 : i32
    %c0_i32_3 = arith.constant 0 : i32
    return %c0_i32, %c0_i32_0, %c0_i32_1, %c0_i32_2 : i32, i32, i32, i32
  }
  func.func @transform_6(%arg0: i32) -> (i32, i32, i32, i32) {
    %c0_i32 = arith.constant 0 : i32
    %c0_i32_0 = arith.constant 0 : i32
    %c0_i32_1 = arith.constant 0 : i32
    %c0_i32_2 = arith.constant 0 : i32
    %c0_i32_3 = arith.constant 0 : i32
    return %c0_i32, %c0_i32_0, %c0_i32_1, %c0_i32_2 : i32, i32, i32, i32
  }
  func.func @transform_7(%arg0: i32) -> (i32, i32) {
    %c0_i32 = arith.constant 0 : i32
    %c0_i32_0 = arith.constant 0 : i32
    %c0_i32_1 = arith.constant 0 : i32
    return %c0_i32, %c0_i32_0 : i32, i32
  }
  func.func @transform_8(%arg0: i32) -> (i32, i32) {
    %c0_i32 = arith.constant 0 : i32
    %c0_i32_0 = arith.constant 0 : i32
    %c0_i32_1 = arith.constant 0 : i32
    return %c0_i32, %c0_i32_0 : i32, i32
  }
  func.func @transform_9(%arg0: i32) -> (i32, i32) {
    %c0_i32 = arith.constant 0 : i32
    %c0_i32_0 = arith.constant 0 : i32
    %c0_i32_1 = arith.constant 0 : i32
    return %c0_i32, %c0_i32_0 : i32, i32
  }
  func.func @transform_10(%arg0: i32) -> (i32, i32) {
    %c0_i32 = arith.constant 0 : i32
    %c0_i32_0 = arith.constant 0 : i32
    return %arg0, %c0_i32 : i32, i32
  }
}

module attributes {stable_mosaic.version = 11 : i64} {
  func.func @_mlp_head_kernel(%arg0: memref<2x1024xf32, #tpu.memory_space<vmem>>, %arg1: memref<1024x64xbf16, #tpu.memory_space<vmem>>, %arg2: memref<1x64xf32, #tpu.memory_space<vmem>>, %arg3: memref<64x1xbf16, #tpu.memory_space<vmem>>, %arg4: memref<1x1xf32, #tpu.memory_space<vmem>>, %arg5: memref<2x1xf32, #tpu.memory_space<vmem>>) attributes {dimension_semantics = [], scalar_prefetch = 0 : i64, scratch_operands = 0 : i64, tpu.core_type = #tpu.core_type<tc>} {
    %c0 = arith.constant 0 : index
    %c0_0 = arith.constant 0 : index
    %0 = vector.load %arg0[%c0, %c0_0] : memref<2x1024xf32, #tpu.memory_space<vmem>>, vector<2x1024xf32>
    %1 = arith.truncf %0 : vector<2x1024xf32> to vector<2x1024xbf16>
    %c0_1 = arith.constant 0 : index
    %c0_2 = arith.constant 0 : index
    %2 = vector.load %arg1[%c0_1, %c0_2] : memref<1024x64xbf16, #tpu.memory_space<vmem>>, vector<1024x64xbf16>
    %cst = arith.constant dense<0.000000e+00> : vector<2x64xf32>
    %3 = tpu.matmul %1, %2, %cst {dimension_numbers = #tpu.dot_dimension_numbers<[1], [0], [0], [1], [0, 0, 1, 1], [], []>} : vector<2x1024xbf16>, vector<1024x64xbf16>, vector<2x64xf32> -> vector<2x64xf32>
    %c0_3 = arith.constant 0 : index
    %c0_4 = arith.constant 0 : index
    %4 = vector.load %arg2[%c0_3, %c0_4] : memref<1x64xf32, #tpu.memory_space<vmem>>, vector<1x64xf32>
    %5 = vector.broadcast %4 : vector<1x64xf32> to vector<2x64xf32>
    %6 = arith.addf %3, %5 : vector<2x64xf32>
    %cst_5 = arith.constant 0.000000e+00 : f32
    %7 = vector.broadcast %cst_5 : f32 to vector<2x64xf32>
    %8 = arith.maximumf %6, %7 : vector<2x64xf32>
    %9 = arith.truncf %8 : vector<2x64xf32> to vector<2x64xbf16>
    %c0_6 = arith.constant 0 : index
    %c0_7 = arith.constant 0 : index
    %10 = vector.load %arg3[%c0_6, %c0_7] : memref<64x1xbf16, #tpu.memory_space<vmem>>, vector<64x1xbf16>
    %cst_8 = arith.constant dense<0.000000e+00> : vector<2x1xf32>
    %11 = tpu.matmul %9, %10, %cst_8 {dimension_numbers = #tpu.dot_dimension_numbers<[1], [0], [0], [1], [0, 0, 1, 1], [], []>} : vector<2x64xbf16>, vector<64x1xbf16>, vector<2x1xf32> -> vector<2x1xf32>
    %c0_9 = arith.constant 0 : index
    %c0_10 = arith.constant 0 : index
    %12 = vector.load %arg4[%c0_9, %c0_10] : memref<1x1xf32, #tpu.memory_space<vmem>>, vector<1x1xf32>
    %13 = vector.broadcast %12 : vector<1x1xf32> to vector<2x1xf32>
    %14 = arith.addf %11, %13 : vector<2x1xf32>
    %cst_11 = arith.constant 5.000000e-01 : f32
    %15 = vector.broadcast %cst_11 : f32 to vector<2x1xf32>
    %16 = arith.mulf %15, %14 : vector<2x1xf32>
    %17 = math.tanh %16 : vector<2x1xf32>
    %cst_12 = arith.constant 1.000000e+00 : f32
    %18 = vector.broadcast %cst_12 : f32 to vector<2x1xf32>
    %19 = arith.addf %17, %18 : vector<2x1xf32>
    %cst_13 = arith.constant 5.000000e-01 : f32
    %20 = vector.broadcast %cst_13 : f32 to vector<2x1xf32>
    %21 = arith.mulf %20, %19 : vector<2x1xf32>
    %c0_14 = arith.constant 0 : index
    %c0_15 = arith.constant 0 : index
    %22 = vector.load %arg5[%c0_14, %c0_15] : memref<2x1xf32, #tpu.memory_space<vmem>>, vector<2x1xf32>
    tpu.vector_store %arg5[%c0_14, %c0_15], %21 {strides = array<i32>} : memref<2x1xf32, #tpu.memory_space<vmem>>, vector<2x1xf32>,
    return
  }
}

</mosaic_0001>

<bundles_post_ra>
// kernel: resnet_forward.3
= control target key start
LH: loop header
LB: loop body
LE: loop exit
PB: predicated region body
PF: predicated region fallthrough
CT: control target
= control target key end

     0   :  { %vm712_vm0 = vcmask 523264   ;;  %vm733_vm1 = vcmask 1024   ;;  %s1333_s1 = inlined_call_operand.vmem [shape: bf16[1024,64], index: 1, kind: input, shape index: {}]   ;;  %s1334_s0 = inlined_call_operand.vmem [shape: f32[2,1024], index: 0, kind: input, shape index: {}]   ;;  %s1335_s2 = inlined_call_operand.vmem [shape: f32[1,64], index: 2, kind: input, shape index: {}]   ;;  %s1336_s3 = inlined_call_operand.vmem [shape: bf16[64,1], index: 3, kind: input, shape index: {}]   ;;  %s1337_s4 = inlined_call_operand.<no memory space> [shape: f32[1,1], index: 4, kind: input, shape index: {}]   ;;  %s1338_s5 = inlined_call_operand.vmem [shape: f32[2,1], index: 5, kind: output, shape index: {}]  }
   0x1   :  { %v1019_v0 = vld [vmem:[%s1333_s1 + $0x38] sm:$0xff]  ;;  %v1018_v4 = vld [vmem:[%s1333_s1 + $0x30] sm:$0xff]  ;;  %v1017_v8 = vld [vmem:[%s1333_s1 + $0x28] sm:$0xff] }
   0x2   :  { %v1027_v1 = vld [vmem:[%s1333_s1 + $0x78] sm:$0xff]  ;;  %570 = vmatpush.bf16.msra.mxu0 %v1019_v0  ;;  %v1026_v5 = vld [vmem:[%s1333_s1 + $0x70] sm:$0xff]  ;;  %v1025_v9 = vld [vmem:[%s1333_s1 + $0x68] sm:$0xff] }
   0x3   :  { %v1035_v2 = vld [vmem:[%s1333_s1 + $0xb8] sm:$0xff]  ;;  %583 = vmatpush.bf16.msra.mxu1 %v1027_v1  ;;  %v1034_v6 = vld [vmem:[%s1333_s1 + $0xb0] sm:$0xff]  ;;  %v1033_v10 = vld [vmem:[%s1333_s1 + $0xa8] sm:$0xff] }
   0x4   :  { %v1043_v3 = vld [vmem:[%s1333_s1 + $0xf8] sm:$0xff]  ;;  %596 = vmatpush.bf16.msra.mxu2 %v1035_v2  ;;  %v1042_v7 = vld [vmem:[%s1333_s1 + $0xf0] sm:$0xff]  ;;  %v1041_v11 = vld [vmem:[%s1333_s1 + $0xe8] sm:$0xff] }
   0x5   :  { %609 = vmatpush.bf16.msra.mxu3 %v1043_v3  ;;  %v1016_v12 = vld [vmem:[%s1333_s1 + $0x20] sm:$0xff]  ;;  %v24_v17 = vld [vmem:[%s1334_s0 + $0x8] sm:$0xff]  ;;  %v1015_v18 = vld [vmem:[%s1333_s1 + $0x18] sm:$0xff] }
   0x6   :  { %571 = vmatpush.bf16.msra.mxu0 %v1018_v4  ;;  %v1024_v13 = vld [vmem:[%s1333_s1 + $0x60] sm:$0xff]  ;;  %v1023_v19 = vld [vmem:[%s1333_s1 + $0x58] sm:$0xff]  ;;  %29 = vst [vmem:[#allocation1 + $0x20] ss:$4 sm:$0xff] %v24_v17  ;;  %v1014_v22 = vld [vmem:[%s1333_s1 + $0x10] sm:$0xff] }
   0x7   :  { %584 = vmatpush.bf16.msra.mxu1 %v1026_v5  ;;  %v1032_v14 = vld [vmem:[%s1333_s1 + $0xa0] sm:$0xff]  ;;  %v1031_v20 = vld [vmem:[%s1333_s1 + $0x98] sm:$0xff]  ;;  %v1022_v23 = vld [vmem:[%s1333_s1 + $0x50] sm:$0xff] }
   0x8   :  { %597 = vmatpush.bf16.msra.mxu2 %v1034_v6  ;;  %v1040_v15 = vld [vmem:[%s1333_s1 + $0xe0] sm:$0xff]  ;;  %v1039_v21 = vld [vmem:[%s1333_s1 + $0xd8] sm:$0xff]  ;;  %v1030_v24 = vld [vmem:[%s1333_s1 + $0x90] sm:$0xff] }
   0x9   :  { %610 = vmatpush.bf16.msra.mxu3 %v1042_v7  ;;  %v23_v16 = vld [vmem:[%s1334_s0] sm:$0xff]  ;;  %v1038_v25 = vld [vmem:[%s1333_s1 + $0xd0] sm:$0xff]  ;;  %v1013_v26 = vld [vmem:[%s1333_s1 + $0x8] sm:$0xff] }
   0xa   :  { %572 = vmatpush.bf16.msra.mxu0 %v1017_v8  ;;  %27 = vst [vmem:[#allocation1] ss:$4 sm:$0xff] %v23_v16  ;;  %v1021_v27 = vld [vmem:[%s1333_s1 + $0x48] sm:$0xff]  ;;  %v1012_v30 = vld [vmem:[%s1333_s1] sm:$0xff]  ;;  %v1051_v34 = vld [vmem:[%s1333_s1 + $0x138] sm:$0xff] }
   0xb   :  { %585 = vmatpush.bf16.msra.mxu1 %v1025_v9  ;;  %v1029_v28 = vld [vmem:[%s1333_s1 + $0x88] sm:$0xff]  ;;  %v1020_v31 = vld [vmem:[%s1333_s1 + $0x40] sm:$0xff]  ;;  %v1059_v35 = vld [vmem:[%s1333_s1 + $0x178] sm:$0xff] }
   0xc   :  { %598 = vmatpush.bf16.msra.mxu2 %v1033_v10  ;;  %v1037_v29 = vld [vmem:[%s1333_s1 + $0xc8] sm:$0xff]  ;;  %v1028_v32 = vld [vmem:[%s1333_s1 + $0x80] sm:$0xff]  ;;  %v1067_v40 = vld [vmem:[%s1333_s1 + $0x1b8] sm:$0xff] }
   0xd   :  { %611 = vmatpush.bf16.msra.mxu3 %v1041_v11  ;;  %v1036_v33 = vld [vmem:[%s1333_s1 + $0xc0] sm:$0xff]  ;;  %v1075_v41 = vld [vmem:[%s1333_s1 + $0x1f8] sm:$0xff]  ;;  %v1050_v46 = vld [vmem:[%s1333_s1 + $0x130] sm:$0xff] }
   0xe   :  { %573 = vmatpush.bf16.msra.mxu0 %v1016_v12  ;;  %v1058_v47 = vld [vmem:[%s1333_s1 + $0x170] sm:$0xff]  ;;  %v1049_v50 = vld [vmem:[%s1333_s1 + $0x128] sm:$0xff]  ;;  %v1048_v54 = vld [vmem:[%s1333_s1 + $0x120] sm:$0xff] }
   0xf   :  { %586 = vmatpush.bf16.msra.mxu1 %v1024_v13  ;;  %v1066_v48 = vld [vmem:[%s1333_s1 + $0x1b0] sm:$0xff]  ;;  %v1057_v51 = vld [vmem:[%s1333_s1 + $0x168] sm:$0xff]  ;;  %v1056_v55 = vld [vmem:[%s1333_s1 + $0x160] sm:$0xff] }
  0x10   :  { %599 = vmatpush.bf16.msra.mxu2 %v1032_v14  ;;  %v1074_v49 = vld [vmem:[%s1333_s1 + $0x1f0] sm:$0xff]  ;;  %v1065_v52 = vld [vmem:[%s1333_s1 + $0x1a8] sm:$0xff]  ;;  %v1064_v56 = vld [vmem:[%s1333_s1 + $0x1a0] sm:$0xff] }
  0x11   :  { %612 = vmatpush.bf16.msra.mxu3 %v1040_v15  ;;  %v32_v36 = vld.sshfl [vmem:[#allocation1 + $0x10] sm:$0xff pattern:$0x73625140]  ;;  %v30_v37 = vld.sshfl [vmem:[#allocation1] sm:$0xff pattern:$0x73625140] }
  0x12   :  { %574 = vmatpush.bf16.msra.mxu0 %v1015_v18  ;;  %v33_v38 = vld.sshfl [vmem:[#allocation1 + $0x18] sm:$0xff pattern:$0x73625140]  ;;  %v31_v39 = vld.sshfl [vmem:[#allocation1 + $0x8] sm:$0xff pattern:$0x73625140]  ;;  %v48_v42 = vpack.c.bf16 %v32_v36, %v32_v36  ;;  %v46_v43 = vpack.c.bf16 %v30_v37, %v30_v37 }
  0x13   :  { %587 = vmatpush.bf16.msra.mxu1 %v1023_v19  ;;  %v49_v44 = vpack.c.bf16 %v33_v38, %v33_v38  ;;  %v47_v45 = vpack.c.bf16 %v31_v39, %v31_v39  ;;  %v1073_v53 = vld [vmem:[%s1333_s1 + $0x1e8] sm:$0xff]  ;;  %v1072_v57 = vld [vmem:[%s1333_s1 + $0x1e0] sm:$0xff]  ;;  %v1047_v58 = vld [vmem:[%s1333_s1 + $0x118] sm:$0xff] }
  0x14   :  { %600 = vmatpush.bf16.msra.mxu2 %v1031_v20  ;;  %v1055_v59 = vld [vmem:[%s1333_s1 + $0x158] sm:$0xff]  ;;  %v1046_v62 = vld [vmem:[%s1333_s1 + $0x110] sm:$0xff]  ;;  %v1045_v2 = vld [vmem:[%s1333_s1 + $0x108] sm:$0xff] }
  0x15   :  { %613 = vmatpush.bf16.msra.mxu3 %v1039_v21  ;;  %v1063_v60 = vld [vmem:[%s1333_s1 + $0x198] sm:$0xff]  ;;  %v1054_v63 = vld [vmem:[%s1333_s1 + $0x150] sm:$0xff]  ;;  %v1053_v3 = vld [vmem:[%s1333_s1 + $0x148] sm:$0xff] }
  0x16   :  { %575 = vmatpush.bf16.msra.mxu0 %v1014_v22  ;;  %v1071_v61 = vld [vmem:[%s1333_s1 + $0x1d8] sm:$0xff]  ;;  %v1062_v0 = vld [vmem:[%s1333_s1 + $0x190] sm:$0xff]  ;;  %v1061_v4 = vld [vmem:[%s1333_s1 + $0x188] sm:$0xff] }
  0x17   :  { %588 = vmatpush.bf16.msra.mxu1 %v1022_v23  ;;  %v1070_v1 = vld [vmem:[%s1333_s1 + $0x1d0] sm:$0xff]  ;;  %v1069_v5 = vld [vmem:[%s1333_s1 + $0x1c8] sm:$0xff]  ;;  %v1044_v6 = vld [vmem:[%s1333_s1 + $0x100] sm:$0xff] }
  0x18   :  { %601 = vmatpush.bf16.msra.mxu2 %v1030_v24  ;;  %v1052_v7 = vld [vmem:[%s1333_s1 + $0x140] sm:$0xff]  ;;  %v35_v11 = vld.sshfl [vmem:[#allocation1 + $0x28] sm:$0xff pattern:$0x73625140]  ;;  %v1079_v18 = vld [vmem:[%s1336_s3 + $0x18] sm:$0xff] }
  0x19   :  { %614 = vmatpush.bf16.msra.mxu3 %v1038_v25  ;;  %v1060_v8 = vld [vmem:[%s1333_s1 + $0x180] sm:$0xff]  ;;  %v36_v12 = vld.sshfl [vmem:[#allocation1 + $0x30] sm:$0xff pattern:$0x73625140]  ;;  %v51_v15 = vpack.c.bf16 %v35_v11, %v35_v11  ;;  %v1077_v22 = vld [vmem:[%s1336_s3 + $0x8] sm:$0xff] }
  0x1a   :  { %576 = vmatpush.bf16.msra.mxu0 %v1013_v26  ;;  %v1068_v9 = vld [vmem:[%s1333_s1 + $0x1c0] sm:$0xff]  ;;  %v37_v13 = vld.sshfl [vmem:[#allocation1 + $0x38] sm:$0xff pattern:$0x73625140]  ;;  %v52_v16 = vpack.c.bf16 %v36_v12, %v36_v12  ;;  %v1078_v20 = vld [vmem:[%s1336_s3 + $0x10] sm:$0xff] }
  0x1b   :  { %589 = vmatpush.bf16.msra.mxu1 %v1021_v27  ;;  %v34_v10 = vld.sshfl [vmem:[#allocation1 + $0x20] sm:$0xff pattern:$0x73625140]  ;;  %v53_v17 = vpack.c.bf16 %v37_v13, %v37_v13 }
  0x1c   :  { %602 = vmatpush.bf16.msra.mxu2 %v1029_v28  ;;  %v50_v14 = vpack.c.bf16 %v34_v10, %v34_v10  ;;  %v1076_v26 = vld [vmem:[%s1336_s3] sm:$0xff] }
  0x1d   :  { %615 = vmatpush.bf16.msra.mxu3 %v1037_v29  ;;  %v1080_v28 = vld [vmem:[%s1335_s2] ss:$0 sm:$0xff]  ;;  %v10_v29 = vstv %s1337_s4 }
  0x1e   :  { %577 = vmatpush.bf16.msra.mxu0 %v1012_v30  ;;  %11 = vst [vmem:[#allocation2] sm:$0x1] %v10_v29 }
  0x1f   :  { %590 = vmatpush.bf16.msra.mxu1 %v1020_v31 }
  0x20   :  { %603 = vmatpush.bf16.msra.mxu2 %v1028_v32 }
  0x21   :  { %616 = vmatpush.bf16.msra.mxu3 %v1036_v33  ;;  %578 = vmatmul.bf16.vlgmr.msra.gmra.mxu0 %v46_v43 }
  0x22   :  { %622 = vmatpush.bf16.msrb.mxu0 %v1051_v34  ;;  %591 = vmatmul.bf16.vlgmr.msra.gmra.mxu1 %v47_v45 }
  0x23   :  { %635 = vmatpush.bf16.msrb.mxu1 %v1059_v35  ;;  %604 = vmatmul.bf16.vlgmr.msra.gmra.mxu2 %v48_v42 }
  0x24   :  { %648 = vmatpush.bf16.msrb.mxu2 %v1067_v40  ;;  %617 = vmatmul.bf16.vlgmr.msra.gmra.mxu3 %v49_v44 }
  0x25   :  { %661 = vmatpush.bf16.msrb.mxu3 %v1075_v41 }
  0x26   :  { %623 = vmatpush.bf16.msrb.mxu0 %v1050_v46 }
  0x27   :  { %636 = vmatpush.bf16.msrb.mxu1 %v1058_v47 }
  0x28   :  { %649 = vmatpush.bf16.msrb.mxu2 %v1066_v48 }
  0x29   :  { %662 = vmatpush.bf16.msrb.mxu3 %v1074_v49 }
  0x2a   :  { %624 = vmatpush.bf16.msrb.mxu0 %v1049_v50  ;;  %v1081_v50 = vld [vmem:[#allocation2] ss:$0 sm:$0xff] }
  0x2b   :  { %637 = vmatpush.bf16.msrb.mxu1 %v1057_v51 }
  0x2c   :  { %650 = vmatpush.bf16.msrb.mxu2 %v1065_v52 }
  0x2d   :  { %663 = vmatpush.bf16.msrb.mxu3 %v1073_v53 }
  0x2e   :  { %625 = vmatpush.bf16.msrb.mxu0 %v1048_v54 }
  0x2f   :  { %638 = vmatpush.bf16.msrb.mxu1 %v1056_v55 }
  0x30   :  { %651 = vmatpush.bf16.msrb.mxu2 %v1064_v56 }
  0x31   :  { %664 = vmatpush.bf16.msrb.mxu3 %v1072_v57 }
  0x32   :  { %626 = vmatpush.bf16.msrb.mxu0 %v1047_v58 }
  0x33   :  { %639 = vmatpush.bf16.msrb.mxu1 %v1055_v59 }
  0x34   :  { %652 = vmatpush.bf16.msrb.mxu2 %v1063_v60 }
  0x35   :  { %665 = vmatpush.bf16.msrb.mxu3 %v1071_v61 }
  0x36   :  { %627 = vmatpush.bf16.msrb.mxu0 %v1046_v62 }
  0x37   :  { %640 = vmatpush.bf16.msrb.mxu1 %v1054_v63 }
  0x38   :  { %653 = vmatpush.bf16.msrb.mxu2 %v1062_v0 }
  0x39   :  { %666 = vmatpush.bf16.msrb.mxu3 %v1070_v1 }
  0x3a   :  { %628 = vmatpush.bf16.msrb.mxu0 %v1045_v2 }
  0x3b   :  { %641 = vmatpush.bf16.msrb.mxu1 %v1053_v3 }
  0x3c   :  { %654 = vmatpush.bf16.msrb.mxu2 %v1061_v4 }
  0x3d   :  { %667 = vmatpush.bf16.msrb.mxu3 %v1069_v5 }
  0x3e   :  { %629 = vmatpush.bf16.msrb.mxu0 %v1044_v6 }
  0x3f   :  { %642 = vmatpush.bf16.msrb.mxu1 %v1052_v7 }
  0x40   :  { %655 = vmatpush.bf16.msrb.mxu2 %v1060_v8 }
  0x41   :  { %668 = vmatpush.bf16.msrb.mxu3 %v1068_v9  ;;  %630 = vmatmul.bf16.vlgmr.msrb.gmra.mxu0 %v50_v14 }
  0x42   :  { %643 = vmatmul.bf16.vlgmr.msrb.gmra.mxu1 %v51_v15  ;;  %720 = vmatpush.bf16.msra.mxu0 %v1079_v18 }
  0x43   :  { %656 = vmatmul.bf16.vlgmr.msrb.gmra.mxu2 %v52_v16 }
  0x44   :  { %669 = vmatmul.bf16.vlgmr.msrb.gmra.mxu3 %v53_v17 }
  0x46   :  { %721 = vmatpush.bf16.msra.mxu0 %v1078_v20 }
  0x4a   :  { %722 = vmatpush.bf16.msra.mxu0 %v1077_v22 }
  0x4e   :  { %723 = vmatpush.bf16.msra.mxu0 %v1076_v26 }
  0x9e   :  { %v579_v19 = vpop.f32.mrf.mxu0 }
  0x9f   :  { %v592_v21 = vpop.f32.mrf.mxu1  ;;  %v580_v32 = vadd.f32 %v1080_v28, %v579_v19 }
  0xa1   :  { %v593_v33 = vadd.f32 %v592_v21, %v580_v32 }
  0xa6   :  { %v605_v23 = vpop.f32.mrf.mxu2  ;;  %v581_v25 = vpop.f32.mrf.mxu0 }
  0xa7   :  { %v618_v24 = vpop.f32.mrf.mxu3  ;;  %v594_v27 = vpop.f32.mrf.mxu1  ;;  %v606_v34 = vadd.f32 %v605_v23, %v593_v33 }
  0xa9   :  { %v619_v35 = vadd.f32 %v618_v24, %v606_v34 }
  0xae   :  { %v607_v30 = vpop.f32.mrf.mxu2 }
  0xaf   :  { %v620_v31 = vpop.f32.mrf.mxu3 }
  0xbe   :  { %v631_v36 = vpop.f32.mrf.mxu0 }
  0xbf   :  { %v644_v37 = vpop.f32.mrf.mxu1  ;;  %v632_v38 = vadd.f32 %v631_v36, %v619_v35 }
  0xc1   :  { %v645_v39 = vadd.f32 %v644_v37, %v632_v38 }
  0xc6   :  { %v657_v40 = vpop.f32.mrf.mxu2  ;;  %v633_v43 = vpop.f32.mrf.mxu0 }
  0xc7   :  { %v670_v41 = vpop.f32.mrf.mxu3  ;;  %v658_v42 = vadd.f32 %v657_v40, %v645_v39  ;;  %v646_v44 = vpop.f32.mrf.mxu1 }
  0xc9   :  { %v671_v45 = vadd.f32 %v670_v41, %v658_v42 }
  0xcb   :  { %v674_v46 = vmax.f32 %v671_v45, 0.0 }
  0xcd   :  { %v675_v47 = vpack.c.bf16 %v674_v46, %v674_v46 }
  0xce   :  { %v659_v48 = vpop.f32.mrf.mxu2 }
  0xcf   :  { %v672_v49 = vpop.f32.mrf.mxu3  ;;  %1011 = vmatmul.msk.bf16.vlgmr.msra.gmra.mxu0 %vm712_vm0, %v675_v47 }
 0x14c   :  { %v725_v51 = vpop.f32.mrf.mxu0 }
 0x14d   :  { %v726_v52 = vadd.f32 %v1081_v50, %v725_v51 }
 0x14f   :  { %v729_v53 = vmul.f32 0.5, %v726_v52 }
 0x151   :  { %1082 = vtanh.f32 %v729_v53 }
 0x154   :  { %v727_v54 = vpop.f32.mrf.mxu0 }
 0x157   :  { %v1083_v55 = vpop.eup %1082 }
 0x158   :  { %v731_v56 = vadd.f32 1.0, %v1083_v55 }
 0x15a   :  { %v732_v57 = vmul.f32 0.5, %v731_v56 }
 0x15c   :  { %734 = vst.msk [vmem:[%s1338_s5] sm:$0x3] %vm733_vm1, %v732_v57 }

// kernel: resnet_forward.2
= control target key start
LH: loop header
LB: loop body
LE: loop exit
PB: predicated region body
PF: predicated region fallthrough
CT: control target
= control target key end

     0   :  { %vm36_vm0 = vcmask 1043456   ;;  %vm37_vm1 = vcmask 523268   ;;  %v10284_v3 = vmov 0   ;;  %vm306_vm3 = vcmask 519168   ;;  %s10285_s17 = smov 64   ;;  %s13068_s0 = inlined_call_operand.vmem [shape: bf16[2,8,8,64], index: 0, kind: input, shape index: {}]   ;;  %s13069_s1 = inlined_call_operand.vmem [shape: bf16[3,192,32], index: 1, kind: input, shape index: {}]   ;;  %s13070_s2 = inlined_call_operand.vmem [shape: f32[1,32], index: 2, kind: input, shape index: {}]   ;;  %s13071_s3 = inlined_call_operand.vmem [shape: f32[1,32], index: 3, kind: input, shape index: {}]   ;;  %s13072_s4 = inlined_call_operand.vmem [shape: bf16[3,2,3,96,32], index: 4, kind: input, shape index: {}]   ;;  %s13073_s5 = inlined_call_operand.vmem [shape: f32[3,2,1,32], index: 5, kind: input, shape index: {}]   ;;  %s13074_s6 = inlined_call_operand.vmem [shape: f32[3,2,1,32], index: 6, kind: input, shape index: {}]   ;;  %s13075_s7 = inlined_call_operand.vmem [shape: bf16[32,16], index: 7, kind: input, shape index: {}]   ;;  %s13076_s8 = inlined_call_operand.vmem [shape: f32[1,16], index: 8, kind: input, shape index: {}]   ;;  %s13077_s9 = inlined_call_operand.vmem [shape: f32[1,16], index: 9, kind: input, shape index: {}]   ;;  %s13078_s10 = inlined_call_operand.vmem [shape: f32[128,16], index: 10, kind: output, shape index: {}]  }
   0x1   :  { %vm10342_vm2 = vmor %vm37_vm1, %vm36_vm0  ;;  %v80_v1 = vld [vmem:[%s13068_s0] sm:$0xf]  ;;  %v10352_v2 = vld [vmem:[%s13069_s1 + $0xb8] sm:$0xff]  ;;  %vm437_vm4 = vsmask.f32 3328  ;;  %vm712_vm6 = vcmask 523264  }
   0x2   :  { %40 = vst.msk [vmem:[#allocation2 + $0x8] sm:$0xff] %vm10342_vm2, %v10284_v3  ;;  %112 = vrot.lane.b32.xlu0 %v80_v1, %s10285_s17  ;;  %v179_v4 = vshrl.u32 %v80_v1, 16  ;;  %v182_v5 = vshll.u32 %v80_v1, 16  ;;  %v82_v6 = vld [vmem:[%s13068_s0 + $0x8] sm:$0xf]  ;;  %10255 = vmatpush.bf16.msra.mxu3 %v10352_v2  ;;  %v10368_v7 = vld [vmem:[%s13069_s1 + $0xb0] sm:$0xff]  ;;  %vm10421_vm5 = vmand %vm306_vm3, %vm437_vm4 }
   0x3   :  { %39 = vst.msk [vmem:[#allocation2] sm:$0xff] %vm10342_vm2, %v10284_v3  ;;  %116 = vrot.lane.b32.xlu1 %v82_v6, %s10285_s17  ;;  %v193_v8 = vshrl.u32 %v82_v6, 16  ;;  %v196_v9 = vshll.u32 %v82_v6, 16  ;;  %v81_v10 = vld [vmem:[%s13068_s0 + $0x4] sm:$0xf]  ;;  %10254 = vmatpush.bf16.msra.mxu2 %v10352_v2  ;;  %v10390_v22 = vld [vmem:[%s13069_s1 + $0xa8] sm:$0xff] }
   0x4   :  { %v181_v11 = vrot.slane %v179_v4, 7  ;;  %v357_v12 = vrot.slane %v179_v4, 4  ;;  %v358_v13 = vrot.slane %v182_v5, 5  ;;  %41 = vst.msk [vmem:[#allocation2 + $0x10] sm:$0xff] %vm10342_vm2, %v10284_v3  ;;  %v186_v14 = vshrl.u32 %v81_v10, 16  ;;  %10253 = vmatpush.bf16.msra.mxu1 %v10352_v2  ;;  %v10440_v43 = vld [vmem:[%s13069_s1 + $0xa0] sm:$0xff] }
   0x5   :  { %42 = vst.msk [vmem:[#allocation2 + $0x18] sm:$0xff] %vm10342_vm2, %v10284_v3  ;;  %v195_v15 = vrot.slane %v193_v8, 7  ;;  %v365_v16 = vrot.slane %v193_v8, 4  ;;  %v189_v17 = vshll.u32 %v81_v10, 16  ;;  %v366_v20 = vrot.slane %v196_v9, 5  ;;  %v9937_v34 = vld [vmem:[%s13069_s1 + $0x30] sm:$0xff] }
   0x6   :  { %v10382_v18 = vor.u32 %v182_v5, %v181_v11  ;;  %v359_v19 = vor.u32 %v358_v13, %v357_v12  ;;  %43 = vst.msk [vmem:[#allocation2 + $0x20] sm:$0xff] %vm10342_vm2, %v10284_v3  ;;  %v188_v21 = vrot.slane %v186_v14, 7  ;;  %v83_v23 = vld [vmem:[%s13068_s0 + $0xc] sm:$0xf]  ;;  %10258 = vmatpush.bf16.msra.mxu3 %v10368_v7  ;;  %v361_v25 = vrot.slane %v186_v14, 4 }
   0x7   :  { %44 = vst.msk [vmem:[#allocation2 + $0x28] sm:$0xff] %vm10342_vm2, %v10284_v3  ;;  %v10399_v24 = vor.u32 %v196_v9, %v195_v15  ;;  %v362_v26 = vrot.slane %v189_v17, 5  ;;  %v200_v27 = vshrl.u32 %v83_v23, 16  ;;  %v10404_v28 = vld [vmem:[%s13068_s0 + $0x28] sm:$0xf]  ;;  %v203_v31 = vshll.u32 %v83_v23, 16  ;;  %10257 = vmatpush.bf16.msra.mxu2 %v10368_v7 }
   0x8   :  { %v360_v29 = vrot.slane %v359_v19, 4  ;;  %45 = vst.msk [vmem:[#allocation2 + $0x30] sm:$0xff] %vm10342_vm2, %v10284_v3  ;;  %v10409_v30 = vor.u32 %v189_v17, %v188_v21  ;;  %v10414_v32 = vld [vmem:[%s13068_s0 + $0x2c] sm:$0xf]  ;;  %v249_v33 = vshrl.u32 %v10404_v28, 16  ;;  %10256 = vmatpush.bf16.msra.mxu1 %v10368_v7  ;;  %v252_v40 = vshll.u32 %v10404_v28, 16 }
   0x9   :  { %v439_v35 = vld [vmem:[#allocation2 + $0xc] sm:$0xf]  ;;  %46 = vst.msk [vmem:[#allocation2 + $0x38] sm:$0xff] %vm10342_vm2, %v10284_v3  ;;  %v202_v36 = vrot.slane %v200_v27, 7  ;;  %v369_v37 = vrot.slane %v200_v27, 4  ;;  %v370_v39 = vrot.slane %v203_v31, 5  ;;  %v367_v42 = vor.u32 %v366_v20, %v365_v16 }
   0xa   :  { %v440_v38 = vsel %vm10421_vm5, %v360_v29, %v439_v35  ;;  %47 = vst.msk [vmem:[#allocation2 + $0x40] sm:$0xff] %vm10342_vm2, %v10284_v3  ;;  %114 = vrot.lane.b32.xlu0 %v81_v10, %s10285_s17  ;;  %v256_v41 = vshrl.u32 %v10414_v32, 16  ;;  %10261 = vmatpush.bf16.msra.mxu3 %v10390_v22  ;;  %v259_v45 = vshll.u32 %v10414_v32, 16  ;;  %v10449_v46 = vld [vmem:[%s13068_s0 + $0x30] sm:$0xf]  ;;  %v363_v47 = vor.u32 %v362_v26, %v361_v25 }
   0xb   :  { %441 = vst [vmem:[#allocation2 + $0xc] sm:$0xf] %v440_v38  ;;  %v10442_v44 = vor.u32 %v203_v31, %v202_v36  ;;  %118 = vrot.lane.b32.xlu1 %v83_v23, %s10285_s17  ;;  %v397_v48 = vrot.slane %v249_v33, 4  ;;  %v398_v49 = vrot.slane %v252_v40, 5  ;;  %10260 = vmatpush.bf16.msra.mxu2 %v10390_v22  ;;  %v371_v50 = vor.u32 %v370_v39, %v369_v37  ;;  %v10473_v53 = vld [vmem:[%s13068_s0 + $0x34] sm:$0xf] }
   0xc   :  { %48 = vst.msk [vmem:[#allocation2 + $0x48] sm:$0xff] %vm10342_vm2, %v10284_v3  ;;  %10259 = vmatpush.bf16.msra.mxu1 %v10390_v22  ;;  %v401_v51 = vrot.slane %v256_v41, 4  ;;  %v402_v52 = vrot.slane %v259_v45, 5  ;;  %v263_v54 = vshrl.u32 %v10449_v46, 16  ;;  %v266_v55 = vshll.u32 %v10449_v46, 16 }
   0xd   :  { %49 = vst.msk [vmem:[#allocation2 + $0x50] sm:$0xff] %vm10342_vm2, %v10284_v3  ;;  %v445_v56 = vld [vmem:[#allocation2 + $0x1c] sm:$0xf]  ;;  %v368_v57 = vrot.slane %v367_v42, 4  ;;  %v270_v58 = vshrl.u32 %v10473_v53, 16  ;;  %v273_v59 = vshll.u32 %v10473_v53, 16  ;;  %v399_v63 = vor.u32 %v398_v49, %v397_v48 }
   0xe   :  { %50 = vst.msk [vmem:[#allocation2 + $0x58] sm:$0xff] %vm10342_vm2, %v10284_v3  ;;  %10264 = vmatpush.bf16.msra.mxu3 %v10440_v43  ;;  %v364_v60 = vrot.slane %v363_v47, 4  ;;  %v442_v61 = vld [vmem:[#allocation2 + $0x14] sm:$0xf]  ;;  %v448_v62 = vld [vmem:[#allocation2 + $0x24] sm:$0xf]  ;;  %v403_v6 = vor.u32 %v402_v52, %v401_v51 }
   0xf   :  { %51 = vst.msk [vmem:[#allocation2 + $0x60] sm:$0xff] %vm10342_vm2, %v10284_v3  ;;  %v405_v1 = vrot.slane %v263_v54, 4  ;;  %v406_v4 = vrot.slane %v266_v55, 5  ;;  %10263 = vmatpush.bf16.msra.mxu2 %v10440_v43  ;;  %v372_v5 = vrot.slane %v371_v50, 4  ;;  %v409_v8 = vrot.slane %v270_v58, 4 }
  0x10   :  { %52 = vst.msk [vmem:[#allocation2 + $0x68] sm:$0xff] %vm10342_vm2, %v10284_v3  ;;  %10262 = vmatpush.bf16.msra.mxu1 %v10440_v43  ;;  %v410_v9 = vrot.slane %v273_v59, 5  ;;  %v10502_v10 = vld [vmem:[%s13068_s0 + $0x38] sm:$0xf]  ;;  %v10510_v12 = vld [vmem:[%s13068_s0 + $0x3c] sm:$0xf]  ;;  %v446_v17 = vsel %vm10421_vm5, %v368_v57, %v445_v56  ;;  %v443_v23 = vsel %vm10421_vm5, %v364_v60, %v442_v61 }
  0x11   :  { %53 = vst.msk [vmem:[#allocation2 + $0x70] sm:$0xff] %vm10342_vm2, %v10284_v3  ;;  %v407_v11 = vor.u32 %v406_v4, %v405_v1  ;;  %v277_v13 = vshrl.u32 %v10502_v10, 16  ;;  %v280_v14 = vshll.u32 %v10502_v10, 16  ;;  %v284_v16 = vshrl.u32 %v10510_v12, 16  ;;  %v86_v27 = vld [vmem:[%s13068_s0 + $0x18] sm:$0xf] }
  0x12   :  { %54 = vst.msk [vmem:[#allocation2 + $0x78] sm:$0xff] %vm10342_vm2, %v10284_v3  ;;  %v411_v15 = vor.u32 %v410_v9, %v409_v8  ;;  %v400_v19 = vrot.slane %v399_v63, 4  ;;  %v449_v25 = vsel %vm10421_vm5, %v372_v5, %v448_v62  ;;  %v404_v26 = vrot.slane %v403_v6, 4  ;;  %124 = vrot.lane.b32.xlu0 %v86_v27, %s10285_s17  ;;  %v84_v37 = vld [vmem:[%s13068_s0 + $0x10] sm:$0xf] }
  0x13   :  { %55 = vst.msk [vmem:[#allocation2 + $0x80] sm:$0xff] %vm10342_vm2, %v10284_v3  ;;  %v413_v20 = vrot.slane %v277_v13, 4  ;;  %v414_v21 = vrot.slane %v280_v14, 5  ;;  %v287_v29 = vshll.u32 %v10510_v12, 16  ;;  %v408_v31 = vrot.slane %v407_v11, 4  ;;  %120 = vrot.lane.b32.xlu2 %v84_v37, %s10285_s17 }
  0x14   :  { %56 = vst.msk [vmem:[#allocation2 + $0x88] sm:$0xff] %vm10342_vm2, %v10284_v3  ;;  %v221_v35 = vshrl.u32 %v86_v27, 16  ;;  %v224_v36 = vshll.u32 %v86_v27, 16  ;;  %v412_v42 = vrot.slane %v411_v15, 4  ;;  %v417_v47 = vrot.slane %v284_v16, 4 }
  0x15   :  { %57 = vst.msk [vmem:[#allocation2 + $0x90] sm:$0xff] %vm10342_vm2, %v10284_v3  ;;  %v415_v38 = vor.u32 %v414_v21, %v413_v20  ;;  %v207_v57 = vshrl.u32 %v84_v37, 16  ;;  %v210_v63 = vshll.u32 %v84_v37, 16  ;;  %v457_v11 = vld [vmem:[#allocation2 + $0x3c] sm:$0xf]  ;;  %vm161_vm7 = vcmask 1043968  }
  0x16   :  { %58 = vst.msk [vmem:[#allocation2 + $0x98] sm:$0xff] %vm10342_vm2, %v10284_v3  ;;  %v223_v49 = vrot.slane %v221_v35, 7  ;;  %v381_v50 = vrot.slane %v221_v35, 4  ;;  %v382_v56 = vrot.slane %v224_v36, 5  ;;  %v451_v27 = vld [vmem:[#allocation2 + $0x2c] sm:$0xf] }
  0x17   :  { %447 = vst [vmem:[#allocation2 + $0x1c] sm:$0xf] %v446_v17  ;;  %v469_v39 = vld [vmem:[#allocation2 + $0x6c] sm:$0xf]  ;;  %v416_v1 = vrot.slane %v415_v38, 4  ;;  %v209_v6 = vrot.slane %v207_v57, 7 }
  0x18   :  { %444 = vst [vmem:[#allocation2 + $0x14] sm:$0xf] %v443_v23  ;;  %v470_v0 = vsel %vm10421_vm5, %v400_v19, %v469_v39  ;;  %v472_v48 = vld [vmem:[#allocation2 + $0x74] sm:$0xf]  ;;  %v10554_v62 = vor.u32 %v224_v36, %v223_v49  ;;  %v383_v5 = vor.u32 %v382_v56, %v381_v50  ;;  %v373_v8 = vrot.slane %v207_v57, 4 }
  0x19   :  { %450 = vst [vmem:[#allocation2 + $0x24] sm:$0xf] %v449_v25  ;;  %v473_v51 = vsel %vm10421_vm5, %v404_v26, %v472_v48  ;;  %v475_v52 = vld [vmem:[#allocation2 + $0x7c] sm:$0xf]  ;;  %v374_v15 = vrot.slane %v210_v63, 5  ;;  %v418_v17 = vrot.slane %v287_v29, 5  ;;  %v10562_v21 = vor.u32 %v210_v63, %v209_v6 }
  0x1a   :  { %471 = vst [vmem:[#allocation2 + $0x6c] sm:$0xf] %v470_v0  ;;  %v476_v60 = vsel %vm10421_vm5, %v408_v31, %v475_v52  ;;  %v478_v61 = vld [vmem:[#allocation2 + $0x84] sm:$0xf]  ;;  %v384_v20 = vrot.slane %v383_v5, 4  ;;  %v9941_v49 = vld [vmem:[%s13069_s1 + $0x50] sm:$0xff] }
  0x1b   :  { %474 = vst [vmem:[#allocation2 + $0x74] sm:$0xf] %v473_v51  ;;  %v479_v4 = vsel %vm10421_vm5, %v412_v42, %v478_v61  ;;  %v481_v9 = vld [vmem:[#allocation2 + $0x8c] sm:$0xf]  ;;  %v375_v23 = vor.u32 %v374_v15, %v373_v8  ;;  %v419_v25 = vor.u32 %v418_v17, %v417_v47  ;;  %v9942_v47 = vld [vmem:[%s13069_s1 + $0x58] sm:$0xff]  ;;  %vm1481_vm10 = vcmask 261120  }
  0x1c   :  { %477 = vst [vmem:[#allocation2 + $0x7c] sm:$0xf] %v476_v60  ;;  %v482_v19 = vsel %vm10421_vm5, %v416_v1, %v481_v9  ;;  %v458_v26 = vsel %vm10421_vm5, %v384_v20, %v457_v11  ;;  %v484_v31 = vld [vmem:[#allocation2 + $0x94] sm:$0xf]  ;;  %1056 = vmatpush.bf16.msrb.mxu3 %v9942_v47  ;;  %v87_v52 = vld [vmem:[%s13068_s0 + $0x1c] sm:$0xf] }
  0x1d   :  { %480 = vst [vmem:[#allocation2 + $0x84] sm:$0xf] %v479_v4  ;;  %v376_v35 = vrot.slane %v375_v23, 4  ;;  %v420_v36 = vrot.slane %v419_v25, 4  ;;  %v85_v48 = vld [vmem:[%s13068_s0 + $0x14] sm:$0xf]  ;;  %126 = vrot.lane.b32.xlu1 %v87_v52, %s10285_s17 }
  0x1e   :  { %483 = vst [vmem:[#allocation2 + $0x8c] sm:$0xf] %v482_v19  ;;  %v214_v50 = vshrl.u32 %v85_v48, 16  ;;  %v217_v51 = vshll.u32 %v85_v48, 16  ;;  %122 = vrot.lane.b32.xlu2 %v85_v48, %s10285_s17  ;;  %v228_v56 = vshrl.u32 %v87_v52, 16  ;;  %v231_v57 = vshll.u32 %v87_v52, 16 }
  0x1f   :  { %459 = vst [vmem:[#allocation2 + $0x3c] sm:$0xf] %v458_v26  ;;  %v452_v39 = vsel %vm10421_vm5, %v376_v35, %v451_v27  ;;  %v485_v42 = vsel %vm10421_vm5, %v420_v36, %v484_v31  ;;  %v9940_v9 = vld [vmem:[%s13069_s1 + $0x48] sm:$0xff]  ;;  %v454_v11 = vld [vmem:[#allocation2 + $0x34] sm:$0xf]  ;;  %v9939_v31 = vld [vmem:[%s13069_s1 + $0x40] sm:$0xff] }
  0x20   :  { %453 = vst [vmem:[#allocation2 + $0x2c] sm:$0xf] %v452_v39  ;;  %v216_v60 = vrot.slane %v214_v50, 7  ;;  %v377_v61 = vrot.slane %v214_v50, 4  ;;  %v378_v63 = vrot.slane %v217_v51, 5  ;;  %v230_v1 = vrot.slane %v228_v56, 7  ;;  %1057 = vmatpush.bf16.msrb.mxu3 %v9941_v49 }
  0x21   :  { %v9953_v37 = vld [vmem:[#allocation2 + $0x6c] sm:$0xf]  ;;  %486 = vst [vmem:[#allocation2 + $0x94] sm:$0xf] %v485_v42  ;;  %v385_v4 = vrot.slane %v228_v56, 4  ;;  %v386_v5 = vrot.slane %v231_v57, 5 }
  0x22   :  { %v8193_v38 = vld [vmem:[#allocation2 + $0x70] sm:$0xf0]  ;;  %v10585_v6 = vor.u32 %v217_v51, %v216_v60  ;;  %v379_v8 = vor.u32 %v378_v63, %v377_v61  ;;  %v10590_v15 = vor.u32 %v231_v57, %v230_v1  ;;  %v460_v20 = vld [vmem:[#allocation2 + $0x44] sm:$0xf]  ;;  %v88_v61 = vld [vmem:[%s13068_s0 + $0x20] sm:$0xf] }
  0x23   :  { %v8196_v0 = vor.u32 %v9953_v37, %v8193_v38  ;;  %v387_v17 = vor.u32 %v386_v5, %v385_v4  ;;  %v9955_v25 = vld [vmem:[#allocation2 + $0x7c] sm:$0xf]  ;;  %v89_v37 = vld [vmem:[%s13068_s0 + $0x24] sm:$0xf]  ;;  %v235_v63 = vshrl.u32 %v88_v61, 16  ;;  %v238_v1 = vshll.u32 %v88_v61, 16 }
  0x24   :  { %v380_v19 = vrot.slane %v379_v8, 4  ;;  %v8201_v26 = vld [vmem:[#allocation2 + $0x80] sm:$0xf0]  ;;  %1058 = vmatpush.bf16.msrb.mxu3 %v9940_v9  ;;  %v242_v38 = vshrl.u32 %v89_v37, 16  ;;  %v245_v39 = vshll.u32 %v89_v37, 16  ;;  %130 = vrot.lane.b32.xlu0 %v89_v37, %s10285_s17  ;;  %vm59_vm11 = vcmask 781312  }
  0x25   :  { %8266 = vmatmul.msk.bf16.vlgmr.msra.gmra.mxu3 %vm712_vm6, %v8196_v0  ;;  %v388_v23 = vrot.slane %v387_v17, 4  ;;  %132 = vrot.lane.b32.xlu1 %v10404_v28, %s10285_s17  ;;  %v8204_v36 = vor.u32 %v9955_v25, %v8201_v26  ;;  %v466_v50 = vld [vmem:[#allocation2 + $0x64] sm:$0xf]  ;;  %v9957_v52 = vld [vmem:[#allocation2 + $0x8c] sm:$0xf]  ;;  %v237_v4 = vrot.slane %v235_v63, 7 }
  0x26   :  { %v455_v27 = vsel %vm10421_vm5, %v380_v19, %v454_v11  ;;  %v244_v42 = vrot.slane %v242_v38, 7  ;;  %v393_v0 = vrot.slane %v242_v38, 4  ;;  %v394_v47 = vrot.slane %v245_v39, 5  ;;  %128 = vrot.lane.b32.xlu2 %v88_v61, %s10285_s17  ;;  %v463_v17 = vld [vmem:[#allocation2 + $0x5c] sm:$0xf] }
  0x27   :  { %456 = vst [vmem:[#allocation2 + $0x34] sm:$0xf] %v455_v27  ;;  %v461_v35 = vsel %vm10421_vm5, %v388_v23, %v460_v20  ;;  %v389_v5 = vrot.slane %v235_v63, 4  ;;  %v390_v8 = vrot.slane %v238_v1, 5  ;;  %v10621_v9 = vor.u32 %v238_v1, %v237_v4  ;;  %v9915_v20 = vld [vmem:[#allocation2 + $0x4] sm:$0xf] }
  0x28   :  { %462 = vst [vmem:[#allocation2 + $0x44] sm:$0xf] %v461_v35  ;;  %1059 = vmatpush.bf16.msrb.mxu3 %v9939_v31  ;;  %v10608_v48 = vor.u32 %v245_v39, %v244_v42  ;;  %v395_v49 = vor.u32 %v394_v47, %v393_v0  ;;  %v8209_v56 = vld [vmem:[#allocation2 + $0x90] sm:$0xf0]  ;;  %v8273_v23 = vld [vmem:[#allocation2 + $0x8] sm:$0xf0] }
  0x29   :  { %v8212_v60 = vor.u32 %v9957_v52, %v8209_v56  ;;  %v391_v11 = vor.u32 %v390_v8, %v389_v5  ;;  %v8276_v26 = vor.u32 %v9915_v20, %v8273_v23  ;;  %v9949_v27 = vld [vmem:[#allocation2 + $0x3c] sm:$0xf]  ;;  %v8161_v38 = vld [vmem:[#allocation2 + $0x20] sm:$0xf0]  ;;  %v9936_v47 = vld [vmem:[%s13069_s1 + $0x28] sm:$0xff]  ;;  %vm1595_vm12 = vcmask 519424  }
  0x2a   :  { %v396_v51 = vrot.slane %v395_v49, 4  ;;  %v9938_v35 = vld [vmem:[%s13069_s1 + $0x38] sm:$0xff]  ;;  %v9917_v49 = vld [vmem:[#allocation2 + $0x14] sm:$0xf]  ;;  %v9935_v52 = vld [vmem:[%s13069_s1 + $0x20] sm:$0xff]  ;;  %vm1740_vm13 = vcmask 257024  }
  0x2b   :  { %v392_v19 = vrot.slane %v391_v11, 4  ;;  %v9945_v37 = vld [vmem:[#allocation2 + $0x1c] sm:$0xf]  ;;  %1003 = vmatpush.bf16.msrb.mxu2 %v9938_v35  ;;  %v9964_v63 = vld [vmem:[%s13069_s1 + $0x88] sm:$0xff]  ;;  %v9963_v8 = vld [vmem:[%s13069_s1 + $0x80] sm:$0xff]  ;;  %vm1902_vm15 = vcmask 781824  }
  0x2c   :  { %v467_v57 = vsel %vm10421_vm5, %v396_v51, %v466_v50  ;;  %136 = vrot.lane.b32.xlu0 %v10449_v46, %s10285_s17  ;;  %v8164_v39 = vor.u32 %v9945_v37, %v8161_v38  ;;  %v9966_v42 = vld [vmem:[%s13069_s1 + $0x98] sm:$0xff]  ;;  %v9965_v51 = vld [vmem:[%s13069_s1 + $0x90] sm:$0xff]  ;;  %v9992_v5 = vld [vmem:[%s13069_s1 + $0xe8] sm:$0xff]  ;;  %vm307_vm8 = vsmask.f32 7938  ;;  %vm2085_vm1 = vcmask 785408  }
  0x2d   :  { %138 = vrot.lane.b32.xlu1 %v10473_v53, %s10285_s17  ;;  %468 = vst [vmem:[#allocation2 + $0x64] sm:$0xf] %v467_v57  ;;  %v464_v25 = vsel %vm10421_vm5, %v392_v19, %v463_v17  ;;  %v9994_v0 = vld [vmem:[%s13069_s1 + $0xf8] sm:$0xff]  ;;  %737 = vmatpush.bf16.msra.mxu0 %v9966_v42  ;;  %v9993_v57 = vld [vmem:[%s13069_s1 + $0xf0] sm:$0xff]  ;;  %v9947_v11 = vld [vmem:[#allocation2 + $0x2c] sm:$0xf] }
  0x2e   :  { %134 = vrot.lane.b32.xlu2 %v10414_v32, %s10285_s17  ;;  %465 = vst [vmem:[#allocation2 + $0x5c] sm:$0xf] %v464_v25  ;;  %8262 = vmatmul.msk.bf16.vlgmr.msra.gmra.mxu1 %vm712_vm6, %v8164_v39  ;;  %v8281_v50 = vld [vmem:[#allocation2 + $0x18] sm:$0xf0]  ;;  %v8169_v17 = vld [vmem:[#allocation2 + $0x30] sm:$0xf0]  ;;  %vm10713_vm9 = vmand %vm306_vm3, %vm307_vm8 }
  0x2f   :  { %v8177_v31 = vld [vmem:[#allocation2 + $0x40] sm:$0xf0]  ;;  %1311 = vmatpush.bf16.msrb.mxu1 %v9994_v0  ;;  %1004 = vmatpush.bf16.msrb.mxu2 %v9937_v34  ;;  %v8284_v56 = vor.u32 %v9917_v49, %v8281_v50  ;;  %v9934_v4 = vld [vmem:[%s13069_s1 + $0x18] sm:$0xff]  ;;  %v9933_v19 = vld [vmem:[%s13069_s1 + $0x10] sm:$0xff]  ;;  %v8172_v23 = vor.u32 %v9947_v11, %v8169_v17  ;;  %63 = vst.msk [vmem:[#allocation3 + $0xc] sm:$0xf] %vm59_vm11, %v10284_v3 }
  0x30   :  { %v9991_v20 = vld [vmem:[%s13069_s1 + $0xe0] sm:$0xff]  ;;  %v9962_v25 = vld [vmem:[%s13069_s1 + $0x78] sm:$0xff]  ;;  %v8289_v35 = vld [vmem:[#allocation2 + $0x28] sm:$0xf0]  ;;  %60 = vst.msk [vmem:[#allocation3] sm:$0xf] %vm59_vm11, %v10284_v3 }
  0x31   :  { %738 = vmatpush.bf16.msra.mxu0 %v9965_v51  ;;  %v9931_v38 = vld [vmem:[%s13069_s1] sm:$0xff]  ;;  %v9989_v34 = vld [vmem:[%s13069_s1 + $0xd0] sm:$0xff]  ;;  %v9998_v0 = vld [vmem:[%s13069_s1 + $0x118] sm:$0xff]  ;;  %61 = vst.msk [vmem:[#allocation3 + $0x4] sm:$0xf] %vm59_vm11, %v10284_v3  ;;  %vm8104_vm2 = vcmask 130048  }
  0x32   :  { %v9988_v50 = vld [vmem:[%s13069_s1 + $0xc8] sm:$0xff]  ;;  %1364 = vmatpush.bf16.msra.mxu3 %v9998_v0  ;;  %v9959_v51 = vld [vmem:[%s13069_s1 + $0x60] sm:$0xff]  ;;  %62 = vst.msk [vmem:[#allocation3 + $0x8] sm:$0xf] %vm59_vm11, %v10284_v3  ;;  %vm11286_vm14 = vmand %vm1740_vm13, %vm307_vm8 }
  0x33   :  { %1005 = vmatpush.bf16.msrb.mxu2 %v9936_v47  ;;  %1312 = vmatpush.bf16.msrb.mxu1 %v9993_v57  ;;  %v9960_v47 = vld [vmem:[%s13069_s1 + $0x68] sm:$0xff]  ;;  %64 = vst.msk [vmem:[#allocation3 + $0x10] sm:$0xf] %vm59_vm11, %v10284_v3  ;;  %vm11325_vm0 = vmand %vm1902_vm15, %vm437_vm4 }
  0x34   :  { %142 = vrot.lane.b32.xlu0 %v10510_v12, %s10285_s17  ;;  %v8185_v61 = vld [vmem:[#allocation2 + $0x60] sm:$0xf0]  ;;  %65 = vst.msk [vmem:[#allocation3 + $0x14] sm:$0xf] %vm59_vm11, %v10284_v3 }
  0x35   :  { %8267 = vmatmul.msk.bf16.gmra.mxu3 %vm712_vm6, %v8204_v36  ;;  %v8180_v36 = vor.u32 %v9949_v27, %v8177_v31  ;;  %739 = vmatpush.bf16.msra.mxu0 %v9964_v63  ;;  %v9990_v27 = vld [vmem:[%s13069_s1 + $0xd8] sm:$0xff]  ;;  %v9919_v31 = vld [vmem:[#allocation2 + $0x24] sm:$0xf]  ;;  %v9921_v63 = vld [vmem:[#allocation2 + $0x34] sm:$0xf] }
  0x36   :  { %140 = vrot.lane.b32.xlu2 %v10502_v10, %s10285_s17  ;;  %v8292_v37 = vor.u32 %v9919_v31, %v8289_v35  ;;  %66 = vst.msk [vmem:[#allocation3 + $0x18] sm:$0xf] %vm59_vm11, %v10284_v3 }
  0x37   :  { %8264 = vmatmul.msk.bf16.vlgmr.msra.gmra.mxu2 %vm712_vm6, %v8180_v36  ;;  %1313 = vmatpush.bf16.msrb.mxu1 %v9992_v5  ;;  %v9961_v36 = vld [vmem:[%s13069_s1 + $0x70] sm:$0xff]  ;;  %v8297_v5 = vld [vmem:[#allocation2 + $0x38] sm:$0xf0]  ;;  %67 = vst.msk [vmem:[#allocation3 + $0x1c] sm:$0xf] %vm59_vm11, %v10284_v3 }
  0x38   :  { %1006 = vmatpush.bf16.msrb.mxu2 %v9935_v52  ;;  %v8300_v17 = vor.u32 %v9921_v63, %v8297_v5  ;;  %v8313_v63 = vld [vmem:[#allocation2 + $0x68] sm:$0xf0]  ;;  %v9975_v52 = vld [vmem:[#allocation2 + $0x34] sm:$0xf]  ;;  %68 = vst.msk [vmem:[#allocation3 + $0x20] sm:$0xf] %vm59_vm11, %v10284_v3 }
  0x39   :  { %740 = vmatpush.bf16.msra.mxu0 %v9963_v8  ;;  %69 = vst.msk [vmem:[#allocation3 + $0x24] sm:$0xf] %vm59_vm11, %v10284_v3 }
  0x3a   :  { %70 = vst.msk [vmem:[#allocation3 + $0x28] sm:$0xf] %vm59_vm11, %v10284_v3 }
  0x3b   :  { %1314 = vmatpush.bf16.msrb.mxu1 %v9991_v20  ;;  %71 = vst.msk [vmem:[#allocation3 + $0x2c] sm:$0xf] %vm59_vm11, %v10284_v3 }
  0x3c   :  { %1007 = vmatpush.bf16.msrb.mxu2 %v9934_v4  ;;  %72 = vst.msk [vmem:[#allocation3 + $0x30] sm:$0xf] %vm59_vm11, %v10284_v3 }
  0x3d   :  { %741 = vmatpush.bf16.msra.mxu0 %v9962_v25  ;;  %73 = vst.msk [vmem:[#allocation3 + $0x34] sm:$0xf] %vm59_vm11, %v10284_v3 }
  0x3e   :  { %8263 = vmatmul.msk.bf16.gmra.mxu1 %vm712_vm6, %v8172_v23  ;;  %74 = vst.msk [vmem:[#allocation3 + $0x38] sm:$0xf] %vm59_vm11, %v10284_v3 }
  0x3f   :  { %1315 = vmatpush.bf16.msrb.mxu1 %v9990_v27  ;;  %75 = vst.msk [vmem:[#allocation3 + $0x3c] sm:$0xf] %vm59_vm11, %v10284_v3 }
  0x40   :  { %1008 = vmatpush.bf16.msrb.mxu2 %v9933_v19  ;;  %v8271_v19 = vld [vmem:[#allocation2] sm:$0xf]  ;;  %76 = vst.msk [vmem:[#allocation3 + $0x40] sm:$0xf] %vm59_vm11, %v10284_v3 }
  0x41   :  { %742 = vmatpush.bf16.msra.mxu0 %v9961_v36  ;;  %77 = vst.msk [vmem:[#allocation3 + $0x44] sm:$0xf] %vm59_vm11, %v10284_v3 }
  0x42   :  { %78 = vst.msk [vmem:[#allocation3 + $0x48] sm:$0xf] %vm59_vm11, %v10284_v3 }
  0x43   :  { %1316 = vmatpush.bf16.msrb.mxu1 %v9989_v34  ;;  %79 = vst.msk [vmem:[#allocation3 + $0x4c] sm:$0xf] %vm59_vm11, %v10284_v3 }
  0x45   :  { %8268 = vmatmul.msk.bf16.gmra.mxu3 %vm712_vm6, %v8212_v60  ;;  %v9951_v60 = vld [vmem:[#allocation2 + $0x5c] sm:$0xf]  ;;  %743 = vmatpush.bf16.msra.mxu0 %v9960_v47  ;;  %v9997_v47 = vld [vmem:[%s13069_s1 + $0x110] sm:$0xff] }
  0x46   :  { %v8188_v1 = vor.u32 %v9951_v60, %v8185_v61  ;;  %1365 = vmatpush.bf16.msra.mxu3 %v9997_v47 }
  0x47   :  { %1317 = vmatpush.bf16.msrb.mxu1 %v9988_v50 }
  0x48   :  { %8265 = vmatmul.msk.bf16.gmra.mxu2 %vm712_vm6, %v8188_v1 }
  0x49   :  { %744 = vmatpush.bf16.msra.mxu0 %v9959_v51 }
  0x4d   :  { %790 = vmatpush.bf16.msrb.mxu0 %v10352_v2 }
  0x51   :  { %791 = vmatpush.bf16.msrb.mxu0 %v10368_v7 }
  0x55   :  { %8381 = vmatmul.msk.bf16.vlgmr.msrb.gmra.mxu3 %vm712_vm6, %v8276_v26  ;;  %v9932_v26 = vld [vmem:[%s13069_s1 + $0x8] sm:$0xff]  ;;  %792 = vmatpush.bf16.msrb.mxu0 %v10390_v22 }
  0x56   :  { %1009 = vmatpush.bf16.msrb.mxu2 %v9932_v26 }
  0x59   :  { %793 = vmatpush.bf16.msrb.mxu0 %v10440_v43 }
  0x5a   :  { %1010 = vmatpush.bf16.msrb.mxu2 %v9931_v38  ;;  %v8305_v38 = vld [vmem:[#allocation2 + $0x58] sm:$0xf0] }
  0x65   :  { %8382 = vmatmul.msk.bf16.gmra.mxu3 %vm712_vm6, %v8284_v56  ;;  %v9987_v56 = vld [vmem:[%s13069_s1 + $0xc0] sm:$0xff] }
  0x66   :  { %1318 = vmatpush.bf16.msrb.mxu1 %v9987_v56 }
  0x6d   :  { %v121_v49 = vpop.permute.xlu2 %120 }
  0x6e   :  { %166 = vst.msk [vmem:[#allocation2 + $0x28] sm:$0xf] %vm161_vm7, %v121_v49 }
  0x74   :  { %v113_v39 = vpop.permute.xlu0 %112 }
  0x75   :  { %8383 = vmatmul.msk.bf16.gmra.mxu3 %vm712_vm6, %v8292_v37  ;;  %162 = vst.msk [vmem:[#allocation2 + $0x8] sm:$0xf] %vm161_vm7, %v113_v39  ;;  %v117_v42 = vpop.permute.xlu1 %116  ;;  %v321_v11 = vld [vmem:[#allocation2 + $0x28] sm:$0xf]  ;;  %v9923_v37 = vld [vmem:[#allocation2 + $0x54] sm:$0xf] }
  0x76   :  { %164 = vst.msk [vmem:[#allocation2 + $0x18] sm:$0xf] %vm161_vm7, %v117_v42  ;;  %v322_v2 = vsel %vm10713_vm9, %v10562_v21, %v321_v11  ;;  %v8308_v43 = vor.u32 %v9923_v37, %v8305_v38  ;;  %v9995_v38 = vld [vmem:[%s13069_s1 + $0x100] sm:$0xff] }
  0x77   :  { %323 = vst [vmem:[#allocation2 + $0x28] sm:$0xf] %v322_v2 }
  0x7c   :  { %v309_v57 = vld [vmem:[#allocation2 + $0x8] sm:$0xf]  ;;  %v115_v60 = vpop.permute.xlu0 %114 }
  0x7d   :  { %v310_v61 = vsel %vm10713_vm9, %v10382_v18, %v309_v57  ;;  %v315_v1 = vld [vmem:[#allocation2 + $0x18] sm:$0xf]  ;;  %163 = vst.msk [vmem:[#allocation2 + $0x10] sm:$0xf] %vm161_vm7, %v115_v60  ;;  %v119_v4 = vpop.permute.xlu1 %118  ;;  %v123_v18 = vpop.permute.xlu2 %122 }
  0x7e   :  { %311 = vst [vmem:[#allocation2 + $0x8] sm:$0xf] %v310_v61  ;;  %v316_v8 = vsel %vm10713_vm9, %v10399_v24, %v315_v1  ;;  %v9974_v51 = vld [vmem:[#allocation2 + $0x24] sm:$0xf0]  ;;  %v9925_v61 = vld [vmem:[#allocation2 + $0x64] sm:$0xf] }
  0x7f   :  { %317 = vst [vmem:[#allocation2 + $0x18] sm:$0xf] %v316_v8  ;;  %v8316_v5 = vor.u32 %v9925_v61, %v8313_v63  ;;  %v9929_v63 = vld [vmem:[#allocation2 + $0x84] sm:$0xf] }
  0x80   :  { %165 = vst.msk [vmem:[#allocation2 + $0x20] sm:$0xf] %vm161_vm7, %v119_v4 }
  0x81   :  { %167 = vst.msk [vmem:[#allocation2 + $0x30] sm:$0xf] %vm161_vm7, %v123_v18  ;;  %v9920_v18 = vld [vmem:[#allocation2 + $0x24] sm:$0xf0] }
  0x84   :  { %v312_v20 = vld [vmem:[#allocation2 + $0x10] sm:$0xf]  ;;  %v125_v26 = vpop.permute.xlu0 %124 }
  0x85   :  { %8384 = vmatmul.msk.bf16.gmra.mxu3 %vm712_vm6, %v8300_v17  ;;  %v313_v24 = vsel %vm10713_vm9, %v10409_v30, %v312_v20  ;;  %v9916_v21 = vld [vmem:[#allocation2 + $0x4] sm:$0xf0]  ;;  %168 = vst.msk [vmem:[#allocation2 + $0x38] sm:$0xf] %vm161_vm7, %v125_v26  ;;  %v129_v4 = vpop.permute.xlu2 %128 }
  0x86   :  { %314 = vst [vmem:[#allocation2 + $0x10] sm:$0xf] %v313_v24  ;;  %v8272_v23 = vor.u32 %v9916_v21, %v8271_v19  ;;  %v9972_v30 = vld [vmem:[#allocation2 + $0x14] sm:$0xf0]  ;;  %v8151_v31 = vld [vmem:[#allocation2 + $0x8] sm:$0xf] }
  0x87   :  { %v318_v25 = vld [vmem:[#allocation2 + $0x20] sm:$0xf]  ;;  %v9918_v0 = vld [vmem:[#allocation2 + $0x14] sm:$0xf0]  ;;  %170 = vst.msk [vmem:[#allocation2 + $0x58] sm:$0xf] %vm161_vm7, %v129_v4 }
  0x88   :  { %v319_v7 = vsel %vm10713_vm9, %v10442_v44, %v318_v25  ;;  %1011 = vmatmul.bf16.vlgmr.msrb.gmra.mxu2 %v8272_v23  ;;  %v324_v22 = vld [vmem:[#allocation2 + $0x30] sm:$0xf]  ;;  %v8159_v57 = vld [vmem:[#allocation2 + $0x18] sm:$0xf]  ;;  %v9996_v23 = vld [vmem:[%s13069_s1 + $0x108] sm:$0xff] }
  0x89   :  { %320 = vst [vmem:[#allocation2 + $0x20] sm:$0xf] %v319_v7  ;;  %v325_v27 = vsel %vm10713_vm9, %v10585_v6, %v324_v22  ;;  %v251_v7 = vrot.slane %v249_v33, 7  ;;  %1366 = vmatpush.bf16.msra.mxu3 %v9996_v23  ;;  %v8167_v22 = vld [vmem:[#allocation2 + $0x28] sm:$0xf]  ;;  %v279_v23 = vrot.slane %v277_v13, 7 }
  0x8a   :  { %326 = vst [vmem:[#allocation2 + $0x30] sm:$0xf] %v325_v27 }
  0x8c   :  { %v327_v39 = vld [vmem:[#allocation2 + $0x38] sm:$0xf] }
  0x8d   :  { %v9944_v35 = vld [vmem:[#allocation2 + $0xc] sm:$0xf0]  ;;  %v328_v42 = vsel %vm10713_vm9, %v10554_v62, %v327_v39  ;;  %1367 = vmatpush.bf16.msra.mxu3 %v9995_v38 }
  0x8e   :  { %v8415_v36 = vld [vmem:[#allocation2 + $0x10] sm:$0xf]  ;;  %v8152_v44 = vor.u32 %v9944_v35, %v8151_v31  ;;  %329 = vst [vmem:[#allocation2 + $0x38] sm:$0xf] %v328_v42  ;;  %v333_v24 = vld [vmem:[#allocation2 + $0x58] sm:$0xf]  ;;  %v254_v31 = vor.u32 %v252_v40, %v251_v7 }
  0x8f   :  { %v8416_v34 = vor.u32 %v9972_v30, %v8415_v36  ;;  %v8279_v6 = vld [vmem:[#allocation2 + $0x10] sm:$0xf]  ;;  %v127_v56 = vpop.permute.xlu1 %126  ;;  %v9927_v35 = vld [vmem:[#allocation2 + $0x74] sm:$0xf]  ;;  %v8321_v36 = vld [vmem:[#allocation2 + $0x78] sm:$0xf0] }
  0x90   :  { %745 = vmatmul.bf16.vlgmr.msra.gmra.mxu0 %v8152_v44  ;;  %v8280_v49 = vor.u32 %v9918_v0, %v8279_v6  ;;  %v8423_v50 = vld [vmem:[#allocation2 + $0x20] sm:$0xf]  ;;  %169 = vst.msk [vmem:[#allocation2 + $0x40] sm:$0xf] %vm161_vm7, %v127_v56  ;;  %v8324_v44 = vor.u32 %v9927_v35, %v8321_v36  ;;  %v258_v56 = vrot.slane %v256_v41, 7 }
  0x91   :  { %1319 = vmatmul.bf16.vlgmr.msrb.gmra.mxu1 %v8416_v34  ;;  %v9946_v60 = vld [vmem:[#allocation2 + $0x1c] sm:$0xf0]  ;;  %v8424_v62 = vor.u32 %v9974_v51, %v8423_v50  ;;  %v8431_v20 = vld [vmem:[#allocation2 + $0x30] sm:$0xf]  ;;  %v135_v50 = vpop.permute.xlu2 %134  ;;  %v9978_v51 = vld [vmem:[#allocation2 + $0x44] sm:$0xf0] }
  0x92   :  { %v8160_v1 = vor.u32 %v9946_v60, %v8159_v57  ;;  %v8287_v2 = vld [vmem:[#allocation2 + $0x20] sm:$0xf]  ;;  %v9948_v27 = vld [vmem:[#allocation2 + $0x2c] sm:$0xf0]  ;;  %173 = vst.msk [vmem:[#allocation2 + $0x70] sm:$0xf] %vm161_vm7, %v135_v50  ;;  %v261_v61 = vor.u32 %v259_v45, %v258_v56 }
  0x93   :  { %v8288_v17 = vor.u32 %v9920_v18, %v8287_v2  ;;  %v8168_v37 = vor.u32 %v9948_v27, %v8167_v22  ;;  %v8295_v28 = vld [vmem:[#allocation2 + $0x30] sm:$0xf]  ;;  %v282_v22 = vor.u32 %v280_v14, %v279_v23  ;;  %v9971_v27 = vld [vmem:[#allocation2 + $0x14] sm:$0xf]  ;;  %v9986_v23 = vld [vmem:[#allocation2 + $0x94] sm:$0xf0] }
  0x95   :  { %8385 = vmatmul.msk.bf16.gmra.mxu3 %vm712_vm6, %v8308_v43  ;;  %v9976_v25 = vld [vmem:[#allocation2 + $0x34] sm:$0xf0] }
  0x96   :  { %v131_v26 = vpop.permute.xlu0 %130  ;;  %v8432_v30 = vor.u32 %v9976_v25, %v8431_v20  ;;  %v9922_v40 = vld [vmem:[#allocation2 + $0x34] sm:$0xf0] }
  0x97   :  { %v330_v8 = vld [vmem:[#allocation2 + $0x40] sm:$0xf]  ;;  %v133_v21 = vpop.permute.xlu1 %132  ;;  %171 = vst.msk [vmem:[#allocation2 + $0x60] sm:$0xf] %vm161_vm7, %v131_v26  ;;  %v8296_v42 = vor.u32 %v9922_v40, %v8295_v28  ;;  %v8175_v0 = vld [vmem:[#allocation2 + $0x38] sm:$0xf] }
  0x98   :  { %1016 = vmatmul.bf16.gmra.mxu2 %v8280_v49  ;;  %v331_v11 = vsel %vm10713_vm9, %v10590_v15, %v330_v8  ;;  %v334_v15 = vsel %vm10713_vm9, %v10621_v9, %v333_v24  ;;  %172 = vst.msk [vmem:[#allocation2 + $0x68] sm:$0xf] %vm161_vm7, %v133_v21  ;;  %v286_v40 = vrot.slane %v284_v16, 7 }
  0x99   :  { %332 = vst [vmem:[#allocation2 + $0x40] sm:$0xf] %v331_v11  ;;  %v342_v41 = vld [vmem:[#allocation2 + $0x70] sm:$0xf]  ;;  %v141_v24 = vpop.permute.xlu2 %140 }
  0x9a   :  { %335 = vst [vmem:[#allocation2 + $0x58] sm:$0xf] %v334_v15  ;;  %v8303_v11 = vld [vmem:[#allocation2 + $0x50] sm:$0xf]  ;;  %v343_v2 = vsel %vm10713_vm9, %v261_v61, %v342_v41  ;;  %v272_v15 = vrot.slane %v270_v58, 7 }
  0x9b   :  { %344 = vst [vmem:[#allocation2 + $0x70] sm:$0xf] %v343_v2 }
  0x9c   :  { %176 = vst.msk [vmem:[#allocation2 + $0x88] sm:$0xf] %vm161_vm7, %v141_v24 }
  0x9e   :  { %v336_v43 = vld [vmem:[#allocation2 + $0x60] sm:$0xf]  ;;  %v137_v57 = vpop.permute.xlu0 %136 }
  0x9f   :  { %v339_v33 = vld [vmem:[#allocation2 + $0x68] sm:$0xf]  ;;  %v337_v39 = vsel %vm10713_vm9, %v10608_v48, %v336_v43  ;;  %v265_v48 = vrot.slane %v263_v54, 7  ;;  %174 = vst.msk [vmem:[#allocation2 + $0x78] sm:$0xf] %vm161_vm7, %v137_v57  ;;  %v139_v25 = vpop.permute.xlu1 %138 }
  0xa0   :  { %750 = vmatmul.bf16.gmra.mxu0 %v8160_v1  ;;  %v340_v34 = vsel %vm10713_vm9, %v254_v31, %v339_v33  ;;  %338 = vst [vmem:[#allocation2 + $0x60] sm:$0xf] %v337_v39  ;;  %v9950_v47 = vld [vmem:[#allocation2 + $0x3c] sm:$0xf0]  ;;  %v8329_v1 = vld [vmem:[#allocation2 + $0x88] sm:$0xf0]  ;;  %v275_v31 = vor.u32 %v273_v59, %v272_v15 }
  0xa1   :  { %1324 = vmatmul.bf16.gmra.mxu1 %v8424_v62  ;;  %341 = vst [vmem:[#allocation2 + $0x68] sm:$0xf] %v340_v34  ;;  %v8439_v49 = vld [vmem:[#allocation2 + $0x40] sm:$0xf]  ;;  %v8176_v60 = vor.u32 %v9950_v47, %v8175_v0  ;;  %v268_v4 = vor.u32 %v266_v55, %v265_v48  ;;  %v8332_v8 = vor.u32 %v9929_v63, %v8329_v1  ;;  %v9924_v54 = vld [vmem:[#allocation2 + $0x54] sm:$0xf0] }
  0xa2   :  { %v8440_v62 = vor.u32 %v9978_v51, %v8439_v49  ;;  %v8304_v45 = vor.u32 %v9924_v54, %v8303_v11  ;;  %v8183_v55 = vld [vmem:[#allocation2 + $0x58] sm:$0xf]  ;;  %175 = vst.msk [vmem:[#allocation2 + $0x80] sm:$0xf] %vm161_vm7, %v139_v25  ;;  %v8455_v34 = vld [vmem:[#allocation2 + $0x70] sm:$0xf]  ;;  %v289_v0 = vor.u32 %v287_v29, %v286_v40 }
  0xa3   :  { %v351_v13 = vld [vmem:[#allocation2 + $0x88] sm:$0xf]  ;;  %v9973_v47 = vld [vmem:[#allocation2 + $0x24] sm:$0xf]  ;;  %v8425_v49 = vld [vmem:[#allocation2 + $0x28] sm:$0xf0] }
  0xa4   :  { %v352_v58 = vsel %vm10713_vm9, %v282_v22, %v351_v13  ;;  %v8428_v56 = vor.u32 %v9973_v47, %v8425_v49  ;;  %v8319_v16 = vld [vmem:[#allocation2 + $0x70] sm:$0xf]  ;;  %v8433_v11 = vld [vmem:[#allocation2 + $0x38] sm:$0xf0]  ;;  %v9943_v13 = vld [vmem:[#allocation2 + $0xc] sm:$0xf] }
  0xa5   :  { %8386 = vmatmul.msk.bf16.gmra.mxu3 %vm712_vm6, %v8316_v5  ;;  %353 = vst [vmem:[#allocation2 + $0x88] sm:$0xf] %v352_v58  ;;  %v8436_v2 = vor.u32 %v9975_v52, %v8433_v11  ;;  %v8457_v47 = vld [vmem:[#allocation2 + $0x78] sm:$0xf0] }
  0xa6   :  { %v345_v18 = vld [vmem:[#allocation2 + $0x78] sm:$0xf]  ;;  %v143_v43 = vpop.permute.xlu0 %142 }
  0xa7   :  { %v346_v32 = vsel %vm10713_vm9, %v268_v4, %v345_v18  ;;  %v8447_v20 = vld [vmem:[#allocation2 + $0x60] sm:$0xf]  ;;  %177 = vst.msk [vmem:[#allocation2 + $0x90] sm:$0xf] %vm161_vm7, %v143_v43 }
  0xa8   :  { %v10760_v19 = vpop.f32.mrf.mxu3  ;;  %1021 = vmatmul.bf16.gmra.mxu2 %v8288_v17  ;;  %347 = vst [vmem:[#allocation2 + $0x78] sm:$0xf] %v346_v32  ;;  %v9952_v17 = vld [vmem:[#allocation2 + $0x5c] sm:$0xf0]  ;;  %v9980_v21 = vld [vmem:[#allocation2 + $0x64] sm:$0xf0] }
  0xa9   :  { %v8184_v7 = vor.u32 %v9952_v17, %v8183_v55  ;;  %v8448_v26 = vor.u32 %v9980_v21, %v8447_v20  ;;  %v8311_v14 = vld [vmem:[#allocation2 + $0x60] sm:$0xf]  ;;  %v9926_v33 = vld [vmem:[#allocation2 + $0x64] sm:$0xf0] }
  0xaa   :  { %v8312_v53 = vor.u32 %v9926_v33, %v8311_v14  ;;  %v8191_v38 = vld [vmem:[#allocation2 + $0x68] sm:$0xf]  ;;  %v9979_v14 = vld [vmem:[#allocation2 + $0x64] sm:$0xf]  ;;  %v8449_v33 = vld [vmem:[#allocation2 + $0x68] sm:$0xf0] }
  0xac   :  { %v9984_v1 = vld [vmem:[#allocation2 + $0x84] sm:$0xf0] }
  0xad   :  { %v9930_v32 = vld [vmem:[#allocation2 + $0x84] sm:$0xf0] }
  0xae   :  { %v354_v51 = vld [vmem:[#allocation2 + $0x90] sm:$0xf]  ;;  %v8207_v20 = vld [vmem:[#allocation2 + $0x88] sm:$0xf] }
  0xaf   :  { %v9982_v28 = vld [vmem:[#allocation2 + $0x74] sm:$0xf0]  ;;  %v355_v57 = vsel %vm10713_vm9, %v289_v0, %v354_v51  ;;  %v9981_v0 = vld [vmem:[#allocation2 + $0x74] sm:$0xf] }
  0xb0   :  { %v10774_v9 = vpop.f32.mrf.mxu3  ;;  %755 = vmatmul.bf16.gmra.mxu0 %v8168_v37  ;;  %v348_v37 = vld [vmem:[#allocation2 + $0x80] sm:$0xf]  ;;  %356 = vst [vmem:[#allocation2 + $0x90] sm:$0xf] %v355_v57  ;;  %v9928_v48 = vld [vmem:[#allocation2 + $0x74] sm:$0xf0]  ;;  %v8460_v57 = vor.u32 %v9981_v0, %v8457_v47 }
  0xb1   :  { %1329 = vmatmul.bf16.gmra.mxu1 %v8432_v30  ;;  %v8417_v30 = vld [vmem:[#allocation2 + $0x18] sm:$0xf0]  ;;  %v349_v10 = vsel %vm10713_vm9, %v275_v31, %v348_v37  ;;  %v8320_v12 = vor.u32 %v9928_v48, %v8319_v16 }
  0xb2   :  { %v8420_v36 = vor.u32 %v9971_v27, %v8417_v30  ;;  %350 = vst [vmem:[#allocation2 + $0x80] sm:$0xf] %v349_v10 }
  0xb5   :  { %8387 = vmatmul.msk.bf16.gmra.mxu3 %vm712_vm6, %v8324_v44  ;;  %v9954_v44 = vld [vmem:[#allocation2 + $0x6c] sm:$0xf0] }
  0xb6   :  { %v8192_v39 = vor.u32 %v9954_v44, %v8191_v38  ;;  %v8452_v38 = vor.u32 %v9979_v14, %v8449_v33  ;;  %v800_v44 = vpop.f32.mrf.mxu1 }
  0xb7   :  { %v9958_v24 = vld [vmem:[#allocation2 + $0x8c] sm:$0xf0] }
  0xb8   :  { %v10785_v6 = vpop.f32.mrf.mxu3  ;;  %1026 = vmatmul.bf16.gmra.mxu2 %v8296_v42  ;;  %v8456_v42 = vor.u32 %v9982_v28, %v8455_v34  ;;  %v8471_v21 = vld [vmem:[#allocation2 + $0x90] sm:$0xf]  ;;  %v8208_v25 = vor.u32 %v9958_v24, %v8207_v20 }
  0xb9   :  { %v9956_v61 = vld [vmem:[#allocation2 + $0x7c] sm:$0xf0]  ;;  %v8472_v15 = vor.u32 %v9986_v23, %v8471_v21 }
  0xba   :  { %v8463_v63 = vld [vmem:[#allocation2 + $0x80] sm:$0xf] }
  0xbb   :  { %v8464_v41 = vor.u32 %v9984_v1, %v8463_v63  ;;  %v8327_v18 = vld [vmem:[#allocation2 + $0x80] sm:$0xf] }
  0xc0   :  { %v10797_v5 = vpop.f32.mrf.mxu3  ;;  %760 = vmatmul.bf16.gmra.mxu0 %v8176_v60  ;;  %v10834_v60 = vpop.f32.mrf.mxu2 }
  0xc1   :  { %1334 = vmatmul.bf16.gmra.mxu1 %v8440_v62  ;;  %v8199_v62 = vld [vmem:[#allocation2 + $0x78] sm:$0xf] }
  0xc2   :  { %v8200_v4 = vor.u32 %v9956_v61, %v8199_v62 }
  0xc5   :  { %8388 = vmatmul.msk.bf16.gmra.mxu3 %vm712_vm6, %v8332_v8 }
  0xc8   :  { %v10804_v46 = vpop.f32.mrf.mxu3  ;;  %1031 = vmatmul.bf16.gmra.mxu2 %v8304_v45  ;;  %v10837_v8 = vpop.f32.mrf.mxu2  ;;  %v8328_v45 = vor.u32 %v9930_v32, %v8327_v18 }
  0xd0   :  { %v10816_v35 = vpop.f32.mrf.mxu3  ;;  %765 = vmatmul.bf16.gmra.mxu0 %v8184_v7  ;;  %v10842_v55 = vpop.f32.mrf.mxu2  ;;  %v9977_v7 = vld [vmem:[#allocation2 + $0x44] sm:$0xf] }
  0xd1   :  { %1339 = vmatmul.bf16.gmra.mxu1 %v8448_v26  ;;  %v8441_v26 = vld [vmem:[#allocation2 + $0x48] sm:$0xf0] }
  0xd2   :  { %v8444_v27 = vor.u32 %v9977_v7, %v8441_v26  ;;  %v8473_v7 = vld [vmem:[#allocation2 + $0x98] sm:$0xf0] }
  0xd5   :  { %8525 = vmatmul.msk.bf16.vlgmr.msra.gmra.mxu3 %vm712_vm6, %v8420_v36  ;;  %v8153_v36 = vld [vmem:[#allocation2 + $0x10] sm:$0xf0] }
  0xd6   :  { %v8156_v37 = vor.u32 %v9943_v13, %v8153_v36 }
  0xd8   :  { %v10823_v59 = vpop.f32.mrf.mxu3  ;;  %1036 = vmatmul.bf16.gmra.mxu2 %v8312_v53  ;;  %v10846_v30 = vpop.f32.mrf.mxu2 }
  0xe0   :  { %v10830_v50 = vpop.f32.mrf.mxu3  ;;  %770 = vmatmul.bf16.gmra.mxu0 %v8192_v39  ;;  %v10861_v39 = vpop.f32.mrf.mxu1 }
  0xe1   :  { %1344 = vmatmul.bf16.gmra.mxu1 %v8456_v42 }
  0xe5   :  { %8526 = vmatmul.msk.bf16.gmra.mxu3 %vm712_vm6, %v8428_v56 }
  0xe8   :  { %v1066_v29 = vpop.f32.mrf.mxu3  ;;  %1041 = vmatmul.bf16.gmra.mxu2 %v8320_v12  ;;  %v805_v62 = vpop.f32.mrf.mxu1 }
  0xf0   :  { %v10839_v54 = vpop.f32.mrf.mxu3  ;;  %775 = vmatmul.bf16.gmra.mxu0 %v8200_v4  ;;  %v9983_v4 = vld [vmem:[#allocation2 + $0x84] sm:$0xf]  ;;  %v10866_v11 = vpop.f32.mrf.mxu1 }
  0xf1   :  { %1349 = vmatmul.bf16.gmra.mxu1 %v8464_v41  ;;  %v8465_v41 = vld [vmem:[#allocation2 + $0x88] sm:$0xf0] }
  0xf2   :  { %v8468_v32 = vor.u32 %v9983_v4, %v8465_v41 }
  0xf5   :  { %8527 = vmatmul.msk.bf16.gmra.mxu3 %vm712_vm6, %v8436_v2 }
  0xf8   :  { %v1071_v17 = vpop.f32.mrf.mxu3  ;;  %1046 = vmatmul.bf16.gmra.mxu2 %v8328_v45 }
 0x100   :  { %v10844_v22 = vpop.f32.mrf.mxu3  ;;  %780 = vmatmul.bf16.gmra.mxu0 %v8208_v25 }
 0x101   :  { %1354 = vmatmul.bf16.gmra.mxu1 %v8472_v15  ;;  %v9985_v15 = vld [vmem:[#allocation2 + $0x94] sm:$0xf] }
 0x105   :  { %8528 = vmatmul.msk.bf16.gmra.mxu3 %vm712_vm6, %v8444_v27 }
 0x108   :  { %v1076_v31 = vpop.f32.mrf.mxu3 }
 0x10b   :  { %v10849_v58 = vpop.f32.mrf.mxu2 }
 0x10d   :  { %v10851_v10 = vpop.f32.mrf.mxu0 }
 0x10e   :  { %v10877_v21 = vpop.f32.mrf.mxu1 }
 0x110   :  { %v10853_v53 = vpop.f32.mrf.mxu3  ;;  %8261 = vmatmul.msk.bf16.vlgmr.msrb.gmra.mxu0 %vm712_vm6, %v8156_v37 }
 0x113   :  { %v10856_v34 = vpop.f32.mrf.mxu2 }
 0x115   :  { %8529 = vmatmul.msk.bf16.gmra.mxu3 %vm712_vm6, %v8452_v38  ;;  %v10859_v43 = vpop.f32.mrf.mxu0 }
 0x116   :  { %v10886_v14 = vpop.f32.mrf.mxu1 }
 0x118   :  { %v1081_v28 = vpop.f32.mrf.mxu3 }
 0x11b   :  { %v1017_v40 = vpop.f32.mrf.mxu2 }
 0x11d   :  { %v751_v42 = vpop.f32.mrf.mxu0 }
 0x11e   :  { %v801_v49 = vadd.f32 %v800_v44, %v751_v42  ;;  %v1325_v42 = vpop.f32.mrf.mxu1 }
 0x120   :  { %v10863_v51 = vpop.f32.mrf.mxu3  ;;  %v1018_v56 = vadd.f32 %v1017_v40, %v801_v49 }
 0x122   :  { %v1067_v16 = vadd.f32 %v1066_v29, %v1018_v56 }
 0x123   :  { %v1019_v48 = vpop.f32.mrf.mxu2 }
 0x125   :  { %8530 = vmatmul.msk.bf16.gmra.mxu3 %vm712_vm6, %v8460_v57  ;;  %v753_v12 = vpop.f32.mrf.mxu0 }
 0x126   :  { %v1327_v57 = vpop.f32.mrf.mxu1 }
 0x128   :  { %v1086_v61 = vpop.f32.mrf.mxu3 }
 0x12b   :  { %v1022_v63 = vpop.f32.mrf.mxu2 }
 0x12d   :  { %v756_v1 = vpop.f32.mrf.mxu0 }
 0x12e   :  { %v806_v52 = vadd.f32 %v805_v62, %v756_v1 }
 0x130   :  { %v10868_v2 = vpop.f32.mrf.mxu3  ;;  %v1023_v18 = vadd.f32 %v1022_v63, %v806_v52 }
 0x132   :  { %v10870_v45 = vadd.f32 %v1071_v17, %v1023_v18  ;;  %v8476_v17 = vor.u32 %v9985_v15, %v8473_v7  ;;  %v10917_v7 = vld [vmem:[%s13070_s2] ss:$0 sm:$0xff]  ;;  %s10286_s2 = smov 32  }
 0x133   :  { %v10872_v29 = vpop.f32.mrf.mxu2 }
 0x135   :  { %8531 = vmatmul.msk.bf16.gmra.mxu3 %vm712_vm6, %v8468_v32  ;;  %v10875_v20 = vpop.f32.mrf.mxu0 }
 0x138   :  { %v1091_v24 = vpop.f32.mrf.mxu3 }
 0x13b   :  { %v1027_v23 = vpop.f32.mrf.mxu2 }
 0x13d   :  { %v761_v25 = vpop.f32.mrf.mxu0 }
 0x13e   :  { %v811_v26 = vadd.f32 %v10834_v60, %v761_v25  ;;  %v803_v25 = vadd.f32 %v10861_v39, %v753_v12 }
 0x140   :  { %v10880_v27 = vpop.f32.mrf.mxu3  ;;  %v1028_v13 = vadd.f32 %v1027_v23, %v811_v26  ;;  %v10922_v26 = vld [vmem:[%s13071_s3] ss:$0 sm:$0xff] }
 0x142   :  { %v10882_v36 = vadd.f32 %v1076_v31, %v1028_v13 }
 0x143   :  { %v10884_v37 = vpop.f32.mrf.mxu2 }
 0x145   :  { %8532 = vmatmul.msk.bf16.gmra.mxu3 %vm712_vm6, %v8476_v17  ;;  %v10889_v33 = vpop.f32.mrf.mxu0  ;;  %v1020_v17 = vadd.f32 %v1019_v48, %v803_v25 }
 0x148   :  { %v10891_v38 = vpop.f32.mrf.mxu3 }
 0x14b   :  { %v1032_v44 = vpop.f32.mrf.mxu2 }
 0x14d   :  { %v766_v40 = vpop.f32.mrf.mxu0 }
 0x14e   :  { %v816_v60 = vadd.f32 %v10842_v55, %v766_v40  ;;  %v1330_v55 = vpop.f32.mrf.mxu1 }
 0x150   :  { %v10894_v0 = vpop.f32.mrf.mxu3  ;;  %v1033_v47 = vadd.f32 %v1032_v44, %v816_v60 }
 0x152   :  { %v10896_v31 = vadd.f32 %v1081_v28, %v1033_v47 }
 0x153   :  { %v10898_v49 = vpop.f32.mrf.mxu2 }
 0x155   :  { %v10900_v56 = vpop.f32.mrf.mxu0 }
 0x156   :  { %v1332_v13 = vpop.f32.mrf.mxu1 }
 0x158   :  { %v10902_v62 = vpop.f32.mrf.mxu3 }
 0x15b   :  { %v1037_v63 = vpop.f32.mrf.mxu2 }
 0x15d   :  { %v771_v1 = vpop.f32.mrf.mxu0 }
 0x15e   :  { %v821_v4 = vadd.f32 %v10760_v19, %v771_v1 }
 0x160   :  { %v10905_v41 = vpop.f32.mrf.mxu3  ;;  %v1038_v52 = vadd.f32 %v1037_v63, %v821_v4 }
 0x162   :  { %v10907_v18 = vadd.f32 %v1086_v61, %v1038_v52 }
 0x163   :  { %v10909_v32 = vpop.f32.mrf.mxu2 }
 0x165   :  { %v10911_v28 = vpop.f32.mrf.mxu0 }
 0x168   :  { %v1374_v23 = vpop.f32.mrf.mxu3 }
 0x169   :  { %v1375_v15 = vadd.f32 %v1374_v23, %v1325_v42 }
 0x16b   :  { %v1411_v19 = vadd.f32 %v1375_v15, %v1067_v16  ;;  %v1042_v61 = vpop.f32.mrf.mxu2  ;;  %v1069_v16 = vadd.f32 %v10839_v54, %v1020_v17 }
 0x16d   :  { %v1431_v44 = vmul.f32 %v10917_v7, %v1411_v19  ;;  %v776_v40 = vpop.f32.mrf.mxu0  ;;  %v808_v19 = vadd.f32 %v10866_v11, %v10875_v20 }
 0x16e   :  { %v826_v39 = vadd.f32 %v10785_v6, %v776_v40  ;;  %v1335_v6 = vpop.f32.mrf.mxu1 }
 0x16f   :  { %v1451_v12 = vadd.f32 %v10922_v26, %v1431_v44  ;;  %v1025_v44 = vadd.f32 %v10872_v29, %v808_v19 }
 0x170   :  { %v1376_v42 = vpop.f32.mrf.mxu3  ;;  %v1043_v60 = vadd.f32 %v1042_v61, %v826_v39 }
 0x171   :  { %v1467_v47 = vmax.f32 %v1451_v12, 0.0  ;;  %v1377_v63 = vadd.f32 %v1376_v42, %v1327_v57 }
 0x172   :  { %v10928_v1 = vadd.f32 %v1091_v24, %v1043_v60 }
 0x173   :  { %1484 = vst.msk [vmem:[#allocation4 + $0x10] sm:$0xff] %vm1481_vm10, %v1467_v47  ;;  %v1412_v4 = vadd.f32 %v1377_v63, %v1069_v16  ;;  %v10932_v52 = vpop.f32.mrf.mxu2  ;;  %v1074_v47 = vadd.f32 %v10844_v22, %v1025_v44 }
 0x175   :  { %v1432_v48 = vmul.f32 %v10917_v7, %v1412_v4  ;;  %v10934_v23 = vpop.f32.mrf.mxu0 }
 0x176   :  { %v1337_v12 = vpop.f32.mrf.mxu1 }
 0x177   :  { %v1452_v25 = vadd.f32 %v10922_v26, %v1432_v48 }
 0x178   :  { %v1379_v15 = vpop.f32.mrf.mxu3 }
 0x179   :  { %v1468_v54 = vmax.f32 %v1452_v25, 0.0  ;;  %v1380_v57 = vadd.f32 %v1379_v15, %v1330_v55 }
 0x17a   :  { %v1500_v24 = vld [vmem:[#allocation4 + $0x10] sm:$0xff] }
 0x17b   :  { %1485 = vst.msk [vmem:[#allocation4 + $0x18] sm:$0xff] %vm1481_vm10, %v1468_v54  ;;  %v1413_v61 = vadd.f32 %v1380_v57, %v10870_v45  ;;  %v10941_v17 = vpack.c.bf16 %v1500_v24, %v1500_v24  ;;  %v1047_v55 = vpop.f32.mrf.mxu2  ;;  %v813_v54 = vadd.f32 %v10837_v8, %v10889_v33 }
 0x17d   :  { %v1433_v40 = vmul.f32 %v10917_v7, %v1413_v61  ;;  %1550 = vrot.lane.b32.xlu0 %v10941_v17, %s10286_s2  ;;  %v781_v39 = vpop.f32.mrf.mxu0 }
 0x17e   :  { %v831_v11 = vadd.f32 %v10804_v46, %v781_v39  ;;  %v1340_v44 = vpop.f32.mrf.mxu1 }
 0x17f   :  { %v1453_v20 = vadd.f32 %v10922_v26, %v1433_v40 }
 0x180   :  { %v1381_v42 = vpop.f32.mrf.mxu3  ;;  %v1048_v60 = vadd.f32 %v1047_v55, %v831_v11 }
 0x181   :  { %v1469_v45 = vmax.f32 %v1453_v20, 0.0  ;;  %v1382_v16 = vadd.f32 %v1381_v42, %v1332_v13  ;;  %v1030_v20 = vadd.f32 %v10884_v37, %v813_v54 }
 0x182   :  { %v1501_v29 = vld [vmem:[#allocation4 + $0x18] sm:$0xff]  ;;  %v10951_v63 = vadd.f32 %v10891_v38, %v1048_v60 }
 0x183   :  { %1486 = vst.msk [vmem:[#allocation4 + $0x20] sm:$0xff] %vm1481_vm10, %v1469_v45  ;;  %v1414_v4 = vadd.f32 %v1382_v16, %v1074_v47  ;;  %v10954_v48 = vpack.c.bf16 %v1501_v29, %v1501_v29  ;;  %v1079_v37 = vadd.f32 %v10853_v53, %v1030_v20 }
 0x185   :  { %v1434_v46 = vmul.f32 %v10917_v7, %v1414_v4  ;;  %v10957_v25 = vpop.f32.mrf.mxu0  ;;  %v1634_v15 = vshrl.u32 %v10954_v48, 16  ;;  %v1637_v13 = vshll.u32 %v10954_v48, 16 }
 0x187   :  { %v1454_v19 = vadd.f32 %v10922_v26, %v1434_v46  ;;  %v1636_v22 = vrot.slane %v1634_v15, 7 }
 0x188   :  { %v1384_v38 = vpop.f32.mrf.mxu3 }
 0x189   :  { %v1470_v57 = vmax.f32 %v1454_v19, 0.0  ;;  %v1385_v24 = vadd.f32 %v1384_v38, %v1335_v6  ;;  %v10968_v61 = vor.u32 %v1637_v13, %v1636_v22 }
 0x18a   :  { %v1502_v40 = vld [vmem:[#allocation4 + $0x20] sm:$0xff] }
 0x18b   :  { %1487 = vst.msk [vmem:[#allocation4 + $0x28] sm:$0xff] %vm1481_vm10, %v1470_v57  ;;  %v1415_v39 = vadd.f32 %v1385_v24, %v10882_v36  ;;  %v10972_v11 = vpack.c.bf16 %v1502_v40, %v1502_v40 }
 0x18d   :  { %v1435_v55 = vmul.f32 %v10917_v7, %v1415_v39  ;;  %v795_v42 = vpop.f32.mrf.mxu0  ;;  %v1641_v8 = vshrl.u32 %v10972_v11, 16  ;;  %v1644_v45 = vshll.u32 %v10972_v11, 16 }
 0x18e   :  { %v796_v33 = vadd.f32 %v795_v42, %v10851_v10  ;;  %v1370_v10 = vadd.f32 %v10902_v62, %v10877_v21  ;;  %v818_v42 = vadd.f32 %v10846_v30, %v10900_v56 }
 0x18f   :  { %v1455_v6 = vadd.f32 %v10922_v26, %v1435_v55  ;;  %v1643_v60 = vrot.slane %v1641_v8, 7 }
 0x190   :  { %v1386_v47 = vpop.f32.mrf.mxu3  ;;  %v1013_v36 = vadd.f32 %v10849_v58, %v796_v33  ;;  %v1342_v58 = vpop.f32.mrf.mxu1  ;;  %v1035_v56 = vadd.f32 %v10898_v49, %v818_v42 }
 0x191   :  { %v1471_v16 = vmax.f32 %v1455_v6, 0.0  ;;  %v1387_v29 = vadd.f32 %v1386_v47, %v1337_v12  ;;  %v10986_v4 = vor.u32 %v1644_v45, %v1643_v60  ;;  %v1372_v60 = vadd.f32 %v10905_v41, %v10886_v14 }
 0x192   :  { %v1062_v46 = vadd.f32 %v10823_v59, %v1013_v36  ;;  %v1503_v19 = vld [vmem:[#allocation4 + $0x28] sm:$0xff]  ;;  %v1084_v49 = vadd.f32 %v10863_v51, %v1035_v56 }
 0x193   :  { %1488 = vst.msk [vmem:[#allocation4 + $0x30] sm:$0xff] %vm1481_vm10, %v1471_v16  ;;  %v1416_v22 = vadd.f32 %v1387_v29, %v1079_v37  ;;  %v10992_v38 = vpack.c.bf16 %v1503_v19, %v1503_v19 }
 0x194   :  { %v1409_v54 = vadd.f32 %v1370_v10, %v1062_v46 }
 0x195   :  { %v1436_v53 = vmul.f32 %v10917_v7, %v1416_v22  ;;  %v797_v12 = vpop.f32.mrf.mxu0  ;;  %v1648_v57 = vshrl.u32 %v10992_v38, 16  ;;  %v1651_v62 = vshll.u32 %v10992_v38, 16 }
 0x196   :  { %v1429_v24 = vmul.f32 %v10917_v7, %v1409_v54  ;;  %v798_v40 = vadd.f32 %v797_v12, %v10859_v43 }
 0x197   :  { %v1456_v21 = vadd.f32 %v10922_v26, %v1436_v53  ;;  %v1650_v59 = vrot.slane %v1648_v57, 7 }
 0x198   :  { %v1389_v39 = vpop.f32.mrf.mxu3  ;;  %v1449_v20 = vadd.f32 %v10922_v26, %v1429_v24  ;;  %v1015_v55 = vadd.f32 %v10856_v34, %v798_v40  ;;  %v1345_v14 = vpop.f32.mrf.mxu1 }
 0x199   :  { %v1472_v33 = vmax.f32 %v1456_v21, 0.0  ;;  %v1390_v6 = vadd.f32 %v1389_v39, %v1340_v44  ;;  %v11008_v43 = vor.u32 %v1651_v62, %v1650_v59 }
 0x19a   :  { %v1465_v47 = vmax.f32 %v1449_v20, 0.0  ;;  %v1064_v36 = vadd.f32 %v10830_v50, %v1015_v55  ;;  %v1504_v16 = vld [vmem:[#allocation4 + $0x30] sm:$0xff] }
 0x19b   :  { %1489 = vst.msk [vmem:[#allocation4 + $0x38] sm:$0xff] %vm1481_vm10, %v1472_v33  ;;  %v1417_v34 = vadd.f32 %v1390_v6, %v10896_v31  ;;  %v11015_v37 = vpack.c.bf16 %v1504_v16, %v1504_v16 }
 0x19c   :  { %1482 = vst.msk [vmem:[#allocation4] sm:$0xff] %vm1481_vm10, %v1465_v47  ;;  %v1410_v30 = vadd.f32 %v1372_v60, %v1064_v36 }
 0x19d   :  { %v1437_v44 = vmul.f32 %v10917_v7, %v1417_v34  ;;  %v1655_v29 = vshrl.u32 %v11015_v37, 16  ;;  %v1658_v31 = vshll.u32 %v11015_v37, 16 }
 0x19e   :  { %v1430_v41 = vmul.f32 %v10917_v7, %v1410_v30  ;;  %v823_v30 = vadd.f32 %v10774_v9, %v10911_v28 }
 0x19f   :  { %v1457_v50 = vadd.f32 %v10922_v26, %v1437_v44  ;;  %v1657_v10 = vrot.slane %v1655_v29, 7 }
 0x1a0   :  { %v1391_v46 = vpop.f32.mrf.mxu3  ;;  %v1450_v19 = vadd.f32 %v10922_v26, %v1430_v41  ;;  %v1347_v60 = vpop.f32.mrf.mxu1 }
 0x1a1   :  { %v1473_v22 = vmax.f32 %v1457_v50, 0.0  ;;  %v1392_v54 = vadd.f32 %v1391_v46, %v1342_v58  ;;  %v11030_v53 = vor.u32 %v1658_v31, %v1657_v10 }
 0x1a2   :  { %v1466_v12 = vmax.f32 %v1450_v19, 0.0  ;;  %v1505_v24 = vld [vmem:[#allocation4 + $0x38] sm:$0xff] }
 0x1a3   :  { %1490 = vst.msk [vmem:[#allocation4 + $0x40] sm:$0xff] %vm1481_vm10, %v1473_v22  ;;  %v1418_v40 = vadd.f32 %v1392_v54, %v1084_v49  ;;  %v1498_v21 = vld [vmem:[#allocation4] sm:$0xff]  ;;  %v11033_v59 = vpack.c.bf16 %v1505_v24, %v1505_v24  ;;  %v10012_v49 = vld [vmem:[%s13072_s4 + $0x28] sm:$0xff]  ;;  %v1040_v54 = vadd.f32 %v10909_v32, %v823_v30 }
 0x1a4   :  { %1483 = vst.msk [vmem:[#allocation4 + $0x8] sm:$0xff] %vm1481_vm10, %v1466_v12  ;;  %v1514_v39 = vpack.c.bf16 %v1498_v21, %v1498_v21  ;;  %2261 = vmatpush.bf16.msra.mxu2 %v10012_v49 }
 0x1a5   :  { %v1438_v20 = vmul.f32 %v10917_v7, %v1418_v40  ;;  %v1662_v51 = vshrl.u32 %v11033_v59, 16  ;;  %v1665_v6 = vshll.u32 %v11033_v59, 16 }
 0x1a6   :  { %1546 = vrot.lane.b32.xlu1 %v1514_v39, %s10286_s2  ;;  %v1613_v58 = vshrl.u32 %v1514_v39, 16  ;;  %v1616_v55 = vshll.u32 %v1514_v39, 16  ;;  %v1627_v39 = vshrl.u32 %v10941_v17, 16 }
 0x1a7   :  { %v1458_v42 = vadd.f32 %v10922_v26, %v1438_v20  ;;  %v1664_v33 = vrot.slane %v1662_v51, 7 }
 0x1a8   :  { %v1394_v47 = vpop.f32.mrf.mxu3  ;;  %v1790_v36 = vrot.slane %v1613_v58, 4  ;;  %v1791_v16 = vrot.slane %v1616_v55, 5  ;;  %v1615_v34 = vrot.slane %v1613_v58, 7 }
 0x1a9   :  { %v1474_v56 = vmax.f32 %v1458_v42, 0.0  ;;  %v1395_v44 = vadd.f32 %v1394_v47, %v1345_v14  ;;  %v11047_v41 = vor.u32 %v1665_v6, %v1664_v33  ;;  %v1630_v47 = vshll.u32 %v10941_v17, 16  ;;  %v10036_v17 = vld [vmem:[%s13072_s4 + $0x68] sm:$0xff] }
 0x1aa   :  { %v1792_v50 = vor.u32 %v1791_v16, %v1790_v36  ;;  %v11049_v10 = vor.u32 %v1616_v55, %v1615_v34  ;;  %v1506_v46 = vld [vmem:[#allocation4 + $0x40] sm:$0xff]  ;;  %v1089_v16 = vadd.f32 %v10868_v2, %v1040_v54  ;;  %v1802_v54 = vrot.slane %v1634_v15, 4 }
 0x1ab   :  { %1491 = vst.msk [vmem:[#allocation4 + $0x48] sm:$0xff] %vm1481_vm10, %v1474_v56  ;;  %v1419_v19 = vadd.f32 %v1395_v44, %v10907_v18  ;;  %v1499_v22 = vld [vmem:[#allocation4 + $0x8] sm:$0xff]  ;;  %v11056_v9 = vpack.c.bf16 %v1506_v46, %v1506_v46  ;;  %v1350_v56 = vpop.f32.mrf.mxu1 }
 0x1ac   :  { %v1515_v28 = vpack.c.bf16 %v1499_v22, %v1499_v22  ;;  %v1793_v14 = vrot.slane %v1792_v50, 4  ;;  %v10040_v22 = vld [vmem:[%s13072_s4 + $0x88] sm:$0xff] }
 0x1ad   :  { %v1439_v12 = vmul.f32 %v10917_v7, %v1419_v19  ;;  %v1669_v24 = vshrl.u32 %v11056_v9, 16  ;;  %v1672_v32 = vshll.u32 %v11056_v9, 16  ;;  %2440 = vmatpush.bf16.msra.mxu1 %v10040_v22 }
 0x1ae   :  { %1548 = vrot.lane.b32.xlu2 %v1515_v28, %s10286_s2  ;;  %1854 = vrot.lane.b32.xlu1 %v1793_v14, %s10285_s17  ;;  %v1620_v18 = vshrl.u32 %v1515_v28, 16  ;;  %v1623_v40 = vshll.u32 %v1515_v28, 16  ;;  %v1799_v28 = vrot.slane %v1630_v47, 5 }
 0x1af   :  { %v1459_v21 = vadd.f32 %v10922_v26, %v1439_v12  ;;  %v1671_v20 = vrot.slane %v1669_v24, 7  ;;  %v1803_v12 = vrot.slane %v1637_v13, 5  ;;  %v828_v13 = vadd.f32 %v10797_v5, %v10934_v23  ;;  %v10011_v23 = vld [vmem:[%s13072_s4 + $0x20] sm:$0xff] }
 0x1b0   :  { %v1396_v58 = vpop.f32.mrf.mxu3  ;;  %v1794_v55 = vrot.slane %v1620_v18, 4  ;;  %v1795_v42 = vrot.slane %v1623_v40, 5  ;;  %v1622_v33 = vrot.slane %v1620_v18, 7  ;;  %2262 = vmatpush.bf16.msra.mxu2 %v10011_v23 }
 0x1b1   :  { %v1475_v36 = vmax.f32 %v1459_v21, 0.0  ;;  %v1397_v34 = vadd.f32 %v1396_v58, %v1347_v60  ;;  %v11072_v30 = vor.u32 %v1672_v32, %v1671_v20  ;;  %v1798_v60 = vrot.slane %v1627_v39, 4 }
 0x1b2   :  { %v1796_v44 = vor.u32 %v1795_v42, %v1794_v55  ;;  %v11074_v50 = vor.u32 %v1623_v40, %v1622_v33  ;;  %v1507_v46 = vld [vmem:[#allocation4 + $0x48] sm:$0xff] }
 0x1b3   :  { %1492 = vst.msk [vmem:[#allocation4 + $0x50] sm:$0xff] %vm1481_vm10, %v1475_v36  ;;  %v1420_v19 = vadd.f32 %v1397_v34, %v1089_v16  ;;  %v11080_v49 = vpack.c.bf16 %v1507_v46, %v1507_v46  ;;  %v1800_v58 = vor.u32 %v1799_v28, %v1798_v60  ;;  %v1806_v36 = vrot.slane %v1641_v8, 4  ;;  %v1352_v46 = vpop.f32.mrf.mxu1 }
 0x1b4   :  { %v1797_v2 = vrot.slane %v1796_v44, 4  ;;  %v1807_v16 = vrot.slane %v1644_v45, 5 }
 0x1b5   :  { %v1440_v14 = vmul.f32 %v10917_v7, %v1420_v19  ;;  %v1676_v18 = vshrl.u32 %v11080_v49, 16  ;;  %v1679_v15 = vshll.u32 %v11080_v49, 16  ;;  %v1801_v8 = vrot.slane %v1800_v58, 4 }
 0x1b6   :  { %1552 = vrot.lane.b32.xlu2 %v10954_v48, %s10286_s2  ;;  %1856 = vrot.lane.b32.xlu0 %v1797_v2, %s10285_s17  ;;  %v1804_v48 = vor.u32 %v1803_v12, %v1802_v54  ;;  %v1808_v22 = vor.u32 %v1807_v16, %v1806_v36 }
 0x1b7   :  { %v1460_v40 = vadd.f32 %v10922_v26, %v1440_v14  ;;  %1554 = vrot.lane.b32.xlu1 %v10972_v11, %s10286_s2  ;;  %v1678_v21 = vrot.slane %v1676_v18, 7  ;;  %v1045_v11 = vadd.f32 %v10932_v52, %v828_v13 }
 0x1b8   :  { %v1399_v20 = vpop.f32.mrf.mxu3  ;;  %v1805_v19 = vrot.slane %v1804_v48, 4  ;;  %v1815_v48 = vrot.slane %v1658_v31, 5 }
 0x1b9   :  { %v1476_v55 = vmax.f32 %v1460_v40, 0.0  ;;  %v1400_v42 = vadd.f32 %v1399_v20, %v1350_v56  ;;  %v11105_v33 = vor.u32 %v1679_v15, %v1678_v21  ;;  %v10039_v56 = vld [vmem:[%s13072_s4 + $0x80] sm:$0xff]  ;;  %v1094_v54 = vadd.f32 %v10880_v27, %v1045_v11 }
 0x1ba   :  { %v1508_v34 = vld [vmem:[#allocation4 + $0x50] sm:$0xff]  ;;  %2441 = vmatpush.bf16.msra.mxu1 %v10039_v56  ;;  %v1809_v20 = vrot.slane %v1808_v22, 4  ;;  %v1810_v27 = vrot.slane %v1648_v57, 4  ;;  %v1818_v22 = vrot.slane %v1662_v51, 4 }
 0x1bb   :  { %1493 = vst.msk [vmem:[#allocation4 + $0x58] sm:$0xff] %vm1481_vm10, %v1476_v55  ;;  %v1421_v5 = vadd.f32 %v1400_v42, %v10928_v1  ;;  %v11119_v44 = vpack.c.bf16 %v1508_v34, %v1508_v34  ;;  %v1811_v55 = vrot.slane %v1651_v62, 5  ;;  %v1814_v42 = vrot.slane %v1655_v29, 4  ;;  %v1355_v57 = vpop.f32.mrf.mxu1 }
 0x1bd   :  { %v1441_v45 = vmul.f32 %v10917_v7, %v1421_v5  ;;  %v1683_v1 = vshrl.u32 %v11119_v44, 16  ;;  %v1686_v60 = vshll.u32 %v11119_v44, 16  ;;  %v1816_v34 = vor.u32 %v1815_v48, %v1814_v42 }
 0x1be   :  { %1858 = vrot.lane.b32.xlu2 %v1801_v8, %s10285_s17  ;;  %1556 = vrot.lane.b32.xlu0 %v10992_v38, %s10286_s2  ;;  %v833_v5 = vadd.f32 %v10816_v35, %v10957_v25  ;;  %v1049_v35 = vpop.f32.mrf.mxu2 }
 0x1bf   :  { %v1461_v2 = vadd.f32 %v10922_v26, %v1441_v45  ;;  %1860 = vrot.lane.b32.xlu1 %v1805_v19, %s10285_s17  ;;  %v1685_v52 = vrot.slane %v1683_v1, 7  ;;  %v1817_v19 = vrot.slane %v1816_v34, 4  ;;  %v1830_v3 = vrot.slane %v1683_v1, 4 }
 0x1c0   :  { %v1401_v28 = vpop.f32.mrf.mxu3 }
 0x1c1   :  { %v1477_v14 = vmax.f32 %v1461_v2, 0.0  ;;  %v1402_v12 = vadd.f32 %v1401_v28, %v1352_v46  ;;  %v11139_v40 = vor.u32 %v1686_v60, %v1685_v52  ;;  %v1819_v2 = vrot.slane %v1665_v6, 5 }
 0x1c2   :  { %v1509_v21 = vld [vmem:[#allocation4 + $0x58] sm:$0xff]  ;;  %v1050_v52 = vadd.f32 %v1049_v35, %v833_v5 }
 0x1c3   :  { %1494 = vst.msk [vmem:[#allocation4 + $0x60] sm:$0xff] %vm1481_vm10, %v1477_v14  ;;  %v1422_v13 = vadd.f32 %v1402_v12, %v1094_v54  ;;  %v11144_v58 = vpack.c.bf16 %v1509_v21, %v1509_v21  ;;  %v1357_v14 = vpop.f32.mrf.mxu1  ;;  %v1820_v12 = vor.u32 %v1819_v2, %v1818_v22  ;;  %v10009_v22 = vld [vmem:[%s13072_s4 + $0x10] sm:$0xff] }
 0x1c5   :  { %v1442_v36 = vmul.f32 %v10917_v7, %v1422_v13  ;;  %v1690_v16 = vshrl.u32 %v11144_v58, 16  ;;  %v1693_v29 = vshll.u32 %v11144_v58, 16  ;;  %v1099_v13 = vadd.f32 %v10894_v0, %v1050_v52 }
 0x1c6   :  { %1558 = vrot.lane.b32.xlu2 %v11015_v37, %s10286_s2  ;;  %1862 = vrot.lane.b32.xlu0 %v1809_v20, %s10285_s17  ;;  %v1812_v37 = vor.u32 %v1811_v55, %v1810_v27  ;;  %v1823_v0 = vrot.slane %v1672_v32, 5 }
 0x1c7   :  { %v1462_v38 = vadd.f32 %v10922_v26, %v1442_v36  ;;  %1560 = vrot.lane.b32.xlu1 %v11033_v59, %s10286_s2  ;;  %v1692_v62 = vrot.slane %v1690_v16, 7  ;;  %v1821_v36 = vrot.slane %v1820_v12, 4 }
 0x1c8   :  { %v1404_v31 = vpop.f32.mrf.mxu3  ;;  %v1813_v25 = vrot.slane %v1812_v37, 4 }
 0x1c9   :  { %v1478_v23 = vmax.f32 %v1462_v38, 0.0  ;;  %v1405_v56 = vadd.f32 %v1404_v31, %v1355_v57  ;;  %v11181_v46 = vor.u32 %v1693_v29, %v1692_v62  ;;  %v1822_v57 = vrot.slane %v1669_v24, 4 }
 0x1ca   :  { %v1510_v8 = vld [vmem:[#allocation4 + $0x60] sm:$0xff]  ;;  %v1826_v62 = vrot.slane %v1676_v18, 4  ;;  %v1827_v31 = vrot.slane %v1679_v15, 5 }
 0x1cb   :  { %1495 = vst.msk [vmem:[#allocation4 + $0x68] sm:$0xff] %vm1481_vm10, %v1478_v23  ;;  %v1423_v11 = vadd.f32 %v1405_v56, %v10951_v63  ;;  %v11187_v45 = vpack.c.bf16 %v1510_v8, %v1510_v8  ;;  %v1824_v32 = vor.u32 %v1823_v0, %v1822_v57  ;;  %v1629_v0 = vrot.slane %v1627_v39, 7 }
 0x1cc   :  { %v1828_v15 = vor.u32 %v1827_v31, %v1826_v62 }
 0x1cd   :  { %v1443_v28 = vmul.f32 %v10917_v7, %v1423_v11  ;;  %v1697_v63 = vshrl.u32 %v11187_v45, 16  ;;  %v1700_v6 = vshll.u32 %v11187_v45, 16  ;;  %v1825_v23 = vrot.slane %v1824_v32, 4 }
 0x1ce   :  { %1864 = vrot.lane.b32.xlu2 %v1813_v25, %s10285_s17  ;;  %1866 = vrot.lane.b32.xlu0 %v1817_v19, %s10285_s17  ;;  %v1829_v56 = vrot.slane %v1828_v15, 4  ;;  %v10010_v25 = vld [vmem:[%s13072_s4 + $0x18] sm:$0xff] }
 0x1cf   :  { %v1463_v59 = vadd.f32 %v10922_v26, %v1443_v28  ;;  %1562 = vrot.lane.b32.xlu1 %v11056_v9, %s10286_s2  ;;  %v1699_v51 = vrot.slane %v1697_v63, 7  ;;  %2263 = vmatpush.bf16.msra.mxu2 %v10010_v25  ;;  %v1834_v28 = vrot.slane %v1690_v16, 4 }
 0x1d0   :  { %v1406_v54 = vpop.f32.mrf.mxu3 }
 0x1d1   :  { %v1479_v21 = vmax.f32 %v1463_v59, 0.0  ;;  %v1407_v20 = vadd.f32 %v1406_v54, %v1357_v14  ;;  %v11216_v27 = vor.u32 %v1700_v6, %v1699_v51  ;;  %v1835_v59 = vrot.slane %v1693_v29, 5  ;;  %v10037_v51 = vld [vmem:[%s13072_s4 + $0x70] sm:$0xff] }
 0x1d2   :  { %v1511_v55 = vld [vmem:[#allocation4 + $0x68] sm:$0xff]  ;;  %v1838_v14 = vrot.slane %v1697_v63, 4  ;;  %v1839_v54 = vrot.slane %v1700_v6, 5 }
 0x1d3   :  { %1496 = vst.msk [vmem:[#allocation4 + $0x70] sm:$0xff] %vm1481_vm10, %v1479_v21  ;;  %v1424_v42 = vadd.f32 %v1407_v20, %v1099_v13  ;;  %v1527_v48 = vpack.c.bf16 %v1511_v55, %v1511_v55  ;;  %2264 = vmatpush.bf16.msra.mxu2 %v10009_v22  ;;  %v1836_v29 = vor.u32 %v1835_v59, %v1834_v28 }
 0x1d4   :  { %v1840_v21 = vor.u32 %v1839_v54, %v1838_v14  ;;  %v10021_v14 = vld [vmem:[%s13072_s4 + $0x30] sm:$0xff] }
 0x1d5   :  { %v1444_v38 = vmul.f32 %v10917_v7, %v1424_v42  ;;  %v1704_v37 = vshrl.u32 %v1527_v48, 16  ;;  %v1707_v24 = vshll.u32 %v1527_v48, 16  ;;  %v1837_v20 = vrot.slane %v1836_v29, 4 }
 0x1d6   :  { %1564 = vrot.lane.b32.xlu2 %v11080_v49, %s10286_s2  ;;  %1868 = vrot.lane.b32.xlu0 %v1821_v36, %s10285_s17  ;;  %v1841_v6 = vrot.slane %v1840_v21, 4 }
 0x1d7   :  { %v1464_v7 = vadd.f32 %v10922_v26, %v1444_v38  ;;  %1566 = vrot.lane.b32.xlu1 %v11119_v44, %s10286_s2  ;;  %v1706_v9 = vrot.slane %v1704_v37, 7  ;;  %v1831_v26 = vrot.slane %v1686_v60, 5  ;;  %v10038_v44 = vld [vmem:[%s13072_s4 + $0x78] sm:$0xff]  ;;  %v1842_v55 = vrot.slane %v1704_v37, 4 }
 0x1d8   :  { %2442 = vmatpush.bf16.msra.mxu1 %v10038_v44  ;;  %v1843_v63 = vrot.slane %v1707_v24, 5 }
 0x1d9   :  { %v1480_v18 = vmax.f32 %v1464_v7, 0.0  ;;  %v11242_v34 = vor.u32 %v1707_v24, %v1706_v9  ;;  %v1832_v19 = vor.u32 %v1831_v26, %v1830_v3  ;;  %v1632_v9 = vor.u32 %v1630_v47, %v1629_v0 }
 0x1da   :  { %v1512_v5 = vld [vmem:[#allocation4 + $0x70] sm:$0xff] }
 0x1db   :  { %1497 = vst.msk [vmem:[#allocation4 + $0x78] sm:$0xff] %vm1481_vm10, %v1480_v18  ;;  %v1528_v49 = vpack.c.bf16 %v1512_v5, %v1512_v5  ;;  %v1833_v52 = vrot.slane %v1832_v19, 4  ;;  %v10008_v18 = vld [vmem:[%s13072_s4 + $0x8] sm:$0xff]  ;;  %v10026_v5 = vld [vmem:[%s13072_s4 + $0x58] sm:$0xff] }
 0x1dc   :  { %2443 = vmatpush.bf16.msra.mxu1 %v10037_v51  ;;  %2265 = vmatpush.bf16.msra.mxu2 %v10008_v18 }
 0x1dd   :  { %v1711_v8 = vshrl.u32 %v1528_v49, 16  ;;  %v1714_v35 = vshll.u32 %v1528_v49, 16  ;;  %2112 = vmatpush.bf16.msra.mxu0 %v10026_v5 }
 0x1de   :  { %1870 = vrot.lane.b32.xlu2 %v1825_v23, %s10285_s17  ;;  %1568 = vrot.lane.b32.xlu0 %v11144_v58, %s10286_s2 }
 0x1df   :  { %1872 = vrot.lane.b32.xlu1 %v1829_v56, %s10285_s17  ;;  %v1713_v11 = vrot.slane %v1711_v8, 7  ;;  %v1846_v42 = vrot.slane %v1711_v8, 4  ;;  %v1847_v36 = vrot.slane %v1714_v35, 5  ;;  %v10025_v56 = vld [vmem:[%s13072_s4 + $0x50] sm:$0xff]  ;;  %v10024_v8 = vld [vmem:[%s13072_s4 + $0x48] sm:$0xff] }
 0x1e0   :  { %2444 = vmatpush.bf16.msra.mxu1 %v10036_v17 }
 0x1e1   :  { %v11259_v1 = vor.u32 %v1714_v35, %v1713_v11  ;;  %v1848_v57 = vor.u32 %v1847_v36, %v1846_v42  ;;  %2113 = vmatpush.bf16.msra.mxu0 %v10025_v56  ;;  %v10035_v11 = vld [vmem:[%s13072_s4 + $0x60] sm:$0xff] }
 0x1e2   :  { %v1513_v60 = vld [vmem:[#allocation4 + $0x78] sm:$0xff] }
 0x1e3   :  { %v1529_v2 = vpack.c.bf16 %v1513_v60, %v1513_v60  ;;  %v1849_v7 = vrot.slane %v1848_v57, 4 }
 0x1e4   :  { %2445 = vmatpush.bf16.msra.mxu1 %v10035_v11 }
 0x1e5   :  { %v1718_v12 = vshrl.u32 %v1529_v2, 16  ;;  %v1721_v58 = vshll.u32 %v1529_v2, 16  ;;  %2114 = vmatpush.bf16.msra.mxu0 %v10024_v8 }
 0x1e6   :  { %1570 = vrot.lane.b32.xlu2 %v11187_v45, %s10286_s2  ;;  %1874 = vrot.lane.b32.xlu0 %v1833_v52, %s10285_s17  ;;  %v10022_v52 = vld [vmem:[%s13072_s4 + $0x38] sm:$0xff] }
 0x1e7   :  { %1572 = vrot.lane.b32.xlu1 %v1527_v48, %s10286_s2  ;;  %v1720_v16 = vrot.slane %v1718_v12, 7  ;;  %v1844_v48 = vor.u32 %v1843_v63, %v1842_v55  ;;  %v1850_v62 = vrot.slane %v1718_v12, 4  ;;  %v1851_v31 = vrot.slane %v1721_v58, 5 }
 0x1e9   :  { %v11277_v13 = vor.u32 %v1721_v58, %v1720_v16  ;;  %v1845_v38 = vrot.slane %v1844_v48, 4  ;;  %v1852_v32 = vor.u32 %v1851_v31, %v1850_v62 }
 0x1eb   :  { %v1853_v15 = vrot.slane %v1852_v32, 4 }
 0x1ee   :  { %1876 = vrot.lane.b32.xlu2 %v1837_v20, %s10285_s17  ;;  %1574 = vrot.lane.b32.xlu0 %v1528_v49, %s10286_s2  ;;  %v10007_v49 = vld [vmem:[%s13072_s4] sm:$0xff] }
 0x1ef   :  { %v1551_v45 = vpop.permute.xlu0 %1550  ;;  %1878 = vrot.lane.b32.xlu1 %v1841_v6, %s10285_s17  ;;  %2266 = vmatpush.bf16.msra.mxu2 %v10007_v49 }
 0x1f0   :  { %1598 = vst.msk [vmem:[#allocation3 + $0xc] sm:$0xf] %vm1595_vm12, %v1551_v45  ;;  %v8611_v45 = vld [vmem:[#allocation3] sm:$0xf] }
 0x1f6   :  { %1576 = vrot.lane.b32.xlu2 %v1529_v2, %s10286_s2  ;;  %1880 = vrot.lane.b32.xlu0 %v1845_v38, %s10285_s17  ;;  %v10023_v2 = vld [vmem:[%s13072_s4 + $0x40] sm:$0xff] }
 0x1f7   :  { %v1748_v24 = vld [vmem:[#allocation3 + $0xc] sm:$0xf]  ;;  %1882 = vrot.lane.b32.xlu1 %v1849_v7, %s10285_s17  ;;  %2115 = vmatpush.bf16.msra.mxu0 %v10023_v2 }
 0x1f8   :  { %v1749_v39 = vsel %vm11286_vm14, %v1632_v9, %v1748_v24 }
 0x1f9   :  { %1750 = vst [vmem:[#allocation3 + $0xc] sm:$0xf] %v1749_v39 }
 0x1fb   :  { %2116 = vmatpush.bf16.msra.mxu0 %v10022_v52 }
 0x1fe   :  { %1884 = vrot.lane.b32.xlu2 %v1853_v15, %s10285_s17 }
 0x1ff   :  { %2117 = vmatpush.bf16.msra.mxu0 %v10021_v14 }
 0x200   :  { %v1910_v35 = vld [vmem:[#allocation3 + $0xc] sm:$0xf] }
 0x208   :  { %v1549_v47 = vpop.permute.xlu2 %1548 }
 0x209   :  { %1597 = vst.msk [vmem:[#allocation3 + $0x8] sm:$0xf] %vm1595_vm12, %v1549_v47 }
 0x210   :  { %v1745_v23 = vld [vmem:[#allocation3 + $0x8] sm:$0xf]  ;;  %v1553_v3 = vpop.permute.xlu2 %1552 }
 0x211   :  { %v1746_v26 = vsel %vm11286_vm14, %v11074_v50, %v1745_v23  ;;  %1599 = vst.msk [vmem:[#allocation3 + $0x10] sm:$0xf] %vm1595_vm12, %v1553_v3  ;;  %v12899_v50 = vld [vmem:[%s13073_s5 + $0x5] ss:$0 sm:$0xff] }
 0x212   :  { %1747 = vst [vmem:[#allocation3 + $0x8] sm:$0xf] %v1746_v26 }
 0x218   :  { %v1751_v25 = vld [vmem:[#allocation3 + $0x10] sm:$0xf]  ;;  %v1859_v19 = vpop.permute.xlu2 %1858  ;;  %v1547_v44 = vpop.permute.xlu1 %1546 }
 0x219   :  { %v1752_v60 = vsel %vm11286_vm14, %v10968_v61, %v1751_v25  ;;  %v1911_v22 = vsel %vm11325_vm0, %v1859_v19, %v1910_v35  ;;  %1596 = vst.msk [vmem:[#allocation3 + $0x4] sm:$0xf] %vm1595_vm12, %v1547_v44  ;;  %v1907_v54 = vld [vmem:[#allocation3 + $0x8] sm:$0xf] }
 0x21a   :  { %1753 = vst [vmem:[#allocation3 + $0x10] sm:$0xf] %v1752_v60 }
 0x21b   :  { %1912 = vst [vmem:[#allocation3 + $0xc] sm:$0xf] %v1911_v22 }
 0x220   :  { %v1742_v28 = vld [vmem:[#allocation3 + $0x4] sm:$0xf]  ;;  %v1559_v59 = vpop.permute.xlu2 %1558  ;;  %v1855_v61 = vpop.permute.xlu1 %1854 }
 0x221   :  { %v1743_v51 = vsel %vm11286_vm14, %v11049_v10, %v1742_v28  ;;  %1602 = vst.msk [vmem:[#allocation3 + $0x1c] sm:$0xf] %vm1595_vm12, %v1559_v59  ;;  %v1913_v63 = vld [vmem:[#allocation3 + $0x10] sm:$0xf] }
 0x222   :  { %1744 = vst [vmem:[#allocation3 + $0x4] sm:$0xf] %v1743_v51  ;;  %v10027_v36 = vld [vmem:[#allocation3 + $0x8] sm:$0xf0] }
 0x223   :  { %v8551_v25 = vld [vmem:[#allocation3 + $0xc] sm:$0xf] }
 0x228   :  { %v1760_v12 = vld [vmem:[#allocation3 + $0x1c] sm:$0xf]  ;;  %v11348_v16 = vpop.permute.xlu2 %1864  ;;  %v1857_v58 = vpop.permute.xlu0 %1856 }
 0x229   :  { %v1761_v29 = vsel %vm11286_vm14, %v11030_v53, %v1760_v12  ;;  %v1908_v10 = vsel %vm11325_vm0, %v1857_v58, %v1907_v54  ;;  %v1555_v21 = vpop.permute.xlu1 %1554  ;;  %v1904_v20 = vld [vmem:[#allocation3 + $0x4] sm:$0xf] }
 0x22a   :  { %1762 = vst [vmem:[#allocation3 + $0x1c] sm:$0xf] %v1761_v29  ;;  %v1905_v55 = vsel %vm11325_vm0, %v1855_v61, %v1904_v20 }
 0x22b   :  { %1909 = vst [vmem:[#allocation3 + $0x8] sm:$0xf] %v1908_v10 }
 0x22c   :  { %1906 = vst [vmem:[#allocation3 + $0x4] sm:$0xf] %v1905_v55 }
 0x22d   :  { %1600 = vst.msk [vmem:[#allocation3 + $0x14] sm:$0xf] %vm1595_vm12, %v1555_v21 }
 0x230   :  { %v1565_v6 = vpop.permute.xlu2 %1564  ;;  %v1557_v42 = vpop.permute.xlu0 %1556 }
 0x231   :  { %1605 = vst.msk [vmem:[#allocation3 + $0x30] sm:$0xf] %vm1595_vm12, %v1565_v6  ;;  %v1861_v53 = vpop.permute.xlu1 %1860  ;;  %v1922_v3 = vld [vmem:[#allocation3 + $0x1c] sm:$0xf] }
 0x232   :  { %v10013_v48 = vld [vmem:[#allocation3 + $0x4] sm:$0xf0]  ;;  %v1914_v0 = vsel %vm11325_vm0, %v1861_v53, %v1913_v63  ;;  %1601 = vst.msk [vmem:[#allocation3 + $0x18] sm:$0xf] %vm1595_vm12, %v1557_v42 }
 0x233   :  { %v8687_v57 = vld [vmem:[#allocation3 + $0x8] sm:$0xf]  ;;  %v9999_v38 = vld [vmem:[#allocation3] sm:$0xf0]  ;;  %1915 = vst [vmem:[#allocation3 + $0x10] sm:$0xf] %v1914_v0 }
 0x234   :  { %v8547_v62 = vld [vmem:[#allocation3 + $0x4] sm:$0xf]  ;;  %v8688_v31 = vor.u32 %v10027_v36, %v8687_v57  ;;  %v1754_v7 = vld [vmem:[#allocation3 + $0x14] sm:$0xf]  ;;  %v8612_v24 = vor.u32 %v9999_v38, %v8611_v45  ;;  %v8615_v8 = vld [vmem:[#allocation3 + $0x8] sm:$0xf] }
 0x235   :  { %v8548_v9 = vor.u32 %v10013_v48, %v8547_v62  ;;  %v1755_v39 = vsel %vm11286_vm14, %v10986_v4, %v1754_v7 }
 0x236   :  { %8741 = vmatmul.msk.bf16.vlgmr.msra.gmra.mxu1 %vm2085_vm1, %v8688_v31  ;;  %1756 = vst [vmem:[#allocation3 + $0x14] sm:$0xf] %v1755_v39  ;;  %8665 = vmatmul.msk.bf16.vlgmr.msra.gmra.mxu2 %vm2085_vm1, %v8612_v24 }
 0x237   :  { %8601 = vmatmul.msk.bf16.vlgmr.msra.gmra.mxu0 %vm2085_vm1, %v8548_v9 }
 0x238   :  { %v1769_v32 = vld [vmem:[#allocation3 + $0x30] sm:$0xf]  ;;  %v11368_v18 = vpop.permute.xlu2 %1870  ;;  %v1863_v15 = vpop.permute.xlu0 %1862 }
 0x239   :  { %v1770_v17 = vsel %vm11286_vm14, %v11105_v33, %v1769_v32  ;;  %v1561_v47 = vpop.permute.xlu1 %1560  ;;  %v1757_v5 = vld [vmem:[#allocation3 + $0x18] sm:$0xf] }
 0x23a   :  { %1771 = vst [vmem:[#allocation3 + $0x30] sm:$0xf] %v1770_v17  ;;  %v1758_v4 = vsel %vm11286_vm14, %v11008_v43, %v1757_v5  ;;  %v10014_v33 = vld [vmem:[#allocation3 + $0xc] sm:$0xf0]  ;;  %v10000_v43 = vld [vmem:[#allocation3 + $0x8] sm:$0xf0] }
 0x23b   :  { %1759 = vst [vmem:[#allocation3 + $0x18] sm:$0xf] %v1758_v4  ;;  %v8552_v22 = vor.u32 %v10014_v33, %v8551_v25  ;;  %v8616_v2 = vor.u32 %v10000_v43, %v8615_v8  ;;  %v8691_v28 = vld [vmem:[#allocation3 + $0x10] sm:$0xf] }
 0x23c   :  { %1603 = vst.msk [vmem:[#allocation3 + $0x20] sm:$0xf] %vm1595_vm12, %v1561_v47  ;;  %v8619_v42 = vld [vmem:[#allocation3 + $0x10] sm:$0xf] }
 0x23d   :  { %v1916_v49 = vld [vmem:[#allocation3 + $0x14] sm:$0xf] }
 0x23e   :  { %v1917_v23 = vsel %vm11325_vm0, %v1863_v15, %v1916_v49 }
 0x23f   :  { %1918 = vst [vmem:[#allocation3 + $0x14] sm:$0xf] %v1917_v23 }
 0x240   :  { %v1571_v26 = vpop.permute.xlu2 %1570  ;;  %v1867_v56 = vpop.permute.xlu0 %1866 }
 0x241   :  { %1608 = vst.msk [vmem:[#allocation3 + $0x3c] sm:$0xf] %vm1595_vm12, %v1571_v26  ;;  %v1923_v11 = vsel %vm11325_vm0, %v1867_v56, %v1922_v3  ;;  %v1563_v35 = vpop.permute.xlu1 %1562  ;;  %v1931_v21 = vld [vmem:[#allocation3 + $0x30] sm:$0xf] }
 0x242   :  { %1924 = vst [vmem:[#allocation3 + $0x1c] sm:$0xf] %v1923_v11  ;;  %v1919_v19 = vld [vmem:[#allocation3 + $0x18] sm:$0xf] }
 0x243   :  { %1604 = vst.msk [vmem:[#allocation3 + $0x2c] sm:$0xf] %vm1595_vm12, %v1563_v35  ;;  %v1920_v44 = vsel %vm11325_vm0, %v11348_v16, %v1919_v19  ;;  %v1763_v60 = vld [vmem:[#allocation3 + $0x20] sm:$0xf] }
 0x244   :  { %1921 = vst [vmem:[#allocation3 + $0x18] sm:$0xf] %v1920_v44  ;;  %v1764_v52 = vsel %vm11286_vm14, %v11047_v41, %v1763_v60  ;;  %v10030_v60 = vld [vmem:[#allocation3 + $0x20] sm:$0xf0] }
 0x245   :  { %1765 = vst [vmem:[#allocation3 + $0x20] sm:$0xf] %v1764_v52 }
 0x246   :  { %v10028_v59 = vld [vmem:[#allocation3 + $0x10] sm:$0xf0]  ;;  %8666 = vmatmul.msk.bf16.gmra.mxu2 %vm2085_vm1, %v8616_v2 }
 0x247   :  { %8602 = vmatmul.msk.bf16.gmra.mxu0 %vm2085_vm1, %v8552_v22  ;;  %v8692_v61 = vor.u32 %v10028_v59, %v8691_v28  ;;  %v10001_v63 = vld [vmem:[#allocation3 + $0x10] sm:$0xf0] }
 0x248   :  { %v1778_v51 = vld [vmem:[#allocation3 + $0x3c] sm:$0xf]  ;;  %v11391_v14 = vpop.permute.xlu2 %1876  ;;  %v1869_v54 = vpop.permute.xlu0 %1868  ;;  %v8555_v53 = vld [vmem:[#allocation3 + $0x14] sm:$0xf]  ;;  %v8620_v62 = vor.u32 %v10001_v63, %v8619_v42 }
 0x249   :  { %v1779_v12 = vsel %vm11286_vm14, %v11216_v27, %v1778_v51  ;;  %8742 = vmatmul.msk.bf16.gmra.mxu1 %vm2085_vm1, %v8692_v61  ;;  %v1567_v16 = vpop.permute.xlu1 %1566  ;;  %v10029_v45 = vld [vmem:[#allocation3 + $0x18] sm:$0xf0]  ;;  %v8627_v51 = vld [vmem:[#allocation3 + $0x28] sm:$0xf] }
 0x24a   :  { %1780 = vst [vmem:[#allocation3 + $0x3c] sm:$0xf] %v1779_v12  ;;  %v1766_v41 = vld [vmem:[#allocation3 + $0x2c] sm:$0xf]  ;;  %v10002_v5 = vld [vmem:[#allocation3 + $0x18] sm:$0xf0] }
 0x24b   :  { %v1767_v58 = vsel %vm11286_vm14, %v11072_v30, %v1766_v41  ;;  %1606 = vst.msk [vmem:[#allocation3 + $0x34] sm:$0xf] %vm1595_vm12, %v1567_v16  ;;  %v10015_v55 = vld [vmem:[#allocation3 + $0x14] sm:$0xf0]  ;;  %v8559_v8 = vld [vmem:[#allocation3 + $0x1c] sm:$0xf] }
 0x24c   :  { %1768 = vst [vmem:[#allocation3 + $0x2c] sm:$0xf] %v1767_v58  ;;  %v1925_v29 = vld [vmem:[#allocation3 + $0x20] sm:$0xf]  ;;  %v8695_v57 = vld [vmem:[#allocation3 + $0x18] sm:$0xf]  ;;  %v8556_v38 = vor.u32 %v10015_v55, %v8555_v53 }
 0x24d   :  { %v1926_v10 = vsel %vm11325_vm0, %v1869_v54, %v1925_v29  ;;  %v8696_v7 = vor.u32 %v10029_v45, %v8695_v57  ;;  %v8623_v47 = vld [vmem:[#allocation3 + $0x18] sm:$0xf] }
 0x24e   :  { %1927 = vst [vmem:[#allocation3 + $0x20] sm:$0xf] %v1926_v10  ;;  %v8624_v44 = vor.u32 %v10002_v5, %v8623_v47  ;;  %v10034_v47 = vld [vmem:[#allocation3 + $0x48] sm:$0xf0] }
 0x250   :  { %v1577_v20 = vpop.permute.xlu2 %1576  ;;  %v1569_v27 = vpop.permute.xlu0 %1568 }
 0x251   :  { %1611 = vst.msk [vmem:[#allocation3 + $0x48] sm:$0xf] %vm1595_vm12, %v1577_v20  ;;  %v1873_v6 = vpop.permute.xlu1 %1872  ;;  %v1940_v26 = vld [vmem:[#allocation3 + $0x3c] sm:$0xf] }
 0x252   :  { %v1772_v36 = vld [vmem:[#allocation3 + $0x34] sm:$0xf]  ;;  %1607 = vst.msk [vmem:[#allocation3 + $0x38] sm:$0xf] %vm1595_vm12, %v1569_v27  ;;  %v1932_v30 = vsel %vm11325_vm0, %v1873_v6, %v1931_v21 }
 0x253   :  { %v1773_v48 = vsel %vm11286_vm14, %v11139_v40, %v1772_v36  ;;  %1933 = vst [vmem:[#allocation3 + $0x30] sm:$0xf] %v1932_v30  ;;  %v1928_v0 = vld [vmem:[#allocation3 + $0x2c] sm:$0xf] }
 0x254   :  { %1774 = vst [vmem:[#allocation3 + $0x34] sm:$0xf] %v1773_v48  ;;  %v1929_v31 = vsel %vm11325_vm0, %v11368_v18, %v1928_v0 }
 0x255   :  { %1930 = vst [vmem:[#allocation3 + $0x2c] sm:$0xf] %v1929_v31  ;;  %v10016_v4 = vld [vmem:[#allocation3 + $0x1c] sm:$0xf0] }
 0x256   :  { %8667 = vmatmul.msk.bf16.gmra.mxu2 %vm2085_vm1, %v8620_v62  ;;  %v8699_v43 = vld [vmem:[#allocation3 + $0x20] sm:$0xf]  ;;  %v8560_v19 = vor.u32 %v10016_v4, %v8559_v8 }
 0x257   :  { %8603 = vmatmul.msk.bf16.gmra.mxu0 %vm2085_vm1, %v8556_v38  ;;  %v8700_v22 = vor.u32 %v10030_v60, %v8699_v43  ;;  %v11466_v8 = vld [vmem:[%s13074_s6] ss:$0 sm:$0xff] }
 0x258   :  { %v1787_v9 = vld [vmem:[#allocation3 + $0x48] sm:$0xf]  ;;  %v1875_v24 = vpop.permute.xlu0 %1874  ;;  %v1885_v23 = vpop.permute.xlu2 %1884 }
 0x259   :  { %v1788_v40 = vsel %vm11286_vm14, %v11277_v13, %v1787_v9  ;;  %v1775_v39 = vld [vmem:[#allocation3 + $0x38] sm:$0xf]  ;;  %8743 = vmatmul.msk.bf16.gmra.mxu1 %vm2085_vm1, %v8696_v7  ;;  %v1573_v32 = vpop.permute.xlu1 %1572 }
 0x25a   :  { %1789 = vst [vmem:[#allocation3 + $0x48] sm:$0xf] %v1788_v40  ;;  %v1776_v18 = vsel %vm11286_vm14, %v11181_v46, %v1775_v39  ;;  %v10017_v61 = vld [vmem:[#allocation3 + $0x2c] sm:$0xf0] }
 0x25b   :  { %v1934_v15 = vld [vmem:[#allocation3 + $0x34] sm:$0xf]  ;;  %1777 = vst [vmem:[#allocation3 + $0x38] sm:$0xf] %v1776_v18  ;;  %v8703_v10 = vld [vmem:[#allocation3 + $0x30] sm:$0xf] }
 0x25c   :  { %v1935_v17 = vsel %vm11325_vm0, %v1875_v24, %v1934_v15  ;;  %1609 = vst.msk [vmem:[#allocation3 + $0x40] sm:$0xf] %vm1595_vm12, %v1573_v32  ;;  %v8563_v54 = vld [vmem:[#allocation3 + $0x2c] sm:$0xf]  ;;  %v8631_v55 = vld [vmem:[#allocation3 + $0x30] sm:$0xf] }
 0x25d   :  { %1936 = vst [vmem:[#allocation3 + $0x34] sm:$0xf] %v1935_v17  ;;  %v8564_v58 = vor.u32 %v10017_v61, %v8563_v54 }
 0x260   :  { %v1575_v13 = vpop.permute.xlu0 %1574 }
 0x261   :  { %v1949_v49 = vld [vmem:[#allocation3 + $0x48] sm:$0xf]  ;;  %1610 = vst.msk [vmem:[#allocation3 + $0x44] sm:$0xf] %vm1595_vm12, %v1575_v13  ;;  %v1879_v3 = vpop.permute.xlu1 %1878 }
 0x262   :  { %v1937_v56 = vld [vmem:[#allocation3 + $0x38] sm:$0xf]  ;;  %v1950_v46 = vsel %vm11325_vm0, %v1885_v23, %v1949_v49  ;;  %v1941_v35 = vsel %vm11325_vm0, %v1879_v3, %v1940_v26  ;;  %v11461_v3 = vld [vmem:[%s13073_s5] ss:$0 sm:$0xff] }
 0x263   :  { %v1938_v33 = vsel %vm11325_vm0, %v11391_v14, %v1937_v56  ;;  %1951 = vst [vmem:[#allocation3 + $0x48] sm:$0xf] %v1950_v46  ;;  %v1781_v11 = vld [vmem:[#allocation3 + $0x40] sm:$0xf]  ;;  %v10003_v14 = vld [vmem:[#allocation3 + $0x28] sm:$0xf0] }
 0x264   :  { %1939 = vst [vmem:[#allocation3 + $0x38] sm:$0xf] %v1938_v33  ;;  %v1782_v25 = vsel %vm11286_vm14, %v11242_v34, %v1781_v11  ;;  %v8628_v29 = vor.u32 %v10003_v14, %v8627_v51  ;;  %v10004_v27 = vld [vmem:[#allocation3 + $0x30] sm:$0xf0] }
 0x265   :  { %1783 = vst [vmem:[#allocation3 + $0x40] sm:$0xf] %v1782_v25  ;;  %v8567_v63 = vld [vmem:[#allocation3 + $0x34] sm:$0xf]  ;;  %v8632_v30 = vor.u32 %v10004_v27, %v8631_v55  ;;  %v10054_v55 = vld [vmem:[%s13072_s4 + $0xb8] sm:$0xff] }
 0x266   :  { %1942 = vst [vmem:[#allocation3 + $0x3c] sm:$0xf] %v1941_v35  ;;  %8668 = vmatmul.msk.bf16.gmra.mxu2 %vm2085_vm1, %v8624_v44  ;;  %3300 = vmatpush.bf16.msrb.mxu0 %v10054_v55 }
 0x267   :  { %8604 = vmatmul.msk.bf16.gmra.mxu0 %vm2085_vm1, %v8560_v19 }
 0x268   :  { %v1784_v2 = vld [vmem:[#allocation3 + $0x44] sm:$0xf]  ;;  %v1881_v28 = vpop.permute.xlu0 %1880 }
 0x269   :  { %v1785_v52 = vsel %vm11286_vm14, %v11259_v1, %v1784_v2  ;;  %8744 = vmatmul.msk.bf16.gmra.mxu1 %vm2085_vm1, %v8700_v22  ;;  %v1883_v16 = vpop.permute.xlu1 %1882  ;;  %v10031_v1 = vld [vmem:[#allocation3 + $0x30] sm:$0xf0] }
 0x26a   :  { %1786 = vst [vmem:[#allocation3 + $0x44] sm:$0xf] %v1785_v52  ;;  %v8704_v21 = vor.u32 %v10031_v1, %v8703_v10  ;;  %v10020_v39 = vld [vmem:[#allocation3 + $0x44] sm:$0xf0] }
 0x26b   :  { %v10018_v20 = vld [vmem:[#allocation3 + $0x34] sm:$0xf0]  ;;  %v8715_v18 = vld [vmem:[#allocation3 + $0x48] sm:$0xf] }
 0x26c   :  { %v1943_v34 = vld [vmem:[#allocation3 + $0x40] sm:$0xf]  ;;  %v8707_v6 = vld [vmem:[#allocation3 + $0x38] sm:$0xf]  ;;  %v8568_v36 = vor.u32 %v10018_v20, %v8567_v63  ;;  %v8716_v5 = vor.u32 %v10034_v47, %v8715_v18 }
 0x26d   :  { %v1944_v59 = vsel %vm11325_vm0, %v1881_v28, %v1943_v34  ;;  %v10032_v42 = vld [vmem:[#allocation3 + $0x38] sm:$0xf0]  ;;  %v8635_v45 = vld [vmem:[#allocation3 + $0x38] sm:$0xf]  ;;  %v10068_v28 = vld [vmem:[%s13072_s4 + $0xe8] sm:$0xff] }
 0x26e   :  { %1945 = vst [vmem:[#allocation3 + $0x40] sm:$0xf] %v1944_v59  ;;  %v8708_v53 = vor.u32 %v10032_v42, %v8707_v6  ;;  %v10005_v48 = vld [vmem:[#allocation3 + $0x38] sm:$0xf0]  ;;  %3151 = vmatpush.bf16.msrb.mxu3 %v10068_v28 }
 0x26f   :  { %v8571_v0 = vld [vmem:[#allocation3 + $0x3c] sm:$0xf]  ;;  %v8636_v31 = vor.u32 %v10005_v48, %v8635_v45 }
 0x270   :  { %v10082_v34 = vld [vmem:[%s13072_s4 + $0x118] sm:$0xff] }
 0x271   :  { %v1946_v12 = vld [vmem:[#allocation3 + $0x44] sm:$0xf]  ;;  %3478 = vmatpush.bf16.msrb.mxu2 %v10082_v34 }
 0x272   :  { %v1947_v41 = vsel %vm11325_vm0, %v1883_v16, %v1946_v12 }
 0x273   :  { %1948 = vst [vmem:[#allocation3 + $0x44] sm:$0xf] %v1947_v41 }
 0x275   :  { %v10019_v57 = vld [vmem:[#allocation3 + $0x3c] sm:$0xf0] }
 0x276   :  { %8669 = vmatmul.msk.bf16.gmra.mxu2 %vm2085_vm1, %v8628_v29  ;;  %v8572_v62 = vor.u32 %v10019_v57, %v8571_v0  ;;  %v8711_v7 = vld [vmem:[#allocation3 + $0x40] sm:$0xf] }
 0x277   :  { %8605 = vmatmul.msk.bf16.gmra.mxu0 %vm2085_vm1, %v8564_v58  ;;  %v8639_v32 = vld [vmem:[#allocation3 + $0x40] sm:$0xf] }
 0x279   :  { %8745 = vmatmul.msk.bf16.gmra.mxu1 %vm2085_vm1, %v8704_v21 }
 0x27a   :  { %v10033_v38 = vld [vmem:[#allocation3 + $0x40] sm:$0xf0] }
 0x27b   :  { %v8712_v9 = vor.u32 %v10033_v38, %v8711_v7  ;;  %v10006_v24 = vld [vmem:[#allocation3 + $0x40] sm:$0xf0] }
 0x27c   :  { %v8575_v40 = vld [vmem:[#allocation3 + $0x44] sm:$0xf]  ;;  %v8640_v17 = vor.u32 %v10006_v24, %v8639_v32 }
 0x27d   :  { %v8576_v15 = vor.u32 %v10020_v39, %v8575_v40 }
 0x286   :  { %8670 = vmatmul.msk.bf16.gmra.mxu2 %vm2085_vm1, %v8632_v30 }
 0x287   :  { %8606 = vmatmul.msk.bf16.gmra.mxu0 %vm2085_vm1, %v8568_v36 }
 0x289   :  { %8746 = vmatmul.msk.bf16.gmra.mxu1 %vm2085_vm1, %v8708_v53 }
 0x296   :  { %8671 = vmatmul.msk.bf16.gmra.mxu2 %vm2085_vm1, %v8636_v31 }
 0x297   :  { %8607 = vmatmul.msk.bf16.gmra.mxu0 %vm2085_vm1, %v8572_v62 }
 0x299   :  { %8747 = vmatmul.msk.bf16.gmra.mxu1 %vm2085_vm1, %v8712_v9 }
 0x2a6   :  { %8672 = vmatmul.msk.bf16.gmra.mxu2 %vm2085_vm1, %v8640_v17 }
 0x2a7   :  { %8608 = vmatmul.msk.bf16.gmra.mxu0 %vm2085_vm1, %v8576_v15 }
 0x2a9   :  { %8748 = vmatmul.msk.bf16.gmra.mxu1 %vm2085_vm1, %v8716_v5 }
 0x2b3   :  { %v2447_v13 = vpop.f32.mrf.mxu1 }
 0x2b4   :  { %v2119_v4 = vpop.f32.mrf.mxu0 }
 0x2b9   :  { %v2268_v49 = vpop.f32.mrf.mxu2 }
 0x2ba   :  { %v2269_v23 = vadd.f32 %v2268_v49, %v2119_v4 }
 0x2bb   :  { %v2449_v46 = vpop.f32.mrf.mxu1 }
 0x2bc   :  { %v2121_v26 = vpop.f32.mrf.mxu0  ;;  %v2487_v56 = vadd.f32 %v2447_v13, %v2269_v23 }
 0x2be   :  { %v2507_v33 = vmul.f32 %v11461_v3, %v2487_v56 }
 0x2c0   :  { %v2527_v11 = vadd.f32 %v11466_v8, %v2507_v33 }
 0x2c1   :  { %v2270_v35 = vpop.f32.mrf.mxu2 }
 0x2c2   :  { %v2271_v43 = vadd.f32 %v2270_v35, %v2121_v26  ;;  %v2543_v25 = vmax.f32 %v2527_v11, 0.0 }
 0x2c4   :  { %v2124_v19 = vpop.f32.mrf.mxu0  ;;  %v2488_v44 = vadd.f32 %v2449_v46, %v2271_v43  ;;  %v2559_v60 = vpack.c.bf16 %v2543_v25, %v2543_v25 }
 0x2c6   :  { %v2508_v22 = vmul.f32 %v11461_v3, %v2488_v44  ;;  %v2452_v2 = vpop.f32.mrf.mxu1  ;;  %2591 = vrot.lane.b32.xlu0 %v2559_v60, %s10286_s2  ;;  %v2656_v52 = vshrl.u32 %v2559_v60, 16  ;;  %v2659_v61 = vshll.u32 %v2559_v60, 16  ;;  %v10081_v44 = vld [vmem:[%s13072_s4 + $0x110] sm:$0xff] }
 0x2c7   :  { %3479 = vmatpush.bf16.msrb.mxu2 %v10081_v44 }
 0x2c8   :  { %v2528_v59 = vadd.f32 %v11466_v8, %v2508_v22  ;;  %v2658_v51 = vrot.slane %v2656_v52, 7  ;;  %v2831_v29 = vrot.slane %v2656_v52, 4  ;;  %v2832_v10 = vrot.slane %v2659_v61, 5  ;;  %v10053_v22 = vld [vmem:[%s13072_s4 + $0xb0] sm:$0xff] }
 0x2c9   :  { %v2273_v14 = vpop.f32.mrf.mxu2  ;;  %3301 = vmatpush.bf16.msrb.mxu0 %v10053_v22 }
 0x2ca   :  { %v2274_v54 = vadd.f32 %v2273_v14, %v2124_v19  ;;  %v2544_v12 = vmax.f32 %v2528_v59, 0.0  ;;  %v11479_v16 = vor.u32 %v2659_v61, %v2658_v51  ;;  %v2833_v42 = vor.u32 %v2832_v10, %v2831_v29  ;;  %v10067_v19 = vld [vmem:[%s13072_s4 + $0xe0] sm:$0xff] }
 0x2cb   :  { %3152 = vmatpush.bf16.msrb.mxu3 %v10067_v19 }
 0x2cc   :  { %v2126_v41 = vpop.f32.mrf.mxu0  ;;  %v2489_v1 = vadd.f32 %v2452_v2, %v2274_v54  ;;  %v2560_v58 = vpack.c.bf16 %v2544_v12, %v2544_v12  ;;  %v2834_v7 = vrot.slane %v2833_v42, 4 }
 0x2ce   :  { %v2509_v21 = vmul.f32 %v11461_v3, %v2489_v1  ;;  %v2454_v20 = vpop.f32.mrf.mxu1  ;;  %2593 = vrot.lane.b32.xlu1 %v2560_v58, %s10286_s2  ;;  %v2663_v27 = vshrl.u32 %v2560_v58, 16  ;;  %v2666_v63 = vshll.u32 %v2560_v58, 16 }
 0x2d0   :  { %v2529_v6 = vadd.f32 %v11466_v8, %v2509_v21  ;;  %v2665_v36 = vrot.slane %v2663_v27, 7  ;;  %v2835_v0 = vrot.slane %v2663_v27, 4  ;;  %v2836_v38 = vrot.slane %v2666_v63, 5 }
 0x2d1   :  { %v2275_v30 = vpop.f32.mrf.mxu2 }
 0x2d2   :  { %v2276_v53 = vadd.f32 %v2275_v30, %v2126_v41  ;;  %v2545_v45 = vmax.f32 %v2529_v6, 0.0  ;;  %v11487_v48 = vor.u32 %v2666_v63, %v2665_v36  ;;  %v2837_v32 = vor.u32 %v2836_v38, %v2835_v0 }
 0x2d4   :  { %v2129_v57 = vpop.f32.mrf.mxu0  ;;  %v2490_v62 = vadd.f32 %v2454_v20, %v2276_v53  ;;  %v2561_v31 = vpack.c.bf16 %v2545_v45, %v2545_v45  ;;  %v2838_v46 = vrot.slane %v2837_v32, 4 }
 0x2d6   :  { %v2510_v9 = vmul.f32 %v11461_v3, %v2490_v62  ;;  %v2457_v24 = vpop.f32.mrf.mxu1  ;;  %2595 = vrot.lane.b32.xlu2 %v2561_v31, %s10286_s2  ;;  %2895 = vrot.lane.b32.xlu1 %v2834_v7, %s10285_s17  ;;  %v2670_v40 = vshrl.u32 %v2561_v31, 16  ;;  %v2673_v39 = vshll.u32 %v2561_v31, 16  ;;  %v10066_v7 = vld [vmem:[%s13072_s4 + $0xd8] sm:$0xff] }
 0x2d7   :  { %3153 = vmatpush.bf16.msrb.mxu3 %v10066_v7 }
 0x2d8   :  { %v2530_v18 = vadd.f32 %v11466_v8, %v2510_v9  ;;  %v2672_v15 = vrot.slane %v2670_v40, 7  ;;  %v2839_v17 = vrot.slane %v2670_v40, 4  ;;  %v2840_v47 = vrot.slane %v2673_v39, 5  ;;  %v10080_v9 = vld [vmem:[%s13072_s4 + $0x108] sm:$0xff] }
 0x2d9   :  { %v2278_v5 = vpop.f32.mrf.mxu2  ;;  %3480 = vmatpush.bf16.msrb.mxu2 %v10080_v9 }
 0x2da   :  { %v2279_v13 = vadd.f32 %v2278_v5, %v2129_v57  ;;  %v2546_v4 = vmax.f32 %v2530_v18, 0.0  ;;  %v11493_v49 = vor.u32 %v2673_v39, %v2672_v15  ;;  %v2841_v23 = vor.u32 %v2840_v47, %v2839_v17 }
 0x2dc   :  { %v2131_v26 = vpop.f32.mrf.mxu0  ;;  %v2491_v56 = vadd.f32 %v2457_v24, %v2279_v13  ;;  %v2562_v33 = vpack.c.bf16 %v2546_v4, %v2546_v4  ;;  %v2842_v11 = vrot.slane %v2841_v23, 4 }
 0x2de   :  { %v2511_v35 = vmul.f32 %v11461_v3, %v2491_v56  ;;  %v2459_v43 = vpop.f32.mrf.mxu1  ;;  %2897 = vrot.lane.b32.xlu2 %v2838_v46, %s10285_s17  ;;  %2597 = vrot.lane.b32.xlu0 %v2562_v33, %s10286_s2  ;;  %v2677_v25 = vshrl.u32 %v2562_v33, 16  ;;  %v2680_v60 = vshll.u32 %v2562_v33, 16 }
 0x2df   :  { %2899 = vrot.lane.b32.xlu1 %v2842_v11, %s10285_s17 }
 0x2e0   :  { %v2531_v2 = vadd.f32 %v11466_v8, %v2511_v35  ;;  %v2679_v52 = vrot.slane %v2677_v25, 7  ;;  %v2843_v14 = vrot.slane %v2677_v25, 4  ;;  %v2844_v54 = vrot.slane %v2680_v60, 5 }
 0x2e1   :  { %v2280_v28 = vpop.f32.mrf.mxu2 }
 0x2e2   :  { %v2281_v34 = vadd.f32 %v2280_v28, %v2131_v26  ;;  %v2547_v59 = vmax.f32 %v2531_v2, 0.0  ;;  %v11509_v61 = vor.u32 %v2680_v60, %v2679_v52  ;;  %v2845_v10 = vor.u32 %v2844_v54, %v2843_v14 }
 0x2e4   :  { %v2134_v51 = vpop.f32.mrf.mxu0  ;;  %v2492_v12 = vadd.f32 %v2459_v43, %v2281_v34  ;;  %v2563_v41 = vpack.c.bf16 %v2547_v59, %v2547_v59  ;;  %v2846_v30 = vrot.slane %v2845_v10, 4  ;;  %v10052_v43 = vld [vmem:[%s13072_s4 + $0xa8] sm:$0xff] }
 0x2e5   :  { %3302 = vmatpush.bf16.msrb.mxu0 %v10052_v43 }
 0x2e6   :  { %v2512_v1 = vmul.f32 %v11461_v3, %v2492_v12  ;;  %v2462_v58 = vpop.f32.mrf.mxu1  ;;  %2599 = vrot.lane.b32.xlu0 %v2563_v41, %s10286_s2  ;;  %v2684_v29 = vshrl.u32 %v2563_v41, 16  ;;  %v2687_v27 = vshll.u32 %v2563_v41, 16 }
 0x2e8   :  { %v2532_v21 = vadd.f32 %v11466_v8, %v2512_v1  ;;  %v2686_v20 = vrot.slane %v2684_v29, 7  ;;  %v2847_v57 = vrot.slane %v2684_v29, 4  ;;  %v2848_v0 = vrot.slane %v2687_v27, 5 }
 0x2e9   :  { %v2283_v55 = vpop.f32.mrf.mxu2 }
 0x2ea   :  { %v2284_v63 = vadd.f32 %v2283_v55, %v2134_v51  ;;  %v2548_v6 = vmax.f32 %v2532_v21, 0.0  ;;  %v11514_v42 = vor.u32 %v2687_v27, %v2686_v20  ;;  %v2849_v24 = vor.u32 %v2848_v0, %v2847_v57 }
 0x2ec   :  { %v2136_v36 = vpop.f32.mrf.mxu0  ;;  %v2493_v53 = vadd.f32 %v2462_v58, %v2284_v63  ;;  %v2564_v45 = vpack.c.bf16 %v2548_v6, %v2548_v6  ;;  %v2850_v4 = vrot.slane %v2849_v24, 4  ;;  %v10065_v24 = vld [vmem:[%s13072_s4 + $0xd0] sm:$0xff] }
 0x2ed   :  { %3154 = vmatpush.bf16.msrb.mxu3 %v10065_v24 }
 0x2ee   :  { %v2513_v38 = vmul.f32 %v11461_v3, %v2493_v53  ;;  %v2464_v62 = vpop.f32.mrf.mxu1  ;;  %2601 = vrot.lane.b32.xlu2 %v2564_v45, %s10286_s2  ;;  %2901 = vrot.lane.b32.xlu0 %v2846_v30, %s10285_s17  ;;  %v2691_v31 = vshrl.u32 %v2564_v45, 16  ;;  %v2694_v32 = vshll.u32 %v2564_v45, 16 }
 0x2f0   :  { %v2533_v40 = vadd.f32 %v11466_v8, %v2513_v38  ;;  %v2693_v39 = vrot.slane %v2691_v31, 7  ;;  %v2851_v26 = vrot.slane %v2691_v31, 4  ;;  %v2852_v56 = vrot.slane %v2694_v32, 5 }
 0x2f1   :  { %v2285_v18 = vpop.f32.mrf.mxu2 }
 0x2f2   :  { %v2286_v15 = vadd.f32 %v2285_v18, %v2136_v36  ;;  %v2549_v17 = vmax.f32 %v2533_v40, 0.0  ;;  %v11526_v47 = vor.u32 %v2694_v32, %v2693_v39  ;;  %v2853_v2 = vor.u32 %v2852_v56, %v2851_v26  ;;  %v10079_v40 = vld [vmem:[%s13072_s4 + $0x100] sm:$0xff] }
 0x2f3   :  { %3481 = vmatpush.bf16.msrb.mxu2 %v10079_v40 }
 0x2f4   :  { %v2139_v5 = vpop.f32.mrf.mxu0  ;;  %v2494_v13 = vadd.f32 %v2464_v62, %v2286_v15  ;;  %v2565_v23 = vpack.c.bf16 %v2549_v17, %v2549_v17  ;;  %v2854_v41 = vrot.slane %v2853_v2, 4 }
 0x2f6   :  { %v2514_v46 = vmul.f32 %v11461_v3, %v2494_v13  ;;  %v2467_v33 = vpop.f32.mrf.mxu1  ;;  %2903 = vrot.lane.b32.xlu2 %v2850_v4, %s10285_s17  ;;  %2603 = vrot.lane.b32.xlu1 %v2565_v23, %s10286_s2  ;;  %v2698_v11 = vshrl.u32 %v2565_v23, 16  ;;  %v2701_v35 = vshll.u32 %v2565_v23, 16 }
 0x2f8   :  { %v2700_v25 = vrot.slane %v2698_v11, 7  ;;  %v2855_v19 = vrot.slane %v2698_v11, 4  ;;  %v2856_v44 = vrot.slane %v2701_v35, 5  ;;  %v2534_v60 = vadd.f32 %v11466_v8, %v2514_v46 }
 0x2f9   :  { %v2288_v22 = vpop.f32.mrf.mxu2 }
 0x2fa   :  { %v2289_v52 = vadd.f32 %v2288_v22, %v2139_v5  ;;  %v11535_v28 = vor.u32 %v2701_v35, %v2700_v25  ;;  %v2857_v34 = vor.u32 %v2856_v44, %v2855_v19  ;;  %v2550_v59 = vmax.f32 %v2534_v60, 0.0  ;;  %v10051_v25 = vld [vmem:[%s13072_s4 + $0xa0] sm:$0xff] }
 0x2fb   :  { %3303 = vmatpush.bf16.msrb.mxu0 %v10051_v25 }
 0x2fc   :  { %v2141_v51 = vpop.f32.mrf.mxu0  ;;  %v2495_v14 = vadd.f32 %v2467_v33, %v2289_v52  ;;  %v2858_v54 = vrot.slane %v2857_v34, 4  ;;  %v2566_v12 = vpack.c.bf16 %v2550_v59, %v2550_v59 }
 0x2fe   :  { %v2515_v1 = vmul.f32 %v11461_v3, %v2495_v14  ;;  %v2469_v58 = vpop.f32.mrf.mxu1  ;;  %2907 = vrot.lane.b32.xlu2 %v2858_v54, %s10285_s17  ;;  %2605 = vrot.lane.b32.xlu0 %v2566_v12, %s10286_s2  ;;  %v2705_v29 = vshrl.u32 %v2566_v12, 16  ;;  %v2708_v10 = vshll.u32 %v2566_v12, 16 }
 0x2ff   :  { %2905 = vrot.lane.b32.xlu1 %v2854_v41, %s10285_s17 }
 0x300   :  { %v2707_v21 = vrot.slane %v2705_v29, 7  ;;  %v2859_v20 = vrot.slane %v2705_v29, 4  ;;  %v2860_v27 = vrot.slane %v2708_v10, 5  ;;  %v2535_v55 = vadd.f32 %v11466_v8, %v2515_v1 }
 0x301   :  { %v2290_v63 = vpop.f32.mrf.mxu2 }
 0x302   :  { %v2291_v6 = vadd.f32 %v2290_v63, %v2141_v51  ;;  %v11542_v36 = vor.u32 %v2708_v10, %v2707_v21  ;;  %v2861_v30 = vor.u32 %v2860_v27, %v2859_v20  ;;  %v2551_v53 = vmax.f32 %v2535_v55, 0.0 }
 0x304   :  { %v2144_v45 = vpop.f32.mrf.mxu0  ;;  %v2496_v57 = vadd.f32 %v2469_v58, %v2291_v6  ;;  %v2862_v0 = vrot.slane %v2861_v30, 4  ;;  %v2567_v38 = vpack.c.bf16 %v2551_v53, %v2551_v53 }
 0x306   :  { %v2516_v62 = vmul.f32 %v11461_v3, %v2496_v57  ;;  %v2472_v31 = vpop.f32.mrf.mxu1  ;;  %2909 = vrot.lane.b32.xlu2 %v2862_v0, %s10285_s17  ;;  %2607 = vrot.lane.b32.xlu0 %v2567_v38, %s10286_s2  ;;  %v2712_v7 = vshrl.u32 %v2567_v38, 16  ;;  %v2715_v9 = vshll.u32 %v2567_v38, 16 }
 0x308   :  { %v2714_v39 = vrot.slane %v2712_v7, 7  ;;  %v2863_v32 = vrot.slane %v2712_v7, 4  ;;  %v2864_v18 = vrot.slane %v2715_v9, 5  ;;  %v2536_v15 = vadd.f32 %v11466_v8, %v2516_v62 }
 0x309   :  { %v2293_v17 = vpop.f32.mrf.mxu2 }
 0x30a   :  { %v2294_v5 = vadd.f32 %v2293_v17, %v2144_v45  ;;  %v11554_v13 = vor.u32 %v2715_v9, %v2714_v39  ;;  %v2865_v4 = vor.u32 %v2864_v18, %v2863_v32  ;;  %v2552_v23 = vmax.f32 %v2536_v15, 0.0 }
 0x30c   :  { %v2146_v26 = vpop.f32.mrf.mxu0  ;;  %v2497_v56 = vadd.f32 %v2472_v31, %v2294_v5  ;;  %v2866_v46 = vrot.slane %v2865_v4, 4  ;;  %v2568_v33 = vpack.c.bf16 %v2552_v23, %v2552_v23  ;;  %v10064_v4 = vld [vmem:[%s13072_s4 + $0xc8] sm:$0xff]  ;;  %v10078_v23 = vld [vmem:[%s13072_s4 + $0xf8] sm:$0xff] }
 0x30d   :  { %3155 = vmatpush.bf16.msrb.mxu3 %v10064_v4  ;;  %3482 = vmatpush.bf16.msrb.mxu2 %v10078_v23 }
 0x30e   :  { %v2517_v11 = vmul.f32 %v11461_v3, %v2497_v56  ;;  %v2474_v35 = vpop.f32.mrf.mxu1  ;;  %2911 = vrot.lane.b32.xlu2 %v2866_v46, %s10285_s17  ;;  %2609 = vrot.lane.b32.xlu1 %v2568_v33, %s10286_s2  ;;  %v2719_v43 = vshrl.u32 %v2568_v33, 16  ;;  %v2722_v19 = vshll.u32 %v2568_v33, 16 }
 0x310   :  { %v2537_v44 = vadd.f32 %v11466_v8, %v2517_v11  ;;  %v2721_v60 = vrot.slane %v2719_v43, 7  ;;  %v2867_v51 = vrot.slane %v2719_v43, 4  ;;  %v2868_v14 = vrot.slane %v2722_v19, 5 }
 0x311   :  { %v2295_v22 = vpop.f32.mrf.mxu2 }
 0x312   :  { %v2296_v2 = vadd.f32 %v2295_v22, %v2146_v26  ;;  %v2553_v52 = vmax.f32 %v2537_v44, 0.0  ;;  %v11563_v34 = vor.u32 %v2722_v19, %v2721_v60  ;;  %v2869_v10 = vor.u32 %v2868_v14, %v2867_v51  ;;  %v10050_v26 = vld [vmem:[%s13072_s4 + $0x98] sm:$0xff] }
 0x313   :  { %3304 = vmatpush.bf16.msrb.mxu0 %v10050_v26 }
 0x314   :  { %v2149_v59 = vpop.f32.mrf.mxu0  ;;  %v2498_v54 = vadd.f32 %v2474_v35, %v2296_v2  ;;  %v2569_v12 = vpack.c.bf16 %v2553_v52, %v2553_v52  ;;  %v2870_v38 = vrot.slane %v2869_v10, 4 }
 0x316   :  { %v2518_v41 = vmul.f32 %v11461_v3, %v2498_v54  ;;  %v2477_v1 = vpop.f32.mrf.mxu1  ;;  %2611 = vrot.lane.b32.xlu0 %v2569_v12, %s10286_s2  ;;  %v2726_v58 = vshrl.u32 %v2569_v12, 16  ;;  %v2729_v29 = vshll.u32 %v2569_v12, 16 }
 0x318   :  { %v2728_v21 = vrot.slane %v2726_v58, 7  ;;  %v2871_v20 = vrot.slane %v2726_v58, 4  ;;  %v2872_v27 = vrot.slane %v2729_v29, 5  ;;  %v2538_v55 = vadd.f32 %v11466_v8, %v2518_v41 }
 0x319   :  { %v2298_v63 = vpop.f32.mrf.mxu2 }
 0x31a   :  { %v2299_v6 = vadd.f32 %v2298_v63, %v2149_v59  ;;  %v11568_v30 = vor.u32 %v2729_v29, %v2728_v21  ;;  %v2873_v53 = vor.u32 %v2872_v27, %v2871_v20  ;;  %v2554_v45 = vmax.f32 %v2538_v55, 0.0 }
 0x31c   :  { %v2499_v57 = vadd.f32 %v2477_v1, %v2299_v6  ;;  %v2874_v0 = vrot.slane %v2873_v53, 4  ;;  %v2570_v62 = vpack.c.bf16 %v2554_v45, %v2554_v45  ;;  %v2151_v31 = vpop.f32.mrf.mxu0 }
 0x31e   :  { %v2519_v7 = vmul.f32 %v11461_v3, %v2499_v57  ;;  %2915 = vrot.lane.b32.xlu2 %v2874_v0, %s10285_s17  ;;  %2913 = vrot.lane.b32.xlu0 %v2870_v38, %s10285_s17  ;;  %v2733_v9 = vshrl.u32 %v2570_v62, 16  ;;  %v2479_v24 = vpop.f32.mrf.mxu1  ;;  %v2736_v32 = vshll.u32 %v2570_v62, 16 }
 0x31f   :  { %2613 = vrot.lane.b32.xlu1 %v2570_v62, %s10286_s2 }
 0x320   :  { %v2539_v40 = vadd.f32 %v11466_v8, %v2519_v7  ;;  %v2735_v39 = vrot.slane %v2733_v9, 7  ;;  %v2875_v33 = vrot.slane %v2733_v9, 4  ;;  %v2876_v11 = vrot.slane %v2736_v32, 5  ;;  %v10063_v7 = vld [vmem:[%s13072_s4 + $0xc0] sm:$0xff]  ;;  %v10077_v9 = vld [vmem:[%s13072_s4 + $0xf0] sm:$0xff] }
 0x321   :  { %v2300_v18 = vpop.f32.mrf.mxu2  ;;  %3156 = vmatpush.bf16.msrb.mxu3 %v10063_v7  ;;  %3483 = vmatpush.bf16.msrb.mxu2 %v10077_v9 }
 0x322   :  { %v2301_v15 = vadd.f32 %v2300_v18, %v2151_v31  ;;  %v2555_v17 = vmax.f32 %v2539_v40, 0.0  ;;  %v11575_v5 = vor.u32 %v2736_v32, %v2735_v39  ;;  %v2877_v52 = vor.u32 %v2876_v11, %v2875_v33 }
 0x324   :  { %v2500_v56 = vadd.f32 %v2479_v24, %v2301_v15  ;;  %v2571_v46 = vpack.c.bf16 %v2555_v17, %v2555_v17  ;;  %v2154_v25 = vpop.f32.mrf.mxu0  ;;  %v2878_v58 = vrot.slane %v2877_v52, 4 }
 0x326   :  { %v2520_v35 = vmul.f32 %v11461_v3, %v2500_v56  ;;  %v2740_v43 = vshrl.u32 %v2571_v46, 16  ;;  %v2743_v60 = vshll.u32 %v2571_v46, 16  ;;  %v2482_v22 = vpop.f32.mrf.mxu1 }
 0x327   :  { %2615 = vrot.lane.b32.xlu1 %v2571_v46, %s10286_s2 }
 0x328   :  { %v2540_v19 = vadd.f32 %v11466_v8, %v2520_v35  ;;  %v2742_v44 = vrot.slane %v2740_v43, 7  ;;  %v2879_v41 = vrot.slane %v2740_v43, 4  ;;  %v2880_v1 = vrot.slane %v2743_v60, 5 }
 0x329   :  { %v2303_v2 = vpop.f32.mrf.mxu2 }
 0x32a   :  { %v2304_v59 = vadd.f32 %v2303_v2, %v2154_v25  ;;  %v2556_v51 = vmax.f32 %v2540_v19, 0.0  ;;  %v11589_v14 = vor.u32 %v2743_v60, %v2742_v44  ;;  %v2881_v55 = vor.u32 %v2880_v1, %v2879_v41  ;;  %v10049_v25 = vld [vmem:[%s13072_s4 + $0x90] sm:$0xff] }
 0x32b   :  { %3305 = vmatpush.bf16.msrb.mxu0 %v10049_v25 }
 0x32c   :  { %v2501_v54 = vadd.f32 %v2482_v22, %v2304_v59  ;;  %v2572_v12 = vpack.c.bf16 %v2556_v51, %v2556_v51  ;;  %v2156_v6 = vpop.f32.mrf.mxu0  ;;  %v2882_v39 = vrot.slane %v2881_v55, 4 }
 0x32e   :  { %v2521_v29 = vmul.f32 %v11461_v3, %v2501_v54  ;;  %2617 = vrot.lane.b32.xlu0 %v2572_v12, %s10286_s2  ;;  %v2747_v10 = vshrl.u32 %v2572_v12, 16  ;;  %v2750_v21 = vshll.u32 %v2572_v12, 16  ;;  %v2484_v38 = vpop.f32.mrf.mxu1 }
 0x32f   :  { %2917 = vrot.lane.b32.xlu1 %v2878_v58, %s10285_s17 }
 0x330   :  { %v2596_v20 = vpop.permute.xlu2 %2595  ;;  %v2541_v27 = vadd.f32 %v11466_v8, %v2521_v29  ;;  %v2749_v63 = vrot.slane %v2747_v10, 7  ;;  %v2883_v62 = vrot.slane %v2747_v10, 4  ;;  %v2884_v31 = vrot.slane %v2750_v21, 5 }
 0x331   :  { %2641 = vst.msk [vmem:[#allocation3 + $0xc] sm:$0xf] %vm1595_vm12, %v2596_v20  ;;  %v2305_v53 = vpop.f32.mrf.mxu2 }
 0x332   :  { %v2306_v45 = vadd.f32 %v2305_v53, %v2156_v6  ;;  %v2557_v57 = vmax.f32 %v2541_v27, 0.0  ;;  %v11596_v0 = vor.u32 %v2750_v21, %v2749_v63  ;;  %v2885_v17 = vor.u32 %v2884_v31, %v2883_v62  ;;  %v8839_v6 = vld [vmem:[#allocation3] sm:$0xf] }
 0x334   :  { %v2502_v24 = vadd.f32 %v2484_v38, %v2306_v45  ;;  %v2573_v40 = vpack.c.bf16 %v2557_v57, %v2557_v57  ;;  %v2886_v19 = vrot.slane %v2885_v17, 4 }
 0x336   :  { %v2522_v32 = vmul.f32 %v11461_v3, %v2502_v24  ;;  %2619 = vrot.lane.b32.xlu2 %v2573_v40, %s10286_s2  ;;  %2919 = vrot.lane.b32.xlu0 %v2882_v39, %s10285_s17  ;;  %v2754_v18 = vshrl.u32 %v2573_v40, 16  ;;  %v2757_v15 = vshll.u32 %v2573_v40, 16 }
 0x338   :  { %v2789_v4 = vld [vmem:[#allocation3 + $0xc] sm:$0xf]  ;;  %v2592_v23 = vpop.permute.xlu0 %2591  ;;  %v2756_v26 = vrot.slane %v2754_v18, 7  ;;  %v2887_v56 = vrot.slane %v2754_v18, 4  ;;  %v2888_v46 = vrot.slane %v2757_v15, 5  ;;  %v2542_v33 = vadd.f32 %v11466_v8, %v2522_v32  ;;  %v2898_v22 = vpop.permute.xlu2 %2897 }
 0x339   :  { %v2790_v11 = vsel %vm11286_vm14, %v11493_v49, %v2789_v4  ;;  %2639 = vst.msk [vmem:[#allocation3 + $0x4] sm:$0xf] %vm1595_vm12, %v2592_v23 }
 0x33a   :  { %2791 = vst [vmem:[#allocation3 + $0xc] sm:$0xf] %v2790_v11  ;;  %v11612_v3 = vor.u32 %v2757_v15, %v2756_v26  ;;  %v2889_v35 = vor.u32 %v2888_v46, %v2887_v56  ;;  %v2558_v43 = vmax.f32 %v2542_v33, 0.0 }
 0x33c   :  { %v2890_v44 = vrot.slane %v2889_v35, 4  ;;  %v2574_v60 = vpack.c.bf16 %v2558_v43, %v2558_v43 }
 0x33e   :  { %2921 = vrot.lane.b32.xlu2 %v2886_v19, %s10285_s17  ;;  %2923 = vrot.lane.b32.xlu0 %v2890_v44, %s10285_s17  ;;  %v2761_v8 = vshrl.u32 %v2574_v60, 16  ;;  %v2764_v49 = vshll.u32 %v2574_v60, 16 }
 0x33f   :  { %2621 = vrot.lane.b32.xlu1 %v2574_v60, %s10286_s2 }
 0x340   :  { %v2783_v2 = vld [vmem:[#allocation3 + $0x4] sm:$0xf]  ;;  %v2594_v52 = vpop.permute.xlu1 %2593  ;;  %v2763_v59 = vrot.slane %v2761_v8, 7  ;;  %v2891_v51 = vrot.slane %v2761_v8, 4  ;;  %v2892_v54 = vrot.slane %v2764_v49, 5 }
 0x341   :  { %v2784_v12 = vsel %vm11286_vm14, %v11479_v16, %v2783_v2  ;;  %2640 = vst.msk [vmem:[#allocation3 + $0x8] sm:$0xf] %vm1595_vm12, %v2594_v52  ;;  %v2949_v57 = vld [vmem:[#allocation3 + $0xc] sm:$0xf] }
 0x342   :  { %2785 = vst [vmem:[#allocation3 + $0x4] sm:$0xf] %v2784_v12  ;;  %v11624_v41 = vor.u32 %v2764_v49, %v2763_v59  ;;  %v2893_v1 = vor.u32 %v2892_v54, %v2891_v51 }
 0x344   :  { %v2894_v58 = vrot.slane %v2893_v1, 4 }
 0x347   :  { %2925 = vrot.lane.b32.xlu1 %v2894_v58, %s10285_s17 }
 0x348   :  { %v2786_v29 = vld [vmem:[#allocation3 + $0x8] sm:$0xf]  ;;  %v2602_v10 = vpop.permute.xlu2 %2601  ;;  %v2896_v21 = vpop.permute.xlu1 %2895 }
 0x349   :  { %v2787_v20 = vsel %vm11286_vm14, %v11487_v48, %v2786_v29  ;;  %2644 = vst.msk [vmem:[#allocation3 + $0x18] sm:$0xf] %vm1595_vm12, %v2602_v10  ;;  %v2943_v27 = vld [vmem:[#allocation3 + $0x4] sm:$0xf] }
 0x34a   :  { %2788 = vst [vmem:[#allocation3 + $0x8] sm:$0xf] %v2787_v20  ;;  %v2944_v16 = vsel %vm11325_vm0, %v2896_v21, %v2943_v27 }
 0x34b   :  { %2945 = vst [vmem:[#allocation3 + $0x4] sm:$0xf] %v2944_v16 }
 0x350   :  { %v2798_v55 = vld [vmem:[#allocation3 + $0x18] sm:$0xf]  ;;  %v2598_v63 = vpop.permute.xlu0 %2597 }
 0x351   :  { %v2946_v53 = vld [vmem:[#allocation3 + $0x8] sm:$0xf]  ;;  %v2799_v45 = vsel %vm11286_vm14, %v11526_v47, %v2798_v55  ;;  %2642 = vst.msk [vmem:[#allocation3 + $0x10] sm:$0xf] %vm1595_vm12, %v2598_v63  ;;  %v2900_v48 = vpop.permute.xlu1 %2899 }
 0x352   :  { %v2947_v38 = vsel %vm11325_vm0, %v2898_v22, %v2946_v53  ;;  %2800 = vst [vmem:[#allocation3 + $0x18] sm:$0xf] %v2799_v45  ;;  %v10041_v62 = vld [vmem:[#allocation3] sm:$0xf0]  ;;  %v2950_v31 = vsel %vm11325_vm0, %v2900_v48, %v2949_v57 }
 0x353   :  { %2948 = vst [vmem:[#allocation3 + $0x8] sm:$0xf] %v2947_v38  ;;  %v8840_v7 = vor.u32 %v10041_v62, %v8839_v6  ;;  %v8775_v47 = vld [vmem:[#allocation3 + $0x4] sm:$0xf] }
 0x354   :  { %2951 = vst [vmem:[#allocation3 + $0xc] sm:$0xf] %v2950_v31 }
 0x355   :  { %8893 = vmatmul.msk.bf16.vlgmr.msrb.gmra.mxu0 %vm2085_vm1, %v8840_v7 }
 0x358   :  { %v2792_v9 = vld [vmem:[#allocation3 + $0x10] sm:$0xf]  ;;  %v2600_v24 = vpop.permute.xlu0 %2599 }
 0x359   :  { %v2793_v40 = vsel %vm11286_vm14, %v11509_v61, %v2792_v9  ;;  %2643 = vst.msk [vmem:[#allocation3 + $0x14] sm:$0xf] %vm1595_vm12, %v2600_v24  ;;  %v2904_v61 = vpop.permute.xlu2 %2903  ;;  %v2958_v8 = vld [vmem:[#allocation3 + $0x18] sm:$0xf] }
 0x35a   :  { %2794 = vst [vmem:[#allocation3 + $0x10] sm:$0xf] %v2793_v40  ;;  %v10055_v39 = vld [vmem:[#allocation3 + $0x4] sm:$0xf0] }
 0x35b   :  { %v8915_v32 = vld [vmem:[#allocation3 + $0x8] sm:$0xf]  ;;  %v10069_v18 = vld [vmem:[#allocation3 + $0x8] sm:$0xf0]  ;;  %v8776_v15 = vor.u32 %v10055_v39, %v8775_v47 }
 0x35c   :  { %v8916_v17 = vor.u32 %v10069_v18, %v8915_v32  ;;  %v10042_v33 = vld [vmem:[#allocation3 + $0x8] sm:$0xff] }
 0x35d   :  { %8829 = vmatmul.msk.bf16.vlgmr.msrb.gmra.mxu3 %vm2085_vm1, %v8776_v15 }
 0x35e   :  { %8969 = vmatmul.msk.bf16.vlgmr.msrb.gmra.mxu2 %vm2085_vm1, %v8916_v17 }
 0x360   :  { %v2795_v4 = vld [vmem:[#allocation3 + $0x14] sm:$0xf]  ;;  %v2902_v23 = vpop.permute.xlu0 %2901 }
 0x361   :  { %v2796_v26 = vsel %vm11286_vm14, %v11514_v42, %v2795_v4  ;;  %v2952_v56 = vld [vmem:[#allocation3 + $0x10] sm:$0xf]  ;;  %v2908_v42 = vpop.permute.xlu2 %2907 }
 0x362   :  { %2797 = vst [vmem:[#allocation3 + $0x14] sm:$0xf] %v2796_v26  ;;  %v2953_v46 = vsel %vm11325_vm0, %v2902_v23, %v2952_v56 }
 0x363   :  { %2954 = vst [vmem:[#allocation3 + $0x10] sm:$0xf] %v2953_v46 }
 0x365   :  { %8894 = vmatmul.msk.bf16.gmra.mxu0 %vm2085_vm1, %v10042_v33 }
 0x368   :  { %v2604_v11 = vpop.permute.xlu1 %2603 }
 0x369   :  { %v2955_v35 = vld [vmem:[#allocation3 + $0x14] sm:$0xf]  ;;  %2645 = vst.msk [vmem:[#allocation3 + $0x1c] sm:$0xf] %vm1595_vm12, %v2604_v11  ;;  %v2910_v59 = vpop.permute.xlu2 %2909 }
 0x36a   :  { %v2956_v43 = vsel %vm11325_vm0, %v2904_v61, %v2955_v35  ;;  %v10056_v25 = vld [vmem:[#allocation3 + $0xc] sm:$0xff] }
 0x36b   :  { %2957 = vst [vmem:[#allocation3 + $0x14] sm:$0xf] %v2956_v43 }
 0x36d   :  { %8830 = vmatmul.msk.bf16.gmra.mxu3 %vm2085_vm1, %v10056_v25 }
 0x370   :  { %v2801_v19 = vld [vmem:[#allocation3 + $0x1c] sm:$0xf]  ;;  %v2606_v44 = vpop.permute.xlu0 %2605 }
 0x371   :  { %v2802_v60 = vsel %vm11286_vm14, %v11535_v28, %v2801_v19  ;;  %2646 = vst.msk [vmem:[#allocation3 + $0x20] sm:$0xf] %vm1595_vm12, %v2606_v44  ;;  %v2906_v49 = vpop.permute.xlu1 %2905  ;;  %v2912_v29 = vpop.permute.xlu2 %2911 }
 0x372   :  { %2803 = vst [vmem:[#allocation3 + $0x1c] sm:$0xf] %v2802_v60  ;;  %v2959_v22 = vsel %vm11325_vm0, %v2906_v49, %v2958_v8  ;;  %v10043_v2 = vld [vmem:[#allocation3 + $0x10] sm:$0xff] }
 0x373   :  { %v10070_v52 = vld [vmem:[#allocation3 + $0x10] sm:$0xff]  ;;  %2960 = vst [vmem:[#allocation3 + $0x18] sm:$0xf] %v2959_v22 }
 0x374   :  { %8970 = vmatmul.msk.bf16.gmra.mxu2 %vm2085_vm1, %v10070_v52 }
 0x375   :  { %8895 = vmatmul.msk.bf16.gmra.mxu0 %vm2085_vm1, %v10043_v2 }
 0x378   :  { %v2804_v51 = vld [vmem:[#allocation3 + $0x20] sm:$0xf]  ;;  %v2608_v54 = vpop.permute.xlu0 %2607 }
 0x379   :  { %v2961_v12 = vld [vmem:[#allocation3 + $0x1c] sm:$0xf]  ;;  %v2805_v28 = vsel %vm11286_vm14, %v11542_v36, %v2804_v51  ;;  %2647 = vst.msk [vmem:[#allocation3 + $0x2c] sm:$0xf] %vm1595_vm12, %v2608_v54  ;;  %v2916_v63 = vpop.permute.xlu2 %2915 }
 0x37a   :  { %v2962_v1 = vsel %vm11325_vm0, %v2908_v42, %v2961_v12  ;;  %2806 = vst [vmem:[#allocation3 + $0x20] sm:$0xf] %v2805_v28  ;;  %v10057_v58 = vld [vmem:[#allocation3 + $0x14] sm:$0xff] }
 0x37b   :  { %2963 = vst [vmem:[#allocation3 + $0x1c] sm:$0xf] %v2962_v1 }
 0x37d   :  { %8831 = vmatmul.msk.bf16.gmra.mxu3 %vm2085_vm1, %v10057_v58 }
 0x380   :  { %v2807_v10 = vld [vmem:[#allocation3 + $0x2c] sm:$0xf]  ;;  %v2610_v21 = vpop.permute.xlu1 %2609 }
 0x381   :  { %v2964_v20 = vld [vmem:[#allocation3 + $0x20] sm:$0xf]  ;;  %v2808_v27 = vsel %vm11286_vm14, %v11554_v13, %v2807_v10  ;;  %2648 = vst.msk [vmem:[#allocation3 + $0x30] sm:$0xf] %vm1595_vm12, %v2610_v21 }
 0x382   :  { %v2965_v36 = vsel %vm11325_vm0, %v2910_v59, %v2964_v20  ;;  %2809 = vst [vmem:[#allocation3 + $0x2c] sm:$0xf] %v2808_v27  ;;  %v10044_v16 = vld [vmem:[#allocation3 + $0x18] sm:$0xff] }
 0x383   :  { %v10071_v55 = vld [vmem:[#allocation3 + $0x18] sm:$0xff]  ;;  %2966 = vst [vmem:[#allocation3 + $0x20] sm:$0xf] %v2965_v36 }
 0x384   :  { %8971 = vmatmul.msk.bf16.gmra.mxu2 %vm2085_vm1, %v10071_v55 }
 0x385   :  { %8896 = vmatmul.msk.bf16.gmra.mxu0 %vm2085_vm1, %v10044_v16 }
 0x388   :  { %v2810_v6 = vld [vmem:[#allocation3 + $0x30] sm:$0xf]  ;;  %v2612_v53 = vpop.permute.xlu0 %2611 }
 0x389   :  { %v2967_v45 = vld [vmem:[#allocation3 + $0x2c] sm:$0xf]  ;;  %v2811_v13 = vsel %vm11286_vm14, %v11563_v34, %v2810_v6  ;;  %2649 = vst.msk [vmem:[#allocation3 + $0x34] sm:$0xf] %vm1595_vm12, %v2612_v53 }
 0x38a   :  { %v2968_v57 = vsel %vm11325_vm0, %v2912_v29, %v2967_v45  ;;  %2812 = vst [vmem:[#allocation3 + $0x30] sm:$0xf] %v2811_v13  ;;  %v10058_v48 = vld [vmem:[#allocation3 + $0x1c] sm:$0xff] }
 0x38b   :  { %2969 = vst [vmem:[#allocation3 + $0x2c] sm:$0xf] %v2968_v57  ;;  %v10072_v40 = vld [vmem:[#allocation3 + $0x20] sm:$0xff] }
 0x38c   :  { %v11746_v45 = vld [vmem:[%s13074_s6 + $0x1] ss:$0 sm:$0xff] }
 0x38d   :  { %8832 = vmatmul.msk.bf16.gmra.mxu3 %vm2085_vm1, %v10058_v48  ;;  %v3583_v48 = vld [vmem:[#allocation4] sm:$0xff] }
 0x390   :  { %v2813_v38 = vld [vmem:[#allocation3 + $0x34] sm:$0xf]  ;;  %v2620_v62 = vpop.permute.xlu2 %2619  ;;  %v2914_v31 = vpop.permute.xlu0 %2913 }
 0x391   :  { %v2814_v7 = vsel %vm11286_vm14, %v11568_v30, %v2813_v38  ;;  %2653 = vst.msk [vmem:[#allocation3 + $0x44] sm:$0xf] %vm1595_vm12, %v2620_v62  ;;  %v2970_v34 = vld [vmem:[#allocation3 + $0x30] sm:$0xf]  ;;  %v2614_v9 = vpop.permute.xlu1 %2613 }
 0x392   :  { %2815 = vst [vmem:[#allocation3 + $0x34] sm:$0xf] %v2814_v7  ;;  %v2971_v24 = vsel %vm11325_vm0, %v2914_v31, %v2970_v34  ;;  %v10045_v47 = vld [vmem:[#allocation3 + $0x28] sm:$0xff] }
 0x393   :  { %2972 = vst [vmem:[#allocation3 + $0x30] sm:$0xf] %v2971_v24 }
 0x394   :  { %2650 = vst.msk [vmem:[#allocation3 + $0x38] sm:$0xf] %vm1595_vm12, %v2614_v9  ;;  %8972 = vmatmul.msk.bf16.gmra.mxu2 %vm2085_vm1, %v10072_v40 }
 0x395   :  { %8897 = vmatmul.msk.bf16.gmra.mxu0 %vm2085_vm1, %v10045_v47 }
 0x398   :  { %v2825_v39 = vld [vmem:[#allocation3 + $0x44] sm:$0xf]  ;;  %v2922_v8 = vpop.permute.xlu2 %2921 }
 0x399   :  { %v2973_v32 = vld [vmem:[#allocation3 + $0x34] sm:$0xf]  ;;  %v2826_v30 = vsel %vm11286_vm14, %v11612_v3, %v2825_v39  ;;  %v2616_v18 = vpop.permute.xlu1 %2615  ;;  %v3584_v39 = vld [vmem:[#allocation4 + $0x8] sm:$0xff] }
 0x39a   :  { %v2974_v15 = vsel %vm11325_vm0, %v2916_v63, %v2973_v32  ;;  %2827 = vst [vmem:[#allocation3 + $0x44] sm:$0xf] %v2826_v30  ;;  %v10059_v17 = vld [vmem:[#allocation3 + $0x2c] sm:$0xff]  ;;  %v11741_v63 = vld [vmem:[%s13073_s5 + $0x1] ss:$0 sm:$0xff] }
 0x39b   :  { %2975 = vst [vmem:[#allocation3 + $0x34] sm:$0xf] %v2974_v15  ;;  %v2816_v4 = vld [vmem:[#allocation3 + $0x38] sm:$0xf] }
 0x39c   :  { %v2817_v23 = vsel %vm11286_vm14, %v11575_v5, %v2816_v4  ;;  %2651 = vst.msk [vmem:[#allocation3 + $0x3c] sm:$0xf] %vm1595_vm12, %v2616_v18 }
 0x39d   :  { %2818 = vst [vmem:[#allocation3 + $0x38] sm:$0xf] %v2817_v23  ;;  %8833 = vmatmul.msk.bf16.gmra.mxu3 %vm2085_vm1, %v10059_v17 }
 0x3a0   :  { %v2618_v26 = vpop.permute.xlu0 %2617 }
 0x3a1   :  { %2652 = vst.msk [vmem:[#allocation3 + $0x40] sm:$0xf] %vm1595_vm12, %v2618_v26  ;;  %v2918_v3 = vpop.permute.xlu1 %2917  ;;  %v2985_v44 = vld [vmem:[#allocation3 + $0x44] sm:$0xf] }
 0x3a2   :  { %v10046_v56 = vld [vmem:[#allocation3 + $0x30] sm:$0xff] }
 0x3a3   :  { %v10073_v61 = vld [vmem:[#allocation3 + $0x30] sm:$0xff]  ;;  %v2819_v46 = vld [vmem:[#allocation3 + $0x3c] sm:$0xf] }
 0x3a4   :  { %v2820_v33 = vsel %vm11286_vm14, %v11589_v14, %v2819_v46  ;;  %v2976_v11 = vld [vmem:[#allocation3 + $0x38] sm:$0xf]  ;;  %8973 = vmatmul.msk.bf16.gmra.mxu2 %vm2085_vm1, %v10073_v61 }
 0x3a5   :  { %2821 = vst [vmem:[#allocation3 + $0x3c] sm:$0xf] %v2820_v33  ;;  %v2977_v5 = vsel %vm11325_vm0, %v2918_v3, %v2976_v11  ;;  %8898 = vmatmul.msk.bf16.gmra.mxu0 %vm2085_vm1, %v10046_v56 }
 0x3a6   :  { %2978 = vst [vmem:[#allocation3 + $0x38] sm:$0xf] %v2977_v5 }
 0x3a8   :  { %v2822_v35 = vld [vmem:[#allocation3 + $0x40] sm:$0xf]  ;;  %v2920_v43 = vpop.permute.xlu0 %2919 }
 0x3a9   :  { %v2823_v25 = vsel %vm11286_vm14, %v11596_v0, %v2822_v35 }
 0x3aa   :  { %2824 = vst [vmem:[#allocation3 + $0x40] sm:$0xf] %v2823_v25 }
 0x3ac   :  { %v2979_v42 = vld [vmem:[#allocation3 + $0x3c] sm:$0xf] }
 0x3ad   :  { %v2980_v14 = vsel %vm11325_vm0, %v2920_v43, %v2979_v42  ;;  %v10060_v19 = vld [vmem:[#allocation3 + $0x34] sm:$0xff]  ;;  %v10096_v43 = vld [vmem:[%s13072_s4 + $0x148] sm:$0xff] }
 0x3ae   :  { %2981 = vst [vmem:[#allocation3 + $0x3c] sm:$0xf] %v2980_v14  ;;  %8834 = vmatmul.msk.bf16.gmra.mxu3 %vm2085_vm1, %v10060_v19 }
 0x3af   :  { %4404 = vmatpush.bf16.msra.mxu3 %v10096_v43 }
 0x3b0   :  { %v2924_v60 = vpop.permute.xlu0 %2923 }
 0x3b1   :  { %v2982_v49 = vld [vmem:[#allocation3 + $0x40] sm:$0xf]  ;;  %v2986_v22 = vsel %vm11325_vm0, %v2924_v60, %v2985_v44  ;;  %v2622_v2 = vpop.permute.xlu1 %2621 }
 0x3b2   :  { %v2983_v0 = vsel %vm11325_vm0, %v2922_v8, %v2982_v49  ;;  %2987 = vst [vmem:[#allocation3 + $0x44] sm:$0xf] %v2986_v22  ;;  %v3585_v60 = vld [vmem:[#allocation4 + $0x10] sm:$0xff] }
 0x3b3   :  { %2984 = vst [vmem:[#allocation3 + $0x40] sm:$0xf] %v2983_v0 }
 0x3b4   :  { %2654 = vst.msk [vmem:[#allocation3 + $0x48] sm:$0xf] %vm1595_vm12, %v2622_v2 }
 0x3b5   :  { %v10047_v52 = vld [vmem:[#allocation3 + $0x38] sm:$0xff] }
 0x3b6   :  { %v10074_v59 = vld [vmem:[#allocation3 + $0x38] sm:$0xff]  ;;  %8899 = vmatmul.msk.bf16.gmra.mxu0 %vm2085_vm1, %v10047_v52 }
 0x3b7   :  { %8974 = vmatmul.msk.bf16.gmra.mxu2 %vm2085_vm1, %v10074_v59 }
 0x3b9   :  { %v2926_v1 = vpop.permute.xlu1 %2925 }
 0x3ba   :  { %v10061_v54 = vld [vmem:[#allocation3 + $0x3c] sm:$0xff] }
 0x3bb   :  { %v2828_v51 = vld [vmem:[#allocation3 + $0x48] sm:$0xf]  ;;  %v10048_v29 = vld [vmem:[#allocation3 + $0x40] sm:$0xff] }
 0x3bc   :  { %v2829_v12 = vsel %vm11286_vm14, %v11624_v41, %v2828_v51  ;;  %v10075_v10 = vld [vmem:[#allocation3 + $0x40] sm:$0xff] }
 0x3bd   :  { %2830 = vst [vmem:[#allocation3 + $0x48] sm:$0xf] %v2829_v12 }
 0x3be   :  { %8835 = vmatmul.msk.bf16.gmra.mxu3 %vm2085_vm1, %v10061_v54 }
 0x3c4   :  { %v2988_v28 = vld [vmem:[#allocation3 + $0x48] sm:$0xf] }
 0x3c5   :  { %v2989_v58 = vsel %vm11325_vm0, %v2926_v1, %v2988_v28 }
 0x3c6   :  { %2990 = vst [vmem:[#allocation3 + $0x48] sm:$0xf] %v2989_v58  ;;  %8900 = vmatmul.msk.bf16.gmra.mxu0 %vm2085_vm1, %v10048_v29  ;;  %v10110_v58 = vld [vmem:[%s13072_s4 + $0x178] sm:$0xff]  ;;  %v10124_v29 = vld [vmem:[%s13072_s4 + $0x1a8] sm:$0xff] }
 0x3c7   :  { %8975 = vmatmul.msk.bf16.gmra.mxu2 %vm2085_vm1, %v10075_v10  ;;  %4255 = vmatpush.bf16.msrb.mxu1 %v10110_v58  ;;  %v10123_v58 = vld [vmem:[%s13072_s4 + $0x1a0] sm:$0xff] }
 0x3c8   :  { %4582 = vmatpush.bf16.msra.mxu0 %v10124_v29 }
 0x3cc   :  { %4583 = vmatpush.bf16.msra.mxu0 %v10123_v58 }
 0x3cd   :  { %v10062_v21 = vld [vmem:[#allocation3 + $0x44] sm:$0xff] }
 0x3ce   :  { %8836 = vmatmul.msk.bf16.gmra.mxu3 %vm2085_vm1, %v10062_v21  ;;  %v10076_v41 = vld [vmem:[#allocation3 + $0x48] sm:$0xff] }
 0x3d2   :  { %v3307_v20 = vpop.f32.mrf.mxu0 }
 0x3d7   :  { %8976 = vmatmul.msk.bf16.gmra.mxu2 %vm2085_vm1, %v10076_v41 }
 0x3da   :  { %v3309_v27 = vpop.f32.mrf.mxu0 }
 0x3e0   :  { %v3158_v36 = vpop.f32.mrf.mxu3 }
 0x3e1   :  { %v3308_v16 = vadd.f32 %v3307_v20, %v3158_v36  ;;  %v3485_v55 = vpop.f32.mrf.mxu2  ;;  %v3586_v20 = vld [vmem:[#allocation4 + $0x18] sm:$0xff] }
 0x3e2   :  { %v3312_v6 = vpop.f32.mrf.mxu0 }
 0x3e3   :  { %v3525_v53 = vadd.f32 %v3485_v55, %v3308_v16 }
 0x3e5   :  { %v3546_v13 = vmul.f32 %v11741_v63, %v3525_v53 }
 0x3e7   :  { %v3567_v57 = vadd.f32 %v11746_v45, %v3546_v13 }
 0x3e8   :  { %v3160_v38 = vpop.f32.mrf.mxu3 }
 0x3e9   :  { %v3599_v62 = vadd.f32 %v3583_v48, %v3567_v57  ;;  %v3310_v31 = vadd.f32 %v3309_v27, %v3160_v38  ;;  %v3487_v7 = vpop.f32.mrf.mxu2 }
 0x3ea   :  { %v3314_v34 = vpop.f32.mrf.mxu0 }
 0x3eb   :  { %v3615_v9 = vmax.f32 %v3599_v62, 0.0  ;;  %v3526_v24 = vadd.f32 %v3487_v7, %v3310_v31 }
 0x3ed   :  { %3631 = vst.msk [vmem:[#allocation4] sm:$0xff] %vm1481_vm10, %v3615_v9  ;;  %v3547_v47 = vmul.f32 %v11741_v63, %v3526_v24 }
 0x3ef   :  { %v3568_v40 = vadd.f32 %v11746_v45, %v3547_v47 }
 0x3f0   :  { %v3163_v32 = vpop.f32.mrf.mxu3 }
 0x3f1   :  { %v3600_v30 = vadd.f32 %v3584_v39, %v3568_v40  ;;  %v3313_v23 = vadd.f32 %v3312_v6, %v3163_v32 }
 0x3f2   :  { %v3317_v18 = vpop.f32.mrf.mxu0 }
 0x3f3   :  { %v3616_v15 = vmax.f32 %v3600_v30, 0.0 }
 0x3f4   :  { %v3647_v17 = vld [vmem:[#allocation4] sm:$0xff] }
 0x3f5   :  { %3632 = vst.msk [vmem:[#allocation4 + $0x8] sm:$0xff] %vm1481_vm10, %v3616_v15  ;;  %v3663_v4 = vpack.c.bf16 %v3647_v17, %v3647_v17 }
 0x3f7   :  { %3695 = vrot.lane.b32.xlu2 %v3663_v4, %s10286_s2  ;;  %v3490_v26 = vpop.f32.mrf.mxu2  ;;  %v3760_v3 = vshrl.u32 %v3663_v4, 16  ;;  %v3763_v56 = vshll.u32 %v3663_v4, 16 }
 0x3f8   :  { %v3165_v61 = vpop.f32.mrf.mxu3  ;;  %v3527_v46 = vadd.f32 %v3490_v26, %v3313_v23 }
 0x3f9   :  { %v3935_v33 = vrot.slane %v3760_v3, 4  ;;  %v3936_v11 = vrot.slane %v3763_v56, 5  ;;  %v3762_v5 = vrot.slane %v3760_v3, 7  ;;  %v3315_v22 = vadd.f32 %v3314_v34, %v3165_v61  ;;  %v3587_v34 = vld [vmem:[#allocation4 + $0x20] sm:$0xff] }
 0x3fa   :  { %v3548_v35 = vmul.f32 %v11741_v63, %v3527_v46  ;;  %v3319_v25 = vpop.f32.mrf.mxu0 }
 0x3fb   :  { %v3937_v42 = vor.u32 %v3936_v11, %v3935_v33  ;;  %v11759_v14 = vor.u32 %v3763_v56, %v3762_v5  ;;  %v10095_v33 = vld [vmem:[%s13072_s4 + $0x140] sm:$0xff] }
 0x3fc   :  { %v3569_v19 = vadd.f32 %v11746_v45, %v3548_v35  ;;  %v3648_v44 = vld [vmem:[#allocation4 + $0x8] sm:$0xff]  ;;  %4405 = vmatpush.bf16.msra.mxu3 %v10095_v33 }
 0x3fd   :  { %v3664_v8 = vpack.c.bf16 %v3648_v44, %v3648_v44  ;;  %v3938_v49 = vrot.slane %v3937_v42, 4  ;;  %v3588_v35 = vld [vmem:[#allocation4 + $0x28] sm:$0xff] }
 0x3fe   :  { %v3601_v2 = vadd.f32 %v3585_v60, %v3569_v19 }
 0x3ff   :  { %3697 = vrot.lane.b32.xlu0 %v3664_v8, %s10286_s2  ;;  %3999 = vrot.lane.b32.xlu2 %v3938_v49, %s10285_s17  ;;  %v3492_v0 = vpop.f32.mrf.mxu2  ;;  %v3767_v52 = vshrl.u32 %v3664_v8, 16  ;;  %v3770_v12 = vshll.u32 %v3664_v8, 16 }
 0x400   :  { %v3617_v59 = vmax.f32 %v3601_v2, 0.0  ;;  %v3168_v51 = vpop.f32.mrf.mxu3  ;;  %v3528_v54 = vadd.f32 %v3492_v0, %v3315_v22 }
 0x401   :  { %v3769_v28 = vrot.slane %v3767_v52, 7  ;;  %v3318_v27 = vadd.f32 %v3317_v18, %v3168_v51  ;;  %v3939_v57 = vrot.slane %v3767_v52, 4  ;;  %v3940_v48 = vrot.slane %v3770_v12, 5 }
 0x402   :  { %3633 = vst.msk [vmem:[#allocation4 + $0x10] sm:$0xff] %vm1481_vm10, %v3617_v59  ;;  %v3549_v1 = vmul.f32 %v11741_v63, %v3528_v54  ;;  %v3322_v41 = vpop.f32.mrf.mxu0 }
 0x403   :  { %v11772_v10 = vor.u32 %v3770_v12, %v3769_v28  ;;  %v3941_v9 = vor.u32 %v3940_v48, %v3939_v57 }
 0x404   :  { %v3570_v21 = vadd.f32 %v11746_v45, %v3549_v1  ;;  %v10109_v1 = vld [vmem:[%s13072_s4 + $0x170] sm:$0xff] }
 0x405   :  { %v3942_v26 = vrot.slane %v3941_v9, 4  ;;  %4256 = vmatpush.bf16.msrb.mxu1 %v10109_v1 }
 0x406   :  { %v3602_v36 = vadd.f32 %v3586_v20, %v3570_v21  ;;  %v3589_v20 = vld [vmem:[#allocation4 + $0x30] sm:$0xff] }
 0x407   :  { %v3495_v16 = vpop.f32.mrf.mxu2 }
 0x408   :  { %v3618_v55 = vmax.f32 %v3602_v36, 0.0  ;;  %v3170_v6 = vpop.f32.mrf.mxu3  ;;  %v3529_v53 = vadd.f32 %v3495_v16, %v3318_v27 }
 0x409   :  { %v3649_v13 = vld [vmem:[#allocation4 + $0x10] sm:$0xff]  ;;  %v3320_v24 = vadd.f32 %v3319_v25, %v3170_v6 }
 0x40a   :  { %3634 = vst.msk [vmem:[#allocation4 + $0x18] sm:$0xff] %vm1481_vm10, %v3618_v55  ;;  %v3550_v38 = vmul.f32 %v11741_v63, %v3529_v53  ;;  %v3665_v62 = vpack.c.bf16 %v3649_v13, %v3649_v13  ;;  %v3324_v32 = vpop.f32.mrf.mxu0 }
 0x40c   :  { %v3571_v31 = vadd.f32 %v11746_v45, %v3550_v38  ;;  %3699 = vrot.lane.b32.xlu1 %v3665_v62, %s10286_s2  ;;  %v3774_v7 = vshrl.u32 %v3665_v62, 16  ;;  %v3777_v39 = vshll.u32 %v3665_v62, 16 }
 0x40e   :  { %v3603_v47 = vadd.f32 %v3587_v34, %v3571_v31  ;;  %v3776_v40 = vrot.slane %v3774_v7, 7  ;;  %v3943_v61 = vrot.slane %v3774_v7, 4  ;;  %v3944_v46 = vrot.slane %v3777_v39, 5 }
 0x40f   :  { %v3497_v30 = vpop.f32.mrf.mxu2 }
 0x410   :  { %v3619_v18 = vmax.f32 %v3603_v47, 0.0  ;;  %v3173_v15 = vpop.f32.mrf.mxu3  ;;  %v3530_v17 = vadd.f32 %v3497_v30, %v3320_v24  ;;  %v11779_v4 = vor.u32 %v3777_v39, %v3776_v40  ;;  %v3945_v19 = vor.u32 %v3944_v46, %v3943_v61  ;;  %v3590_v39 = vld [vmem:[#allocation4 + $0x38] sm:$0xff]  ;;  %v10094_v30 = vld [vmem:[%s13072_s4 + $0x138] sm:$0xff] }
 0x411   :  { %v3650_v23 = vld [vmem:[#allocation4 + $0x18] sm:$0xff]  ;;  %v3323_v25 = vadd.f32 %v3322_v41, %v3173_v15  ;;  %4406 = vmatpush.bf16.msra.mxu3 %v10094_v30 }
 0x412   :  { %3635 = vst.msk [vmem:[#allocation4 + $0x20] sm:$0xff] %vm1481_vm10, %v3619_v18  ;;  %v3551_v3 = vmul.f32 %v11741_v63, %v3530_v17  ;;  %v3666_v56 = vpack.c.bf16 %v3650_v23, %v3650_v23  ;;  %v3327_v0 = vpop.f32.mrf.mxu0  ;;  %v3946_v12 = vrot.slane %v3945_v19, 4 }
 0x414   :  { %v3572_v11 = vadd.f32 %v11746_v45, %v3551_v3  ;;  %3701 = vrot.lane.b32.xlu0 %v3666_v56, %s10286_s2  ;;  %4001 = vrot.lane.b32.xlu1 %v3942_v26, %s10285_s17  ;;  %v3781_v5 = vshrl.u32 %v3666_v56, 16  ;;  %v3784_v43 = vshll.u32 %v3666_v56, 16 }
 0x416   :  { %v3604_v42 = vadd.f32 %v3588_v35, %v3572_v11  ;;  %v3783_v44 = vrot.slane %v3781_v5, 7  ;;  %v3947_v59 = vrot.slane %v3781_v5, 4  ;;  %v3948_v51 = vrot.slane %v3784_v43, 5 }
 0x417   :  { %v3500_v60 = vpop.f32.mrf.mxu2 }
 0x418   :  { %v3620_v8 = vmax.f32 %v3604_v42, 0.0  ;;  %v3175_v49 = vpop.f32.mrf.mxu3  ;;  %v3531_v22 = vadd.f32 %v3500_v60, %v3323_v25  ;;  %v11789_v2 = vor.u32 %v3784_v43, %v3783_v44  ;;  %v3949_v41 = vor.u32 %v3948_v51, %v3947_v59 }
 0x419   :  { %v3651_v52 = vld [vmem:[#allocation4 + $0x20] sm:$0xff]  ;;  %v3325_v27 = vadd.f32 %v3324_v32, %v3175_v49 }
 0x41a   :  { %3636 = vst.msk [vmem:[#allocation4 + $0x28] sm:$0xff] %vm1481_vm10, %v3620_v8  ;;  %v3552_v54 = vmul.f32 %v11741_v63, %v3531_v22  ;;  %v3667_v28 = vpack.c.bf16 %v3651_v52, %v3651_v52  ;;  %v3950_v62 = vrot.slane %v3949_v41, 4  ;;  %v3329_v24 = vpop.f32.mrf.mxu0  ;;  %v3591_v49 = vld [vmem:[#allocation4 + $0x40] sm:$0xff]  ;;  %v10122_v52 = vld [vmem:[%s13072_s4 + $0x198] sm:$0xff] }
 0x41b   :  { %4584 = vmatpush.bf16.msra.mxu0 %v10122_v52 }
 0x41c   :  { %v3573_v29 = vadd.f32 %v11746_v45, %v3552_v54  ;;  %4003 = vrot.lane.b32.xlu0 %v3946_v12, %s10285_s17  ;;  %3703 = vrot.lane.b32.xlu2 %v3667_v28, %s10286_s2  ;;  %v3788_v21 = vshrl.u32 %v3667_v28, 16  ;;  %v3791_v55 = vshll.u32 %v3667_v28, 16 }
 0x41e   :  { %v3605_v36 = vadd.f32 %v3589_v20, %v3573_v29  ;;  %v3790_v16 = vrot.slane %v3788_v21, 7  ;;  %v3951_v34 = vrot.slane %v3788_v21, 4  ;;  %v3952_v9 = vrot.slane %v3791_v55, 5 }
 0x41f   :  { %v3502_v6 = vpop.f32.mrf.mxu2 }
 0x420   :  { %v3621_v53 = vmax.f32 %v3605_v36, 0.0  ;;  %v3178_v13 = vpop.f32.mrf.mxu3  ;;  %v3532_v57 = vadd.f32 %v3502_v6, %v3325_v27  ;;  %v11802_v48 = vor.u32 %v3791_v55, %v3790_v16  ;;  %v3953_v17 = vor.u32 %v3952_v9, %v3951_v34 }
 0x421   :  { %v3652_v38 = vld [vmem:[#allocation4 + $0x28] sm:$0xff]  ;;  %v3328_v18 = vadd.f32 %v3327_v0, %v3178_v13  ;;  %v10108_v0 = vld [vmem:[%s13072_s4 + $0x168] sm:$0xff] }
 0x422   :  { %3637 = vst.msk [vmem:[#allocation4 + $0x30] sm:$0xff] %vm1481_vm10, %v3621_v53  ;;  %v3553_v31 = vmul.f32 %v11741_v63, %v3532_v57  ;;  %v3668_v7 = vpack.c.bf16 %v3652_v38, %v3652_v38  ;;  %v3954_v25 = vrot.slane %v3953_v17, 4  ;;  %v3332_v60 = vpop.f32.mrf.mxu0  ;;  %4257 = vmatpush.bf16.msrb.mxu1 %v10108_v0  ;;  %v3592_v57 = vld [vmem:[#allocation4 + $0x48] sm:$0xff] }
 0x424   :  { %v3574_v47 = vadd.f32 %v11746_v45, %v3553_v31  ;;  %3705 = vrot.lane.b32.xlu1 %v3668_v7, %s10286_s2  ;;  %4005 = vrot.lane.b32.xlu2 %v3950_v62, %s10285_s17  ;;  %v3795_v40 = vshrl.u32 %v3668_v7, 16  ;;  %v3798_v32 = vshll.u32 %v3668_v7, 16 }
 0x426   :  { %v3606_v15 = vadd.f32 %v3590_v39, %v3574_v47  ;;  %v3797_v23 = vrot.slane %v3795_v40, 7  ;;  %v3955_v11 = vrot.slane %v3795_v40, 4  ;;  %v3956_v5 = vrot.slane %v3798_v32, 5 }
 0x427   :  { %v3505_v26 = vpop.f32.mrf.mxu2 }
 0x428   :  { %v3622_v3 = vmax.f32 %v3606_v15, 0.0  ;;  %v3180_v56 = vpop.f32.mrf.mxu3  ;;  %v3533_v61 = vadd.f32 %v3505_v26, %v3328_v18  ;;  %v11812_v46 = vor.u32 %v3798_v32, %v3797_v23  ;;  %v3957_v22 = vor.u32 %v3956_v5, %v3955_v11  ;;  %v3593_v11 = vld [vmem:[#allocation4 + $0x50] sm:$0xff] }
 0x429   :  { %v3653_v33 = vld [vmem:[#allocation4 + $0x30] sm:$0xff]  ;;  %v3330_v8 = vadd.f32 %v3329_v24, %v3180_v56 }
 0x42a   :  { %3638 = vst.msk [vmem:[#allocation4 + $0x38] sm:$0xff] %vm1481_vm10, %v3622_v3  ;;  %v3554_v35 = vmul.f32 %v11741_v63, %v3533_v61  ;;  %v3669_v43 = vpack.c.bf16 %v3653_v33, %v3653_v33  ;;  %v3958_v36 = vrot.slane %v3957_v22, 4  ;;  %v3334_v34 = vpop.f32.mrf.mxu0  ;;  %v10093_v3 = vld [vmem:[%s13072_s4 + $0x130] sm:$0xff] }
 0x42b   :  { %4407 = vmatpush.bf16.msra.mxu3 %v10093_v3 }
 0x42c   :  { %v3575_v42 = vadd.f32 %v11746_v45, %v3554_v35  ;;  %3707 = vrot.lane.b32.xlu0 %v3669_v43, %s10286_s2  ;;  %4007 = vrot.lane.b32.xlu1 %v3954_v25, %s10285_s17  ;;  %v3802_v19 = vshrl.u32 %v3669_v43, 16  ;;  %v3805_v44 = vshll.u32 %v3669_v43, 16 }
 0x42e   :  { %v3607_v59 = vadd.f32 %v3591_v49, %v3575_v42  ;;  %v3804_v51 = vrot.slane %v3802_v19, 7  ;;  %v3959_v54 = vrot.slane %v3802_v19, 4  ;;  %v3960_v12 = vrot.slane %v3805_v44, 5 }
 0x42f   :  { %v3507_v28 = vpop.f32.mrf.mxu2 }
 0x430   :  { %v3623_v1 = vmax.f32 %v3607_v59, 0.0  ;;  %v3534_v58 = vadd.f32 %v3507_v28, %v3330_v8  ;;  %v11825_v29 = vor.u32 %v3805_v44, %v3804_v51  ;;  %v3961_v21 = vor.u32 %v3960_v12, %v3959_v54  ;;  %v10107_v51 = vld [vmem:[%s13072_s4 + $0x160] sm:$0xff]  ;;  %v10121_v54 = vld [vmem:[%s13072_s4 + $0x190] sm:$0xff] }
 0x431   :  { %v3654_v20 = vld [vmem:[#allocation4 + $0x38] sm:$0xff]  ;;  %v3183_v41 = vpop.f32.mrf.mxu3  ;;  %4258 = vmatpush.bf16.msrb.mxu1 %v10107_v51  ;;  %4585 = vmatpush.bf16.msra.mxu0 %v10121_v54 }
 0x432   :  { %3639 = vst.msk [vmem:[#allocation4 + $0x40] sm:$0xff] %vm1481_vm10, %v3623_v1  ;;  %v3555_v27 = vmul.f32 %v11741_v63, %v3534_v58  ;;  %v3962_v16 = vrot.slane %v3961_v21, 4  ;;  %v3670_v55 = vpack.c.bf16 %v3654_v20, %v3654_v20  ;;  %v3333_v40 = vadd.f32 %v3332_v60, %v3183_v41  ;;  %v3594_v21 = vld [vmem:[#allocation4 + $0x58] sm:$0xff] }
 0x433   :  { %v3337_v35 = vpop.f32.mrf.mxu0 }
 0x434   :  { %v3576_v6 = vadd.f32 %v11746_v45, %v3555_v27  ;;  %4009 = vrot.lane.b32.xlu0 %v3958_v36, %s10285_s17  ;;  %4011 = vrot.lane.b32.xlu1 %v3962_v16, %s10285_s17  ;;  %v3809_v53 = vshrl.u32 %v3670_v55, 16  ;;  %v3812_v13 = vshll.u32 %v3670_v55, 16 }
 0x435   :  { %3709 = vrot.lane.b32.xlu2 %v3670_v55, %s10286_s2 }
 0x436   :  { %v3608_v38 = vadd.f32 %v3592_v57, %v3576_v6  ;;  %v3811_v62 = vrot.slane %v3809_v53, 7  ;;  %v3963_v31 = vrot.slane %v3809_v53, 4  ;;  %v3964_v7 = vrot.slane %v3812_v13, 5 }
 0x438   :  { %v3624_v9 = vmax.f32 %v3608_v38, 0.0  ;;  %v11833_v24 = vor.u32 %v3812_v13, %v3811_v62  ;;  %v3965_v47 = vor.u32 %v3964_v7, %v3963_v31 }
 0x439   :  { %v3655_v39 = vld [vmem:[#allocation4 + $0x40] sm:$0xff]  ;;  %v3185_v32 = vpop.f32.mrf.mxu3 }
 0x43a   :  { %3640 = vst.msk [vmem:[#allocation4 + $0x48] sm:$0xff] %vm1481_vm10, %v3624_v9  ;;  %v3510_v30 = vpop.f32.mrf.mxu2  ;;  %v3966_v18 = vrot.slane %v3965_v47, 4  ;;  %v3671_v15 = vpack.c.bf16 %v3655_v39, %v3655_v39  ;;  %v3335_v43 = vadd.f32 %v3334_v34, %v3185_v32  ;;  %v10092_v34 = vld [vmem:[%s13072_s4 + $0x128] sm:$0xff]  ;;  %v10106_v39 = vld [vmem:[%s13072_s4 + $0x158] sm:$0xff]  ;;  %v3595_v32 = vld [vmem:[#allocation4 + $0x60] sm:$0xff] }
 0x43b   :  { %v3535_v17 = vadd.f32 %v3510_v30, %v3333_v40  ;;  %v3339_v13 = vpop.f32.mrf.mxu0  ;;  %4408 = vmatpush.bf16.msra.mxu3 %v10092_v34  ;;  %v10091_v40 = vld [vmem:[%s13072_s4 + $0x120] sm:$0xff]  ;;  %4259 = vmatpush.bf16.msrb.mxu1 %v10106_v39 }
 0x43c   :  { %4013 = vrot.lane.b32.xlu1 %v3966_v18, %s10285_s17  ;;  %v3816_v23 = vshrl.u32 %v3671_v15, 16  ;;  %v3819_v61 = vshll.u32 %v3671_v15, 16 }
 0x43d   :  { %v3556_v26 = vmul.f32 %v11741_v63, %v3535_v17  ;;  %3711 = vrot.lane.b32.xlu2 %v3671_v15, %s10286_s2 }
 0x43e   :  { %v3818_v56 = vrot.slane %v3816_v23, 7  ;;  %v3967_v8 = vrot.slane %v3816_v23, 4  ;;  %v3968_v49 = vrot.slane %v3819_v61, 5 }
 0x43f   :  { %v3577_v33 = vadd.f32 %v11746_v45, %v3556_v26  ;;  %4409 = vmatpush.bf16.msra.mxu3 %v10091_v40 }
 0x440   :  { %v11843_v5 = vor.u32 %v3819_v61, %v3818_v56  ;;  %v3969_v12 = vor.u32 %v3968_v49, %v3967_v8 }
 0x441   :  { %v3609_v25 = vadd.f32 %v3593_v11, %v3577_v33  ;;  %v3656_v42 = vld [vmem:[#allocation4 + $0x48] sm:$0xff]  ;;  %v3188_v19 = vpop.f32.mrf.mxu3 }
 0x442   :  { %v3512_v44 = vpop.f32.mrf.mxu2  ;;  %v3672_v60 = vpack.c.bf16 %v3656_v42, %v3656_v42  ;;  %v3338_v41 = vadd.f32 %v3337_v35, %v3188_v19  ;;  %v3970_v55 = vrot.slane %v3969_v12, 4 }
 0x443   :  { %v3625_v22 = vmax.f32 %v3609_v25, 0.0  ;;  %v3536_v0 = vadd.f32 %v3512_v44, %v3335_v43 }
 0x444   :  { %3713 = vrot.lane.b32.xlu0 %v3672_v60, %s10286_s2  ;;  %v3823_v52 = vshrl.u32 %v3672_v60, 16  ;;  %v3826_v1 = vshll.u32 %v3672_v60, 16  ;;  %v3342_v60 = vpop.f32.mrf.mxu0 }
 0x445   :  { %3641 = vst.msk [vmem:[#allocation4 + $0x50] sm:$0xff] %vm1481_vm10, %v3625_v22  ;;  %v3557_v59 = vmul.f32 %v11741_v63, %v3536_v0  ;;  %v3596_v22 = vld [vmem:[#allocation4 + $0x68] sm:$0xff] }
 0x446   :  { %v3825_v28 = vrot.slane %v3823_v52, 7  ;;  %v3971_v38 = vrot.slane %v3823_v52, 4  ;;  %v3972_v62 = vrot.slane %v3826_v1, 5 }
 0x447   :  { %v3578_v58 = vadd.f32 %v11746_v45, %v3557_v59 }
 0x448   :  { %v11855_v20 = vor.u32 %v3826_v1, %v3825_v28  ;;  %v3973_v30 = vor.u32 %v3972_v62, %v3971_v38  ;;  %v10120_v28 = vld [vmem:[%s13072_s4 + $0x188] sm:$0xff] }
 0x449   :  { %v3610_v27 = vadd.f32 %v3594_v21, %v3578_v58  ;;  %v3190_v36 = vpop.f32.mrf.mxu3  ;;  %4586 = vmatpush.bf16.msra.mxu0 %v10120_v28 }
 0x44a   :  { %v3515_v16 = vpop.f32.mrf.mxu2  ;;  %v3340_v18 = vadd.f32 %v3339_v13, %v3190_v36  ;;  %v3974_v43 = vrot.slane %v3973_v30, 4 }
 0x44b   :  { %v3626_v6 = vmax.f32 %v3610_v27, 0.0  ;;  %v3537_v53 = vadd.f32 %v3515_v16, %v3338_v41 }
 0x44c   :  { %4015 = vrot.lane.b32.xlu0 %v3970_v55, %s10285_s17  ;;  %v3657_v57 = vld [vmem:[#allocation4 + $0x50] sm:$0xff]  ;;  %v3344_v62 = vpop.f32.mrf.mxu0 }
 0x44d   :  { %3642 = vst.msk [vmem:[#allocation4 + $0x58] sm:$0xff] %vm1481_vm10, %v3626_v6  ;;  %v3558_v31 = vmul.f32 %v11741_v63, %v3537_v53  ;;  %v3673_v7 = vpack.c.bf16 %v3657_v57, %v3657_v57 }
 0x44f   :  { %v3579_v9 = vadd.f32 %v11746_v45, %v3558_v31  ;;  %3715 = vrot.lane.b32.xlu2 %v3673_v7, %s10286_s2  ;;  %v3830_v47 = vshrl.u32 %v3673_v7, 16  ;;  %v3833_v26 = vshll.u32 %v3673_v7, 16  ;;  %v3597_v31 = vld [vmem:[#allocation4 + $0x70] sm:$0xff] }
 0x451   :  { %v3611_v15 = vadd.f32 %v3595_v32, %v3579_v9  ;;  %v3696_v17 = vpop.permute.xlu2 %3695  ;;  %v3832_v23 = vrot.slane %v3830_v47, 7  ;;  %v3193_v11 = vpop.f32.mrf.mxu3  ;;  %v3975_v19 = vrot.slane %v3830_v47, 4  ;;  %v3976_v44 = vrot.slane %v3833_v26, 5 }
 0x452   :  { %v3517_v3 = vpop.f32.mrf.mxu2  ;;  %3743 = vst.msk [vmem:[#allocation3 + $0x4] sm:$0xf] %vm1595_vm12, %v3696_v17  ;;  %v3343_v52 = vadd.f32 %v3342_v60, %v3193_v11 }
 0x453   :  { %v3627_v56 = vmax.f32 %v3611_v15, 0.0  ;;  %v3538_v61 = vadd.f32 %v3517_v3, %v3340_v18  ;;  %v11872_v33 = vor.u32 %v3833_v26, %v3832_v23  ;;  %v3977_v54 = vor.u32 %v3976_v44, %v3975_v19  ;;  %v3598_v44 = vld [vmem:[#allocation4 + $0x78] sm:$0xff] }
 0x454   :  { %v3658_v35 = vld [vmem:[#allocation4 + $0x58] sm:$0xff] }
 0x455   :  { %3643 = vst.msk [vmem:[#allocation4 + $0x60] sm:$0xff] %vm1481_vm10, %v3627_v56  ;;  %v3559_v25 = vmul.f32 %v11741_v63, %v3538_v61  ;;  %v3674_v42 = vpack.c.bf16 %v3658_v35, %v3658_v35  ;;  %v3978_v13 = vrot.slane %v3977_v54, 4 }
 0x457   :  { %v3580_v8 = vadd.f32 %v11746_v45, %v3559_v25  ;;  %3717 = vrot.lane.b32.xlu1 %v3674_v42, %s10286_s2  ;;  %4017 = vrot.lane.b32.xlu2 %v3974_v43, %s10285_s17  ;;  %v3837_v49 = vshrl.u32 %v3674_v42, 16  ;;  %v3840_v0 = vshll.u32 %v3674_v42, 16  ;;  %v10105_v43 = vld [vmem:[%s13072_s4 + $0x150] sm:$0xff]  ;;  %v10119_v25 = vld [vmem:[%s13072_s4 + $0x180] sm:$0xff] }
 0x458   :  { %4260 = vmatpush.bf16.msrb.mxu1 %v10105_v43  ;;  %4587 = vmatpush.bf16.msra.mxu0 %v10119_v25 }
 0x459   :  { %v3612_v59 = vadd.f32 %v3596_v22, %v3580_v8  ;;  %v3887_v51 = vld [vmem:[#allocation3 + $0x4] sm:$0xf]  ;;  %v3839_v12 = vrot.slane %v3837_v49, 7  ;;  %v3979_v16 = vrot.slane %v3837_v49, 4  ;;  %v3980_v55 = vrot.slane %v3840_v0, 5  ;;  %v3195_v57 = vpop.f32.mrf.mxu3  ;;  %v4000_v39 = vpop.permute.xlu2 %3999 }
 0x45a   :  { %v3888_v1 = vsel %vm11286_vm14, %v11759_v14, %v3887_v51  ;;  %v3520_v58 = vpop.f32.mrf.mxu2  ;;  %v3345_v34 = vadd.f32 %v3344_v62, %v3195_v57 }
 0x45b   :  { %v3628_v21 = vmax.f32 %v3612_v59, 0.0  ;;  %3889 = vst [vmem:[#allocation3 + $0x4] sm:$0xf] %v3888_v1  ;;  %v3539_v41 = vadd.f32 %v3520_v58, %v3343_v52  ;;  %v11885_v27 = vor.u32 %v3840_v0, %v3839_v12  ;;  %v3981_v7 = vor.u32 %v3980_v55, %v3979_v16 }
 0x45c   :  { %v3659_v36 = vld [vmem:[#allocation4 + $0x60] sm:$0xff] }
 0x45d   :  { %3644 = vst.msk [vmem:[#allocation4 + $0x68] sm:$0xff] %vm1481_vm10, %v3628_v21  ;;  %v3560_v6 = vmul.f32 %v11741_v63, %v3539_v41  ;;  %v3675_v53 = vpack.c.bf16 %v3659_v36, %v3659_v36  ;;  %v3982_v26 = vrot.slane %v3981_v7, 4 }
 0x45f   :  { %v3581_v38 = vadd.f32 %v11746_v45, %v3560_v6  ;;  %3719 = vrot.lane.b32.xlu0 %v3675_v53, %s10286_s2  ;;  %4019 = vrot.lane.b32.xlu1 %v3978_v13, %s10285_s17  ;;  %v3844_v14 = vshrl.u32 %v3675_v53, 16  ;;  %v3847_v40 = vshll.u32 %v3675_v53, 16 }
 0x461   :  { %v3613_v9 = vadd.f32 %v3597_v31, %v3581_v38  ;;  %v3846_v47 = vrot.slane %v3844_v14, 7  ;;  %v3983_v11 = vrot.slane %v3844_v14, 4  ;;  %v3984_v35 = vrot.slane %v3847_v40, 5 }
 0x462   :  { %v4047_v32 = vld [vmem:[#allocation3 + $0x4] sm:$0xf]  ;;  %v3522_v30 = vpop.f32.mrf.mxu2 }
 0x463   :  { %v3629_v18 = vmax.f32 %v3613_v9, 0.0  ;;  %v4048_v15 = vsel %vm11325_vm0, %v4000_v39, %v4047_v32  ;;  %v3540_v17 = vadd.f32 %v3522_v30, %v3345_v34  ;;  %v11894_v23 = vor.u32 %v3847_v40, %v3846_v47 }
 0x464   :  { %4049 = vst [vmem:[#allocation3 + $0x4] sm:$0xf] %v4048_v15  ;;  %v3660_v3 = vld [vmem:[#allocation4 + $0x68] sm:$0xff]  ;;  %v3985_v60 = vor.u32 %v3984_v35, %v3983_v11 }
 0x465   :  { %3645 = vst.msk [vmem:[#allocation4 + $0x70] sm:$0xff] %vm1481_vm10, %v3629_v18  ;;  %v3561_v56 = vmul.f32 %v11741_v63, %v3540_v17  ;;  %v3676_v61 = vpack.c.bf16 %v3660_v3, %v3660_v3 }
 0x466   :  { %v3986_v51 = vrot.slane %v3985_v60, 4 }
 0x467   :  { %v3582_v42 = vadd.f32 %v11746_v45, %v3561_v56  ;;  %4021 = vrot.lane.b32.xlu0 %v3982_v26, %s10285_s17  ;;  %3721 = vrot.lane.b32.xlu2 %v3676_v61, %s10286_s2  ;;  %v3851_v19 = vshrl.u32 %v3676_v61, 16  ;;  %v3854_v49 = vshll.u32 %v3676_v61, 16 }
 0x469   :  { %v3614_v63 = vadd.f32 %v3598_v44, %v3582_v42  ;;  %v3853_v8 = vrot.slane %v3851_v19, 7  ;;  %v3987_v54 = vrot.slane %v3851_v19, 4  ;;  %v3988_v12 = vrot.slane %v3854_v49, 5 }
 0x46b   :  { %v3630_v22 = vmax.f32 %v3614_v63, 0.0  ;;  %v10083_v0 = vld [vmem:[#allocation3] sm:$0xff]  ;;  %v11907_v52 = vor.u32 %v3854_v49, %v3853_v8  ;;  %v3989_v21 = vor.u32 %v3988_v12, %v3987_v54 }
 0x46c   :  { %v3661_v59 = vld [vmem:[#allocation4 + $0x70] sm:$0xff]  ;;  %9123 = vmatmul.msk.bf16.vlgmr.msra.gmra.mxu3 %vm2085_vm1, %v10083_v0 }
 0x46d   :  { %3646 = vst.msk [vmem:[#allocation4 + $0x78] sm:$0xff] %vm1481_vm10, %v3630_v22  ;;  %v3677_v45 = vpack.c.bf16 %v3661_v59, %v3661_v59  ;;  %v3990_v57 = vrot.slane %v3989_v21, 4 }
 0x46f   :  { %3723 = vrot.lane.b32.xlu1 %v3677_v45, %s10286_s2  ;;  %4023 = vrot.lane.b32.xlu2 %v3986_v51, %s10285_s17  ;;  %v3858_v28 = vshrl.u32 %v3677_v45, 16  ;;  %v3861_v1 = vshll.u32 %v3677_v45, 16 }
 0x471   :  { %v3698_v58 = vpop.permute.xlu0 %3697  ;;  %v3860_v41 = vrot.slane %v3858_v28, 7  ;;  %v3991_v36 = vrot.slane %v3858_v28, 4  ;;  %v3992_v16 = vrot.slane %v3861_v1, 5 }
 0x472   :  { %3744 = vst.msk [vmem:[#allocation3 + $0x8] sm:$0xf] %vm1595_vm12, %v3698_v58 }
 0x473   :  { %v11914_v55 = vor.u32 %v3861_v1, %v3860_v41  ;;  %v3993_v6 = vor.u32 %v3992_v16, %v3991_v36 }
 0x474   :  { %v3662_v53 = vld [vmem:[#allocation4 + $0x78] sm:$0xff] }
 0x475   :  { %v3678_v13 = vpack.c.bf16 %v3662_v53, %v3662_v53  ;;  %v3994_v38 = vrot.slane %v3993_v6, 4 }
 0x476   :  { %v3704_v14 = vpop.permute.xlu2 %3703 }
 0x477   :  { %3725 = vrot.lane.b32.xlu0 %v3678_v13, %s10286_s2  ;;  %4025 = vrot.lane.b32.xlu1 %v3990_v57, %s10285_s17  ;;  %3747 = vst.msk [vmem:[#allocation3 + $0x14] sm:$0xf] %vm1595_vm12, %v3704_v14  ;;  %v3865_v62 = vshrl.u32 %v3678_v13, 16  ;;  %v3868_v31 = vshll.u32 %v3678_v13, 16 }
 0x478   :  { %4027 = vrot.lane.b32.xlu2 %v3994_v38, %s10285_s17 }
 0x479   :  { %v3890_v7 = vld [vmem:[#allocation3 + $0x8] sm:$0xf]  ;;  %v3867_v34 = vrot.slane %v3865_v62, 7  ;;  %v3995_v9 = vrot.slane %v3865_v62, 4  ;;  %v3996_v47 = vrot.slane %v3868_v31, 5 }
 0x47a   :  { %v3891_v40 = vsel %vm11286_vm14, %v11772_v10, %v3890_v7 }
 0x47b   :  { %v11923_v39 = vor.u32 %v3868_v31, %v3867_v34  ;;  %v3997_v32 = vor.u32 %v3996_v47, %v3995_v9  ;;  %3892 = vst [vmem:[#allocation3 + $0x8] sm:$0xf] %v3891_v40 }
 0x47d   :  { %v3998_v30 = vrot.slane %v3997_v32, 4 }
 0x47e   :  { %v3899_v18 = vld [vmem:[#allocation3 + $0x14] sm:$0xf]  ;;  %v3700_v15 = vpop.permute.xlu1 %3699  ;;  %v4006_v61 = vpop.permute.xlu2 %4005 }
 0x47f   :  { %4029 = vrot.lane.b32.xlu0 %v3998_v30, %s10285_s17  ;;  %3745 = vst.msk [vmem:[#allocation3 + $0xc] sm:$0xf] %vm1595_vm12, %v3700_v15  ;;  %v3900_v17 = vsel %vm11286_vm14, %v11802_v48, %v3899_v18 }
 0x480   :  { %3901 = vst [vmem:[#allocation3 + $0x14] sm:$0xf] %v3900_v17 }
 0x482   :  { %v4050_v10 = vld [vmem:[#allocation3 + $0x8] sm:$0xf] }
 0x486   :  { %v3893_v26 = vld [vmem:[#allocation3 + $0xc] sm:$0xf]  ;;  %v3702_v3 = vpop.permute.xlu0 %3701  ;;  %v4002_v56 = vpop.permute.xlu1 %4001 }
 0x487   :  { %3746 = vst.msk [vmem:[#allocation3 + $0x10] sm:$0xf] %vm1595_vm12, %v3702_v3  ;;  %v4051_v11 = vsel %vm11325_vm0, %v4002_v56, %v4050_v10  ;;  %v3894_v35 = vsel %vm11286_vm14, %v11779_v4, %v3893_v26  ;;  %v4059_v12 = vld [vmem:[#allocation3 + $0x14] sm:$0xf] }
 0x488   :  { %4052 = vst [vmem:[#allocation3 + $0x8] sm:$0xf] %v4051_v11 }
 0x489   :  { %3895 = vst [vmem:[#allocation3 + $0xc] sm:$0xf] %v3894_v35 }
 0x48e   :  { %v3896_v43 = vld [vmem:[#allocation3 + $0x10] sm:$0xf]  ;;  %v4004_v25 = vpop.permute.xlu0 %4003 }
 0x48f   :  { %v3897_v48 = vsel %vm11286_vm14, %v11789_v2, %v3896_v43  ;;  %v3710_v42 = vpop.permute.xlu2 %3709  ;;  %v10097_v19 = vld [vmem:[#allocation3 + $0x4] sm:$0xff] }
 0x490   :  { %3898 = vst [vmem:[#allocation3 + $0x10] sm:$0xf] %v3897_v48  ;;  %v4053_v44 = vld [vmem:[#allocation3 + $0xc] sm:$0xf]  ;;  %9059 = vmatmul.msk.bf16.vlgmr.msrb.gmra.mxu1 %vm2085_vm1, %v10097_v19 }
 0x491   :  { %v4054_v63 = vsel %vm11325_vm0, %v4004_v25, %v4053_v44  ;;  %3750 = vst.msk [vmem:[#allocation3 + $0x20] sm:$0xf] %vm1595_vm12, %v3710_v42 }
 0x492   :  { %4055 = vst [vmem:[#allocation3 + $0xc] sm:$0xf] %v4054_v63 }
 0x496   :  { %v3706_v4 = vpop.permute.xlu1 %3705 }
 0x497   :  { %3748 = vst.msk [vmem:[#allocation3 + $0x18] sm:$0xf] %vm1595_vm12, %v3706_v4  ;;  %v3712_v60 = vpop.permute.xlu2 %3711  ;;  %v4056_v8 = vld [vmem:[#allocation3 + $0x10] sm:$0xf] }
 0x498   :  { %v3908_v49 = vld [vmem:[#allocation3 + $0x20] sm:$0xf]  ;;  %3751 = vst.msk [vmem:[#allocation3 + $0x2c] sm:$0xf] %vm1595_vm12, %v3712_v60  ;;  %v4057_v2 = vsel %vm11325_vm0, %v4006_v61, %v4056_v8 }
 0x499   :  { %v3909_v22 = vsel %vm11286_vm14, %v11833_v24, %v3908_v49  ;;  %v10084_v0 = vld [vmem:[#allocation3 + $0x8] sm:$0xff]  ;;  %4058 = vst [vmem:[#allocation3 + $0x10] sm:$0xf] %v4057_v2 }
 0x49a   :  { %v10111_v59 = vld [vmem:[#allocation3 + $0x8] sm:$0xff]  ;;  %3910 = vst [vmem:[#allocation3 + $0x20] sm:$0xf] %v3909_v22  ;;  %9124 = vmatmul.msk.bf16.gmra.mxu3 %vm2085_vm1, %v10084_v0 }
 0x49b   :  { %9199 = vmatmul.msk.bf16.vlgmr.msra.gmra.mxu0 %vm2085_vm1, %v10111_v59 }
 0x49e   :  { %v3902_v45 = vld [vmem:[#allocation3 + $0x18] sm:$0xf]  ;;  %v3708_v51 = vpop.permute.xlu0 %3707  ;;  %v4008_v54 = vpop.permute.xlu1 %4007 }
 0x49f   :  { %v3911_v28 = vld [vmem:[#allocation3 + $0x2c] sm:$0xf]  ;;  %3749 = vst.msk [vmem:[#allocation3 + $0x1c] sm:$0xf] %vm1595_vm12, %v3708_v51  ;;  %v4060_v1 = vsel %vm11325_vm0, %v4008_v54, %v4059_v12  ;;  %v3903_v24 = vsel %vm11286_vm14, %v11812_v46, %v3902_v45 }
 0x4a0   :  { %v3912_v58 = vsel %vm11286_vm14, %v11843_v5, %v3911_v28  ;;  %4061 = vst [vmem:[#allocation3 + $0x14] sm:$0xf] %v4060_v1  ;;  %v10098_v21 = vld [vmem:[#allocation3 + $0xc] sm:$0xff] }
 0x4a1   :  { %3913 = vst [vmem:[#allocation3 + $0x2c] sm:$0xf] %v3912_v58  ;;  %9060 = vmatmul.msk.bf16.gmra.mxu1 %vm2085_vm1, %v10098_v21  ;;  %v4068_v14 = vld [vmem:[#allocation3 + $0x20] sm:$0xf] }
 0x4a2   :  { %3904 = vst [vmem:[#allocation3 + $0x18] sm:$0xf] %v3903_v24 }
 0x4a6   :  { %v3905_v41 = vld [vmem:[#allocation3 + $0x1c] sm:$0xf]  ;;  %v4012_v36 = vpop.permute.xlu1 %4011  ;;  %v4010_v16 = vpop.permute.xlu0 %4009 }
 0x4a7   :  { %v3906_v6 = vsel %vm11286_vm14, %v11825_v29, %v3905_v41  ;;  %v10085_v53 = vld [vmem:[#allocation3 + $0x10] sm:$0xff] }
 0x4a8   :  { %v10112_v13 = vld [vmem:[#allocation3 + $0x10] sm:$0xff]  ;;  %3907 = vst [vmem:[#allocation3 + $0x1c] sm:$0xf] %v3906_v6  ;;  %v4071_v17 = vld [vmem:[#allocation3 + $0x2c] sm:$0xf] }
 0x4a9   :  { %v4062_v46 = vld [vmem:[#allocation3 + $0x18] sm:$0xf]  ;;  %v3716_v57 = vpop.permute.xlu2 %3715 }
 0x4aa   :  { %v4063_v5 = vsel %vm11325_vm0, %v4010_v16, %v4062_v46  ;;  %3753 = vst.msk [vmem:[#allocation3 + $0x34] sm:$0xf] %vm1595_vm12, %v3716_v57  ;;  %9125 = vmatmul.msk.bf16.gmra.mxu3 %vm2085_vm1, %v10085_v53 }
 0x4ab   :  { %4064 = vst [vmem:[#allocation3 + $0x18] sm:$0xf] %v4063_v5  ;;  %9200 = vmatmul.msk.bf16.gmra.mxu0 %vm2085_vm1, %v10112_v13 }
 0x4ae   :  { %v4014_v38 = vpop.permute.xlu1 %4013 }
 0x4af   :  { %v4065_v62 = vld [vmem:[#allocation3 + $0x1c] sm:$0xf]  ;;  %v4069_v29 = vsel %vm11325_vm0, %v4014_v38, %v4068_v14 }
 0x4b0   :  { %v4066_v31 = vsel %vm11325_vm0, %v4012_v36, %v4065_v62  ;;  %4070 = vst [vmem:[#allocation3 + $0x20] sm:$0xf] %v4069_v29 }
 0x4b1   :  { %4067 = vst [vmem:[#allocation3 + $0x1c] sm:$0xf] %v4066_v31  ;;  %v3917_v7 = vld [vmem:[#allocation3 + $0x34] sm:$0xf]  ;;  %v4018_v30 = vpop.permute.xlu2 %4017 }
 0x4b2   :  { %v10099_v34 = vld [vmem:[#allocation3 + $0x14] sm:$0xff]  ;;  %v3918_v9 = vsel %vm11286_vm14, %v11872_v33, %v3917_v7 }
 0x4b3   :  { %3919 = vst [vmem:[#allocation3 + $0x34] sm:$0xf] %v3918_v9  ;;  %9061 = vmatmul.msk.bf16.gmra.mxu1 %vm2085_vm1, %v10099_v34 }
 0x4b6   :  { %v3714_v47 = vpop.permute.xlu0 %3713 }
 0x4b7   :  { %3752 = vst.msk [vmem:[#allocation3 + $0x30] sm:$0xf] %vm1595_vm12, %v3714_v47  ;;  %v10114_v25 = vld [vmem:[#allocation3 + $0x20] sm:$0xff] }
 0x4b8   :  { %v10086_v40 = vld [vmem:[#allocation3 + $0x18] sm:$0xff] }
 0x4b9   :  { %v10113_v32 = vld [vmem:[#allocation3 + $0x18] sm:$0xff] }
 0x4ba   :  { %9126 = vmatmul.msk.bf16.gmra.mxu3 %vm2085_vm1, %v10086_v40  ;;  %v10100_v56 = vld [vmem:[#allocation3 + $0x1c] sm:$0xff]  ;;  %v4077_v63 = vld [vmem:[#allocation3 + $0x34] sm:$0xf] }
 0x4bb   :  { %9201 = vmatmul.msk.bf16.gmra.mxu0 %vm2085_vm1, %v10113_v32  ;;  %v12037_v40 = vld [vmem:[%s13073_s5 + $0x2] ss:$0 sm:$0xff] }
 0x4be   :  { %v3914_v18 = vld [vmem:[#allocation3 + $0x30] sm:$0xf]  ;;  %v4016_v15 = vpop.permute.xlu0 %4015 }
 0x4bf   :  { %v3915_v33 = vsel %vm11286_vm14, %v11855_v20, %v3914_v18  ;;  %v4072_v26 = vsel %vm11325_vm0, %v4016_v15, %v4071_v17  ;;  %v12042_v18 = vld [vmem:[%s13074_s6 + $0x2] ss:$0 sm:$0xff] }
 0x4c0   :  { %3916 = vst [vmem:[#allocation3 + $0x30] sm:$0xf] %v3915_v33 }
 0x4c1   :  { %4073 = vst [vmem:[#allocation3 + $0x2c] sm:$0xf] %v4072_v26  ;;  %v3722_v3 = vpop.permute.xlu2 %3721 }
 0x4c2   :  { %3756 = vst.msk [vmem:[#allocation3 + $0x40] sm:$0xf] %vm1595_vm12, %v3722_v3 }
 0x4c3   :  { %9062 = vmatmul.msk.bf16.gmra.mxu1 %vm2085_vm1, %v10100_v56 }
 0x4c7   :  { %v4074_v10 = vld [vmem:[#allocation3 + $0x30] sm:$0xf] }
 0x4c8   :  { %v10087_v61 = vld [vmem:[#allocation3 + $0x28] sm:$0xff]  ;;  %v4075_v11 = vsel %vm11325_vm0, %v4018_v30, %v4074_v10 }
 0x4c9   :  { %v3926_v35 = vld [vmem:[#allocation3 + $0x40] sm:$0xf]  ;;  %v3718_v43 = vpop.permute.xlu1 %3717  ;;  %4076 = vst [vmem:[#allocation3 + $0x30] sm:$0xf] %v4075_v11  ;;  %v4024_v45 = vpop.permute.xlu2 %4023 }
 0x4ca   :  { %3754 = vst.msk [vmem:[#allocation3 + $0x38] sm:$0xf] %vm1595_vm12, %v3718_v43  ;;  %v3927_v20 = vsel %vm11286_vm14, %v11907_v52, %v3926_v35  ;;  %9127 = vmatmul.msk.bf16.gmra.mxu3 %vm2085_vm1, %v10087_v61 }
 0x4cb   :  { %9202 = vmatmul.msk.bf16.gmra.mxu0 %vm2085_vm1, %v10114_v25  ;;  %3928 = vst [vmem:[#allocation3 + $0x40] sm:$0xf] %v3927_v20  ;;  %v10152_v25 = vld [vmem:[%s13072_s4 + $0x208] sm:$0xff]  ;;  %v10166_v20 = vld [vmem:[%s13072_s4 + $0x238] sm:$0xff] }
 0x4cc   :  { %5295 = vmatpush.bf16.msra.mxu2 %v10152_v25  ;;  %5622 = vmatpush.bf16.msrb.mxu3 %v10166_v20  ;;  %v10137_v25 = vld [vmem:[%s13072_s4 + $0x1d0] sm:$0xff] }
 0x4d0   :  { %v10101_v48 = vld [vmem:[#allocation3 + $0x2c] sm:$0xff] }
 0x4d1   :  { %v3920_v42 = vld [vmem:[#allocation3 + $0x38] sm:$0xf]  ;;  %v3720_v19 = vpop.permute.xlu0 %3719  ;;  %v4020_v44 = vpop.permute.xlu1 %4019 }
 0x4d2   :  { %3755 = vst.msk [vmem:[#allocation3 + $0x3c] sm:$0xf] %vm1595_vm12, %v3720_v19  ;;  %v4078_v4 = vsel %vm11325_vm0, %v4020_v44, %v4077_v63  ;;  %v3921_v60 = vsel %vm11286_vm14, %v11885_v27, %v3920_v42  ;;  %v4086_v24 = vld [vmem:[#allocation3 + $0x40] sm:$0xf]  ;;  %v4028_v6 = vpop.permute.xlu2 %4027  ;;  %v10138_v63 = vld [vmem:[%s13072_s4 + $0x1d8] sm:$0xff] }
 0x4d3   :  { %4079 = vst [vmem:[#allocation3 + $0x34] sm:$0xf] %v4078_v4  ;;  %9063 = vmatmul.msk.bf16.gmra.mxu1 %vm2085_vm1, %v10101_v48 }
 0x4d4   :  { %3922 = vst [vmem:[#allocation3 + $0x38] sm:$0xf] %v3921_v60  ;;  %5444 = vmatpush.bf16.msra.mxu1 %v10138_v63 }
 0x4d8   :  { %5445 = vmatpush.bf16.msra.mxu1 %v10137_v25 }
 0x4d9   :  { %v3923_v52 = vld [vmem:[#allocation3 + $0x3c] sm:$0xf]  ;;  %v4022_v8 = vpop.permute.xlu0 %4021 }
 0x4da   :  { %v3924_v49 = vsel %vm11286_vm14, %v11894_v23, %v3923_v52  ;;  %v10088_v2 = vld [vmem:[#allocation3 + $0x30] sm:$0xff] }
 0x4db   :  { %v10115_v22 = vld [vmem:[#allocation3 + $0x30] sm:$0xff]  ;;  %3925 = vst [vmem:[#allocation3 + $0x3c] sm:$0xf] %v3924_v49  ;;  %v4080_v0 = vld [vmem:[#allocation3 + $0x38] sm:$0xf]  ;;  %9128 = vmatmul.msk.bf16.gmra.mxu3 %vm2085_vm1, %v10088_v2 }
 0x4dc   :  { %v4081_v59 = vsel %vm11325_vm0, %v4022_v8, %v4080_v0  ;;  %9203 = vmatmul.msk.bf16.gmra.mxu0 %vm2085_vm1, %v10115_v22 }
 0x4dd   :  { %4082 = vst [vmem:[#allocation3 + $0x38] sm:$0xf] %v4081_v59 }
 0x4e1   :  { %v3724_v27 = vpop.permute.xlu1 %3723 }
 0x4e2   :  { %3757 = vst.msk [vmem:[#allocation3 + $0x44] sm:$0xf] %vm1595_vm12, %v3724_v27  ;;  %v4083_v51 = vld [vmem:[#allocation3 + $0x3c] sm:$0xf] }
 0x4e3   :  { %v4084_v23 = vsel %vm11325_vm0, %v4024_v45, %v4083_v51 }
 0x4e4   :  { %v10102_v54 = vld [vmem:[#allocation3 + $0x34] sm:$0xff]  ;;  %4085 = vst [vmem:[#allocation3 + $0x3c] sm:$0xf] %v4084_v23 }
 0x4e5   :  { %9064 = vmatmul.msk.bf16.gmra.mxu1 %vm2085_vm1, %v10102_v54 }
 0x4e9   :  { %v3929_v12 = vld [vmem:[#allocation3 + $0x44] sm:$0xf]  ;;  %v3726_v28 = vpop.permute.xlu0 %3725  ;;  %v4026_v1 = vpop.permute.xlu1 %4025 }
 0x4ea   :  { %v3930_v58 = vsel %vm11286_vm14, %v11914_v55, %v3929_v12  ;;  %3758 = vst.msk [vmem:[#allocation3 + $0x48] sm:$0xf] %vm1595_vm12, %v3726_v28  ;;  %v4087_v21 = vsel %vm11325_vm0, %v4026_v1, %v4086_v24 }
 0x4eb   :  { %3931 = vst [vmem:[#allocation3 + $0x44] sm:$0xf] %v3930_v58  ;;  %v10089_v41 = vld [vmem:[#allocation3 + $0x38] sm:$0xff] }
 0x4ec   :  { %v10116_v36 = vld [vmem:[#allocation3 + $0x38] sm:$0xff]  ;;  %4088 = vst [vmem:[#allocation3 + $0x40] sm:$0xf] %v4087_v21  ;;  %9129 = vmatmul.msk.bf16.gmra.mxu3 %vm2085_vm1, %v10089_v41 }
 0x4ed   :  { %9204 = vmatmul.msk.bf16.gmra.mxu0 %vm2085_vm1, %v10116_v36 }
 0x4ef   :  { %v4411_v31 = vpop.f32.mrf.mxu3 }
 0x4f1   :  { %v3932_v16 = vld [vmem:[#allocation3 + $0x48] sm:$0xf]  ;;  %v4030_v5 = vpop.permute.xlu0 %4029 }
 0x4f2   :  { %v3933_v53 = vsel %vm11286_vm14, %v11923_v39, %v3932_v16  ;;  %v4089_v55 = vld [vmem:[#allocation3 + $0x44] sm:$0xf] }
 0x4f3   :  { %3934 = vst [vmem:[#allocation3 + $0x48] sm:$0xf] %v3933_v53  ;;  %v10103_v13 = vld [vmem:[#allocation3 + $0x3c] sm:$0xff]  ;;  %v4090_v46 = vsel %vm11325_vm0, %v4028_v6, %v4089_v55 }
 0x4f4   :  { %4091 = vst [vmem:[#allocation3 + $0x44] sm:$0xf] %v4090_v46 }
 0x4f5   :  { %9065 = vmatmul.msk.bf16.gmra.mxu1 %vm2085_vm1, %v10103_v13 }
 0x4f7   :  { %v4413_v34 = vpop.f32.mrf.mxu3 }
 0x4fa   :  { %v4092_v57 = vld [vmem:[#allocation3 + $0x48] sm:$0xf] }
 0x4fb   :  { %v4093_v38 = vsel %vm11325_vm0, %v4030_v5, %v4092_v57  ;;  %v10090_v14 = vld [vmem:[#allocation3 + $0x40] sm:$0xff] }
 0x4fc   :  { %v10117_v62 = vld [vmem:[#allocation3 + $0x40] sm:$0xff]  ;;  %4094 = vst [vmem:[#allocation3 + $0x48] sm:$0xf] %v4093_v38  ;;  %9130 = vmatmul.msk.bf16.gmra.mxu3 %vm2085_vm1, %v10090_v14 }
 0x4fd   :  { %9205 = vmatmul.msk.bf16.gmra.mxu0 %vm2085_vm1, %v10117_v62 }
 0x503   :  { %v10104_v39 = vld [vmem:[#allocation3 + $0x44] sm:$0xff] }
 0x504   :  { %v10118_v29 = vld [vmem:[#allocation3 + $0x48] sm:$0xff] }
 0x505   :  { %9066 = vmatmul.msk.bf16.gmra.mxu1 %vm2085_vm1, %v10104_v39 }
 0x50d   :  { %9206 = vmatmul.msk.bf16.gmra.mxu0 %vm2085_vm1, %v10118_v29  ;;  %v4262_v7 = vpop.f32.mrf.mxu1 }
 0x50e   :  { %v4412_v47 = vadd.f32 %v4411_v31, %v4262_v7  ;;  %v10151_v31 = vld [vmem:[%s13072_s4 + $0x200] sm:$0xff] }
 0x50f   :  { %5296 = vmatpush.bf16.msra.mxu2 %v10151_v31 }
 0x515   :  { %v4264_v9 = vpop.f32.mrf.mxu1 }
 0x516   :  { %v4414_v26 = vadd.f32 %v4413_v34, %v4264_v9 }
 0x518   :  { %v4589_v32 = vpop.f32.mrf.mxu0 }
 0x519   :  { %v4629_v30 = vadd.f32 %v4589_v32, %v4412_v47 }
 0x51b   :  { %v4650_v15 = vmul.f32 %v12037_v40, %v4629_v30 }
 0x51d   :  { %v4671_v17 = vadd.f32 %v12042_v18, %v4650_v15  ;;  %v4416_v33 = vpop.f32.mrf.mxu3 }
 0x51e   :  { %v4267_v3 = vpop.f32.mrf.mxu1 }
 0x51f   :  { %v4687_v56 = vmax.f32 %v4671_v17, 0.0  ;;  %v4417_v4 = vadd.f32 %v4416_v33, %v4267_v3 }
 0x520   :  { %v4591_v10 = vpop.f32.mrf.mxu0 }
 0x521   :  { %v4630_v61 = vadd.f32 %v4591_v10, %v4414_v26  ;;  %v4703_v11 = vpack.c.bf16 %v4687_v56, %v4687_v56 }
 0x523   :  { %v4651_v35 = vmul.f32 %v12037_v40, %v4630_v61  ;;  %4735 = vrot.lane.b32.xlu1 %v4703_v11, %s10286_s2  ;;  %v4800_v43 = vshrl.u32 %v4703_v11, 16  ;;  %v4803_v42 = vshll.u32 %v4703_v11, 16 }
 0x525   :  { %v4672_v48 = vadd.f32 %v12042_v18, %v4651_v35  ;;  %v4802_v19 = vrot.slane %v4800_v43, 7  ;;  %v4418_v44 = vpop.f32.mrf.mxu3  ;;  %v4975_v0 = vrot.slane %v4800_v43, 4  ;;  %v4976_v59 = vrot.slane %v4803_v42, 5  ;;  %v10165_v43 = vld [vmem:[%s13072_s4 + $0x230] sm:$0xff] }
 0x526   :  { %v4269_v60 = vpop.f32.mrf.mxu1  ;;  %5623 = vmatpush.bf16.msrb.mxu3 %v10165_v43 }
 0x527   :  { %v4688_v52 = vmax.f32 %v4672_v48, 0.0  ;;  %v12058_v8 = vor.u32 %v4803_v42, %v4802_v19  ;;  %v4977_v54 = vor.u32 %v4976_v59, %v4975_v0  ;;  %v4419_v1 = vadd.f32 %v4418_v44, %v4269_v60 }
 0x528   :  { %v4594_v49 = vpop.f32.mrf.mxu0 }
 0x529   :  { %v4631_v2 = vadd.f32 %v4594_v49, %v4417_v4  ;;  %v4704_v22 = vpack.c.bf16 %v4688_v52, %v4688_v52  ;;  %v4978_v55 = vrot.slane %v4977_v54, 4 }
 0x52b   :  { %v4652_v27 = vmul.f32 %v12037_v40, %v4631_v2  ;;  %4737 = vrot.lane.b32.xlu2 %v4704_v22, %s10286_s2  ;;  %v4807_v45 = vshrl.u32 %v4704_v22, 16  ;;  %v4810_v51 = vshll.u32 %v4704_v22, 16 }
 0x52d   :  { %v4673_v23 = vadd.f32 %v12042_v18, %v4652_v27  ;;  %v4809_v12 = vrot.slane %v4807_v45, 7  ;;  %v4421_v28 = vpop.f32.mrf.mxu3  ;;  %v4979_v41 = vrot.slane %v4807_v45, 4  ;;  %v4980_v36 = vrot.slane %v4810_v51, 5 }
 0x52f   :  { %v4689_v24 = vmax.f32 %v4673_v23, 0.0  ;;  %v12063_v58 = vor.u32 %v4810_v51, %v4809_v12  ;;  %v4981_v5 = vor.u32 %v4980_v36, %v4979_v41 }
 0x530   :  { %v4596_v21 = vpop.f32.mrf.mxu0  ;;  %v4272_v16 = vpop.f32.mrf.mxu1 }
 0x531   :  { %v4632_v6 = vadd.f32 %v4596_v21, %v4419_v1  ;;  %v4705_v53 = vpack.c.bf16 %v4689_v24, %v4689_v24  ;;  %v4422_v7 = vadd.f32 %v4421_v28, %v4272_v16  ;;  %v4982_v17 = vrot.slane %v4981_v5, 4 }
 0x533   :  { %v4653_v13 = vmul.f32 %v12037_v40, %v4632_v6  ;;  %4739 = vrot.lane.b32.xlu0 %v4705_v53, %s10286_s2  ;;  %5039 = vrot.lane.b32.xlu2 %v4978_v55, %s10285_s17  ;;  %v4814_v46 = vshrl.u32 %v4705_v53, 16  ;;  %v4817_v57 = vshll.u32 %v4705_v53, 16 }
 0x535   :  { %v4674_v38 = vadd.f32 %v12042_v18, %v4653_v13  ;;  %v4816_v14 = vrot.slane %v4814_v46, 7  ;;  %v4983_v62 = vrot.slane %v4814_v46, 4  ;;  %v4984_v39 = vrot.slane %v4817_v57, 5  ;;  %v4423_v29 = vpop.f32.mrf.mxu3 }
 0x537   :  { %v4690_v34 = vmax.f32 %v4674_v38, 0.0  ;;  %v12072_v9 = vor.u32 %v4817_v57, %v4816_v14  ;;  %v4985_v47 = vor.u32 %v4984_v39, %v4983_v62  ;;  %v10150_v62 = vld [vmem:[%s13072_s4 + $0x1f8] sm:$0xff]  ;;  %v10164_v39 = vld [vmem:[%s13072_s4 + $0x228] sm:$0xff] }
 0x538   :  { %v4599_v32 = vpop.f32.mrf.mxu0  ;;  %v4274_v30 = vpop.f32.mrf.mxu1  ;;  %5297 = vmatpush.bf16.msra.mxu2 %v10150_v62  ;;  %5624 = vmatpush.bf16.msrb.mxu3 %v10164_v39 }
 0x539   :  { %v4633_v15 = vadd.f32 %v4599_v32, %v4422_v7  ;;  %v4706_v33 = vpack.c.bf16 %v4690_v34, %v4690_v34  ;;  %v4986_v26 = vrot.slane %v4985_v47, 4  ;;  %v4424_v20 = vadd.f32 %v4423_v29, %v4274_v30 }
 0x53b   :  { %v4654_v3 = vmul.f32 %v12037_v40, %v4633_v15  ;;  %5041 = vrot.lane.b32.xlu0 %v4982_v17, %s10285_s17  ;;  %4741 = vrot.lane.b32.xlu1 %v4706_v33, %s10286_s2  ;;  %v4821_v56 = vshrl.u32 %v4706_v33, 16  ;;  %v4824_v10 = vshll.u32 %v4706_v33, 16 }
 0x53c   :  { %5043 = vrot.lane.b32.xlu2 %v4986_v26, %s10285_s17 }
 0x53d   :  { %v4675_v61 = vadd.f32 %v12042_v18, %v4654_v3  ;;  %v4823_v11 = vrot.slane %v4821_v56, 7  ;;  %v4426_v35 = vpop.f32.mrf.mxu3  ;;  %v4987_v44 = vrot.slane %v4821_v56, 4  ;;  %v4988_v63 = vrot.slane %v4824_v10, 5 }
 0x53f   :  { %v4691_v48 = vmax.f32 %v4675_v61, 0.0  ;;  %v12085_v42 = vor.u32 %v4824_v10, %v4823_v11  ;;  %v4989_v22 = vor.u32 %v4988_v63, %v4987_v44  ;;  %v10136_v61 = vld [vmem:[%s13072_s4 + $0x1c8] sm:$0xff] }
 0x540   :  { %v4601_v19 = vpop.f32.mrf.mxu0  ;;  %v4277_v4 = vpop.f32.mrf.mxu1  ;;  %5446 = vmatpush.bf16.msra.mxu1 %v10136_v61 }
 0x541   :  { %v4634_v60 = vadd.f32 %v4601_v19, %v4424_v20  ;;  %v4707_v52 = vpack.c.bf16 %v4691_v48, %v4691_v48  ;;  %v4427_v51 = vadd.f32 %v4426_v35, %v4277_v4  ;;  %v4990_v28 = vrot.slane %v4989_v22, 4 }
 0x543   :  { %v4655_v49 = vmul.f32 %v12037_v40, %v4634_v60  ;;  %4743 = vrot.lane.b32.xlu1 %v4707_v52, %s10286_s2  ;;  %v4828_v2 = vshrl.u32 %v4707_v52, 16  ;;  %v4831_v27 = vshll.u32 %v4707_v52, 16 }
 0x545   :  { %v4676_v0 = vadd.f32 %v12042_v18, %v4655_v49  ;;  %v4830_v59 = vrot.slane %v4828_v2, 7  ;;  %v4428_v45 = vpop.f32.mrf.mxu3  ;;  %v4991_v41 = vrot.slane %v4828_v2, 4  ;;  %v4992_v36 = vrot.slane %v4831_v27, 5 }
 0x547   :  { %v4692_v23 = vmax.f32 %v4676_v0, 0.0  ;;  %v12090_v54 = vor.u32 %v4831_v27, %v4830_v59  ;;  %v4993_v55 = vor.u32 %v4992_v36, %v4991_v41 }
 0x548   :  { %v4604_v12 = vpop.f32.mrf.mxu0  ;;  %v4279_v1 = vpop.f32.mrf.mxu1 }
 0x549   :  { %v4635_v24 = vadd.f32 %v4604_v12, %v4427_v51  ;;  %v4708_v21 = vpack.c.bf16 %v4692_v23, %v4692_v23  ;;  %v4429_v5 = vadd.f32 %v4428_v45, %v4279_v1  ;;  %v4994_v34 = vrot.slane %v4993_v55, 4 }
 0x54b   :  { %v4656_v16 = vmul.f32 %v12037_v40, %v4635_v24  ;;  %4745 = vrot.lane.b32.xlu0 %v4708_v21, %s10286_s2  ;;  %5045 = vrot.lane.b32.xlu1 %v4990_v28, %s10285_s17  ;;  %v4835_v6 = vshrl.u32 %v4708_v21, 16  ;;  %v4838_v46 = vshll.u32 %v4708_v21, 16 }
 0x54d   :  { %v4677_v53 = vadd.f32 %v12042_v18, %v4656_v16  ;;  %v4837_v13 = vrot.slane %v4835_v6, 7  ;;  %v4431_v57 = vpop.f32.mrf.mxu3  ;;  %v4995_v32 = vrot.slane %v4835_v6, 4  ;;  %v4996_v30 = vrot.slane %v4838_v46, 5 }
 0x54f   :  { %v4693_v38 = vmax.f32 %v4677_v53, 0.0  ;;  %v12096_v14 = vor.u32 %v4838_v46, %v4837_v13  ;;  %v4997_v35 = vor.u32 %v4996_v30, %v4995_v32  ;;  %v10149_v13 = vld [vmem:[%s13072_s4 + $0x1f0] sm:$0xff]  ;;  %v10163_v46 = vld [vmem:[%s13072_s4 + $0x220] sm:$0xff] }
 0x550   :  { %v4606_v29 = vpop.f32.mrf.mxu0  ;;  %v4282_v31 = vpop.f32.mrf.mxu1  ;;  %5298 = vmatpush.bf16.msra.mxu2 %v10149_v13  ;;  %5625 = vmatpush.bf16.msrb.mxu3 %v10163_v46 }
 0x551   :  { %v4636_v7 = vadd.f32 %v4606_v29, %v4429_v5  ;;  %v4709_v47 = vpack.c.bf16 %v4693_v38, %v4693_v38  ;;  %v4432_v48 = vadd.f32 %v4431_v57, %v4282_v31  ;;  %v4998_v52 = vrot.slane %v4997_v35, 4 }
 0x553   :  { %v4657_v15 = vmul.f32 %v12037_v40, %v4636_v7  ;;  %5047 = vrot.lane.b32.xlu0 %v4994_v34, %s10285_s17  ;;  %4747 = vrot.lane.b32.xlu2 %v4709_v47, %s10286_s2  ;;  %v4842_v17 = vshrl.u32 %v4709_v47, 16  ;;  %v4845_v33 = vshll.u32 %v4709_v47, 16 }
 0x555   :  { %v4844_v26 = vrot.slane %v4842_v17, 7  ;;  %v4999_v3 = vrot.slane %v4842_v17, 4  ;;  %v5000_v56 = vrot.slane %v4845_v33, 5  ;;  %v4678_v10 = vadd.f32 %v12042_v18, %v4657_v15  ;;  %v4433_v11 = vpop.f32.mrf.mxu3 }
 0x557   :  { %v12111_v43 = vor.u32 %v4845_v33, %v4844_v26  ;;  %v5001_v25 = vor.u32 %v5000_v56, %v4999_v3  ;;  %v4694_v20 = vmax.f32 %v4678_v10, 0.0  ;;  %v10135_v3 = vld [vmem:[%s13072_s4 + $0x1c0] sm:$0xff] }
 0x558   :  { %v4284_v19 = vpop.f32.mrf.mxu1  ;;  %5447 = vmatpush.bf16.msra.mxu1 %v10135_v3 }
 0x559   :  { %v4609_v44 = vpop.f32.mrf.mxu0  ;;  %v5002_v63 = vrot.slane %v5001_v25, 4  ;;  %v4710_v4 = vpack.c.bf16 %v4694_v20, %v4694_v20  ;;  %v4434_v28 = vadd.f32 %v4433_v11, %v4284_v19 }
 0x55a   :  { %v4637_v60 = vadd.f32 %v4609_v44, %v4432_v48 }
 0x55b   :  { %5051 = vrot.lane.b32.xlu0 %v5002_v63, %s10285_s17  ;;  %4749 = vrot.lane.b32.xlu1 %v4710_v4, %s10286_s2  ;;  %v4849_v49 = vshrl.u32 %v4710_v4, 16  ;;  %v4852_v2 = vshll.u32 %v4710_v4, 16 }
 0x55c   :  { %v4658_v22 = vmul.f32 %v12037_v40, %v4637_v60  ;;  %5049 = vrot.lane.b32.xlu2 %v4998_v52, %s10285_s17 }
 0x55d   :  { %v4851_v0 = vrot.slane %v4849_v49, 7  ;;  %v5003_v59 = vrot.slane %v4849_v49, 4  ;;  %v5004_v27 = vrot.slane %v4852_v2, 5 }
 0x55e   :  { %v4679_v45 = vadd.f32 %v12042_v18, %v4658_v22  ;;  %v4436_v51 = vpop.f32.mrf.mxu3 }
 0x55f   :  { %v12118_v23 = vor.u32 %v4852_v2, %v4851_v0  ;;  %v5005_v12 = vor.u32 %v5004_v27, %v5003_v59 }
 0x560   :  { %v4695_v1 = vmax.f32 %v4679_v45, 0.0 }
 0x561   :  { %v4611_v24 = vpop.f32.mrf.mxu0  ;;  %v5006_v21 = vrot.slane %v5005_v12, 4 }
 0x562   :  { %v4638_v41 = vadd.f32 %v4611_v24, %v4434_v28  ;;  %v4711_v36 = vpack.c.bf16 %v4695_v1, %v4695_v1  ;;  %v4287_v16 = vpop.f32.mrf.mxu1 }
 0x563   :  { %5053 = vrot.lane.b32.xlu0 %v5006_v21, %s10285_s17  ;;  %v4437_v34 = vadd.f32 %v4436_v51, %v4287_v16 }
 0x564   :  { %v4659_v6 = vmul.f32 %v12037_v40, %v4638_v41  ;;  %4751 = vrot.lane.b32.xlu1 %v4711_v36, %s10286_s2  ;;  %v4856_v53 = vshrl.u32 %v4711_v36, 16  ;;  %v4859_v55 = vshll.u32 %v4711_v36, 16 }
 0x566   :  { %v4858_v57 = vrot.slane %v4856_v53, 7  ;;  %v5007_v5 = vrot.slane %v4856_v53, 4  ;;  %v5008_v38 = vrot.slane %v4859_v55, 5  ;;  %v4680_v62 = vadd.f32 %v12042_v18, %v4659_v6  ;;  %v4438_v39 = vpop.f32.mrf.mxu3 }
 0x568   :  { %v12130_v29 = vor.u32 %v4859_v55, %v4858_v57  ;;  %v5009_v31 = vor.u32 %v5008_v38, %v5007_v5  ;;  %v4696_v7 = vmax.f32 %v4680_v62, 0.0  ;;  %v10148_v38 = vld [vmem:[%s13072_s4 + $0x1e8] sm:$0xff]  ;;  %v10162_v62 = vld [vmem:[%s13072_s4 + $0x218] sm:$0xff] }
 0x569   :  { %5299 = vmatpush.bf16.msra.mxu2 %v10148_v38  ;;  %5626 = vmatpush.bf16.msrb.mxu3 %v10162_v62 }
 0x56a   :  { %v4614_v47 = vpop.f32.mrf.mxu0  ;;  %v5010_v32 = vrot.slane %v5009_v31, 4  ;;  %v4712_v30 = vpack.c.bf16 %v4696_v7, %v4696_v7  ;;  %v4289_v15 = vpop.f32.mrf.mxu1 }
 0x56b   :  { %v4639_v17 = vadd.f32 %v4614_v47, %v4437_v34  ;;  %v4439_v35 = vadd.f32 %v4438_v39, %v4289_v15  ;;  %v10134_v39 = vld [vmem:[%s13072_s4 + $0x1b8] sm:$0xff] }
 0x56c   :  { %5055 = vrot.lane.b32.xlu0 %v5010_v32, %s10285_s17  ;;  %4753 = vrot.lane.b32.xlu2 %v4712_v30, %s10286_s2  ;;  %v4863_v33 = vshrl.u32 %v4712_v30, 16  ;;  %v4866_v10 = vshll.u32 %v4712_v30, 16 }
 0x56d   :  { %v4660_v26 = vmul.f32 %v12037_v40, %v4639_v17  ;;  %5448 = vmatpush.bf16.msra.mxu1 %v10134_v39 }
 0x56e   :  { %v4865_v56 = vrot.slane %v4863_v33, 7  ;;  %v5011_v19 = vrot.slane %v4863_v33, 4  ;;  %v5012_v44 = vrot.slane %v4866_v10, 5 }
 0x56f   :  { %v4681_v61 = vadd.f32 %v12042_v18, %v4660_v26  ;;  %v4441_v20 = vpop.f32.mrf.mxu3 }
 0x570   :  { %v12139_v11 = vor.u32 %v4866_v10, %v4865_v56  ;;  %v5013_v22 = vor.u32 %v5012_v44, %v5011_v19 }
 0x571   :  { %v4697_v25 = vmax.f32 %v4681_v61, 0.0 }
 0x572   :  { %v4616_v48 = vpop.f32.mrf.mxu0  ;;  %v4292_v63 = vpop.f32.mrf.mxu1  ;;  %v5014_v16 = vrot.slane %v5013_v22, 4 }
 0x573   :  { %v4640_v4 = vadd.f32 %v4616_v48, %v4439_v35  ;;  %v4713_v60 = vpack.c.bf16 %v4697_v25, %v4697_v25  ;;  %v4442_v51 = vadd.f32 %v4441_v20, %v4292_v63 }
 0x575   :  { %v4661_v52 = vmul.f32 %v12037_v40, %v4640_v4  ;;  %4755 = vrot.lane.b32.xlu1 %v4713_v60, %s10286_s2  ;;  %v4870_v49 = vshrl.u32 %v4713_v60, 16  ;;  %v4873_v2 = vshll.u32 %v4713_v60, 16 }
 0x577   :  { %v4872_v0 = vrot.slane %v4870_v49, 7  ;;  %v5015_v59 = vrot.slane %v4870_v49, 4  ;;  %v5016_v27 = vrot.slane %v4873_v2, 5  ;;  %v4682_v45 = vadd.f32 %v12042_v18, %v4661_v52  ;;  %v4443_v53 = vpop.f32.mrf.mxu3 }
 0x579   :  { %v12144_v12 = vor.u32 %v4873_v2, %v4872_v0  ;;  %v5017_v28 = vor.u32 %v5016_v27, %v5015_v59  ;;  %v4698_v1 = vmax.f32 %v4682_v45, 0.0 }
 0x57a   :  { %v4619_v24 = vpop.f32.mrf.mxu0  ;;  %v4294_v21 = vpop.f32.mrf.mxu1 }
 0x57b   :  { %v4641_v41 = vadd.f32 %v4619_v24, %v4442_v51  ;;  %v5018_v36 = vrot.slane %v5017_v28, 4  ;;  %v4714_v6 = vpack.c.bf16 %v4698_v1, %v4698_v1  ;;  %v4444_v31 = vadd.f32 %v4443_v53, %v4294_v21  ;;  %v10147_v21 = vld [vmem:[%s13072_s4 + $0x1e0] sm:$0xff] }
 0x57c   :  { %5300 = vmatpush.bf16.msra.mxu2 %v10147_v21 }
 0x57d   :  { %v4662_v55 = vmul.f32 %v12037_v40, %v4641_v41  ;;  %5059 = vrot.lane.b32.xlu0 %v5018_v36, %s10285_s17  ;;  %5057 = vrot.lane.b32.xlu1 %v5014_v16, %s10285_s17  ;;  %v4877_v13 = vshrl.u32 %v4714_v6, 16  ;;  %v4880_v5 = vshll.u32 %v4714_v6, 16  ;;  %v10161_v41 = vld [vmem:[%s13072_s4 + $0x210] sm:$0xff] }
 0x57e   :  { %4757 = vrot.lane.b32.xlu2 %v4714_v6, %s10286_s2  ;;  %5627 = vmatpush.bf16.msrb.mxu3 %v10161_v41 }
 0x57f   :  { %v4683_v46 = vadd.f32 %v12042_v18, %v4662_v55  ;;  %v4879_v57 = vrot.slane %v4877_v13, 7  ;;  %v5019_v17 = vrot.slane %v4877_v13, 4  ;;  %v5020_v33 = vrot.slane %v4880_v5, 5  ;;  %v4446_v10 = vpop.f32.mrf.mxu3 }
 0x581   :  { %v4699_v7 = vmax.f32 %v4683_v46, 0.0  ;;  %v12160_v34 = vor.u32 %v4880_v5, %v4879_v57  ;;  %v5021_v20 = vor.u32 %v5020_v33, %v5019_v17  ;;  %v10133_v17 = vld [vmem:[%s13072_s4 + $0x1b0] sm:$0xff] }
 0x582   :  { %v4621_v47 = vpop.f32.mrf.mxu0  ;;  %v4297_v15 = vpop.f32.mrf.mxu1  ;;  %5449 = vmatpush.bf16.msra.mxu1 %v10133_v17 }
 0x583   :  { %v4642_v32 = vadd.f32 %v4621_v47, %v4444_v31  ;;  %v4715_v30 = vpack.c.bf16 %v4699_v7, %v4699_v7  ;;  %v4447_v48 = vadd.f32 %v4446_v10, %v4297_v15  ;;  %v5022_v2 = vrot.slane %v5021_v20, 4 }
 0x585   :  { %v4663_v26 = vmul.f32 %v12037_v40, %v4642_v32  ;;  %v4738_v3 = vpop.permute.xlu2 %4737  ;;  %v4884_v56 = vshrl.u32 %v4715_v30, 16  ;;  %v4887_v25 = vshll.u32 %v4715_v30, 16 }
 0x586   :  { %4759 = vrot.lane.b32.xlu2 %v4715_v30, %s10286_s2  ;;  %4784 = vst.msk [vmem:[#allocation3 + $0x8] sm:$0xf] %vm1595_vm12, %v4738_v3 }
 0x587   :  { %v4684_v61 = vadd.f32 %v12042_v18, %v4663_v26  ;;  %v4886_v35 = vrot.slane %v4884_v56, 7  ;;  %v5023_v52 = vrot.slane %v4884_v56, 4  ;;  %v5024_v49 = vrot.slane %v4887_v25, 5  ;;  %v4448_v36 = vpop.f32.mrf.mxu3 }
 0x589   :  { %v4700_v19 = vmax.f32 %v4684_v61, 0.0  ;;  %v12166_v44 = vor.u32 %v4887_v25, %v4886_v35  ;;  %v5025_v1 = vor.u32 %v5024_v49, %v5023_v52 }
 0x58a   :  { %v4624_v63 = vpop.f32.mrf.mxu0  ;;  %v4299_v27 = vpop.f32.mrf.mxu1 }
 0x58b   :  { %v4643_v4 = vadd.f32 %v4624_v63, %v4447_v48  ;;  %v4716_v60 = vpack.c.bf16 %v4700_v19, %v4700_v19  ;;  %v4449_v16 = vadd.f32 %v4448_v36, %v4299_v27  ;;  %v5026_v5 = vrot.slane %v5025_v1, 4 }
 0x58d   :  { %v4930_v22 = vld [vmem:[#allocation3 + $0x8] sm:$0xf]  ;;  %v4664_v0 = vmul.f32 %v12037_v40, %v4643_v4  ;;  %4761 = vrot.lane.b32.xlu1 %v4716_v60, %s10286_s2  ;;  %v4891_v59 = vshrl.u32 %v4716_v60, 16  ;;  %v4894_v45 = vshll.u32 %v4716_v60, 16  ;;  %v5040_v61 = vpop.permute.xlu2 %5039 }
 0x58e   :  { %5061 = vrot.lane.b32.xlu2 %v5022_v2, %s10285_s17  ;;  %v4931_v51 = vsel %vm11286_vm14, %v12063_v58, %v4930_v22 }
 0x58f   :  { %v4685_v28 = vadd.f32 %v12042_v18, %v4664_v0  ;;  %v4893_v24 = vrot.slane %v4891_v59, 7  ;;  %4932 = vst [vmem:[#allocation3 + $0x8] sm:$0xf] %v4931_v51  ;;  %v5027_v55 = vrot.slane %v4891_v59, 4  ;;  %v5028_v13 = vrot.slane %v4894_v45, 5 }
 0x591   :  { %v4701_v6 = vmax.f32 %v4685_v28, 0.0  ;;  %v12181_v53 = vor.u32 %v4894_v45, %v4893_v24  ;;  %v5029_v7 = vor.u32 %v5028_v13, %v5027_v55 }
 0x592   :  { %v4626_v58 = vpop.f32.mrf.mxu0 }
 0x593   :  { %v4644_v46 = vadd.f32 %v4626_v58, %v4449_v16  ;;  %v4717_v57 = vpack.c.bf16 %v4701_v6, %v4701_v6  ;;  %v5030_v3 = vrot.slane %v5029_v7, 4 }
 0x595   :  { %v4665_v38 = vmul.f32 %v12037_v40, %v4644_v46  ;;  %4763 = vrot.lane.b32.xlu0 %v4717_v57, %s10286_s2  ;;  %5063 = vrot.lane.b32.xlu1 %v5026_v5, %s10285_s17  ;;  %v4736_v62 = vpop.permute.xlu1 %4735  ;;  %v4898_v39 = vshrl.u32 %v4717_v57, 16  ;;  %v4901_v31 = vshll.u32 %v4717_v57, 16 }
 0x596   :  { %4783 = vst.msk [vmem:[#allocation3 + $0x4] sm:$0xf] %vm1595_vm12, %v4736_v62  ;;  %v5044_v2 = vpop.permute.xlu2 %5043  ;;  %v5090_v27 = vld [vmem:[#allocation3 + $0x8] sm:$0xf] }
 0x597   :  { %v4900_v47 = vrot.slane %v4898_v39, 7  ;;  %v5031_v32 = vrot.slane %v4898_v39, 4  ;;  %v5032_v30 = vrot.slane %v4901_v31, 5  ;;  %v4686_v15 = vadd.f32 %v12042_v18, %v4665_v38 }
 0x599   :  { %v12191_v40 = vor.u32 %v4901_v31, %v4900_v47  ;;  %v5033_v33 = vor.u32 %v5032_v30, %v5031_v32  ;;  %v4702_v26 = vmax.f32 %v4686_v15, 0.0 }
 0x59b   :  { %v5034_v56 = vrot.slane %v5033_v33, 4  ;;  %v4718_v10 = vpack.c.bf16 %v4702_v26, %v4702_v26 }
 0x59d   :  { %v4927_v35 = vld [vmem:[#allocation3 + $0x4] sm:$0xf]  ;;  %5065 = vrot.lane.b32.xlu0 %v5030_v3, %s10285_s17  ;;  %5067 = vrot.lane.b32.xlu1 %v5034_v56, %s10285_s17  ;;  %v4905_v25 = vshrl.u32 %v4718_v10, 16  ;;  %v4908_v18 = vshll.u32 %v4718_v10, 16 }
 0x59e   :  { %v4928_v20 = vsel %vm11286_vm14, %v12058_v8, %v4927_v35  ;;  %4765 = vrot.lane.b32.xlu2 %v4718_v10, %s10286_s2 }
 0x59f   :  { %4929 = vst [vmem:[#allocation3 + $0x4] sm:$0xf] %v4928_v20  ;;  %v4907_v48 = vrot.slane %v4905_v25, 7  ;;  %v5035_v19 = vrot.slane %v4905_v25, 4  ;;  %v5036_v63 = vrot.slane %v4908_v18, 5 }
 0x5a1   :  { %v12199_v4 = vor.u32 %v4908_v18, %v4907_v48  ;;  %v5037_v60 = vor.u32 %v5036_v63, %v5035_v19 }
 0x5a3   :  { %v5038_v52 = vrot.slane %v5037_v60, 4 }
 0x5a5   :  { %v4740_v49 = vpop.permute.xlu0 %4739 }
 0x5a6   :  { %5069 = vrot.lane.b32.xlu2 %v5038_v52, %s10285_s17  ;;  %4785 = vst.msk [vmem:[#allocation3 + $0xc] sm:$0xf] %vm1595_vm12, %v4740_v49  ;;  %v5087_v22 = vld [vmem:[#allocation3 + $0x4] sm:$0xf] }
 0x5a7   :  { %v5088_v8 = vsel %vm11325_vm0, %v5040_v61, %v5087_v22 }
 0x5a8   :  { %5089 = vst [vmem:[#allocation3 + $0x4] sm:$0xf] %v5088_v8 }
 0x5ad   :  { %v4933_v0 = vld [vmem:[#allocation3 + $0xc] sm:$0xf]  ;;  %v5042_v59 = vpop.permute.xlu0 %5041  ;;  %v4742_v45 = vpop.permute.xlu1 %4741 }
 0x5ae   :  { %v4934_v51 = vsel %vm11286_vm14, %v12072_v9, %v4933_v0  ;;  %v5091_v28 = vsel %vm11325_vm0, %v5042_v59, %v5090_v27  ;;  %4786 = vst.msk [vmem:[#allocation3 + $0x10] sm:$0xf] %vm1595_vm12, %v4742_v45  ;;  %v4748_v1 = vpop.permute.xlu2 %4747 }
 0x5af   :  { %4935 = vst [vmem:[#allocation3 + $0xc] sm:$0xf] %v4934_v51  ;;  %v10125_v24 = vld [vmem:[#allocation3] sm:$0xff] }
 0x5b0   :  { %5092 = vst [vmem:[#allocation3 + $0x8] sm:$0xf] %v5091_v28  ;;  %9353 = vmatmul.msk.bf16.vlgmr.msra.gmra.mxu1 %vm2085_vm1, %v10125_v24 }
 0x5b1   :  { %4789 = vst.msk [vmem:[#allocation3 + $0x1c] sm:$0xf] %vm1595_vm12, %v4748_v1 }
 0x5b5   :  { %v4936_v21 = vld [vmem:[#allocation3 + $0x10] sm:$0xf]  ;;  %v4744_v41 = vpop.permute.xlu1 %4743 }
 0x5b6   :  { %4787 = vst.msk [vmem:[#allocation3 + $0x14] sm:$0xf] %vm1595_vm12, %v4744_v41  ;;  %v4937_v9 = vsel %vm11286_vm14, %v12085_v42, %v4936_v21  ;;  %v5093_v36 = vld [vmem:[#allocation3 + $0xc] sm:$0xf]  ;;  %v5050_v5 = vpop.permute.xlu2 %5049 }
 0x5b7   :  { %v10139_v16 = vld [vmem:[#allocation3 + $0x4] sm:$0xff]  ;;  %4938 = vst [vmem:[#allocation3 + $0x10] sm:$0xf] %v4937_v9  ;;  %v5094_v6 = vsel %vm11325_vm0, %v5044_v2, %v5093_v36 }
 0x5b8   :  { %v4945_v58 = vld [vmem:[#allocation3 + $0x1c] sm:$0xf]  ;;  %5095 = vst [vmem:[#allocation3 + $0xc] sm:$0xf] %v5094_v6  ;;  %9289 = vmatmul.msk.bf16.vlgmr.msra.gmra.mxu2 %vm2085_vm1, %v10139_v16 }
 0x5b9   :  { %v4946_v55 = vsel %vm11286_vm14, %v12111_v43, %v4945_v58 }
 0x5ba   :  { %4947 = vst [vmem:[#allocation3 + $0x1c] sm:$0xf] %v4946_v55 }
 0x5bd   :  { %v4939_v13 = vld [vmem:[#allocation3 + $0x14] sm:$0xf]  ;;  %v4746_v46 = vpop.permute.xlu0 %4745  ;;  %v5046_v57 = vpop.permute.xlu1 %5045 }
 0x5be   :  { %4788 = vst.msk [vmem:[#allocation3 + $0x18] sm:$0xf] %vm1595_vm12, %v4746_v46  ;;  %v5096_v42 = vld [vmem:[#allocation3 + $0x10] sm:$0xf]  ;;  %v4940_v38 = vsel %vm11286_vm14, %v12090_v54, %v4939_v13 }
 0x5bf   :  { %v5097_v62 = vsel %vm11325_vm0, %v5046_v57, %v5096_v42  ;;  %v10126_v39 = vld [vmem:[#allocation3 + $0x8] sm:$0xff]  ;;  %4941 = vst [vmem:[#allocation3 + $0x14] sm:$0xf] %v4940_v38 }
 0x5c0   :  { %v10153_v31 = vld [vmem:[#allocation3 + $0x8] sm:$0xff]  ;;  %5098 = vst [vmem:[#allocation3 + $0x10] sm:$0xf] %v5097_v62  ;;  %9354 = vmatmul.msk.bf16.gmra.mxu1 %vm2085_vm1, %v10126_v39 }
 0x5c1   :  { %9429 = vmatmul.msk.bf16.vlgmr.msrb.gmra.mxu3 %vm2085_vm1, %v10153_v31  ;;  %v5105_v33 = vld [vmem:[#allocation3 + $0x1c] sm:$0xf] }
 0x5c5   :  { %v4942_v43 = vld [vmem:[#allocation3 + $0x18] sm:$0xf]  ;;  %v5048_v7 = vpop.permute.xlu0 %5047 }
 0x5c6   :  { %v4943_v47 = vsel %vm11286_vm14, %v12096_v14, %v4942_v43  ;;  %v5099_v32 = vld [vmem:[#allocation3 + $0x14] sm:$0xf]  ;;  %v4754_v30 = vpop.permute.xlu2 %4753 }
 0x5c7   :  { %4944 = vst [vmem:[#allocation3 + $0x18] sm:$0xf] %v4943_v47  ;;  %v5100_v54 = vsel %vm11325_vm0, %v5048_v7, %v5099_v32  ;;  %v10140_v15 = vld [vmem:[#allocation3 + $0xc] sm:$0xff] }
 0x5c8   :  { %5101 = vst [vmem:[#allocation3 + $0x14] sm:$0xf] %v5100_v54  ;;  %9290 = vmatmul.msk.bf16.gmra.mxu2 %vm2085_vm1, %v10140_v15 }
 0x5c9   :  { %4792 = vst.msk [vmem:[#allocation3 + $0x30] sm:$0xf] %vm1595_vm12, %v4754_v30 }
 0x5cd   :  { %v5052_v17 = vpop.permute.xlu0 %5051  ;;  %v4750_v26 = vpop.permute.xlu1 %4749 }
 0x5ce   :  { %v5106_v3 = vsel %vm11325_vm0, %v5052_v17, %v5105_v33  ;;  %4790 = vst.msk [vmem:[#allocation3 + $0x20] sm:$0xf] %vm1595_vm12, %v4750_v26  ;;  %v5102_v14 = vld [vmem:[#allocation3 + $0x18] sm:$0xf] }
 0x5cf   :  { %5107 = vst [vmem:[#allocation3 + $0x1c] sm:$0xf] %v5106_v3  ;;  %v10127_v56 = vld [vmem:[#allocation3 + $0x10] sm:$0xff]  ;;  %v5103_v61 = vsel %vm11325_vm0, %v5050_v5, %v5102_v14 }
 0x5d0   :  { %v10154_v10 = vld [vmem:[#allocation3 + $0x10] sm:$0xff]  ;;  %5104 = vst [vmem:[#allocation3 + $0x18] sm:$0xf] %v5103_v61  ;;  %9355 = vmatmul.msk.bf16.gmra.mxu1 %vm2085_vm1, %v10127_v56 }
 0x5d1   :  { %v4954_v35 = vld [vmem:[#allocation3 + $0x30] sm:$0xf]  ;;  %9430 = vmatmul.msk.bf16.gmra.mxu3 %vm2085_vm1, %v10154_v10 }
 0x5d2   :  { %v4955_v25 = vsel %vm11286_vm14, %v12139_v11, %v4954_v35 }
 0x5d3   :  { %4956 = vst [vmem:[#allocation3 + $0x30] sm:$0xf] %v4955_v25 }
 0x5d5   :  { %v4948_v18 = vld [vmem:[#allocation3 + $0x20] sm:$0xf]  ;;  %v5054_v60 = vpop.permute.xlu0 %5053 }
 0x5d6   :  { %v4949_v20 = vsel %vm11286_vm14, %v12118_v23, %v4948_v18  ;;  %v4752_v48 = vpop.permute.xlu1 %4751 }
 0x5d7   :  { %4950 = vst [vmem:[#allocation3 + $0x20] sm:$0xf] %v4949_v20  ;;  %v10141_v19 = vld [vmem:[#allocation3 + $0x14] sm:$0xff] }
 0x5d8   :  { %4791 = vst.msk [vmem:[#allocation3 + $0x2c] sm:$0xf] %vm1595_vm12, %v4752_v48  ;;  %v4758_v63 = vpop.permute.xlu2 %4757  ;;  %9291 = vmatmul.msk.bf16.gmra.mxu2 %vm2085_vm1, %v10141_v19  ;;  %v10128_v2 = vld [vmem:[#allocation3 + $0x18] sm:$0xff] }
 0x5d9   :  { %4794 = vst.msk [vmem:[#allocation3 + $0x38] sm:$0xf] %vm1595_vm12, %v4758_v63  ;;  %v10155_v22 = vld [vmem:[#allocation3 + $0x18] sm:$0xff] }
 0x5da   :  { %v5114_v16 = vld [vmem:[#allocation3 + $0x30] sm:$0xf] }
 0x5de   :  { %v5108_v52 = vld [vmem:[#allocation3 + $0x20] sm:$0xf]  ;;  %v5056_v51 = vpop.permute.xlu0 %5055 }
 0x5df   :  { %v5109_v11 = vsel %vm11325_vm0, %v5054_v60, %v5108_v52  ;;  %v4951_v49 = vld [vmem:[#allocation3 + $0x2c] sm:$0xf] }
 0x5e0   :  { %5110 = vst [vmem:[#allocation3 + $0x20] sm:$0xf] %v5109_v11  ;;  %v4960_v23 = vld [vmem:[#allocation3 + $0x38] sm:$0xf]  ;;  %v4952_v8 = vsel %vm11286_vm14, %v12130_v29, %v4951_v49  ;;  %v4760_v0 = vpop.permute.xlu2 %4759  ;;  %9356 = vmatmul.msk.bf16.gmra.mxu1 %vm2085_vm1, %v10128_v2 }
 0x5e1   :  { %4953 = vst [vmem:[#allocation3 + $0x2c] sm:$0xf] %v4952_v8  ;;  %9431 = vmatmul.msk.bf16.gmra.mxu3 %vm2085_vm1, %v10155_v22  ;;  %v4961_v59 = vsel %vm11286_vm14, %v12160_v34, %v4960_v23  ;;  %v12317_v22 = vld [vmem:[%s13073_s5 + $0x3] ss:$0 sm:$0xff] }
 0x5e2   :  { %4795 = vst.msk [vmem:[#allocation3 + $0x3c] sm:$0xf] %vm1595_vm12, %v4760_v0 }
 0x5e3   :  { %4962 = vst [vmem:[#allocation3 + $0x38] sm:$0xf] %v4961_v59  ;;  %v12322_v59 = vld [vmem:[%s13074_s6 + $0x3] ss:$0 sm:$0xff] }
 0x5e7   :  { %v4756_v27 = vpop.permute.xlu1 %4755  ;;  %v10142_v45 = vld [vmem:[#allocation3 + $0x1c] sm:$0xff] }
 0x5e8   :  { %v5111_v28 = vld [vmem:[#allocation3 + $0x2c] sm:$0xf]  ;;  %4793 = vst.msk [vmem:[#allocation3 + $0x34] sm:$0xf] %vm1595_vm12, %v4756_v27  ;;  %v5062_v29 = vpop.permute.xlu2 %5061  ;;  %9292 = vmatmul.msk.bf16.gmra.mxu2 %vm2085_vm1, %v10142_v45  ;;  %v10156_v6 = vld [vmem:[#allocation3 + $0x20] sm:$0xff] }
 0x5e9   :  { %v5112_v1 = vsel %vm11325_vm0, %v5056_v51, %v5111_v28  ;;  %v4963_v24 = vld [vmem:[#allocation3 + $0x3c] sm:$0xf]  ;;  %v5727_v28 = vld [vmem:[#allocation4] sm:$0xff] }
 0x5ea   :  { %5113 = vst [vmem:[#allocation3 + $0x2c] sm:$0xf] %v5112_v1  ;;  %v5120_v21 = vld [vmem:[#allocation3 + $0x38] sm:$0xf]  ;;  %v4964_v34 = vsel %vm11286_vm14, %v12166_v44, %v4963_v24 }
 0x5eb   :  { %v5121_v41 = vsel %vm11325_vm0, %v5062_v29, %v5120_v21  ;;  %4965 = vst [vmem:[#allocation3 + $0x3c] sm:$0xf] %v4964_v34 }
 0x5ec   :  { %5122 = vst [vmem:[#allocation3 + $0x38] sm:$0xf] %v5121_v41 }
 0x5ef   :  { %v4957_v9 = vld [vmem:[#allocation3 + $0x34] sm:$0xf]  ;;  %v5058_v36 = vpop.permute.xlu1 %5057  ;;  %v5060_v44 = vpop.permute.xlu0 %5059 }
 0x5f0   :  { %v4958_v58 = vsel %vm11286_vm14, %v12144_v12, %v4957_v9  ;;  %v5115_v55 = vsel %vm11325_vm0, %v5058_v36, %v5114_v16 }
 0x5f1   :  { %4959 = vst [vmem:[#allocation3 + $0x34] sm:$0xf] %v4958_v58  ;;  %v10129_v13 = vld [vmem:[#allocation3 + $0x28] sm:$0xff]  ;;  %9432 = vmatmul.msk.bf16.gmra.mxu3 %vm2085_vm1, %v10156_v6  ;;  %v5728_v6 = vld [vmem:[#allocation4 + $0x8] sm:$0xff] }
 0x5f2   :  { %5116 = vst [vmem:[#allocation3 + $0x30] sm:$0xf] %v5115_v55  ;;  %9357 = vmatmul.msk.bf16.gmra.mxu1 %vm2085_vm1, %v10129_v13  ;;  %v5123_v32 = vld [vmem:[#allocation3 + $0x3c] sm:$0xf] }
 0x5f8   :  { %v5117_v46 = vld [vmem:[#allocation3 + $0x34] sm:$0xf]  ;;  %v4766_v57 = vpop.permute.xlu2 %4765 }
 0x5f9   :  { %v5118_v5 = vsel %vm11325_vm0, %v5060_v44, %v5117_v46  ;;  %4798 = vst.msk [vmem:[#allocation3 + $0x48] sm:$0xf] %vm1595_vm12, %v4766_v57  ;;  %v10143_v42 = vld [vmem:[#allocation3 + $0x2c] sm:$0xff] }
 0x5fa   :  { %5119 = vst [vmem:[#allocation3 + $0x34] sm:$0xf] %v5118_v5  ;;  %9293 = vmatmul.msk.bf16.gmra.mxu2 %vm2085_vm1, %v10143_v42 }
 0x5ff   :  { %v4762_v12 = vpop.permute.xlu1 %4761 }
 0x600   :  { %v4972_v38 = vld [vmem:[#allocation3 + $0x48] sm:$0xf]  ;;  %4796 = vst.msk [vmem:[#allocation3 + $0x40] sm:$0xf] %vm1595_vm12, %v4762_v12  ;;  %v5070_v15 = vpop.permute.xlu2 %5069 }
 0x601   :  { %v4973_v62 = vsel %vm11286_vm14, %v12199_v4, %v4972_v38  ;;  %v10130_v39 = vld [vmem:[#allocation3 + $0x30] sm:$0xff] }
 0x602   :  { %v10157_v31 = vld [vmem:[#allocation3 + $0x30] sm:$0xff]  ;;  %4974 = vst [vmem:[#allocation3 + $0x48] sm:$0xf] %v4973_v62  ;;  %9358 = vmatmul.msk.bf16.gmra.mxu1 %vm2085_vm1, %v10130_v39  ;;  %v10180_v62 = vld [vmem:[%s13072_s4 + $0x268] sm:$0xff] }
 0x603   :  { %9433 = vmatmul.msk.bf16.gmra.mxu3 %vm2085_vm1, %v10157_v31  ;;  %v10144_v17 = vld [vmem:[#allocation3 + $0x34] sm:$0xff]  ;;  %6548 = vmatpush.bf16.msrb.mxu2 %v10180_v62 }
 0x607   :  { %v4966_v43 = vld [vmem:[#allocation3 + $0x40] sm:$0xf]  ;;  %v4764_v7 = vpop.permute.xlu0 %4763  ;;  %v5064_v47 = vpop.permute.xlu1 %5063 }
 0x608   :  { %4797 = vst.msk [vmem:[#allocation3 + $0x44] sm:$0xf] %vm1595_vm12, %v4764_v7  ;;  %v5124_v30 = vsel %vm11325_vm0, %v5064_v47, %v5123_v32  ;;  %v4967_v4 = vsel %vm11286_vm14, %v12181_v53, %v4966_v43  ;;  %v5729_v47 = vld [vmem:[#allocation4 + $0x10] sm:$0xff] }
 0x609   :  { %v5132_v54 = vld [vmem:[#allocation3 + $0x48] sm:$0xf]  ;;  %5125 = vst [vmem:[#allocation3 + $0x3c] sm:$0xf] %v5124_v30 }
 0x60a   :  { %v5133_v33 = vsel %vm11325_vm0, %v5070_v15, %v5132_v54  ;;  %4968 = vst [vmem:[#allocation3 + $0x40] sm:$0xf] %v4967_v4  ;;  %9294 = vmatmul.msk.bf16.gmra.mxu2 %vm2085_vm1, %v10144_v17 }
 0x60b   :  { %5134 = vst [vmem:[#allocation3 + $0x48] sm:$0xf] %v5133_v33 }
 0x60f   :  { %v4969_v26 = vld [vmem:[#allocation3 + $0x44] sm:$0xf]  ;;  %v5066_v3 = vpop.permute.xlu0 %5065  ;;  %v5068_v25 = vpop.permute.xlu1 %5067 }
 0x610   :  { %v4970_v14 = vsel %vm11286_vm14, %v12191_v40, %v4969_v26  ;;  %v10131_v56 = vld [vmem:[#allocation3 + $0x38] sm:$0xff] }
 0x611   :  { %v10158_v10 = vld [vmem:[#allocation3 + $0x38] sm:$0xff]  ;;  %v5126_v53 = vld [vmem:[#allocation3 + $0x40] sm:$0xf]  ;;  %4971 = vst [vmem:[#allocation3 + $0x44] sm:$0xf] %v4970_v14 }
 0x612   :  { %v5127_v61 = vsel %vm11325_vm0, %v5066_v3, %v5126_v53  ;;  %9359 = vmatmul.msk.bf16.gmra.mxu1 %vm2085_vm1, %v10131_v56  ;;  %v10160_v60 = vld [vmem:[#allocation3 + $0x48] sm:$0xff] }
 0x613   :  { %5128 = vst [vmem:[#allocation3 + $0x40] sm:$0xf] %v5127_v61  ;;  %9434 = vmatmul.msk.bf16.gmra.mxu3 %vm2085_vm1, %v10158_v10  ;;  %v10194_v61 = vld [vmem:[%s13072_s4 + $0x298] sm:$0xff] }
 0x614   :  { %6399 = vmatpush.bf16.msrb.mxu0 %v10194_v61 }
 0x618   :  { %v5129_v35 = vld [vmem:[#allocation3 + $0x44] sm:$0xf] }
 0x619   :  { %v5130_v18 = vsel %vm11325_vm0, %v5068_v25, %v5129_v35  ;;  %v10208_v35 = vld [vmem:[%s13072_s4 + $0x2c8] sm:$0xff] }
 0x61a   :  { %5131 = vst [vmem:[#allocation3 + $0x44] sm:$0xf] %v5130_v18  ;;  %v10145_v20 = vld [vmem:[#allocation3 + $0x3c] sm:$0xff]  ;;  %6726 = vmatpush.bf16.msrb.mxu1 %v10208_v35 }
 0x61b   :  { %9295 = vmatmul.msk.bf16.gmra.mxu2 %vm2085_vm1, %v10145_v20 }
 0x621   :  { %v10132_v40 = vld [vmem:[#allocation3 + $0x40] sm:$0xff] }
 0x622   :  { %v10159_v48 = vld [vmem:[#allocation3 + $0x40] sm:$0xff]  ;;  %9360 = vmatmul.msk.bf16.gmra.mxu1 %vm2085_vm1, %v10132_v40 }
 0x623   :  { %9435 = vmatmul.msk.bf16.gmra.mxu3 %vm2085_vm1, %v10159_v48  ;;  %v10146_v19 = vld [vmem:[#allocation3 + $0x44] sm:$0xff] }
 0x624   :  { %v5730_v48 = vld [vmem:[#allocation4 + $0x18] sm:$0xff] }
 0x62b   :  { %9296 = vmatmul.msk.bf16.gmra.mxu2 %vm2085_vm1, %v10146_v19 }
 0x62d   :  { %v5451_v63 = vpop.f32.mrf.mxu1 }
 0x633   :  { %9436 = vmatmul.msk.bf16.gmra.mxu3 %vm2085_vm1, %v10160_v60 }
 0x635   :  { %v5453_v52 = vpop.f32.mrf.mxu1 }
 0x63b   :  { %v5302_v11 = vpop.f32.mrf.mxu2 }
 0x63c   :  { %v5452_v2 = vadd.f32 %v5451_v63, %v5302_v11 }
 0x63d   :  { %v5456_v49 = vpop.f32.mrf.mxu1 }
 0x643   :  { %v5304_v23 = vpop.f32.mrf.mxu2 }
 0x644   :  { %v5629_v8 = vpop.f32.mrf.mxu3  ;;  %v5454_v29 = vadd.f32 %v5453_v52, %v5304_v23 }
 0x645   :  { %v5669_v0 = vadd.f32 %v5629_v8, %v5452_v2  ;;  %v5458_v27 = vpop.f32.mrf.mxu1 }
 0x647   :  { %v5690_v45 = vmul.f32 %v12317_v22, %v5669_v0 }
 0x649   :  { %v5711_v51 = vadd.f32 %v12322_v59, %v5690_v45 }
 0x64b   :  { %v5743_v1 = vadd.f32 %v5727_v28, %v5711_v51  ;;  %v5307_v24 = vpop.f32.mrf.mxu2 }
 0x64c   :  { %v5631_v21 = vpop.f32.mrf.mxu3  ;;  %v5457_v58 = vadd.f32 %v5456_v49, %v5307_v24  ;;  %v5731_v24 = vld [vmem:[#allocation4 + $0x20] sm:$0xff] }
 0x64d   :  { %v5759_v34 = vmax.f32 %v5743_v1, 0.0  ;;  %v5670_v41 = vadd.f32 %v5631_v21, %v5454_v29  ;;  %v5461_v9 = vpop.f32.mrf.mxu1 }
 0x64f   :  { %5775 = vst.msk [vmem:[#allocation4] sm:$0xff] %vm1481_vm10, %v5759_v34  ;;  %v5691_v36 = vmul.f32 %v12317_v22, %v5670_v41 }
 0x651   :  { %v5712_v16 = vadd.f32 %v12322_v59, %v5691_v36 }
 0x653   :  { %v5744_v55 = vadd.f32 %v5728_v6, %v5712_v16  ;;  %v5309_v13 = vpop.f32.mrf.mxu2 }
 0x654   :  { %v5634_v44 = vpop.f32.mrf.mxu3  ;;  %v5459_v7 = vadd.f32 %v5458_v27, %v5309_v13 }
 0x655   :  { %v5760_v46 = vmax.f32 %v5744_v55, 0.0  ;;  %v5671_v57 = vadd.f32 %v5634_v44, %v5457_v58  ;;  %v5463_v12 = vpop.f32.mrf.mxu1 }
 0x656   :  { %v5791_v5 = vld [vmem:[#allocation4] sm:$0xff] }
 0x657   :  { %5776 = vst.msk [vmem:[#allocation4 + $0x8] sm:$0xff] %vm1481_vm10, %v5760_v46  ;;  %v5692_v42 = vmul.f32 %v12317_v22, %v5671_v57  ;;  %v5807_v38 = vpack.c.bf16 %v5791_v5, %v5791_v5 }
 0x659   :  { %v5713_v39 = vadd.f32 %v12322_v59, %v5692_v42  ;;  %5839 = vrot.lane.b32.xlu0 %v5807_v38, %s10286_s2  ;;  %v5904_v31 = vshrl.u32 %v5807_v38, 16  ;;  %v5907_v43 = vshll.u32 %v5807_v38, 16 }
 0x65b   :  { %v5745_v32 = vadd.f32 %v5729_v47, %v5713_v39  ;;  %v5906_v30 = vrot.slane %v5904_v31, 7  ;;  %v6079_v4 = vrot.slane %v5904_v31, 4  ;;  %v6080_v54 = vrot.slane %v5907_v43, 5  ;;  %v5312_v15 = vpop.f32.mrf.mxu2  ;;  %v10179_v31 = vld [vmem:[%s13072_s4 + $0x260] sm:$0xff] }
 0x65c   :  { %v5636_v17 = vpop.f32.mrf.mxu3  ;;  %v5462_v63 = vadd.f32 %v5461_v9, %v5312_v15  ;;  %6549 = vmatpush.bf16.msrb.mxu2 %v10179_v31 }
 0x65d   :  { %v5761_v33 = vmax.f32 %v5745_v32, 0.0  ;;  %v12336_v26 = vor.u32 %v5907_v43, %v5906_v30  ;;  %v5672_v3 = vadd.f32 %v5636_v17, %v5459_v7  ;;  %v6081_v56 = vor.u32 %v6080_v54, %v6079_v4  ;;  %v5466_v20 = vpop.f32.mrf.mxu1  ;;  %v5732_v43 = vld [vmem:[#allocation4 + $0x28] sm:$0xff] }
 0x65e   :  { %v5792_v14 = vld [vmem:[#allocation4 + $0x8] sm:$0xff] }
 0x65f   :  { %5777 = vst.msk [vmem:[#allocation4 + $0x10] sm:$0xff] %vm1481_vm10, %v5761_v33  ;;  %v5693_v10 = vmul.f32 %v12317_v22, %v5672_v3  ;;  %v5808_v53 = vpack.c.bf16 %v5792_v14, %v5792_v14  ;;  %v6082_v25 = vrot.slane %v6081_v56, 4 }
 0x661   :  { %v5714_v18 = vadd.f32 %v12322_v59, %v5693_v10  ;;  %5841 = vrot.lane.b32.xlu1 %v5808_v53, %s10286_s2  ;;  %v5911_v40 = vshrl.u32 %v5808_v53, 16  ;;  %v5914_v19 = vshll.u32 %v5808_v53, 16  ;;  %6143 = vrot.lane.b32.xlu0 %v6082_v25, %s10285_s17 }
 0x663   :  { %v5746_v60 = vadd.f32 %v5730_v48, %v5714_v18  ;;  %v5913_v52 = vrot.slane %v5911_v40, 7  ;;  %v5314_v11 = vpop.f32.mrf.mxu2  ;;  %v6083_v27 = vrot.slane %v5911_v40, 4  ;;  %v6084_v45 = vrot.slane %v5914_v19, 5  ;;  %v10193_v40 = vld [vmem:[%s13072_s4 + $0x290] sm:$0xff]  ;;  %v10207_v48 = vld [vmem:[%s13072_s4 + $0x2c0] sm:$0xff] }
 0x664   :  { %v5639_v49 = vpop.f32.mrf.mxu3  ;;  %v5464_v34 = vadd.f32 %v5463_v12, %v5314_v11  ;;  %6400 = vmatpush.bf16.msrb.mxu0 %v10193_v40  ;;  %6727 = vmatpush.bf16.msrb.mxu1 %v10207_v48 }
 0x665   :  { %v5762_v2 = vmax.f32 %v5746_v60, 0.0  ;;  %v12349_v23 = vor.u32 %v5914_v19, %v5913_v52  ;;  %v5673_v8 = vadd.f32 %v5639_v49, %v5462_v63  ;;  %v6085_v21 = vor.u32 %v6084_v45, %v6083_v27  ;;  %v5468_v9 = vpop.f32.mrf.mxu1  ;;  %v5733_v19 = vld [vmem:[#allocation4 + $0x30] sm:$0xff] }
 0x666   :  { %v5793_v0 = vld [vmem:[#allocation4 + $0x10] sm:$0xff] }
 0x667   :  { %5778 = vst.msk [vmem:[#allocation4 + $0x18] sm:$0xff] %vm1481_vm10, %v5762_v2  ;;  %v5694_v51 = vmul.f32 %v12317_v22, %v5673_v8  ;;  %v5809_v28 = vpack.c.bf16 %v5793_v0, %v5793_v0  ;;  %v6086_v57 = vrot.slane %v6085_v21, 4 }
 0x669   :  { %v5715_v29 = vadd.f32 %v12322_v59, %v5694_v51  ;;  %5843 = vrot.lane.b32.xlu2 %v5809_v28, %s10286_s2  ;;  %v5918_v1 = vshrl.u32 %v5809_v28, 16  ;;  %v5921_v16 = vshll.u32 %v5809_v28, 16 }
 0x66b   :  { %v5747_v41 = vadd.f32 %v5731_v24, %v5715_v29  ;;  %v5920_v36 = vrot.slane %v5918_v1, 7  ;;  %v5317_v6 = vpop.f32.mrf.mxu2  ;;  %v6087_v38 = vrot.slane %v5918_v1, 4  ;;  %v6088_v62 = vrot.slane %v5921_v16, 5 }
 0x66c   :  { %v5641_v58 = vpop.f32.mrf.mxu3  ;;  %v5467_v47 = vadd.f32 %v5466_v20, %v5317_v6 }
 0x66d   :  { %v5763_v55 = vmax.f32 %v5747_v41, 0.0  ;;  %v12355_v13 = vor.u32 %v5921_v16, %v5920_v36  ;;  %v5674_v44 = vadd.f32 %v5641_v58, %v5464_v34  ;;  %v6089_v30 = vor.u32 %v6088_v62, %v6087_v38  ;;  %v10178_v36 = vld [vmem:[%s13072_s4 + $0x258] sm:$0xff]  ;;  %v5734_v16 = vld [vmem:[#allocation4 + $0x38] sm:$0xff] }
 0x66e   :  { %v5794_v46 = vld [vmem:[#allocation4 + $0x18] sm:$0xff]  ;;  %6550 = vmatpush.bf16.msrb.mxu2 %v10178_v36 }
 0x66f   :  { %5779 = vst.msk [vmem:[#allocation4 + $0x20] sm:$0xff] %vm1481_vm10, %v5763_v55  ;;  %v5695_v5 = vmul.f32 %v12317_v22, %v5674_v44  ;;  %v5810_v42 = vpack.c.bf16 %v5794_v46, %v5794_v46  ;;  %v5471_v14 = vpop.f32.mrf.mxu1  ;;  %v6090_v35 = vrot.slane %v6089_v30, 4 }
 0x671   :  { %v5716_v12 = vadd.f32 %v12322_v59, %v5695_v5  ;;  %5845 = vrot.lane.b32.xlu1 %v5810_v42, %s10286_s2  ;;  %6145 = vrot.lane.b32.xlu2 %v6086_v57, %s10285_s17  ;;  %v5925_v39 = vshrl.u32 %v5810_v42, 16  ;;  %v5928_v7 = vshll.u32 %v5810_v42, 16 }
 0x673   :  { %v5748_v32 = vadd.f32 %v5732_v43, %v5716_v12  ;;  %v5927_v4 = vrot.slane %v5925_v39, 7  ;;  %v5319_v54 = vpop.f32.mrf.mxu2  ;;  %v6091_v10 = vrot.slane %v5925_v39, 4  ;;  %v6092_v53 = vrot.slane %v5928_v7, 5 }
 0x674   :  { %v5644_v15 = vpop.f32.mrf.mxu3  ;;  %v5469_v60 = vadd.f32 %v5468_v9, %v5319_v54  ;;  %v10206_v54 = vld [vmem:[%s13072_s4 + $0x2b8] sm:$0xff] }
 0x675   :  { %v5764_v17 = vmax.f32 %v5748_v32, 0.0  ;;  %v5675_v33 = vadd.f32 %v5644_v15, %v5467_v47  ;;  %v12365_v3 = vor.u32 %v5928_v7, %v5927_v4  ;;  %v6093_v63 = vor.u32 %v6092_v53, %v6091_v10  ;;  %v10192_v4 = vld [vmem:[%s13072_s4 + $0x288] sm:$0xff]  ;;  %6728 = vmatpush.bf16.msrb.mxu1 %v10206_v54  ;;  %v5735_v53 = vld [vmem:[#allocation4 + $0x40] sm:$0xff] }
 0x676   :  { %v5795_v56 = vld [vmem:[#allocation4 + $0x20] sm:$0xff]  ;;  %6401 = vmatpush.bf16.msrb.mxu0 %v10192_v4 }
 0x677   :  { %5780 = vst.msk [vmem:[#allocation4 + $0x28] sm:$0xff] %vm1481_vm10, %v5764_v17  ;;  %v5696_v61 = vmul.f32 %v12317_v22, %v5675_v33  ;;  %v5811_v25 = vpack.c.bf16 %v5795_v56, %v5795_v56  ;;  %v6094_v28 = vrot.slane %v6093_v63, 4  ;;  %v5473_v34 = vpop.f32.mrf.mxu1 }
 0x679   :  { %v5717_v18 = vadd.f32 %v12322_v59, %v5696_v61  ;;  %6147 = vrot.lane.b32.xlu1 %v6090_v35, %s10285_s17  ;;  %5847 = vrot.lane.b32.xlu0 %v5811_v25, %s10286_s2  ;;  %v5932_v20 = vshrl.u32 %v5811_v25, 16  ;;  %v5935_v49 = vshll.u32 %v5811_v25, 16 }
 0x67b   :  { %v5749_v52 = vadd.f32 %v5733_v19, %v5717_v18  ;;  %v5934_v11 = vrot.slane %v5932_v20, 7  ;;  %v6095_v24 = vrot.slane %v5932_v20, 4  ;;  %v6096_v21 = vrot.slane %v5935_v49, 5 }
 0x67c   :  { %v5646_v2 = vpop.f32.mrf.mxu3 }
 0x67d   :  { %v5765_v8 = vmax.f32 %v5749_v52, 0.0  ;;  %v5676_v0 = vadd.f32 %v5646_v2, %v5469_v60  ;;  %v12378_v27 = vor.u32 %v5935_v49, %v5934_v11  ;;  %v5322_v45 = vpop.f32.mrf.mxu2  ;;  %v6097_v55 = vor.u32 %v6096_v21, %v6095_v24 }
 0x67e   :  { %v5796_v51 = vld [vmem:[#allocation4 + $0x28] sm:$0xff]  ;;  %v5472_v46 = vadd.f32 %v5471_v14, %v5322_v45 }
 0x67f   :  { %5781 = vst.msk [vmem:[#allocation4 + $0x30] sm:$0xff] %vm1481_vm10, %v5765_v8  ;;  %v5697_v29 = vmul.f32 %v12317_v22, %v5676_v0  ;;  %v5812_v1 = vpack.c.bf16 %v5796_v51, %v5796_v51  ;;  %v6098_v7 = vrot.slane %v6097_v55, 4  ;;  %v5476_v15 = vpop.f32.mrf.mxu1  ;;  %v5736_v51 = vld [vmem:[#allocation4 + $0x48] sm:$0xff] }
 0x681   :  { %v5718_v41 = vadd.f32 %v12322_v59, %v5697_v29  ;;  %5849 = vrot.lane.b32.xlu2 %v5812_v1, %s10286_s2  ;;  %6149 = vrot.lane.b32.xlu0 %v6094_v28, %s10285_s17  ;;  %v5939_v9 = vshrl.u32 %v5812_v1, 16  ;;  %v5942_v6 = vshll.u32 %v5812_v1, 16 }
 0x683   :  { %v5750_v58 = vadd.f32 %v5734_v16, %v5718_v41  ;;  %v5941_v44 = vrot.slane %v5939_v9, 7  ;;  %v6099_v12 = vrot.slane %v5939_v9, 4  ;;  %v6100_v39 = vrot.slane %v5942_v6, 5 }
 0x685   :  { %v5766_v57 = vmax.f32 %v5750_v58, 0.0  ;;  %v12388_v5 = vor.u32 %v5942_v6, %v5941_v44  ;;  %v5324_v42 = vpop.f32.mrf.mxu2  ;;  %v6101_v17 = vor.u32 %v6100_v39, %v6099_v12 }
 0x686   :  { %v5649_v38 = vpop.f32.mrf.mxu3  ;;  %v5797_v62 = vld [vmem:[#allocation4 + $0x30] sm:$0xff]  ;;  %v5474_v61 = vadd.f32 %v5473_v34, %v5324_v42 }
 0x687   :  { %5782 = vst.msk [vmem:[#allocation4 + $0x38] sm:$0xff] %vm1481_vm10, %v5766_v57  ;;  %v5677_v31 = vadd.f32 %v5649_v38, %v5472_v46  ;;  %v5813_v43 = vpack.c.bf16 %v5797_v62, %v5797_v62  ;;  %v6102_v60 = vrot.slane %v6101_v17, 4  ;;  %v5478_v45 = vpop.f32.mrf.mxu1  ;;  %v10177_v57 = vld [vmem:[%s13072_s4 + $0x250] sm:$0xff]  ;;  %v5737_v62 = vld [vmem:[#allocation4 + $0x50] sm:$0xff] }
 0x688   :  { %6551 = vmatpush.bf16.msrb.mxu2 %v10177_v57 }
 0x689   :  { %v5698_v47 = vmul.f32 %v12317_v22, %v5677_v31  ;;  %5851 = vrot.lane.b32.xlu1 %v5813_v43, %s10286_s2  ;;  %6151 = vrot.lane.b32.xlu2 %v6098_v7, %s10285_s17  ;;  %v5946_v32 = vshrl.u32 %v5813_v43, 16  ;;  %v5949_v30 = vshll.u32 %v5813_v43, 16 }
 0x68b   :  { %v5719_v33 = vadd.f32 %v12322_v59, %v5698_v47  ;;  %v5948_v14 = vrot.slane %v5946_v32, 7  ;;  %v6103_v56 = vrot.slane %v5946_v32, 4  ;;  %v6104_v10 = vrot.slane %v5949_v30, 5 }
 0x68d   :  { %v5751_v35 = vadd.f32 %v5735_v53, %v5719_v33  ;;  %v12401_v25 = vor.u32 %v5949_v30, %v5948_v14  ;;  %v6105_v18 = vor.u32 %v6104_v10, %v6103_v56  ;;  %v5327_v20 = vpop.f32.mrf.mxu2  ;;  %v10191_v10 = vld [vmem:[%s13072_s4 + $0x280] sm:$0xff]  ;;  %v10205_v53 = vld [vmem:[%s13072_s4 + $0x2b0] sm:$0xff] }
 0x68e   :  { %v5651_v40 = vpop.f32.mrf.mxu3  ;;  %v5798_v48 = vld [vmem:[#allocation4 + $0x38] sm:$0xff]  ;;  %v5477_v24 = vadd.f32 %v5476_v15, %v5327_v20  ;;  %6402 = vmatpush.bf16.msrb.mxu0 %v10191_v10  ;;  %6729 = vmatpush.bf16.msrb.mxu1 %v10205_v53 }
 0x68f   :  { %v5767_v19 = vmax.f32 %v5751_v35, 0.0  ;;  %v5678_v63 = vadd.f32 %v5651_v40, %v5474_v61  ;;  %v6106_v52 = vrot.slane %v6105_v18, 4  ;;  %v5814_v11 = vpack.c.bf16 %v5798_v48, %v5798_v48  ;;  %v5481_v7 = vpop.f32.mrf.mxu1  ;;  %v5738_v18 = vld [vmem:[#allocation4 + $0x58] sm:$0xff] }
 0x691   :  { %5783 = vst.msk [vmem:[#allocation4 + $0x40] sm:$0xff] %vm1481_vm10, %v5767_v19  ;;  %v5699_v49 = vmul.f32 %v12317_v22, %v5678_v63  ;;  %6153 = vrot.lane.b32.xlu1 %v6102_v60, %s10285_s17  ;;  %6155 = vrot.lane.b32.xlu2 %v6106_v52, %s10285_s17  ;;  %v5953_v2 = vshrl.u32 %v5814_v11, 16  ;;  %v5956_v8 = vshll.u32 %v5814_v11, 16 }
 0x692   :  { %5853 = vrot.lane.b32.xlu0 %v5814_v11, %s10286_s2 }
 0x693   :  { %v5720_v0 = vadd.f32 %v12322_v59, %v5699_v49  ;;  %v5955_v28 = vrot.slane %v5953_v2, 7  ;;  %v6107_v29 = vrot.slane %v5953_v2, 4  ;;  %v6108_v1 = vrot.slane %v5956_v8, 5 }
 0x695   :  { %v5752_v21 = vadd.f32 %v5736_v51, %v5720_v0  ;;  %v5329_v34 = vpop.f32.mrf.mxu2  ;;  %v12409_v9 = vor.u32 %v5956_v8, %v5955_v28  ;;  %v6109_v36 = vor.u32 %v6108_v1, %v6107_v29 }
 0x696   :  { %v5654_v41 = vpop.f32.mrf.mxu3  ;;  %v5479_v12 = vadd.f32 %v5478_v45, %v5329_v34  ;;  %v10176_v34 = vld [vmem:[%s13072_s4 + $0x248] sm:$0xff] }
 0x697   :  { %v5768_v16 = vmax.f32 %v5752_v21, 0.0  ;;  %v5679_v6 = vadd.f32 %v5654_v41, %v5477_v24  ;;  %v6110_v58 = vrot.slane %v6109_v36, 4  ;;  %v5483_v8 = vpop.f32.mrf.mxu1  ;;  %v5739_v41 = vld [vmem:[#allocation4 + $0x60] sm:$0xff]  ;;  %6552 = vmatpush.bf16.msrb.mxu2 %v10176_v34  ;;  %v10175_v34 = vld [vmem:[%s13072_s4 + $0x240] sm:$0xff] }
 0x698   :  { %v5799_v55 = vld [vmem:[#allocation4 + $0x40] sm:$0xff] }
 0x699   :  { %5784 = vst.msk [vmem:[#allocation4 + $0x48] sm:$0xff] %vm1481_vm10, %v5768_v16  ;;  %v5700_v44 = vmul.f32 %v12317_v22, %v5679_v6  ;;  %v5815_v46 = vpack.c.bf16 %v5799_v55, %v5799_v55  ;;  %6157 = vrot.lane.b32.xlu2 %v6110_v58, %s10285_s17 }
 0x69b   :  { %v5721_v42 = vadd.f32 %v12322_v59, %v5700_v44  ;;  %5855 = vrot.lane.b32.xlu0 %v5815_v46, %s10286_s2  ;;  %v5960_v38 = vshrl.u32 %v5815_v46, 16  ;;  %v5963_v43 = vshll.u32 %v5815_v46, 16  ;;  %6553 = vmatpush.bf16.msrb.mxu2 %v10175_v34 }
 0x69d   :  { %v5753_v39 = vadd.f32 %v5737_v62, %v5721_v42  ;;  %v5962_v31 = vrot.slane %v5960_v38, 7  ;;  %v6111_v14 = vrot.slane %v5960_v38, 4  ;;  %v6112_v56 = vrot.slane %v5963_v43, 5 }
 0x69e   :  { %v5656_v47 = vpop.f32.mrf.mxu3  ;;  %v5332_v30 = vpop.f32.mrf.mxu2 }
 0x69f   :  { %v5769_v32 = vmax.f32 %v5753_v39, 0.0  ;;  %v5680_v4 = vadd.f32 %v5656_v47, %v5479_v12  ;;  %v12419_v54 = vor.u32 %v5963_v43, %v5962_v31  ;;  %v5482_v40 = vadd.f32 %v5481_v7, %v5332_v30  ;;  %v5486_v47 = vpop.f32.mrf.mxu1 }
 0x6a0   :  { %v5800_v15 = vld [vmem:[#allocation4 + $0x48] sm:$0xff]  ;;  %v6113_v19 = vor.u32 %v6112_v56, %v6111_v14 }
 0x6a1   :  { %5785 = vst.msk [vmem:[#allocation4 + $0x50] sm:$0xff] %vm1481_vm10, %v5769_v32  ;;  %v5701_v17 = vmul.f32 %v12317_v22, %v5680_v4  ;;  %v5816_v33 = vpack.c.bf16 %v5800_v15, %v5800_v15  ;;  %v10190_v4 = vld [vmem:[%s13072_s4 + $0x278] sm:$0xff]  ;;  %v10204_v15 = vld [vmem:[%s13072_s4 + $0x2a8] sm:$0xff] }
 0x6a2   :  { %v6114_v29 = vrot.slane %v6113_v19, 4  ;;  %6403 = vmatpush.bf16.msrb.mxu0 %v10190_v4  ;;  %6730 = vmatpush.bf16.msrb.mxu1 %v10204_v15 }
 0x6a3   :  { %v5722_v61 = vadd.f32 %v12322_v59, %v5701_v17  ;;  %5857 = vrot.lane.b32.xlu1 %v5816_v33, %s10286_s2  ;;  %v5967_v35 = vshrl.u32 %v5816_v33, 16  ;;  %v5970_v20 = vshll.u32 %v5816_v33, 16  ;;  %v5740_v17 = vld [vmem:[#allocation4 + $0x68] sm:$0xff] }
 0x6a5   :  { %v5754_v48 = vadd.f32 %v5738_v18, %v5722_v61  ;;  %v5969_v63 = vrot.slane %v5967_v35, 7  ;;  %v6115_v45 = vrot.slane %v5967_v35, 4  ;;  %v6116_v51 = vrot.slane %v5970_v20, 5 }
 0x6a6   :  { %v5659_v60 = vpop.f32.mrf.mxu3  ;;  %v5334_v11 = vpop.f32.mrf.mxu2 }
 0x6a7   :  { %v5770_v52 = vmax.f32 %v5754_v48, 0.0  ;;  %v5681_v49 = vadd.f32 %v5659_v60, %v5482_v40  ;;  %v12431_v2 = vor.u32 %v5970_v20, %v5969_v63  ;;  %v6117_v36 = vor.u32 %v6116_v51, %v6115_v45  ;;  %v5741_v45 = vld [vmem:[#allocation4 + $0x70] sm:$0xff] }
 0x6a8   :  { %v5801_v0 = vld [vmem:[#allocation4 + $0x50] sm:$0xff]  ;;  %v5484_v16 = vadd.f32 %v5483_v8, %v5334_v11 }
 0x6a9   :  { %5786 = vst.msk [vmem:[#allocation4 + $0x58] sm:$0xff] %vm1481_vm10, %v5770_v52  ;;  %v5702_v28 = vmul.f32 %v12317_v22, %v5681_v49  ;;  %v5817_v1 = vpack.c.bf16 %v5801_v0, %v5801_v0  ;;  %v6118_v12 = vrot.slane %v6117_v36, 4  ;;  %v5488_v0 = vpop.f32.mrf.mxu1 }
 0x6ab   :  { %v5723_v24 = vadd.f32 %v12322_v59, %v5702_v28  ;;  %6159 = vrot.lane.b32.xlu1 %v6114_v29, %s10285_s17  ;;  %5859 = vrot.lane.b32.xlu0 %v5817_v1, %s10286_s2  ;;  %v5974_v21 = vshrl.u32 %v5817_v1, 16  ;;  %v5977_v55 = vshll.u32 %v5817_v1, 16 }
 0x6ad   :  { %v5755_v6 = vadd.f32 %v5739_v41, %v5723_v24  ;;  %v5976_v58 = vrot.slane %v5974_v21, 7  ;;  %v6119_v43 = vrot.slane %v5974_v21, 4  ;;  %v6120_v7 = vrot.slane %v5977_v55, 5 }
 0x6ae   :  { %v5661_v44 = vpop.f32.mrf.mxu3  ;;  %v5337_v38 = vpop.f32.mrf.mxu2 }
 0x6af   :  { %v5771_v46 = vmax.f32 %v5755_v6, 0.0  ;;  %v5682_v57 = vadd.f32 %v5661_v44, %v5484_v16  ;;  %v12441_v42 = vor.u32 %v5977_v55, %v5976_v58  ;;  %v5487_v14 = vadd.f32 %v5486_v47, %v5337_v38 }
 0x6b0   :  { %v5802_v62 = vld [vmem:[#allocation4 + $0x58] sm:$0xff]  ;;  %v6121_v10 = vor.u32 %v6120_v7, %v6119_v43 }
 0x6b1   :  { %5787 = vst.msk [vmem:[#allocation4 + $0x60] sm:$0xff] %vm1481_vm10, %v5771_v46  ;;  %v5703_v39 = vmul.f32 %v12317_v22, %v5682_v57  ;;  %v5818_v31 = vpack.c.bf16 %v5802_v62, %v5802_v62 }
 0x6b2   :  { %v6122_v52 = vrot.slane %v6121_v10, 4 }
 0x6b3   :  { %v5724_v32 = vadd.f32 %v12322_v59, %v5703_v39  ;;  %5861 = vrot.lane.b32.xlu2 %v5818_v31, %s10286_s2  ;;  %6161 = vrot.lane.b32.xlu0 %v6118_v12, %s10285_s17  ;;  %v5981_v30 = vshrl.u32 %v5818_v31, 16  ;;  %v5984_v33 = vshll.u32 %v5818_v31, 16  ;;  %v10189_v39 = vld [vmem:[%s13072_s4 + $0x270] sm:$0xff]  ;;  %v10203_v31 = vld [vmem:[%s13072_s4 + $0x2a0] sm:$0xff] }
 0x6b4   :  { %6404 = vmatpush.bf16.msrb.mxu0 %v10189_v39  ;;  %6731 = vmatpush.bf16.msrb.mxu1 %v10203_v31 }
 0x6b5   :  { %v5756_v56 = vadd.f32 %v5740_v17, %v5724_v32  ;;  %v5983_v53 = vrot.slane %v5981_v30, 7  ;;  %v6123_v48 = vrot.slane %v5981_v30, 4  ;;  %v6124_v19 = vrot.slane %v5984_v33, 5 }
 0x6b6   :  { %v5664_v61 = vpop.f32.mrf.mxu3  ;;  %v5339_v11 = vpop.f32.mrf.mxu2 }
 0x6b7   :  { %v5772_v35 = vmax.f32 %v5756_v56, 0.0  ;;  %v5683_v18 = vadd.f32 %v5664_v61, %v5487_v14  ;;  %v12454_v20 = vor.u32 %v5984_v33, %v5983_v53  ;;  %v6125_v51 = vor.u32 %v6124_v19, %v6123_v48 }
 0x6b8   :  { %v5803_v40 = vld [vmem:[#allocation4 + $0x60] sm:$0xff]  ;;  %v5489_v28 = vadd.f32 %v5488_v0, %v5339_v11 }
 0x6b9   :  { %5788 = vst.msk [vmem:[#allocation4 + $0x68] sm:$0xff] %vm1481_vm10, %v5772_v35  ;;  %v5704_v63 = vmul.f32 %v12317_v22, %v5683_v18  ;;  %v5819_v60 = vpack.c.bf16 %v5803_v40, %v5803_v40  ;;  %v6126_v6 = vrot.slane %v6125_v51, 4 }
 0x6bb   :  { %v5725_v49 = vadd.f32 %v12322_v59, %v5704_v63  ;;  %5863 = vrot.lane.b32.xlu1 %v5819_v60, %s10286_s2  ;;  %6163 = vrot.lane.b32.xlu2 %v6122_v52, %s10285_s17  ;;  %v5988_v8 = vshrl.u32 %v5819_v60, 16  ;;  %v5991_v24 = vshll.u32 %v5819_v60, 16 }
 0x6bd   :  { %v5757_v29 = vadd.f32 %v5741_v45, %v5725_v49  ;;  %v5990_v1 = vrot.slane %v5988_v8, 7  ;;  %v6127_v46 = vrot.slane %v5988_v8, 4  ;;  %v6128_v57 = vrot.slane %v5991_v24, 5 }
 0x6be   :  { %v5666_v21 = vpop.f32.mrf.mxu3 }
 0x6bf   :  { %v5773_v41 = vmax.f32 %v5757_v29, 0.0  ;;  %v5684_v36 = vadd.f32 %v5666_v21, %v5489_v28  ;;  %v12464_v16 = vor.u32 %v5991_v24, %v5990_v1  ;;  %v6129_v7 = vor.u32 %v6128_v57, %v6127_v46 }
 0x6c0   :  { %v5804_v58 = vld [vmem:[#allocation4 + $0x68] sm:$0xff] }
 0x6c1   :  { %5789 = vst.msk [vmem:[#allocation4 + $0x70] sm:$0xff] %vm1481_vm10, %v5773_v41  ;;  %v5705_v55 = vmul.f32 %v12317_v22, %v5684_v36  ;;  %v5820_v44 = vpack.c.bf16 %v5804_v58, %v5804_v58  ;;  %v5742_v22 = vld [vmem:[#allocation4 + $0x78] sm:$0xff]  ;;  %v6130_v17 = vrot.slane %v6129_v7, 4 }
 0x6c3   :  { %v5726_v38 = vadd.f32 %v12322_v59, %v5705_v55  ;;  %6165 = vrot.lane.b32.xlu1 %v6126_v6, %s10285_s17  ;;  %5865 = vrot.lane.b32.xlu0 %v5820_v44, %s10286_s2  ;;  %v5844_v62 = vpop.permute.xlu2 %5843  ;;  %v5995_v12 = vshrl.u32 %v5820_v44, 16  ;;  %v5998_v47 = vshll.u32 %v5820_v44, 16 }
 0x6c4   :  { %5889 = vst.msk [vmem:[#allocation3 + $0xc] sm:$0xf] %vm1595_vm12, %v5844_v62 }
 0x6c5   :  { %v5758_v43 = vadd.f32 %v5742_v22, %v5726_v38  ;;  %v5997_v59 = vrot.slane %v5995_v12, 7  ;;  %v6131_v33 = vrot.slane %v5995_v12, 4  ;;  %v6132_v14 = vrot.slane %v5998_v47, 5 }
 0x6c7   :  { %v5774_v32 = vmax.f32 %v5758_v43, 0.0  ;;  %v12478_v30 = vor.u32 %v5998_v47, %v5997_v59  ;;  %v6133_v18 = vor.u32 %v6132_v14, %v6131_v33 }
 0x6c8   :  { %v5805_v4 = vld [vmem:[#allocation4 + $0x70] sm:$0xff] }
 0x6c9   :  { %5790 = vst.msk [vmem:[#allocation4 + $0x78] sm:$0xff] %vm1481_vm10, %v5774_v32  ;;  %v5821_v15 = vpack.c.bf16 %v5805_v4, %v5805_v4  ;;  %v6134_v49 = vrot.slane %v6133_v18, 4 }
 0x6cb   :  { %v6037_v56 = vld [vmem:[#allocation3 + $0xc] sm:$0xf]  ;;  %5867 = vrot.lane.b32.xlu2 %v5821_v15, %s10286_s2  ;;  %6167 = vrot.lane.b32.xlu0 %v6130_v17, %s10285_s17  ;;  %v5840_v10 = vpop.permute.xlu0 %5839  ;;  %v6002_v53 = vshrl.u32 %v5821_v15, 16  ;;  %v6005_v61 = vshll.u32 %v5821_v15, 16  ;;  %v6146_v0 = vpop.permute.xlu2 %6145 }
 0x6cc   :  { %5887 = vst.msk [vmem:[#allocation3 + $0x4] sm:$0xf] %vm1595_vm12, %v5840_v10  ;;  %v6038_v35 = vsel %vm11286_vm14, %v12355_v13, %v6037_v56 }
 0x6cd   :  { %v6004_v40 = vrot.slane %v6002_v53, 7  ;;  %v6135_v48 = vrot.slane %v6002_v53, 4  ;;  %v6136_v19 = vrot.slane %v6005_v61, 5  ;;  %6039 = vst [vmem:[#allocation3 + $0xc] sm:$0xf] %v6038_v35 }
 0x6cf   :  { %v12487_v63 = vor.u32 %v6005_v61, %v6004_v40  ;;  %v6137_v60 = vor.u32 %v6136_v19, %v6135_v48 }
 0x6d0   :  { %v5806_v52 = vld [vmem:[#allocation4 + $0x78] sm:$0xff] }
 0x6d1   :  { %v5822_v11 = vpack.c.bf16 %v5806_v52, %v5806_v52  ;;  %v6138_v8 = vrot.slane %v6137_v60, 4 }
 0x6d3   :  { %v6031_v45 = vld [vmem:[#allocation3 + $0x4] sm:$0xf]  ;;  %5869 = vrot.lane.b32.xlu1 %v5822_v11, %s10286_s2  ;;  %6169 = vrot.lane.b32.xlu2 %v6134_v49, %s10285_s17  ;;  %v5842_v51 = vpop.permute.xlu1 %5841  ;;  %v6009_v13 = vshrl.u32 %v5822_v11, 16  ;;  %v6012_v28 = vshll.u32 %v5822_v11, 16  ;;  %v6144_v44 = vpop.permute.xlu0 %6143 }
 0x6d4   :  { %6171 = vrot.lane.b32.xlu0 %v6138_v8, %s10285_s17  ;;  %5888 = vst.msk [vmem:[#allocation3 + $0x8] sm:$0xf] %vm1595_vm12, %v5842_v51  ;;  %v6032_v29 = vsel %vm11286_vm14, %v12336_v26, %v6031_v45  ;;  %v6197_v22 = vld [vmem:[#allocation3 + $0xc] sm:$0xf] }
 0x6d5   :  { %6033 = vst [vmem:[#allocation3 + $0x4] sm:$0xf] %v6032_v29  ;;  %v6011_v1 = vrot.slane %v6009_v13, 7  ;;  %v6139_v24 = vrot.slane %v6009_v13, 4  ;;  %v6140_v21 = vrot.slane %v6012_v28, 5 }
 0x6d7   :  { %v12496_v34 = vor.u32 %v6012_v28, %v6011_v1  ;;  %v6141_v41 = vor.u32 %v6140_v21, %v6139_v24 }
 0x6d9   :  { %v6142_v36 = vrot.slane %v6141_v41, 4 }
 0x6db   :  { %v6034_v6 = vld [vmem:[#allocation3 + $0x8] sm:$0xf]  ;;  %6173 = vrot.lane.b32.xlu1 %v6142_v36, %s10285_s17  ;;  %v5850_v58 = vpop.permute.xlu2 %5849 }
 0x6dc   :  { %v6035_v55 = vsel %vm11286_vm14, %v12349_v23, %v6034_v6  ;;  %v6191_v46 = vld [vmem:[#allocation3 + $0x4] sm:$0xf]  ;;  %5892 = vst.msk [vmem:[#allocation3 + $0x18] sm:$0xf] %vm1595_vm12, %v5850_v58 }
 0x6dd   :  { %6036 = vst [vmem:[#allocation3 + $0x8] sm:$0xf] %v6035_v55  ;;  %v6192_v26 = vsel %vm11325_vm0, %v6144_v44, %v6191_v46 }
 0x6de   :  { %6193 = vst [vmem:[#allocation3 + $0x4] sm:$0xf] %v6192_v26 }
 0x6e3   :  { %v6046_v57 = vld [vmem:[#allocation3 + $0x18] sm:$0xf]  ;;  %v5846_v38 = vpop.permute.xlu1 %5845  ;;  %v6152_v32 = vpop.permute.xlu2 %6151 }
 0x6e4   :  { %5890 = vst.msk [vmem:[#allocation3 + $0x10] sm:$0xf] %vm1595_vm12, %v5846_v38  ;;  %v6194_v62 = vld [vmem:[#allocation3 + $0x8] sm:$0xf]  ;;  %v6047_v12 = vsel %vm11286_vm14, %v12388_v5, %v6046_v57 }
 0x6e5   :  { %v10167_v39 = vld [vmem:[#allocation3] sm:$0xff]  ;;  %v6195_v23 = vsel %vm11325_vm0, %v6146_v0, %v6194_v62  ;;  %6048 = vst [vmem:[#allocation3 + $0x18] sm:$0xf] %v6047_v12 }
 0x6e6   :  { %6196 = vst [vmem:[#allocation3 + $0x8] sm:$0xf] %v6195_v23  ;;  %9583 = vmatmul.msk.bf16.vlgmr.msrb.gmra.mxu2 %vm2085_vm1, %v10167_v39 }
 0x6eb   :  { %v6040_v31 = vld [vmem:[#allocation3 + $0x10] sm:$0xf]  ;;  %v6148_v43 = vpop.permute.xlu1 %6147  ;;  %v5848_v59 = vpop.permute.xlu0 %5847 }
 0x6ec   :  { %v6198_v7 = vsel %vm11325_vm0, %v6148_v43, %v6197_v22  ;;  %v6041_v47 = vsel %vm11286_vm14, %v12365_v3, %v6040_v31  ;;  %5891 = vst.msk [vmem:[#allocation3 + $0x14] sm:$0xf] %vm1595_vm12, %v5848_v59  ;;  %v6156_v10 = vpop.permute.xlu2 %6155  ;;  %v6206_v48 = vld [vmem:[#allocation3 + $0x18] sm:$0xf] }
 0x6ed   :  { %6199 = vst [vmem:[#allocation3 + $0xc] sm:$0xf] %v6198_v7  ;;  %v10181_v5 = vld [vmem:[#allocation3 + $0x4] sm:$0xff] }
 0x6ee   :  { %9519 = vmatmul.msk.bf16.vlgmr.msrb.gmra.mxu0 %vm2085_vm1, %v10181_v5  ;;  %6042 = vst [vmem:[#allocation3 + $0x10] sm:$0xf] %v6041_v47 }
 0x6f3   :  { %v6150_v4 = vpop.permute.xlu0 %6149  ;;  %v6043_v33 = vld [vmem:[#allocation3 + $0x14] sm:$0xf] }
 0x6f4   :  { %v10195_v15 = vld [vmem:[#allocation3 + $0x8] sm:$0xff]  ;;  %v6044_v14 = vsel %vm11286_vm14, %v12378_v27, %v6043_v33  ;;  %v6158_v11 = vpop.permute.xlu2 %6157 }
 0x6f5   :  { %v10168_v17 = vld [vmem:[#allocation3 + $0x8] sm:$0xff]  ;;  %v6200_v56 = vld [vmem:[#allocation3 + $0x10] sm:$0xf]  ;;  %9659 = vmatmul.msk.bf16.vlgmr.msrb.gmra.mxu1 %vm2085_vm1, %v10195_v15  ;;  %6045 = vst [vmem:[#allocation3 + $0x14] sm:$0xf] %v6044_v14 }
 0x6f6   :  { %v6201_v3 = vsel %vm11325_vm0, %v6150_v4, %v6200_v56  ;;  %9584 = vmatmul.msk.bf16.gmra.mxu2 %vm2085_vm1, %v10168_v17 }
 0x6f7   :  { %6202 = vst [vmem:[#allocation3 + $0x10] sm:$0xf] %v6201_v3 }
 0x6fb   :  { %v5852_v53 = vpop.permute.xlu1 %5851 }
 0x6fc   :  { %5893 = vst.msk [vmem:[#allocation3 + $0x1c] sm:$0xf] %vm1595_vm12, %v5852_v53  ;;  %v6203_v61 = vld [vmem:[#allocation3 + $0x14] sm:$0xf] }
 0x6fd   :  { %v6204_v18 = vsel %vm11325_vm0, %v6152_v32, %v6203_v61 }
 0x6fe   :  { %v10182_v35 = vld [vmem:[#allocation3 + $0xc] sm:$0xff]  ;;  %6205 = vst [vmem:[#allocation3 + $0x14] sm:$0xf] %v6204_v18 }
 0x6ff   :  { %9520 = vmatmul.msk.bf16.gmra.mxu0 %vm2085_vm1, %v10182_v35 }
 0x703   :  { %v6049_v27 = vld [vmem:[#allocation3 + $0x1c] sm:$0xf]  ;;  %v6154_v40 = vpop.permute.xlu1 %6153 }
 0x704   :  { %v6050_v19 = vsel %vm11286_vm14, %v12401_v25, %v6049_v27  ;;  %v6207_v60 = vsel %vm11325_vm0, %v6154_v40, %v6206_v48  ;;  %v5854_v52 = vpop.permute.xlu0 %5853 }
 0x705   :  { %6051 = vst [vmem:[#allocation3 + $0x1c] sm:$0xf] %v6050_v19  ;;  %v10169_v49 = vld [vmem:[#allocation3 + $0x10] sm:$0xff] }
 0x706   :  { %6208 = vst [vmem:[#allocation3 + $0x18] sm:$0xf] %v6207_v60  ;;  %v10196_v8 = vld [vmem:[#allocation3 + $0x10] sm:$0xff]  ;;  %9585 = vmatmul.msk.bf16.gmra.mxu2 %vm2085_vm1, %v10169_v49 }
 0x707   :  { %5894 = vst.msk [vmem:[#allocation3 + $0x20] sm:$0xf] %vm1595_vm12, %v5854_v52  ;;  %9660 = vmatmul.msk.bf16.gmra.mxu1 %vm2085_vm1, %v10196_v8 }
 0x70c   :  { %v6209_v0 = vld [vmem:[#allocation3 + $0x1c] sm:$0xf] }
 0x70d   :  { %v5862_v45 = vpop.permute.xlu2 %5861  ;;  %v5856_v51 = vpop.permute.xlu0 %5855  ;;  %v10183_v13 = vld [vmem:[#allocation3 + $0x14] sm:$0xff]  ;;  %v6210_v28 = vsel %vm11325_vm0, %v6156_v10, %v6209_v0 }
 0x70e   :  { %v6052_v25 = vld [vmem:[#allocation3 + $0x20] sm:$0xf]  ;;  %5898 = vst.msk [vmem:[#allocation3 + $0x38] sm:$0xf] %vm1595_vm12, %v5862_v45 }
 0x70f   :  { %v6053_v29 = vsel %vm11286_vm14, %v12409_v9, %v6052_v25  ;;  %5895 = vst.msk [vmem:[#allocation3 + $0x2c] sm:$0xf] %vm1595_vm12, %v5856_v51  ;;  %9521 = vmatmul.msk.bf16.gmra.mxu0 %vm2085_vm1, %v10183_v13 }
 0x710   :  { %6054 = vst [vmem:[#allocation3 + $0x20] sm:$0xf] %v6053_v29 }
 0x711   :  { %6211 = vst [vmem:[#allocation3 + $0x1c] sm:$0xf] %v6210_v28 }
 0x715   :  { %v6064_v1 = vld [vmem:[#allocation3 + $0x38] sm:$0xf]  ;;  %v5858_v24 = vpop.permute.xlu1 %5857  ;;  %v6164_v44 = vpop.permute.xlu2 %6163 }
 0x716   :  { %v6055_v21 = vld [vmem:[#allocation3 + $0x2c] sm:$0xf]  ;;  %5896 = vst.msk [vmem:[#allocation3 + $0x30] sm:$0xf] %vm1595_vm12, %v5858_v24  ;;  %v6065_v41 = vsel %vm11286_vm14, %v12454_v20, %v6064_v1 }
 0x717   :  { %v6056_v36 = vsel %vm11286_vm14, %v12419_v54, %v6055_v21  ;;  %v6212_v9 = vld [vmem:[#allocation3 + $0x20] sm:$0xf]  ;;  %6066 = vst [vmem:[#allocation3 + $0x38] sm:$0xf] %v6065_v41 }
 0x718   :  { %v10170_v6 = vld [vmem:[#allocation3 + $0x18] sm:$0xff]  ;;  %6057 = vst [vmem:[#allocation3 + $0x2c] sm:$0xf] %v6056_v36  ;;  %v6213_v55 = vsel %vm11325_vm0, %v6158_v11, %v6212_v9 }
 0x719   :  { %v10197_v58 = vld [vmem:[#allocation3 + $0x18] sm:$0xff]  ;;  %6214 = vst [vmem:[#allocation3 + $0x20] sm:$0xf] %v6213_v55  ;;  %9586 = vmatmul.msk.bf16.gmra.mxu2 %vm2085_vm1, %v10170_v6  ;;  %v12613_v6 = vld [vmem:[%s13073_s5 + $0x4] ss:$0 sm:$0xff] }
 0x71a   :  { %9661 = vmatmul.msk.bf16.gmra.mxu1 %vm2085_vm1, %v10197_v58 }
 0x71d   :  { %v6058_v46 = vld [vmem:[#allocation3 + $0x30] sm:$0xf]  ;;  %v6160_v20 = vpop.permute.xlu1 %6159  ;;  %v5860_v26 = vpop.permute.xlu0 %5859 }
 0x71e   :  { %5897 = vst.msk [vmem:[#allocation3 + $0x34] sm:$0xf] %vm1595_vm12, %v5860_v26  ;;  %v6059_v54 = vsel %vm11286_vm14, %v12431_v2, %v6058_v46  ;;  %v6224_v33 = vld [vmem:[#allocation3 + $0x38] sm:$0xf] }
 0x71f   :  { %v6215_v57 = vld [vmem:[#allocation3 + $0x2c] sm:$0xf]  ;;  %6060 = vst [vmem:[#allocation3 + $0x30] sm:$0xf] %v6059_v54 }
 0x720   :  { %v6216_v38 = vsel %vm11325_vm0, %v6160_v20, %v6215_v57  ;;  %v10184_v62 = vld [vmem:[#allocation3 + $0x1c] sm:$0xff] }
 0x721   :  { %6217 = vst [vmem:[#allocation3 + $0x2c] sm:$0xf] %v6216_v38  ;;  %9522 = vmatmul.msk.bf16.gmra.mxu0 %vm2085_vm1, %v10184_v62  ;;  %v10198_v7 = vld [vmem:[#allocation3 + $0x20] sm:$0xff] }
 0x725   :  { %v6061_v12 = vld [vmem:[#allocation3 + $0x34] sm:$0xf]  ;;  %v5868_v39 = vpop.permute.xlu2 %5867  ;;  %v6162_v23 = vpop.permute.xlu0 %6161 }
 0x726   :  { %v6062_v31 = vsel %vm11286_vm14, %v12441_v42, %v6061_v12  ;;  %5901 = vst.msk [vmem:[#allocation3 + $0x44] sm:$0xf] %vm1595_vm12, %v5868_v39  ;;  %v6218_v22 = vld [vmem:[#allocation3 + $0x30] sm:$0xf] }
 0x727   :  { %6063 = vst [vmem:[#allocation3 + $0x34] sm:$0xf] %v6062_v31  ;;  %v6219_v2 = vsel %vm11325_vm0, %v6162_v23, %v6218_v22 }
 0x728   :  { %6220 = vst [vmem:[#allocation3 + $0x30] sm:$0xf] %v6219_v2  ;;  %v10171_v43 = vld [vmem:[#allocation3 + $0x28] sm:$0xff] }
 0x729   :  { %9587 = vmatmul.msk.bf16.gmra.mxu2 %vm2085_vm1, %v10171_v43 }
 0x72a   :  { %9662 = vmatmul.msk.bf16.gmra.mxu1 %vm2085_vm1, %v10198_v7 }
 0x72d   :  { %v6073_v59 = vld [vmem:[#allocation3 + $0x44] sm:$0xf]  ;;  %v5864_v47 = vpop.permute.xlu1 %5863  ;;  %v6170_v48 = vpop.permute.xlu2 %6169 }
 0x72e   :  { %5899 = vst.msk [vmem:[#allocation3 + $0x3c] sm:$0xf] %vm1595_vm12, %v5864_v47  ;;  %v6221_v5 = vld [vmem:[#allocation3 + $0x34] sm:$0xf]  ;;  %v6074_v42 = vsel %vm11286_vm14, %v12487_v63, %v6073_v59 }
 0x72f   :  { %v10185_v32 = vld [vmem:[#allocation3 + $0x2c] sm:$0xff]  ;;  %v6222_v4 = vsel %vm11325_vm0, %v6164_v44, %v6221_v5  ;;  %6075 = vst [vmem:[#allocation3 + $0x44] sm:$0xf] %v6074_v42  ;;  %v12618_v44 = vld [vmem:[%s13074_s6 + $0x4] ss:$0 sm:$0xff] }
 0x730   :  { %6223 = vst [vmem:[#allocation3 + $0x34] sm:$0xf] %v6222_v4 }
 0x731   :  { %9523 = vmatmul.msk.bf16.gmra.mxu0 %vm2085_vm1, %v10185_v32 }
 0x735   :  { %v6067_v15 = vld [vmem:[#allocation3 + $0x3c] sm:$0xf]  ;;  %v6166_v17 = vpop.permute.xlu1 %6165  ;;  %v5866_v14 = vpop.permute.xlu0 %5865 }
 0x736   :  { %v6225_v56 = vsel %vm11325_vm0, %v6166_v17, %v6224_v33  ;;  %5900 = vst.msk [vmem:[#allocation3 + $0x40] sm:$0xf] %vm1595_vm12, %v5866_v14  ;;  %v6068_v63 = vsel %vm11286_vm14, %v12464_v16, %v6067_v15  ;;  %v6233_v19 = vld [vmem:[#allocation3 + $0x44] sm:$0xf] }
 0x737   :  { %6226 = vst [vmem:[#allocation3 + $0x38] sm:$0xf] %v6225_v56  ;;  %v10172_v3 = vld [vmem:[#allocation3 + $0x30] sm:$0xff] }
 0x738   :  { %v10199_v10 = vld [vmem:[#allocation3 + $0x30] sm:$0xff]  ;;  %6069 = vst [vmem:[#allocation3 + $0x3c] sm:$0xf] %v6068_v63 }
 0x739   :  { %9588 = vmatmul.msk.bf16.gmra.mxu2 %vm2085_vm1, %v10172_v3 }
 0x73a   :  { %9663 = vmatmul.msk.bf16.gmra.mxu1 %vm2085_vm1, %v10199_v10 }
 0x73d   :  { %v6070_v53 = vld [vmem:[#allocation3 + $0x40] sm:$0xf]  ;;  %v6168_v61 = vpop.permute.xlu0 %6167 }
 0x73e   :  { %v6071_v35 = vsel %vm11286_vm14, %v12478_v30, %v6070_v53  ;;  %v10186_v18 = vld [vmem:[#allocation3 + $0x34] sm:$0xff] }
 0x73f   :  { %6072 = vst [vmem:[#allocation3 + $0x40] sm:$0xf] %v6071_v35  ;;  %v6227_v27 = vld [vmem:[#allocation3 + $0x3c] sm:$0xf] }
 0x740   :  { %v6228_v16 = vsel %vm11325_vm0, %v6168_v61, %v6227_v27 }
 0x741   :  { %6229 = vst [vmem:[#allocation3 + $0x3c] sm:$0xf] %v6228_v16  ;;  %9524 = vmatmul.msk.bf16.gmra.mxu0 %vm2085_vm1, %v10186_v18 }
 0x745   :  { %v5870_v40 = vpop.permute.xlu1 %5869 }
 0x746   :  { %5902 = vst.msk [vmem:[#allocation3 + $0x48] sm:$0xf] %vm1595_vm12, %v5870_v40  ;;  %v6172_v60 = vpop.permute.xlu0 %6171  ;;  %v6230_v52 = vld [vmem:[#allocation3 + $0x40] sm:$0xf] }
 0x747   :  { %v6234_v11 = vsel %vm11325_vm0, %v6172_v60, %v6233_v19  ;;  %v6231_v30 = vsel %vm11325_vm0, %v6170_v48, %v6230_v52 }
 0x748   :  { %6235 = vst [vmem:[#allocation3 + $0x44] sm:$0xf] %v6234_v11  ;;  %v10173_v49 = vld [vmem:[#allocation3 + $0x38] sm:$0xff]  ;;  %v10236_v11 = vld [vmem:[%s13072_s4 + $0x328] sm:$0xff] }
 0x749   :  { %v10200_v8 = vld [vmem:[#allocation3 + $0x38] sm:$0xff]  ;;  %6232 = vst [vmem:[#allocation3 + $0x40] sm:$0xf] %v6231_v30  ;;  %9589 = vmatmul.msk.bf16.gmra.mxu2 %vm2085_vm1, %v10173_v49  ;;  %7439 = vmatpush.bf16.msra.mxu3 %v10236_v11 }
 0x74a   :  { %9664 = vmatmul.msk.bf16.gmra.mxu1 %vm2085_vm1, %v10200_v8  ;;  %v10250_v30 = vld [vmem:[%s13072_s4 + $0x358] sm:$0xff] }
 0x74b   :  { %v10222_v49 = vld [vmem:[%s13072_s4 + $0x2f8] sm:$0xff]  ;;  %7766 = vmatpush.bf16.msra.mxu2 %v10250_v30 }
 0x74c   :  { %7588 = vmatpush.bf16.msra.mxu0 %v10222_v49 }
 0x74d   :  { %v6076_v0 = vld [vmem:[#allocation3 + $0x48] sm:$0xf]  ;;  %v6174_v25 = vpop.permute.xlu1 %6173 }
 0x74e   :  { %v6077_v45 = vsel %vm11286_vm14, %v12496_v34, %v6076_v0 }
 0x74f   :  { %6078 = vst [vmem:[#allocation3 + $0x48] sm:$0xf] %v6077_v45 }
 0x750   :  { %v10187_v51 = vld [vmem:[#allocation3 + $0x3c] sm:$0xff] }
 0x751   :  { %9525 = vmatmul.msk.bf16.gmra.mxu0 %vm2085_vm1, %v10187_v51  ;;  %v10174_v29 = vld [vmem:[#allocation3 + $0x40] sm:$0xff] }
 0x752   :  { %v10201_v1 = vld [vmem:[#allocation3 + $0x40] sm:$0xff] }
 0x756   :  { %v6236_v13 = vld [vmem:[#allocation3 + $0x48] sm:$0xf] }
 0x757   :  { %v6237_v28 = vsel %vm11325_vm0, %v6174_v25, %v6236_v13 }
 0x758   :  { %6238 = vst [vmem:[#allocation3 + $0x48] sm:$0xf] %v6237_v28 }
 0x759   :  { %9590 = vmatmul.msk.bf16.gmra.mxu2 %vm2085_vm1, %v10174_v29 }
 0x75a   :  { %9665 = vmatmul.msk.bf16.gmra.mxu1 %vm2085_vm1, %v10201_v1 }
 0x75f   :  { %v10188_v24 = vld [vmem:[#allocation3 + $0x44] sm:$0xff] }
 0x760   :  { %v10202_v34 = vld [vmem:[#allocation3 + $0x48] sm:$0xff] }
 0x761   :  { %9526 = vmatmul.msk.bf16.gmra.mxu0 %vm2085_vm1, %v10188_v24 }
 0x769   :  { %v6555_v21 = vpop.f32.mrf.mxu2 }
 0x76a   :  { %9666 = vmatmul.msk.bf16.gmra.mxu1 %vm2085_vm1, %v10202_v34 }
 0x76b   :  { %v6406_v41 = vpop.f32.mrf.mxu0 }
 0x76c   :  { %v6556_v36 = vadd.f32 %v6555_v21, %v6406_v41 }
 0x771   :  { %v6557_v9 = vpop.f32.mrf.mxu2 }
 0x772   :  { %v6733_v58 = vpop.f32.mrf.mxu1 }
 0x773   :  { %v6773_v55 = vadd.f32 %v6733_v58, %v6556_v36  ;;  %v6408_v46 = vpop.f32.mrf.mxu0 }
 0x774   :  { %v6558_v57 = vadd.f32 %v6557_v9, %v6408_v46 }
 0x775   :  { %v6794_v20 = vmul.f32 %v12613_v6, %v6773_v55 }
 0x777   :  { %v6815_v26 = vadd.f32 %v12618_v44, %v6794_v20 }
 0x779   :  { %v6831_v54 = vmax.f32 %v6815_v26, 0.0  ;;  %v6560_v38 = vpop.f32.mrf.mxu2 }
 0x77a   :  { %v6735_v62 = vpop.f32.mrf.mxu1 }
 0x77b   :  { %v6847_v12 = vpack.c.bf16 %v6831_v54, %v6831_v54  ;;  %v6774_v39 = vadd.f32 %v6735_v62, %v6558_v57 }
 0x77c   :  { %v6411_v22 = vpop.f32.mrf.mxu0 }
 0x77d   :  { %v6944_v23 = vshrl.u32 %v6847_v12, 16  ;;  %v6795_v31 = vmul.f32 %v12613_v6, %v6774_v39  ;;  %6879 = vrot.lane.b32.xlu2 %v6847_v12, %s10286_s2  ;;  %v6947_v43 = vshll.u32 %v6847_v12, 16  ;;  %v6561_v15 = vadd.f32 %v6560_v38, %v6411_v22 }
 0x77f   :  { %v6946_v2 = vrot.slane %v6944_v23, 7  ;;  %v6816_v7 = vadd.f32 %v12618_v44, %v6795_v31  ;;  %v7119_v32 = vrot.slane %v6944_v23, 4  ;;  %v7120_v4 = vrot.slane %v6947_v43, 5 }
 0x781   :  { %v12625_v59 = vor.u32 %v6947_v43, %v6946_v2  ;;  %v6832_v47 = vmax.f32 %v6816_v7, 0.0  ;;  %v6562_v5 = vpop.f32.mrf.mxu2  ;;  %v7121_v10 = vor.u32 %v7120_v4, %v7119_v32  ;;  %v10235_v43 = vld [vmem:[%s13072_s4 + $0x320] sm:$0xff] }
 0x782   :  { %7440 = vmatpush.bf16.msra.mxu3 %v10235_v43  ;;  %v10234_v43 = vld [vmem:[%s13072_s4 + $0x318] sm:$0xff] }
 0x783   :  { %v6848_v42 = vpack.c.bf16 %v6832_v47, %v6832_v47  ;;  %v7122_v27 = vrot.slane %v7121_v10, 4 }
 0x784   :  { %v6413_v33 = vpop.f32.mrf.mxu0  ;;  %v6738_v14 = vpop.f32.mrf.mxu1 }
 0x785   :  { %v6951_v17 = vshrl.u32 %v6848_v42, 16  ;;  %6881 = vrot.lane.b32.xlu0 %v6848_v42, %s10286_s2  ;;  %v6775_v56 = vadd.f32 %v6738_v14, %v6561_v15  ;;  %v6954_v3 = vshll.u32 %v6848_v42, 16  ;;  %v6563_v16 = vadd.f32 %v6562_v5, %v6413_v33 }
 0x786   :  { %7441 = vmatpush.bf16.msra.mxu3 %v10234_v43  ;;  %v10247_v43 = vld [vmem:[%s13072_s4 + $0x340] sm:$0xff] }
 0x787   :  { %v6953_v63 = vrot.slane %v6951_v17, 7  ;;  %v6796_v53 = vmul.f32 %v12613_v6, %v6775_v56  ;;  %v7123_v60 = vrot.slane %v6951_v17, 4  ;;  %v7124_v52 = vrot.slane %v6954_v3, 5 }
 0x789   :  { %v12629_v61 = vor.u32 %v6954_v3, %v6953_v63  ;;  %v6817_v35 = vadd.f32 %v12618_v44, %v6796_v53  ;;  %v6565_v18 = vpop.f32.mrf.mxu2  ;;  %v7125_v25 = vor.u32 %v7124_v52, %v7123_v60 }
 0x78b   :  { %v6833_v40 = vmax.f32 %v6817_v35, 0.0  ;;  %v7126_v20 = vrot.slane %v7125_v25, 4 }
 0x78c   :  { %v6416_v48 = vpop.f32.mrf.mxu0  ;;  %v6740_v19 = vpop.f32.mrf.mxu1 }
 0x78d   :  { %7183 = vrot.lane.b32.xlu0 %v7122_v27, %s10285_s17  ;;  %v6849_v8 = vpack.c.bf16 %v6833_v40, %v6833_v40  ;;  %v6776_v0 = vadd.f32 %v6740_v19, %v6563_v16  ;;  %v6566_v9 = vadd.f32 %v6565_v18, %v6416_v48  ;;  %v10249_v18 = vld [vmem:[%s13072_s4 + $0x350] sm:$0xff] }
 0x78e   :  { %v10221_v27 = vld [vmem:[%s13072_s4 + $0x2f0] sm:$0xff]  ;;  %7767 = vmatpush.bf16.msra.mxu2 %v10249_v18 }
 0x78f   :  { %v6958_v45 = vshrl.u32 %v6849_v8, 16  ;;  %v6961_v51 = vshll.u32 %v6849_v8, 16  ;;  %v6797_v13 = vmul.f32 %v12613_v6, %v6776_v0  ;;  %6883 = vrot.lane.b32.xlu1 %v6849_v8, %s10286_s2  ;;  %7589 = vmatpush.bf16.msra.mxu0 %v10221_v27 }
 0x791   :  { %v6960_v28 = vrot.slane %v6958_v45, 7  ;;  %v6818_v29 = vadd.f32 %v12618_v44, %v6797_v13  ;;  %v7127_v1 = vrot.slane %v6958_v45, 4  ;;  %v7128_v24 = vrot.slane %v6961_v51, 5  ;;  %v6567_v34 = vpop.f32.mrf.mxu2 }
 0x793   :  { %v12645_v21 = vor.u32 %v6961_v51, %v6960_v28  ;;  %v6834_v41 = vmax.f32 %v6818_v29, 0.0  ;;  %v7129_v36 = vor.u32 %v7128_v24, %v7127_v1 }
 0x794   :  { %v6418_v58 = vpop.f32.mrf.mxu0 }
 0x795   :  { %v6850_v55 = vpack.c.bf16 %v6834_v41, %v6834_v41  ;;  %v7130_v26 = vrot.slane %v7129_v36, 4  ;;  %v6568_v22 = vadd.f32 %v6567_v34, %v6418_v58 }
 0x797   :  { %v6743_v46 = vpop.f32.mrf.mxu1  ;;  %v6965_v57 = vshrl.u32 %v6850_v55, 16  ;;  %7185 = vrot.lane.b32.xlu1 %v7126_v20, %s10285_s17  ;;  %6885 = vrot.lane.b32.xlu2 %v6850_v55, %s10286_s2  ;;  %v6968_v12 = vshll.u32 %v6850_v55, 16 }
 0x798   :  { %v6777_v54 = vadd.f32 %v6743_v46, %v6566_v9  ;;  %7187 = vrot.lane.b32.xlu0 %v7130_v26, %s10285_s17 }
 0x799   :  { %v6967_v62 = vrot.slane %v6965_v57, 7  ;;  %v7131_v5 = vrot.slane %v6965_v57, 4  ;;  %v7132_v42 = vrot.slane %v6968_v12, 5 }
 0x79a   :  { %v6798_v38 = vmul.f32 %v12613_v6, %v6777_v54 }
 0x79b   :  { %v12652_v23 = vor.u32 %v6968_v12, %v6967_v62  ;;  %v7133_v33 = vor.u32 %v7132_v42, %v7131_v5 }
 0x79c   :  { %v6819_v39 = vadd.f32 %v12618_v44, %v6798_v38  ;;  %v6570_v31 = vpop.f32.mrf.mxu2 }
 0x79d   :  { %v7134_v48 = vrot.slane %v7133_v33, 4 }
 0x79e   :  { %v6835_v2 = vmax.f32 %v6819_v39, 0.0  ;;  %v6421_v7 = vpop.f32.mrf.mxu0 }
 0x79f   :  { %v6745_v47 = vpop.f32.mrf.mxu1  ;;  %v6571_v53 = vadd.f32 %v6570_v31, %v6421_v7  ;;  %v10248_v7 = vld [vmem:[%s13072_s4 + $0x348] sm:$0xff] }
 0x7a0   :  { %v6851_v32 = vpack.c.bf16 %v6835_v2, %v6835_v2  ;;  %v6778_v4 = vadd.f32 %v6745_v47, %v6568_v22  ;;  %7768 = vmatpush.bf16.msra.mxu2 %v10248_v7  ;;  %v10219_v7 = vld [vmem:[%s13072_s4 + $0x2e0] sm:$0xff] }
 0x7a2   :  { %v6972_v15 = vshrl.u32 %v6851_v32, 16  ;;  %v6799_v17 = vmul.f32 %v12613_v6, %v6778_v4  ;;  %6887 = vrot.lane.b32.xlu2 %v6851_v32, %s10286_s2  ;;  %v6975_v56 = vshll.u32 %v6851_v32, 16 }
 0x7a4   :  { %v6974_v14 = vrot.slane %v6972_v15, 7  ;;  %v6820_v63 = vadd.f32 %v12618_v44, %v6799_v17  ;;  %v6572_v3 = vpop.f32.mrf.mxu2  ;;  %v7135_v52 = vrot.slane %v6972_v15, 4  ;;  %v7136_v11 = vrot.slane %v6975_v56, 5  ;;  %7769 = vmatpush.bf16.msra.mxu2 %v10247_v43 }
 0x7a6   :  { %v12660_v10 = vor.u32 %v6975_v56, %v6974_v14  ;;  %v6836_v35 = vmax.f32 %v6820_v63, 0.0  ;;  %v6423_v16 = vpop.f32.mrf.mxu0  ;;  %v7137_v51 = vor.u32 %v7136_v11, %v7135_v52 }
 0x7a7   :  { %v6748_v40 = vpop.f32.mrf.mxu1  ;;  %v6573_v28 = vadd.f32 %v6572_v3, %v6423_v16 }
 0x7a8   :  { %v6852_v19 = vpack.c.bf16 %v6836_v35, %v6836_v35  ;;  %v6779_v60 = vadd.f32 %v6748_v40, %v6571_v53  ;;  %v7138_v36 = vrot.slane %v7137_v51, 4 }
 0x7aa   :  { %v6979_v30 = vshrl.u32 %v6852_v19, 16  ;;  %v6800_v49 = vmul.f32 %v12613_v6, %v6779_v60  ;;  %6889 = vrot.lane.b32.xlu1 %v6852_v19, %s10286_s2  ;;  %7189 = vrot.lane.b32.xlu2 %v7134_v48, %s10285_s17  ;;  %v6982_v0 = vshll.u32 %v6852_v19, 16  ;;  %v10220_v48 = vld [vmem:[%s13072_s4 + $0x2e8] sm:$0xff] }
 0x7ab   :  { %7590 = vmatpush.bf16.msra.mxu0 %v10220_v48 }
 0x7ac   :  { %v6981_v8 = vrot.slane %v6979_v30, 7  ;;  %v6821_v45 = vadd.f32 %v12618_v44, %v6800_v49  ;;  %v6575_v13 = vpop.f32.mrf.mxu2  ;;  %v7139_v9 = vrot.slane %v6979_v30, 4  ;;  %v7140_v58 = vrot.slane %v6982_v0, 5 }
 0x7ae   :  { %v12672_v25 = vor.u32 %v6982_v0, %v6981_v8  ;;  %v6837_v29 = vmax.f32 %v6821_v45, 0.0  ;;  %v6426_v1 = vpop.f32.mrf.mxu0  ;;  %v7141_v12 = vor.u32 %v7140_v58, %v7139_v9 }
 0x7af   :  { %v6750_v24 = vpop.f32.mrf.mxu1  ;;  %v6576_v31 = vadd.f32 %v6575_v13, %v6426_v1  ;;  %7591 = vmatpush.bf16.msra.mxu0 %v10219_v7 }
 0x7b0   :  { %v6853_v34 = vpack.c.bf16 %v6837_v29, %v6837_v29  ;;  %v6780_v41 = vadd.f32 %v6750_v24, %v6573_v28  ;;  %v7142_v15 = vrot.slane %v7141_v12, 4 }
 0x7b2   :  { %v6986_v55 = vshrl.u32 %v6853_v34, 16  ;;  %v6989_v46 = vshll.u32 %v6853_v34, 16  ;;  %v6801_v20 = vmul.f32 %v12613_v6, %v6780_v41  ;;  %7191 = vrot.lane.b32.xlu1 %v7138_v36, %s10285_s17  ;;  %6891 = vrot.lane.b32.xlu0 %v6853_v34, %s10286_s2 }
 0x7b4   :  { %v6988_v26 = vrot.slane %v6986_v55, 7  ;;  %v6822_v54 = vadd.f32 %v12618_v44, %v6801_v20  ;;  %v7143_v57 = vrot.slane %v6986_v55, 4  ;;  %v7144_v38 = vrot.slane %v6989_v46, 5  ;;  %v6577_v62 = vpop.f32.mrf.mxu2 }
 0x7b6   :  { %v12678_v39 = vor.u32 %v6989_v46, %v6988_v26  ;;  %v6838_v22 = vmax.f32 %v6822_v54, 0.0  ;;  %v7145_v2 = vor.u32 %v7144_v38, %v7143_v57  ;;  %v6428_v47 = vpop.f32.mrf.mxu0 }
 0x7b7   :  { %v6753_v5 = vpop.f32.mrf.mxu1  ;;  %v6578_v27 = vadd.f32 %v6577_v62, %v6428_v47 }
 0x7b8   :  { %v6854_v42 = vpack.c.bf16 %v6838_v22, %v6838_v22  ;;  %v6781_v32 = vadd.f32 %v6753_v5, %v6576_v31  ;;  %v7146_v4 = vrot.slane %v7145_v2, 4  ;;  %v10233_v2 = vld [vmem:[%s13072_s4 + $0x310] sm:$0xff] }
 0x7b9   :  { %7442 = vmatpush.bf16.msra.mxu3 %v10233_v2 }
 0x7ba   :  { %v6993_v17 = vshrl.u32 %v6854_v42, 16  ;;  %v6996_v33 = vshll.u32 %v6854_v42, 16  ;;  %v6802_v14 = vmul.f32 %v12613_v6, %v6781_v32  ;;  %7195 = vrot.lane.b32.xlu1 %v7146_v4, %s10285_s17  ;;  %6893 = vrot.lane.b32.xlu2 %v6854_v42, %s10286_s2 }
 0x7bb   :  { %7193 = vrot.lane.b32.xlu0 %v7142_v15, %s10285_s17 }
 0x7bc   :  { %v6995_v56 = vrot.slane %v6993_v17, 7  ;;  %v6823_v63 = vadd.f32 %v12618_v44, %v6802_v14  ;;  %v7147_v3 = vrot.slane %v6993_v17, 4  ;;  %v7148_v53 = vrot.slane %v6996_v33, 5  ;;  %v6580_v35 = vpop.f32.mrf.mxu2 }
 0x7be   :  { %v12691_v18 = vor.u32 %v6996_v33, %v6995_v56  ;;  %v6839_v16 = vmax.f32 %v6823_v63, 0.0  ;;  %v7149_v40 = vor.u32 %v7148_v53, %v7147_v3  ;;  %v6431_v19 = vpop.f32.mrf.mxu0 }
 0x7bf   :  { %v6755_v60 = vpop.f32.mrf.mxu1  ;;  %v6581_v24 = vadd.f32 %v6580_v35, %v6431_v19 }
 0x7c0   :  { %v6855_v52 = vpack.c.bf16 %v6839_v16, %v6839_v16  ;;  %v6782_v11 = vadd.f32 %v6755_v60, %v6578_v27  ;;  %v7150_v30 = vrot.slane %v7149_v40, 4 }
 0x7c2   :  { %v7000_v49 = vshrl.u32 %v6855_v52, 16  ;;  %v7003_v8 = vshll.u32 %v6855_v52, 16  ;;  %v6803_v0 = vmul.f32 %v12613_v6, %v6782_v11  ;;  %7197 = vrot.lane.b32.xlu1 %v7150_v30, %s10285_s17  ;;  %6895 = vrot.lane.b32.xlu2 %v6855_v52, %s10286_s2 }
 0x7c4   :  { %v7002_v45 = vrot.slane %v7000_v49, 7  ;;  %v6824_v51 = vadd.f32 %v12618_v44, %v6803_v0  ;;  %v7151_v13 = vrot.slane %v7000_v49, 4  ;;  %v7152_v28 = vrot.slane %v7003_v8, 5  ;;  %v6582_v29 = vpop.f32.mrf.mxu2 }
 0x7c6   :  { %v12700_v1 = vor.u32 %v7003_v8, %v7002_v45  ;;  %v6840_v34 = vmax.f32 %v6824_v51, 0.0  ;;  %v7153_v41 = vor.u32 %v7152_v28, %v7151_v13  ;;  %v6433_v36 = vpop.f32.mrf.mxu0 }
 0x7c7   :  { %v6758_v9 = vpop.f32.mrf.mxu1  ;;  %v6583_v12 = vadd.f32 %v6582_v29, %v6433_v36  ;;  %v10232_v36 = vld [vmem:[%s13072_s4 + $0x308] sm:$0xff] }
 0x7c8   :  { %v6856_v58 = vpack.c.bf16 %v6840_v34, %v6840_v34  ;;  %v6783_v55 = vadd.f32 %v6758_v9, %v6581_v24  ;;  %v7154_v46 = vrot.slane %v7153_v41, 4  ;;  %v10246_v9 = vld [vmem:[%s13072_s4 + $0x338] sm:$0xff]  ;;  %7443 = vmatpush.bf16.msra.mxu3 %v10232_v36 }
 0x7c9   :  { %7770 = vmatpush.bf16.msra.mxu2 %v10246_v9 }
 0x7ca   :  { %v7007_v20 = vshrl.u32 %v6856_v58, 16  ;;  %v6804_v26 = vmul.f32 %v12613_v6, %v6783_v55  ;;  %7199 = vrot.lane.b32.xlu1 %v7154_v46, %s10285_s17  ;;  %6897 = vrot.lane.b32.xlu0 %v6856_v58, %s10286_s2  ;;  %v7010_v54 = vshll.u32 %v6856_v58, 16  ;;  %v10218_v58 = vld [vmem:[%s13072_s4 + $0x2d8] sm:$0xff] }
 0x7cb   :  { %7592 = vmatpush.bf16.msra.mxu0 %v10218_v58 }
 0x7cc   :  { %v7009_v57 = vrot.slane %v7007_v20, 7  ;;  %v6825_v38 = vadd.f32 %v12618_v44, %v6804_v26  ;;  %v6585_v22 = vpop.f32.mrf.mxu2  ;;  %v7155_v42 = vrot.slane %v7007_v20, 4  ;;  %v7156_v32 = vrot.slane %v7010_v54, 5 }
 0x7ce   :  { %v12706_v62 = vor.u32 %v7010_v54, %v7009_v57  ;;  %v6841_v31 = vmax.f32 %v6825_v38, 0.0  ;;  %v6436_v47 = vpop.f32.mrf.mxu0  ;;  %v7157_v56 = vor.u32 %v7156_v32, %v7155_v42 }
 0x7cf   :  { %v6760_v5 = vpop.f32.mrf.mxu1  ;;  %v6586_v16 = vadd.f32 %v6585_v22, %v6436_v47 }
 0x7d0   :  { %v6857_v4 = vpack.c.bf16 %v6841_v31, %v6841_v31  ;;  %v6784_v15 = vadd.f32 %v6760_v5, %v6583_v12  ;;  %v7158_v49 = vrot.slane %v7157_v56, 4 }
 0x7d2   :  { %v7014_v17 = vshrl.u32 %v6857_v4, 16  ;;  %v7017_v33 = vshll.u32 %v6857_v4, 16  ;;  %v6805_v14 = vmul.f32 %v12613_v6, %v6784_v15  ;;  %6899 = vrot.lane.b32.xlu2 %v6857_v4, %s10286_s2 }
 0x7d4   :  { %v7016_v63 = vrot.slane %v7014_v17, 7  ;;  %v6826_v3 = vadd.f32 %v12618_v44, %v6805_v14  ;;  %v7159_v53 = vrot.slane %v7014_v17, 4  ;;  %v7160_v35 = vrot.slane %v7017_v33, 5  ;;  %v6587_v0 = vpop.f32.mrf.mxu2 }
 0x7d6   :  { %v12720_v27 = vor.u32 %v7017_v33, %v7016_v63  ;;  %v6842_v40 = vmax.f32 %v6826_v3, 0.0  ;;  %v7161_v48 = vor.u32 %v7160_v35, %v7159_v53  ;;  %v6438_v19 = vpop.f32.mrf.mxu0 }
 0x7d7   :  { %v6763_v60 = vpop.f32.mrf.mxu1  ;;  %v6880_v8 = vpop.permute.xlu2 %6879  ;;  %v6588_v34 = vadd.f32 %v6587_v0, %v6438_v19 }
 0x7d8   :  { %v6858_v52 = vpack.c.bf16 %v6842_v40, %v6842_v40  ;;  %v6785_v11 = vadd.f32 %v6763_v60, %v6586_v16  ;;  %v7162_v30 = vrot.slane %v7161_v48, 4  ;;  %6927 = vst.msk [vmem:[#allocation3 + $0x4] sm:$0xf] %vm1595_vm12, %v6880_v8  ;;  %v10231_v60 = vld [vmem:[%s13072_s4 + $0x300] sm:$0xff] }
 0x7d9   :  { %7444 = vmatpush.bf16.msra.mxu3 %v10231_v60 }
 0x7da   :  { %v7021_v45 = vshrl.u32 %v6858_v52, 16  ;;  %v6806_v51 = vmul.f32 %v12613_v6, %v6785_v11  ;;  %7203 = vrot.lane.b32.xlu1 %v7162_v30, %s10285_s17  ;;  %7201 = vrot.lane.b32.xlu2 %v7158_v49, %s10285_s17  ;;  %v7024_v28 = vshll.u32 %v6858_v52, 16  ;;  %v10245_v11 = vld [vmem:[%s13072_s4 + $0x330] sm:$0xff] }
 0x7db   :  { %6901 = vrot.lane.b32.xlu0 %v6858_v52, %s10286_s2  ;;  %v10217_v52 = vld [vmem:[%s13072_s4 + $0x2d0] sm:$0xff]  ;;  %7771 = vmatpush.bf16.msra.mxu2 %v10245_v11 }
 0x7dc   :  { %v7023_v13 = vrot.slane %v7021_v45, 7  ;;  %v6827_v29 = vadd.f32 %v12618_v44, %v6806_v51  ;;  %v7163_v38 = vrot.slane %v7021_v45, 4  ;;  %v7164_v12 = vrot.slane %v7024_v28, 5  ;;  %v6590_v2 = vpop.f32.mrf.mxu2  ;;  %7593 = vmatpush.bf16.msra.mxu0 %v10217_v52 }
 0x7de   :  { %v12728_v24 = vor.u32 %v7024_v28, %v7023_v13  ;;  %v6843_v41 = vmax.f32 %v6827_v29, 0.0  ;;  %v6441_v57 = vpop.f32.mrf.mxu0  ;;  %v7165_v5 = vor.u32 %v7164_v12, %v7163_v38 }
 0x7df   :  { %v6765_v55 = vpop.f32.mrf.mxu1  ;;  %v7071_v20 = vld [vmem:[#allocation3 + $0x4] sm:$0xf]  ;;  %v6591_v32 = vadd.f32 %v6590_v2, %v6441_v57 }
 0x7e0   :  { %v6859_v46 = vpack.c.bf16 %v6843_v41, %v6843_v41  ;;  %v6786_v26 = vadd.f32 %v6765_v55, %v6588_v34  ;;  %v7072_v54 = vsel %vm11286_vm14, %v12625_v59, %v7071_v20  ;;  %v7166_v56 = vrot.slane %v7165_v5, 4 }
 0x7e1   :  { %7073 = vst [vmem:[#allocation3 + $0x4] sm:$0xf] %v7072_v54 }
 0x7e2   :  { %v7028_v31 = vshrl.u32 %v6859_v46, 16  ;;  %v6807_v22 = vmul.f32 %v12613_v6, %v6786_v26  ;;  %v7031_v7 = vshll.u32 %v6859_v46, 16 }
 0x7e3   :  { %6903 = vrot.lane.b32.xlu0 %v6859_v46, %s10286_s2 }
 0x7e4   :  { %v7030_v43 = vrot.slane %v7028_v31, 7  ;;  %v6828_v47 = vadd.f32 %v12618_v44, %v6807_v22  ;;  %v7167_v33 = vrot.slane %v7028_v31, 4  ;;  %v7168_v14 = vrot.slane %v7031_v7, 5  ;;  %v6592_v19 = vpop.f32.mrf.mxu2 }
 0x7e6   :  { %v12745_v42 = vor.u32 %v7031_v7, %v7030_v43  ;;  %v6844_v59 = vmax.f32 %v6828_v47, 0.0  ;;  %v6443_v35 = vpop.f32.mrf.mxu0  ;;  %v7169_v48 = vor.u32 %v7168_v14, %v7167_v33 }
 0x7e7   :  { %v6768_v4 = vpop.f32.mrf.mxu1  ;;  %v6593_v49 = vadd.f32 %v6592_v19, %v6443_v35 }
 0x7e8   :  { %v6860_v15 = vpack.c.bf16 %v6844_v59, %v6844_v59  ;;  %v6787_v17 = vadd.f32 %v6768_v4, %v6591_v32  ;;  %v7170_v29 = vrot.slane %v7169_v48, 4 }
 0x7ea   :  { %v7035_v63 = vshrl.u32 %v6860_v15, 16  ;;  %v6808_v3 = vmul.f32 %v12613_v6, %v6787_v17  ;;  %6905 = vrot.lane.b32.xlu2 %v6860_v15, %s10286_s2  ;;  %v7038_v53 = vshll.u32 %v6860_v15, 16 }
 0x7eb   :  { %7205 = vrot.lane.b32.xlu0 %v7166_v56, %s10285_s17  ;;  %v7231_v56 = vld [vmem:[#allocation3 + $0x4] sm:$0xf] }
 0x7ec   :  { %v7037_v16 = vrot.slane %v7035_v63, 7  ;;  %v6829_v40 = vadd.f32 %v12618_v44, %v6808_v3  ;;  %v7171_v45 = vrot.slane %v7035_v63, 4  ;;  %v7172_v51 = vrot.slane %v7038_v53, 5 }
 0x7ee   :  { %v12760_v30 = vor.u32 %v7038_v53, %v7037_v16  ;;  %v6845_v8 = vmax.f32 %v6829_v40, 0.0  ;;  %v7173_v58 = vor.u32 %v7172_v51, %v7171_v45 }
 0x7ef   :  { %v6770_v0 = vpop.f32.mrf.mxu1 }
 0x7f0   :  { %v6861_v13 = vpack.c.bf16 %v6845_v8, %v6845_v8  ;;  %v6788_v28 = vadd.f32 %v6770_v0, %v6593_v49  ;;  %v7174_v31 = vrot.slane %v7173_v58, 4 }
 0x7f1   :  { %v6886_v9 = vpop.permute.xlu2 %6885 }
 0x7f2   :  { %v7042_v34 = vshrl.u32 %v6861_v13, 16  ;;  %v7045_v41 = vshll.u32 %v6861_v13, 16  ;;  %v6809_v36 = vmul.f32 %v12613_v6, %v6788_v28  ;;  %6907 = vrot.lane.b32.xlu1 %v6861_v13, %s10286_s2  ;;  %7207 = vrot.lane.b32.xlu2 %v7170_v29, %s10285_s17  ;;  %6930 = vst.msk [vmem:[#allocation3 + $0x10] sm:$0xf] %vm1595_vm12, %v6886_v9 }
 0x7f4   :  { %v7044_v55 = vrot.slane %v7042_v34, 7  ;;  %v6830_v46 = vadd.f32 %v12618_v44, %v6809_v36  ;;  %v7175_v20 = vrot.slane %v7042_v34, 4  ;;  %v7176_v26 = vrot.slane %v7045_v41, 5 }
 0x7f6   :  { %v12767_v54 = vor.u32 %v7045_v41, %v7044_v55  ;;  %v6846_v57 = vmax.f32 %v6830_v46, 0.0  ;;  %v7177_v38 = vor.u32 %v7176_v26, %v7175_v20 }
 0x7f7   :  { %v6882_v22 = vpop.permute.xlu0 %6881 }
 0x7f8   :  { %v6862_v12 = vpack.c.bf16 %v6846_v57, %v6846_v57  ;;  %v7178_v6 = vrot.slane %v7177_v38, 4  ;;  %6928 = vst.msk [vmem:[#allocation3 + $0x8] sm:$0xf] %vm1595_vm12, %v6882_v22  ;;  %v10252_v57 = vld [vmem:[%s13075_s7 + $0x8] sm:$0xff] }
 0x7f9   :  { %v7080_v44 = vld [vmem:[#allocation3 + $0x10] sm:$0xf]  ;;  %8005 = vmatpush.bf16.msra.mxu1 %v10252_v57 }
 0x7fa   :  { %v7049_v2 = vshrl.u32 %v6862_v12, 16  ;;  %v7052_v43 = vshll.u32 %v6862_v12, 16  ;;  %7209 = vrot.lane.b32.xlu1 %v7174_v31, %s10285_s17  ;;  %7211 = vrot.lane.b32.xlu2 %v7178_v6, %s10285_s17  ;;  %v7081_v47 = vsel %vm11286_vm14, %v12652_v23, %v7080_v44 }
 0x7fb   :  { %6909 = vrot.lane.b32.xlu0 %v6862_v12, %s10286_s2  ;;  %7082 = vst [vmem:[#allocation3 + $0x10] sm:$0xf] %v7081_v47 }
 0x7fc   :  { %v7051_v7 = vrot.slane %v7049_v2, 7  ;;  %v6888_v5 = vpop.permute.xlu2 %6887  ;;  %v7179_v32 = vrot.slane %v7049_v2, 4  ;;  %v7180_v59 = vrot.slane %v7052_v43, 5 }
 0x7fd   :  { %6931 = vst.msk [vmem:[#allocation3 + $0x14] sm:$0xf] %vm1595_vm12, %v6888_v5 }
 0x7fe   :  { %v12776_v4 = vor.u32 %v7052_v43, %v7051_v7  ;;  %v7181_v15 = vor.u32 %v7180_v59, %v7179_v32 }
 0x7ff   :  { %v7074_v17 = vld [vmem:[#allocation3 + $0x8] sm:$0xf]  ;;  %v7184_v14 = vpop.permute.xlu0 %7183 }
 0x800   :  { %v7182_v33 = vrot.slane %v7181_v15, 4  ;;  %v7075_v63 = vsel %vm11286_vm14, %v12629_v61, %v7074_v17  ;;  %v7232_v23 = vsel %vm11325_vm0, %v7184_v14, %v7231_v56 }
 0x801   :  { %7076 = vst [vmem:[#allocation3 + $0x8] sm:$0xf] %v7075_v63  ;;  %v6884_v3 = vpop.permute.xlu1 %6883 }
 0x802   :  { %7233 = vst [vmem:[#allocation3 + $0x4] sm:$0xf] %v7232_v23  ;;  %v7240_v53 = vld [vmem:[#allocation3 + $0x10] sm:$0xf] }
 0x803   :  { %7213 = vrot.lane.b32.xlu0 %v7182_v33, %s10285_s17  ;;  %6929 = vst.msk [vmem:[#allocation3 + $0xc] sm:$0xf] %vm1595_vm12, %v6884_v3 }
 0x804   :  { %v7190_v35 = vpop.permute.xlu2 %7189  ;;  %v7083_v16 = vld [vmem:[#allocation3 + $0x14] sm:$0xf] }
 0x805   :  { %v7241_v40 = vsel %vm11325_vm0, %v7190_v35, %v7240_v53  ;;  %v7084_v61 = vsel %vm11286_vm14, %v12660_v10, %v7083_v16 }
 0x806   :  { %7242 = vst [vmem:[#allocation3 + $0x10] sm:$0xf] %v7241_v40 }
 0x807   :  { %7085 = vst [vmem:[#allocation3 + $0x14] sm:$0xf] %v7084_v61 }
 0x808   :  { %v7234_v48 = vld [vmem:[#allocation3 + $0x8] sm:$0xf] }
 0x809   :  { %v10209_v19 = vld [vmem:[#allocation3] sm:$0xff]  ;;  %v7186_v52 = vpop.permute.xlu1 %7185 }
 0x80a   :  { %v7077_v60 = vld [vmem:[#allocation3 + $0xc] sm:$0xf]  ;;  %v7235_v49 = vsel %vm11325_vm0, %v7186_v52, %v7234_v48  ;;  %9813 = vmatmul.msk.bf16.vlgmr.msra.gmra.mxu0 %vm2085_vm1, %v10209_v19  ;;  %v7188_v0 = vpop.permute.xlu0 %7187 }
 0x80b   :  { %v7078_v11 = vsel %vm11286_vm14, %v12645_v21, %v7077_v60  ;;  %7236 = vst [vmem:[#allocation3 + $0x8] sm:$0xf] %v7235_v49 }
 0x80c   :  { %7079 = vst [vmem:[#allocation3 + $0xc] sm:$0xf] %v7078_v11 }
 0x80e   :  { %v7243_v58 = vld [vmem:[#allocation3 + $0x14] sm:$0xf] }
 0x812   :  { %v10223_v51 = vld [vmem:[#allocation3 + $0x4] sm:$0xff] }
 0x813   :  { %v7237_v8 = vld [vmem:[#allocation3 + $0xc] sm:$0xf]  ;;  %9749 = vmatmul.msk.bf16.vlgmr.msra.gmra.mxu3 %vm2085_vm1, %v10223_v51 }
 0x814   :  { %v6894_v10 = vpop.permute.xlu2 %6893  ;;  %v7238_v45 = vsel %vm11325_vm0, %v7188_v0, %v7237_v8 }
 0x815   :  { %6934 = vst.msk [vmem:[#allocation3 + $0x20] sm:$0xf] %vm1595_vm12, %v6894_v10 }
 0x816   :  { %7239 = vst [vmem:[#allocation3 + $0xc] sm:$0xf] %v7238_v45 }
 0x81c   :  { %v7092_v21 = vld [vmem:[#allocation3 + $0x20] sm:$0xf]  ;;  %v6890_v13 = vpop.permute.xlu1 %6889  ;;  %v6896_v28 = vpop.permute.xlu2 %6895 }
 0x81d   :  { %v7093_v29 = vsel %vm11286_vm14, %v12691_v18, %v7092_v21  ;;  %6932 = vst.msk [vmem:[#allocation3 + $0x18] sm:$0xf] %vm1595_vm12, %v6890_v13  ;;  %v10210_v34 = vld [vmem:[#allocation3 + $0x8] sm:$0xff] }
 0x81e   :  { %v10237_v41 = vld [vmem:[#allocation3 + $0x8] sm:$0xff]  ;;  %7094 = vst [vmem:[#allocation3 + $0x20] sm:$0xf] %v7093_v29  ;;  %9814 = vmatmul.msk.bf16.gmra.mxu0 %vm2085_vm1, %v10210_v34 }
 0x81f   :  { %6935 = vst.msk [vmem:[#allocation3 + $0x2c] sm:$0xf] %vm1595_vm12, %v6896_v28  ;;  %9889 = vmatmul.msk.bf16.vlgmr.msra.gmra.mxu2 %vm2085_vm1, %v10237_v41  ;;  %v10224_v20 = vld [vmem:[#allocation3 + $0xc] sm:$0xff] }
 0x823   :  { %9750 = vmatmul.msk.bf16.gmra.mxu3 %vm2085_vm1, %v10224_v20 }
 0x824   :  { %v7086_v36 = vld [vmem:[#allocation3 + $0x18] sm:$0xf]  ;;  %v7192_v9 = vpop.permute.xlu1 %7191  ;;  %v6892_v55 = vpop.permute.xlu0 %6891 }
 0x825   :  { %v7087_v46 = vsel %vm11286_vm14, %v12672_v25, %v7086_v36  ;;  %v7244_v18 = vsel %vm11325_vm0, %v7192_v9, %v7243_v58  ;;  %6933 = vst.msk [vmem:[#allocation3 + $0x1c] sm:$0xf] %vm1595_vm12, %v6892_v55  ;;  %v7252_v5 = vld [vmem:[#allocation3 + $0x20] sm:$0xf] }
 0x826   :  { %7088 = vst [vmem:[#allocation3 + $0x18] sm:$0xf] %v7087_v46  ;;  %v7095_v26 = vld [vmem:[#allocation3 + $0x2c] sm:$0xf]  ;;  %v10251_v36 = vld [vmem:[%s13075_s7] sm:$0xff] }
 0x827   :  { %v7096_v38 = vsel %vm11286_vm14, %v12700_v1, %v7095_v26  ;;  %7245 = vst [vmem:[#allocation3 + $0x14] sm:$0xf] %v7244_v18  ;;  %8006 = vmatpush.bf16.msra.mxu1 %v10251_v36 }
 0x828   :  { %7097 = vst [vmem:[#allocation3 + $0x2c] sm:$0xf] %v7096_v38 }
 0x82c   :  { %v7089_v25 = vld [vmem:[#allocation3 + $0x1c] sm:$0xf]  ;;  %v7196_v12 = vpop.permute.xlu1 %7195  ;;  %v6900_v31 = vpop.permute.xlu2 %6899 }
 0x82d   :  { %v7090_v6 = vsel %vm11286_vm14, %v12678_v39, %v7089_v25  ;;  %6937 = vst.msk [vmem:[#allocation3 + $0x34] sm:$0xf] %vm1595_vm12, %v6900_v31  ;;  %v7246_v22 = vld [vmem:[#allocation3 + $0x18] sm:$0xf]  ;;  %v7194_v2 = vpop.permute.xlu0 %7193 }
 0x82e   :  { %7091 = vst [vmem:[#allocation3 + $0x1c] sm:$0xf] %v7090_v6  ;;  %v7247_v1 = vsel %vm11325_vm0, %v7194_v2, %v7246_v22  ;;  %v10211_v43 = vld [vmem:[#allocation3 + $0x10] sm:$0xff] }
 0x82f   :  { %v10238_v44 = vld [vmem:[#allocation3 + $0x10] sm:$0xff]  ;;  %7248 = vst [vmem:[#allocation3 + $0x18] sm:$0xf] %v7247_v1  ;;  %9815 = vmatmul.msk.bf16.gmra.mxu0 %vm2085_vm1, %v10211_v43  ;;  %v7255_v56 = vld [vmem:[#allocation3 + $0x2c] sm:$0xf] }
 0x830   :  { %9890 = vmatmul.msk.bf16.gmra.mxu2 %vm2085_vm1, %v10238_v44 }
 0x834   :  { %v7101_v7 = vld [vmem:[#allocation3 + $0x34] sm:$0xf]  ;;  %v7198_v47 = vpop.permute.xlu1 %7197  ;;  %v7202_v33 = vpop.permute.xlu2 %7201 }
 0x835   :  { %v7249_v32 = vld [vmem:[#allocation3 + $0x1c] sm:$0xf]  ;;  %v7102_v39 = vsel %vm11286_vm14, %v12720_v27, %v7101_v7  ;;  %v7253_v59 = vsel %vm11325_vm0, %v7198_v47, %v7252_v5 }
 0x836   :  { %v7250_v15 = vsel %vm11325_vm0, %v7196_v12, %v7249_v32  ;;  %7103 = vst [vmem:[#allocation3 + $0x34] sm:$0xf] %v7102_v39  ;;  %v10225_v17 = vld [vmem:[#allocation3 + $0x14] sm:$0xff] }
 0x837   :  { %7251 = vst [vmem:[#allocation3 + $0x1c] sm:$0xf] %v7250_v15  ;;  %9751 = vmatmul.msk.bf16.gmra.mxu3 %vm2085_vm1, %v10225_v17 }
 0x838   :  { %7254 = vst [vmem:[#allocation3 + $0x20] sm:$0xf] %v7253_v59 }
 0x83c   :  { %v7200_v14 = vpop.permute.xlu1 %7199  ;;  %v6898_v63 = vpop.permute.xlu0 %6897 }
 0x83d   :  { %v7256_v23 = vsel %vm11325_vm0, %v7200_v14, %v7255_v56  ;;  %6936 = vst.msk [vmem:[#allocation3 + $0x30] sm:$0xf] %vm1595_vm12, %v6898_v63  ;;  %v7261_v19 = vld [vmem:[#allocation3 + $0x34] sm:$0xf] }
 0x83e   :  { %7257 = vst [vmem:[#allocation3 + $0x2c] sm:$0xf] %v7256_v23  ;;  %v10212_v27 = vld [vmem:[#allocation3 + $0x18] sm:$0xff]  ;;  %v12904_v23 = vld [vmem:[%s13074_s6 + $0x5] ss:$0 sm:$0xff] }
 0x83f   :  { %v10239_v3 = vld [vmem:[#allocation3 + $0x18] sm:$0xff]  ;;  %9816 = vmatmul.msk.bf16.gmra.mxu0 %vm2085_vm1, %v10212_v27  ;;  %v10240_v8 = vld [vmem:[#allocation3 + $0x20] sm:$0xff] }
 0x840   :  { %9891 = vmatmul.msk.bf16.gmra.mxu2 %vm2085_vm1, %v10239_v3  ;;  %v10226_v40 = vld [vmem:[#allocation3 + $0x1c] sm:$0xff] }
 0x844   :  { %v7098_v53 = vld [vmem:[#allocation3 + $0x30] sm:$0xf]  ;;  %v6906_v35 = vpop.permute.xlu2 %6905 }
 0x845   :  { %v7099_v16 = vsel %vm11286_vm14, %v12706_v62, %v7098_v53  ;;  %6940 = vst.msk [vmem:[#allocation3 + $0x40] sm:$0xf] %vm1595_vm12, %v6906_v35  ;;  %v10213_v62 = vld [vmem:[#allocation3 + $0x28] sm:$0xff]  ;;  %v7871_v35 = vld [vmem:[#allocation4] sm:$0xff] }
 0x846   :  { %7100 = vst [vmem:[#allocation3 + $0x30] sm:$0xf] %v7099_v16 }
 0x847   :  { %9752 = vmatmul.msk.bf16.gmra.mxu3 %vm2085_vm1, %v10226_v40 }
 0x84c   :  { %v7110_v61 = vld [vmem:[#allocation3 + $0x40] sm:$0xf]  ;;  %v7204_v48 = vpop.permute.xlu1 %7203 }
 0x84d   :  { %v7111_v60 = vsel %vm11286_vm14, %v12760_v30, %v7110_v61  ;;  %v7262_v52 = vsel %vm11325_vm0, %v7204_v48, %v7261_v19  ;;  %v6902_v11 = vpop.permute.xlu0 %6901  ;;  %v7258_v49 = vld [vmem:[#allocation3 + $0x30] sm:$0xf] }
 0x84e   :  { %7112 = vst [vmem:[#allocation3 + $0x40] sm:$0xf] %v7111_v60  ;;  %v7259_v0 = vsel %vm11325_vm0, %v7202_v33, %v7258_v49 }
 0x84f   :  { %7263 = vst [vmem:[#allocation3 + $0x34] sm:$0xf] %v7262_v52  ;;  %9817 = vmatmul.msk.bf16.gmra.mxu0 %vm2085_vm1, %v10213_v62  ;;  %v7872_v62 = vld [vmem:[#allocation4 + $0x8] sm:$0xff] }
 0x850   :  { %6938 = vst.msk [vmem:[#allocation3 + $0x38] sm:$0xf] %vm1595_vm12, %v6902_v11  ;;  %9892 = vmatmul.msk.bf16.gmra.mxu2 %vm2085_vm1, %v10240_v8 }
 0x851   :  { %7260 = vst [vmem:[#allocation3 + $0x30] sm:$0xf] %v7259_v0 }
 0x855   :  { %v6904_v30 = vpop.permute.xlu0 %6903  ;;  %v7270_v26 = vld [vmem:[#allocation3 + $0x40] sm:$0xf] }
 0x856   :  { %6939 = vst.msk [vmem:[#allocation3 + $0x3c] sm:$0xf] %vm1595_vm12, %v6904_v30 }
 0x857   :  { %v7104_v10 = vld [vmem:[#allocation3 + $0x38] sm:$0xf] }
 0x858   :  { %v7105_v45 = vsel %vm11286_vm14, %v12728_v24, %v7104_v10  ;;  %v10227_v51 = vld [vmem:[#allocation3 + $0x2c] sm:$0xff] }
 0x859   :  { %7106 = vst [vmem:[#allocation3 + $0x38] sm:$0xf] %v7105_v45  ;;  %9753 = vmatmul.msk.bf16.gmra.mxu3 %vm2085_vm1, %v10227_v51  ;;  %v10214_v29 = vld [vmem:[#allocation3 + $0x30] sm:$0xff] }
 0x85a   :  { %v10241_v34 = vld [vmem:[#allocation3 + $0x30] sm:$0xff] }
 0x85d   :  { %v7107_v21 = vld [vmem:[#allocation3 + $0x3c] sm:$0xf]  ;;  %v7206_v28 = vpop.permute.xlu0 %7205 }
 0x85e   :  { %v7108_v13 = vsel %vm11286_vm14, %v12745_v42, %v7107_v21  ;;  %v7208_v42 = vpop.permute.xlu2 %7207 }
 0x85f   :  { %7109 = vst [vmem:[#allocation3 + $0x3c] sm:$0xf] %v7108_v13  ;;  %9818 = vmatmul.msk.bf16.gmra.mxu0 %vm2085_vm1, %v10214_v29  ;;  %v7873_v29 = vld [vmem:[#allocation4 + $0x10] sm:$0xff] }
 0x860   :  { %v7264_v41 = vld [vmem:[#allocation3 + $0x38] sm:$0xf]  ;;  %9893 = vmatmul.msk.bf16.gmra.mxu2 %vm2085_vm1, %v10241_v34 }
 0x861   :  { %v7265_v24 = vsel %vm11325_vm0, %v7206_v28, %v7264_v41 }
 0x862   :  { %7266 = vst [vmem:[#allocation3 + $0x38] sm:$0xf] %v7265_v24 }
 0x864   :  { %v6908_v9 = vpop.permute.xlu1 %6907 }
 0x865   :  { %6941 = vst.msk [vmem:[#allocation3 + $0x44] sm:$0xf] %vm1595_vm12, %v6908_v9 }
 0x866   :  { %v7267_v58 = vld [vmem:[#allocation3 + $0x3c] sm:$0xf]  ;;  %v7212_v6 = vpop.permute.xlu2 %7211 }
 0x867   :  { %v7268_v55 = vsel %vm11325_vm0, %v7208_v42, %v7267_v58 }
 0x868   :  { %7269 = vst [vmem:[#allocation3 + $0x3c] sm:$0xf] %v7268_v55 }
 0x869   :  { %v10228_v46 = vld [vmem:[#allocation3 + $0x34] sm:$0xff] }
 0x86a   :  { %9754 = vmatmul.msk.bf16.gmra.mxu3 %vm2085_vm1, %v10228_v46 }
 0x86c   :  { %v7113_v18 = vld [vmem:[#allocation3 + $0x44] sm:$0xf]  ;;  %v7210_v20 = vpop.permute.xlu1 %7209 }
 0x86d   :  { %v7114_v57 = vsel %vm11286_vm14, %v12767_v54, %v7113_v18  ;;  %v7271_v38 = vsel %vm11325_vm0, %v7210_v20, %v7270_v26  ;;  %v6910_v25 = vpop.permute.xlu0 %6909 }
 0x86e   :  { %7115 = vst [vmem:[#allocation3 + $0x44] sm:$0xf] %v7114_v57  ;;  %v7874_v57 = vld [vmem:[#allocation4 + $0x18] sm:$0xff] }
 0x86f   :  { %7272 = vst [vmem:[#allocation3 + $0x40] sm:$0xf] %v7271_v38  ;;  %v10215_v12 = vld [vmem:[#allocation3 + $0x38] sm:$0xff] }
 0x870   :  { %v10242_v31 = vld [vmem:[#allocation3 + $0x38] sm:$0xff]  ;;  %6942 = vst.msk [vmem:[#allocation3 + $0x48] sm:$0xf] %vm1595_vm12, %v6910_v25  ;;  %9819 = vmatmul.msk.bf16.gmra.mxu0 %vm2085_vm1, %v10215_v12 }
 0x871   :  { %9894 = vmatmul.msk.bf16.gmra.mxu2 %vm2085_vm1, %v10242_v31 }
 0x875   :  { %v7273_v22 = vld [vmem:[#allocation3 + $0x44] sm:$0xf]  ;;  %v7214_v5 = vpop.permute.xlu0 %7213 }
 0x876   :  { %v7274_v2 = vsel %vm11325_vm0, %v7212_v6, %v7273_v22  ;;  %v10229_v1 = vld [vmem:[#allocation3 + $0x3c] sm:$0xff] }
 0x877   :  { %v7116_v54 = vld [vmem:[#allocation3 + $0x48] sm:$0xf]  ;;  %7275 = vst [vmem:[#allocation3 + $0x44] sm:$0xf] %v7274_v2 }
 0x878   :  { %v7117_v43 = vsel %vm11286_vm14, %v12776_v4, %v7116_v54 }
 0x879   :  { %7118 = vst [vmem:[#allocation3 + $0x48] sm:$0xf] %v7117_v43 }
 0x87a   :  { %9755 = vmatmul.msk.bf16.gmra.mxu3 %vm2085_vm1, %v10229_v1  ;;  %v7875_v1 = vld [vmem:[#allocation4 + $0x20] sm:$0xff] }
 0x87e   :  { %v10216_v44 = vld [vmem:[#allocation3 + $0x40] sm:$0xff] }
 0x87f   :  { %v10243_v7 = vld [vmem:[#allocation3 + $0x40] sm:$0xff] }
 0x880   :  { %v7276_v47 = vld [vmem:[#allocation3 + $0x48] sm:$0xf]  ;;  %9820 = vmatmul.msk.bf16.gmra.mxu0 %vm2085_vm1, %v10216_v44 }
 0x881   :  { %v7277_v32 = vsel %vm11325_vm0, %v7214_v5, %v7276_v47  ;;  %9895 = vmatmul.msk.bf16.gmra.mxu2 %vm2085_vm1, %v10243_v7 }
 0x882   :  { %7278 = vst [vmem:[#allocation3 + $0x48] sm:$0xf] %v7277_v32 }
 0x887   :  { %v7595_v59 = vpop.f32.mrf.mxu0 }
 0x889   :  { %v10230_v39 = vld [vmem:[#allocation3 + $0x44] sm:$0xff] }
 0x88a   :  { %9756 = vmatmul.msk.bf16.gmra.mxu3 %vm2085_vm1, %v10230_v39  ;;  %v10244_v37 = vld [vmem:[#allocation3 + $0x48] sm:$0xff] }
 0x88f   :  { %v7597_v4 = vpop.f32.mrf.mxu0 }
 0x891   :  { %9896 = vmatmul.msk.bf16.gmra.mxu2 %vm2085_vm1, %v10244_v37 }
 0x896   :  { %v7446_v15 = vpop.f32.mrf.mxu3 }
 0x897   :  { %v7596_v33 = vadd.f32 %v7595_v59, %v7446_v15 }
 0x89b   :  { %v7600_v17 = vpop.f32.mrf.mxu0 }
 0x89e   :  { %v7448_v14 = vpop.f32.mrf.mxu3 }
 0x89f   :  { %v7598_v16 = vadd.f32 %v7597_v4, %v7448_v14 }
 0x8a2   :  { %v7773_v56 = vpop.f32.mrf.mxu2 }
 0x8a3   :  { %v7813_v63 = vadd.f32 %v7773_v56, %v7596_v33  ;;  %v7602_v27 = vpop.f32.mrf.mxu0  ;;  %v7876_v33 = vld [vmem:[#allocation4 + $0x28] sm:$0xff] }
 0x8a5   :  { %v7834_v3 = vmul.f32 %v12899_v50, %v7813_v63 }
 0x8a6   :  { %v7451_v61 = vpop.f32.mrf.mxu3 }
 0x8a7   :  { %v7855_v53 = vadd.f32 %v12904_v23, %v7834_v3  ;;  %v7601_v0 = vadd.f32 %v7600_v17, %v7451_v61  ;;  %v7877_v61 = vld [vmem:[#allocation4 + $0x30] sm:$0xff] }
 0x8a9   :  { %v7887_v40 = vadd.f32 %v7871_v35, %v7855_v53 }
 0x8aa   :  { %v7775_v48 = vpop.f32.mrf.mxu2 }
 0x8ab   :  { %v7903_v19 = vmax.f32 %v7887_v40, 0.0  ;;  %v7814_v60 = vadd.f32 %v7775_v48, %v7598_v16 }
 0x8ac   :  { %v7605_v11 = vpop.f32.mrf.mxu0 }
 0x8ad   :  { %7919 = vst.msk [vmem:[#allocation4] sm:$0xff] %vm1481_vm10, %v7903_v19  ;;  %v7835_v52 = vmul.f32 %v12899_v50, %v7814_v60 }
 0x8ae   :  { %v7453_v30 = vpop.f32.mrf.mxu3 }
 0x8af   :  { %v7856_v49 = vadd.f32 %v12904_v23, %v7835_v52  ;;  %v7603_v34 = vadd.f32 %v7602_v27, %v7453_v30 }
 0x8b1   :  { %v7888_v8 = vadd.f32 %v7872_v62, %v7856_v49 }
 0x8b3   :  { %v7904_v10 = vmax.f32 %v7888_v8, 0.0  ;;  %v7778_v45 = vpop.f32.mrf.mxu2 }
 0x8b4   :  { %v7815_v51 = vadd.f32 %v7778_v45, %v7601_v0  ;;  %v7607_v13 = vpop.f32.mrf.mxu0  ;;  %v7935_v58 = vld [vmem:[#allocation4] sm:$0xff] }
 0x8b5   :  { %7920 = vst.msk [vmem:[#allocation4 + $0x8] sm:$0xff] %vm1481_vm10, %v7904_v10 }
 0x8b6   :  { %v7836_v21 = vmul.f32 %v12899_v50, %v7815_v51  ;;  %v7878_v51 = vld [vmem:[#allocation4 + $0x38] sm:$0xff] }
 0x8b8   :  { %v7857_v28 = vadd.f32 %v12904_v23, %v7836_v21 }
 0x8ba   :  { %v7889_v41 = vadd.f32 %v7873_v29, %v7857_v28  ;;  %v7456_v24 = vpop.f32.mrf.mxu3 }
 0x8bb   :  { %v7780_v36 = vpop.f32.mrf.mxu2  ;;  %v7606_v38 = vadd.f32 %v7605_v11, %v7456_v24 }
 0x8bc   :  { %v7905_v9 = vmax.f32 %v7889_v41, 0.0  ;;  %v7816_v42 = vadd.f32 %v7780_v36, %v7603_v34  ;;  %v7936_v55 = vld [vmem:[#allocation4 + $0x8] sm:$0xff]  ;;  %v7610_v26 = vpop.f32.mrf.mxu0 }
 0x8bd   :  { %v7951_v46 = vpack.c.bf16 %v7936_v55, %v7935_v58 }
 0x8be   :  { %7921 = vst.msk [vmem:[#allocation4 + $0x10] sm:$0xff] %vm1481_vm10, %v7905_v9  ;;  %v7837_v18 = vmul.f32 %v12899_v50, %v7816_v42  ;;  %v7879_v42 = vld [vmem:[#allocation4 + $0x40] sm:$0xff] }
 0x8bf   :  { %9907 = vmatmul.msk.bf16.vlgmr.msra.gmra.mxu1 %vm1481_vm10, %v7951_v46 }
 0x8c0   :  { %v7858_v20 = vadd.f32 %v12904_v23, %v7837_v18 }
 0x8c2   :  { %v7890_v25 = vadd.f32 %v7874_v57, %v7858_v20  ;;  %v7458_v12 = vpop.f32.mrf.mxu3 }
 0x8c3   :  { %v7783_v31 = vpop.f32.mrf.mxu2  ;;  %v7608_v43 = vadd.f32 %v7607_v13, %v7458_v12 }
 0x8c4   :  { %v7906_v6 = vmax.f32 %v7890_v25, 0.0  ;;  %v7817_v22 = vadd.f32 %v7783_v31, %v7606_v38  ;;  %v7612_v7 = vpop.f32.mrf.mxu0 }
 0x8c5   :  { %v7937_v59 = vld [vmem:[#allocation4 + $0x10] sm:$0xff] }
 0x8c6   :  { %7922 = vst.msk [vmem:[#allocation4 + $0x18] sm:$0xff] %vm1481_vm10, %v7906_v6  ;;  %v7838_v2 = vmul.f32 %v12899_v50, %v7817_v22  ;;  %v7880_v6 = vld [vmem:[#allocation4 + $0x48] sm:$0xff] }
 0x8c8   :  { %v7859_v54 = vadd.f32 %v12904_v23, %v7838_v2 }
 0x8ca   :  { %v7891_v44 = vadd.f32 %v7875_v1, %v7859_v54  ;;  %v7461_v47 = vpop.f32.mrf.mxu3 }
 0x8cb   :  { %v7785_v5 = vpop.f32.mrf.mxu2  ;;  %v7611_v14 = vadd.f32 %v7610_v26, %v7461_v47 }
 0x8cc   :  { %v7907_v32 = vmax.f32 %v7891_v44, 0.0  ;;  %v7818_v39 = vadd.f32 %v7785_v5, %v7608_v43  ;;  %v7615_v53 = vpop.f32.mrf.mxu0 }
 0x8cd   :  { %v7938_v37 = vld [vmem:[#allocation4 + $0x18] sm:$0xff] }
 0x8ce   :  { %7923 = vst.msk [vmem:[#allocation4 + $0x20] sm:$0xff] %vm1481_vm10, %v7907_v32  ;;  %v7839_v4 = vmul.f32 %v12899_v50, %v7818_v39  ;;  %v7952_v15 = vpack.c.bf16 %v7938_v37, %v7937_v59  ;;  %v7881_v32 = vld [vmem:[#allocation4 + $0x50] sm:$0xff] }
 0x8d0   :  { %v7860_v17 = vadd.f32 %v12904_v23, %v7839_v4  ;;  %9908 = vmatmul.msk.bf16.gmra.mxu1 %vm1481_vm10, %v7952_v15 }
 0x8d2   :  { %v7892_v56 = vadd.f32 %v7876_v33, %v7860_v17  ;;  %v7463_v63 = vpop.f32.mrf.mxu3 }
 0x8d3   :  { %v7788_v27 = vpop.f32.mrf.mxu2  ;;  %v7613_v48 = vadd.f32 %v7612_v7, %v7463_v63 }
 0x8d4   :  { %v7908_v3 = vmax.f32 %v7892_v56, 0.0  ;;  %v7819_v35 = vadd.f32 %v7788_v27, %v7611_v14  ;;  %v7617_v0 = vpop.f32.mrf.mxu0 }
 0x8d5   :  { %v7939_v62 = vld [vmem:[#allocation4 + $0x20] sm:$0xff] }
 0x8d6   :  { %7924 = vst.msk [vmem:[#allocation4 + $0x28] sm:$0xff] %vm1481_vm10, %v7908_v3  ;;  %v7840_v16 = vmul.f32 %v12899_v50, %v7819_v35 }
 0x8d8   :  { %v7861_v40 = vadd.f32 %v12904_v23, %v7840_v16 }
 0x8da   :  { %v7893_v19 = vadd.f32 %v7877_v61, %v7861_v40 }
 0x8db   :  { %v7790_v60 = vpop.f32.mrf.mxu2 }
 0x8dc   :  { %v7909_v52 = vmax.f32 %v7893_v19, 0.0  ;;  %v7820_v11 = vadd.f32 %v7790_v60, %v7613_v48  ;;  %v7466_v49 = vpop.f32.mrf.mxu3  ;;  %v7620_v36 = vpop.f32.mrf.mxu0 }
 0x8dd   :  { %v7940_v8 = vld [vmem:[#allocation4 + $0x28] sm:$0xff]  ;;  %v7616_v21 = vadd.f32 %v7615_v53, %v7466_v49  ;;  %v7882_v53 = vld [vmem:[#allocation4 + $0x58] sm:$0xff]  ;;  %v7883_v49 = vld [vmem:[#allocation4 + $0x60] sm:$0xff] }
 0x8de   :  { %7925 = vst.msk [vmem:[#allocation4 + $0x30] sm:$0xff] %vm1481_vm10, %v7909_v52  ;;  %v7841_v30 = vmul.f32 %v12899_v50, %v7820_v11  ;;  %v7953_v10 = vpack.c.bf16 %v7940_v8, %v7939_v62 }
 0x8e0   :  { %v7862_v45 = vadd.f32 %v12904_v23, %v7841_v30  ;;  %9909 = vmatmul.msk.bf16.gmra.mxu1 %vm1481_vm10, %v7953_v10 }
 0x8e2   :  { %v7894_v13 = vadd.f32 %v7878_v51, %v7862_v45 }
 0x8e3   :  { %v7793_v28 = vpop.f32.mrf.mxu2 }
 0x8e4   :  { %v7910_v29 = vmax.f32 %v7894_v13, 0.0  ;;  %v7821_v34 = vadd.f32 %v7793_v28, %v7616_v21  ;;  %v7468_v41 = vpop.f32.mrf.mxu3  ;;  %v7622_v22 = vpop.f32.mrf.mxu0 }
 0x8e5   :  { %v7618_v58 = vadd.f32 %v7617_v0, %v7468_v41  ;;  %v7941_v26 = vld [vmem:[#allocation4 + $0x30] sm:$0xff]  ;;  %v7884_v41 = vld [vmem:[#allocation4 + $0x68] sm:$0xff] }
 0x8e6   :  { %7926 = vst.msk [vmem:[#allocation4 + $0x38] sm:$0xff] %vm1481_vm10, %v7910_v29  ;;  %v7842_v24 = vmul.f32 %v12899_v50, %v7821_v34 }
 0x8e8   :  { %v7863_v9 = vadd.f32 %v12904_v23, %v7842_v24 }
 0x8ea   :  { %v7895_v55 = vadd.f32 %v7879_v42, %v7863_v9 }
 0x8eb   :  { %v7795_v46 = vpop.f32.mrf.mxu2 }
 0x8ec   :  { %v7911_v18 = vmax.f32 %v7895_v55, 0.0  ;;  %v7822_v20 = vadd.f32 %v7795_v46, %v7618_v58 }
 0x8ed   :  { %v7942_v57 = vld [vmem:[#allocation4 + $0x38] sm:$0xff]  ;;  %v7471_v38 = vpop.f32.mrf.mxu3  ;;  %v7625_v37 = vpop.f32.mrf.mxu0 }
 0x8ee   :  { %7927 = vst.msk [vmem:[#allocation4 + $0x40] sm:$0xff] %vm1481_vm10, %v7911_v18  ;;  %v7843_v25 = vmul.f32 %v12899_v50, %v7822_v20  ;;  %v7954_v12 = vpack.c.bf16 %v7942_v57, %v7941_v26  ;;  %v7621_v54 = vadd.f32 %v7620_v36, %v7471_v38  ;;  %v7885_v26 = vld [vmem:[#allocation4 + $0x70] sm:$0xff] }
 0x8f0   :  { %v7864_v31 = vadd.f32 %v12904_v23, %v7843_v25  ;;  %9910 = vmatmul.msk.bf16.gmra.mxu1 %vm1481_vm10, %v7954_v12 }
 0x8f2   :  { %v7896_v2 = vadd.f32 %v7880_v6, %v7864_v31 }
 0x8f4   :  { %v7912_v1 = vmax.f32 %v7896_v2, 0.0  ;;  %v7798_v43 = vpop.f32.mrf.mxu2 }
 0x8f5   :  { %v7823_v44 = vadd.f32 %v7798_v43, %v7621_v54  ;;  %v7473_v7 = vpop.f32.mrf.mxu3  ;;  %v7943_v33 = vld [vmem:[#allocation4 + $0x40] sm:$0xff]  ;;  %v7627_v19 = vpop.f32.mrf.mxu0  ;;  %v7886_v43 = vld [vmem:[#allocation4 + $0x78] sm:$0xff] }
 0x8f6   :  { %7928 = vst.msk [vmem:[#allocation4 + $0x48] sm:$0xff] %vm1481_vm10, %v7912_v1  ;;  %v7623_v39 = vadd.f32 %v7622_v22, %v7473_v7 }
 0x8f7   :  { %v7844_v47 = vmul.f32 %v12899_v50, %v7823_v44 }
 0x8f9   :  { %v7865_v5 = vadd.f32 %v12904_v23, %v7844_v47 }
 0x8fb   :  { %v7897_v59 = vadd.f32 %v7881_v32, %v7865_v5 }
 0x8fc   :  { %v7800_v4 = vpop.f32.mrf.mxu2 }
 0x8fd   :  { %v7913_v15 = vmax.f32 %v7897_v59, 0.0  ;;  %v7824_v17 = vadd.f32 %v7800_v4, %v7623_v39  ;;  %v7944_v14 = vld [vmem:[#allocation4 + $0x48] sm:$0xff]  ;;  %v7476_v56 = vpop.f32.mrf.mxu3  ;;  %v7630_v29 = vpop.f32.mrf.mxu0  ;;  %v12965_v39 = vld [vmem:[%s13076_s8] ss:$0 sm:$0xff] }
 0x8fe   :  { %v7955_v63 = vpack.c.bf16 %v7944_v14, %v7943_v33  ;;  %v7626_v35 = vadd.f32 %v7625_v37, %v7476_v56 }
 0x8ff   :  { %7929 = vst.msk [vmem:[#allocation4 + $0x50] sm:$0xff] %vm1481_vm10, %v7913_v15  ;;  %v7845_v27 = vmul.f32 %v12899_v50, %v7824_v17 }
 0x900   :  { %9911 = vmatmul.msk.bf16.gmra.mxu1 %vm1481_vm10, %v7955_v63 }
 0x901   :  { %v7866_v3 = vadd.f32 %v12904_v23, %v7845_v27 }
 0x903   :  { %v7898_v16 = vadd.f32 %v7882_v53, %v7866_v3 }
 0x904   :  { %v7803_v40 = vpop.f32.mrf.mxu2 }
 0x905   :  { %v7914_v61 = vmax.f32 %v7898_v16, 0.0  ;;  %v7825_v48 = vadd.f32 %v7803_v40, %v7626_v35  ;;  %v7478_v60 = vpop.f32.mrf.mxu3  ;;  %v7632_v20 = vpop.f32.mrf.mxu0 }
 0x906   :  { %v7628_v62 = vadd.f32 %v7627_v19, %v7478_v60  ;;  %v7945_v51 = vld [vmem:[#allocation4 + $0x50] sm:$0xff] }
 0x907   :  { %7930 = vst.msk [vmem:[#allocation4 + $0x58] sm:$0xff] %vm1481_vm10, %v7914_v61  ;;  %v7846_v52 = vmul.f32 %v12899_v50, %v7825_v48 }
 0x909   :  { %v7867_v11 = vadd.f32 %v12904_v23, %v7846_v52 }
 0x90b   :  { %v7899_v8 = vadd.f32 %v7883_v49, %v7867_v11 }
 0x90c   :  { %v7805_v0 = vpop.f32.mrf.mxu2 }
 0x90d   :  { %v7915_v30 = vmax.f32 %v7899_v8, 0.0  ;;  %v7826_v10 = vadd.f32 %v7805_v0, %v7628_v62  ;;  %v7481_v45 = vpop.f32.mrf.mxu3 }
 0x90e   :  { %v7946_v21 = vld [vmem:[#allocation4 + $0x58] sm:$0xff]  ;;  %v7631_v24 = vadd.f32 %v7630_v29, %v7481_v45 }
 0x90f   :  { %7931 = vst.msk [vmem:[#allocation4 + $0x60] sm:$0xff] %vm1481_vm10, %v7915_v30  ;;  %v7847_v13 = vmul.f32 %v12899_v50, %v7826_v10  ;;  %v7956_v28 = vpack.c.bf16 %v7946_v21, %v7945_v51 }
 0x911   :  { %v7868_v34 = vadd.f32 %v12904_v23, %v7847_v13  ;;  %9912 = vmatmul.msk.bf16.gmra.mxu1 %vm1481_vm10, %v7956_v28 }
 0x913   :  { %v7900_v36 = vadd.f32 %v7884_v41, %v7868_v34 }
 0x914   :  { %v7808_v9 = vpop.f32.mrf.mxu2 }
 0x915   :  { %v7916_v42 = vmax.f32 %v7900_v36, 0.0  ;;  %v7827_v58 = vadd.f32 %v7808_v9, %v7631_v24  ;;  %v7483_v46 = vpop.f32.mrf.mxu3 }
 0x916   :  { %v7633_v57 = vadd.f32 %v7632_v20, %v7483_v46  ;;  %v7947_v6 = vld [vmem:[#allocation4 + $0x60] sm:$0xff] }
 0x917   :  { %7932 = vst.msk [vmem:[#allocation4 + $0x68] sm:$0xff] %vm1481_vm10, %v7916_v42  ;;  %v7848_v55 = vmul.f32 %v12899_v50, %v7827_v58 }
 0x919   :  { %v7869_v18 = vadd.f32 %v12904_v23, %v7848_v55 }
 0x91b   :  { %v7901_v38 = vadd.f32 %v7885_v26, %v7869_v18 }
 0x91c   :  { %v7810_v25 = vpop.f32.mrf.mxu2 }
 0x91d   :  { %v7917_v12 = vmax.f32 %v7901_v38, 0.0  ;;  %v7828_v31 = vadd.f32 %v7810_v25, %v7633_v57 }
 0x91e   :  { %v7948_v22 = vld [vmem:[#allocation4 + $0x68] sm:$0xff] }
 0x91f   :  { %7933 = vst.msk [vmem:[#allocation4 + $0x70] sm:$0xff] %vm1481_vm10, %v7917_v12  ;;  %v7849_v2 = vmul.f32 %v12899_v50, %v7828_v31  ;;  %v7957_v54 = vpack.c.bf16 %v7948_v22, %v7947_v6  ;;  %v12970_v50 = vld [vmem:[%s13077_s9] ss:$0 sm:$0xff] }
 0x921   :  { %v7870_v1 = vadd.f32 %v12904_v23, %v7849_v2  ;;  %9913 = vmatmul.msk.bf16.gmra.mxu1 %vm1481_vm10, %v7957_v54 }
 0x923   :  { %v7902_v44 = vadd.f32 %v7886_v43, %v7870_v1 }
 0x925   :  { %v7918_v7 = vmax.f32 %v7902_v44, 0.0 }
 0x926   :  { %v7949_v47 = vld [vmem:[#allocation4 + $0x70] sm:$0xff] }
 0x927   :  { %7934 = vst.msk [vmem:[#allocation4 + $0x78] sm:$0xff] %vm1481_vm10, %v7918_v7 }
 0x92e   :  { %v7950_v5 = vld [vmem:[#allocation4 + $0x78] sm:$0xff] }
 0x92f   :  { %v7958_v32 = vpack.c.bf16 %v7950_v5, %v7949_v47 }
 0x931   :  { %9914 = vmatmul.msk.bf16.gmra.mxu1 %vm1481_vm10, %v7958_v32 }
 0x93c   :  { %v8008_v23 = vpop.f32.mrf.mxu1 }
 0x93d   :  { %v8052_v59 = vmul.f32 %v12965_v39, %v8008_v23 }
 0x93f   :  { %v8072_v37 = vadd.f32 %v12970_v50, %v8052_v59 }
 0x941   :  { %v8088_v4 = vmax.f32 %v8072_v37, 0.0 }
 0x943   :  { %8105 = vst.msk [vmem:[%s13078_s10] sm:$0xff] %vm8104_vm2, %v8088_v4 }
 0x944   :  { %v8010_v15 = vpop.f32.mrf.mxu1 }
 0x945   :  { %v8053_v17 = vmul.f32 %v12965_v39, %v8010_v15 }
 0x947   :  { %v8073_v33 = vadd.f32 %v12970_v50, %v8053_v17 }
 0x949   :  { %v8089_v14 = vmax.f32 %v8073_v33, 0.0 }
 0x94b   :  { %8106 = vst.msk [vmem:[%s13078_s10 + $0x8] sm:$0xff] %vm8104_vm2, %v8089_v14 }
 0x94d   :  { %v8013_v56 = vpop.f32.mrf.mxu1 }
 0x94e   :  { %v8054_v63 = vmul.f32 %v12965_v39, %v8013_v56 }
 0x950   :  { %v8074_v27 = vadd.f32 %v12970_v50, %v8054_v63 }
 0x952   :  { %v8090_v3 = vmax.f32 %v8074_v27, 0.0 }
 0x954   :  { %8107 = vst.msk [vmem:[%s13078_s10 + $0x10] sm:$0xff] %vm8104_vm2, %v8090_v3 }
 0x955   :  { %v8015_v53 = vpop.f32.mrf.mxu1 }
 0x956   :  { %v8055_v35 = vmul.f32 %v12965_v39, %v8015_v53 }
 0x958   :  { %v8075_v16 = vadd.f32 %v12970_v50, %v8055_v35 }
 0x95a   :  { %v8091_v40 = vmax.f32 %v8075_v16, 0.0 }
 0x95c   :  { %8108 = vst.msk [vmem:[%s13078_s10 + $0x18] sm:$0xff] %vm8104_vm2, %v8091_v40 }
 0x95d   :  { %v8018_v61 = vpop.f32.mrf.mxu1 }
 0x95e   :  { %v8056_v48 = vmul.f32 %v12965_v39, %v8018_v61 }
 0x960   :  { %v8076_v19 = vadd.f32 %v12970_v50, %v8056_v48 }
 0x962   :  { %v8092_v60 = vmax.f32 %v8076_v19, 0.0 }
 0x964   :  { %8109 = vst.msk [vmem:[%s13078_s10 + $0x20] sm:$0xff] %vm8104_vm2, %v8092_v60 }
 0x965   :  { %v8020_v52 = vpop.f32.mrf.mxu1 }
 0x966   :  { %v8057_v11 = vmul.f32 %v12965_v39, %v8020_v52 }
 0x968   :  { %v8077_v49 = vadd.f32 %v12970_v50, %v8057_v11 }
 0x96a   :  { %v8093_v62 = vmax.f32 %v8077_v49, 0.0 }
 0x96c   :  { %8110 = vst.msk [vmem:[%s13078_s10 + $0x28] sm:$0xff] %vm8104_vm2, %v8093_v62 }
 0x96d   :  { %v8023_v8 = vpop.f32.mrf.mxu1 }
 0x96e   :  { %v8058_v0 = vmul.f32 %v12965_v39, %v8023_v8 }
 0x970   :  { %v8078_v30 = vadd.f32 %v12970_v50, %v8058_v0 }
 0x972   :  { %v8094_v10 = vmax.f32 %v8078_v30, 0.0 }
 0x974   :  { %8111 = vst.msk [vmem:[%s13078_s10 + $0x30] sm:$0xff] %vm8104_vm2, %v8094_v10 }
 0x975   :  { %v8025_v45 = vpop.f32.mrf.mxu1 }
 0x976   :  { %v8059_v51 = vmul.f32 %v12965_v39, %v8025_v45 }
 0x978   :  { %v8079_v21 = vadd.f32 %v12970_v50, %v8059_v51 }
 0x97a   :  { %v8095_v13 = vmax.f32 %v8079_v21, 0.0 }
 0x97c   :  { %8112 = vst.msk [vmem:[%s13078_s10 + $0x38] sm:$0xff] %vm8104_vm2, %v8095_v13 }
 0x97d   :  { %v8028_v28 = vpop.f32.mrf.mxu1 }
 0x97e   :  { %v8060_v29 = vmul.f32 %v12965_v39, %v8028_v28 }
 0x980   :  { %v8080_v34 = vadd.f32 %v12970_v50, %v8060_v29 }
 0x982   :  { %v8096_v41 = vmax.f32 %v8080_v34, 0.0 }
 0x984   :  { %8113 = vst.msk [vmem:[%s13078_s10 + $0x40] sm:$0xff] %vm8104_vm2, %v8096_v41 }
 0x985   :  { %v8030_v24 = vpop.f32.mrf.mxu1 }
 0x986   :  { %v8061_v36 = vmul.f32 %v12965_v39, %v8030_v24 }
 0x988   :  { %v8081_v9 = vadd.f32 %v12970_v50, %v8061_v36 }
 0x98a   :  { %v8097_v42 = vmax.f32 %v8081_v9, 0.0 }
 0x98c   :  { %8114 = vst.msk [vmem:[%s13078_s10 + $0x48] sm:$0xff] %vm8104_vm2, %v8097_v42 }
 0x98e   :  { %v8033_v58 = vpop.f32.mrf.mxu1 }
 0x98f   :  { %v8062_v55 = vmul.f32 %v12965_v39, %v8033_v58 }
 0x991   :  { %v8082_v46 = vadd.f32 %v12970_v50, %v8062_v55 }
 0x993   :  { %v8098_v18 = vmax.f32 %v8082_v46, 0.0 }
 0x995   :  { %8115 = vst.msk [vmem:[%s13078_s10 + $0x50] sm:$0xff] %vm8104_vm2, %v8098_v18 }
 0x996   :  { %v8035_v20 = vpop.f32.mrf.mxu1 }
 0x997   :  { %v8063_v26 = vmul.f32 %v12965_v39, %v8035_v20 }
 0x999   :  { %v8083_v57 = vadd.f32 %v12970_v50, %v8063_v26 }
 0x99b   :  { %v8099_v38 = vmax.f32 %v8083_v57, 0.0 }
 0x99d   :  { %8116 = vst.msk [vmem:[%s13078_s10 + $0x58] sm:$0xff] %vm8104_vm2, %v8099_v38 }
 0x99e   :  { %v8038_v25 = vpop.f32.mrf.mxu1 }
 0x99f   :  { %v8064_v12 = vmul.f32 %v12965_v39, %v8038_v25 }
 0x9a1   :  { %v8084_v31 = vadd.f32 %v12970_v50, %v8064_v12 }
 0x9a3   :  { %v8100_v6 = vmax.f32 %v8084_v31, 0.0 }
 0x9a5   :  { %8117 = vst.msk [vmem:[%s13078_s10 + $0x60] sm:$0xff] %vm8104_vm2, %v8100_v6 }
 0x9a6   :  { %v8040_v22 = vpop.f32.mrf.mxu1 }
 0x9a7   :  { %v8065_v2 = vmul.f32 %v12965_v39, %v8040_v22 }
 0x9a9   :  { %v8085_v54 = vadd.f32 %v12970_v50, %v8065_v2 }
 0x9ab   :  { %v8101_v1 = vmax.f32 %v8085_v54, 0.0 }
 0x9ad   :  { %8118 = vst.msk [vmem:[%s13078_s10 + $0x68] sm:$0xff] %vm8104_vm2, %v8101_v1 }
 0x9ae   :  { %v8043_v43 = vpop.f32.mrf.mxu1 }
 0x9af   :  { %v8066_v44 = vmul.f32 %v12965_v39, %v8043_v43 }
 0x9b1   :  { %v8086_v7 = vadd.f32 %v12970_v50, %v8066_v44 }
 0x9b3   :  { %v8102_v47 = vmax.f32 %v8086_v7, 0.0 }
 0x9b5   :  { %8119 = vst.msk [vmem:[%s13078_s10 + $0x70] sm:$0xff] %vm8104_vm2, %v8102_v47 }
 0x9b6   :  { %v8045_v5 = vpop.f32.mrf.mxu1 }
 0x9b7   :  { %v8067_v32 = vmul.f32 %v12965_v39, %v8045_v5 }
 0x9b9   :  { %v8087_v23 = vadd.f32 %v12970_v50, %v8067_v32 }
 0x9bb   :  { %v8103_v59 = vmax.f32 %v8087_v23, 0.0 }
 0x9bd   :  { %8120 = vst.msk [vmem:[%s13078_s10 + $0x78] sm:$0xff] %vm8104_vm2, %v8103_v59 }

</bundles_post_ra>
